<compile_context>
chip_gen: v7x
topology: tpu7x:2x2x1
jax: 0.10.0
libtpu: 0.0.40
codegen_flags: <defaults>
</compile_context>

<pallas_src>
import jax
import jax.numpy as jnp
from jax.experimental import pallas as pl
from jax.experimental.pallas import tpu as pltpu

BN_EPS = 1e-5
IN_FEATURES = 784
PADDED_IN = 896          # 7 * 128 lanes (x only; w1 stays 784 rows in HBM)
H1, H2, H3, H4 = 2048, 1024, 512, 256
NUM_CLASSES = 10
PADDED_OUT = 128         # lane-dense output block


def mnist_kernel(x_ref,
                 w1_hbm, w2_hbm, g2_ref, b2_ref,
                 w3_hbm, g3_ref, b3_ref,
                 w4_hbm, g4_ref, b4_ref,
                 w5_hbm, o_ref,
                 w1_vmem, w2_vmem, w3_vmem, w4_vmem, w5_vmem, sems):
    inv_b = 1.0 / x_ref.shape[0]   # static batch size

    # Kick off all weight DMAs up front; each layer waits for its own weight
    # just before its dot, so later layers' DMA hides under earlier compute.
    cp1 = pltpu.make_async_copy(w1_hbm, w1_vmem.at[pl.ds(0, IN_FEATURES), :],
                                sems.at[0])
    cp2 = pltpu.make_async_copy(w2_hbm, w2_vmem, sems.at[1])
    cp3 = pltpu.make_async_copy(w3_hbm, w3_vmem, sems.at[2])
    cp4 = pltpu.make_async_copy(w4_hbm, w4_vmem, sems.at[3])
    cp5 = pltpu.make_async_copy(w5_hbm, w5_vmem, sems.at[4])
    cp1.start(); cp2.start(); cp3.start(); cp4.start(); cp5.start()

    # Zero w1's 112 padding rows (disjoint from the DMA's destination rows,
    # hides under the in-flight w1 DMA).  Needed because stale VMEM in the
    # scratch could be NaN/Inf even though x's padded lanes are exactly zero.
    w1_vmem[pl.ds(IN_FEATURES, PADDED_IN - IN_FEATURES), :] = jnp.zeros(
        (PADDED_IN - IN_FEATURES, H1), jnp.bfloat16)

    # l1 + ReLU: bf16 x bf16 on the MXU, f32 accumulate.
    cp1.wait()
    h = jnp.dot(x_ref[...], w1_vmem[...], preferred_element_type=jnp.float32)
    h = jnp.maximum(h, 0.0)

    def linear_bn_relu(h, cp, w_vmem, g_ref, b_ref):
        cp.wait()
        z = jnp.dot(h.astype(jnp.bfloat16), w_vmem[...],
                    preferred_element_type=jnp.float32)
        # BatchNorm1d (training mode, biased batch variance) in one pass.
        mean = jnp.sum(z, axis=0, keepdims=True) * inv_b
        meansq = jnp.sum(z * z, axis=0, keepdims=True) * inv_b
        var = jnp.maximum(meansq - mean * mean, 0.0)
        scale = g_ref[...] * jax.lax.rsqrt(var + BN_EPS)
        shift = b_ref[...] - mean * scale
        return jnp.maximum(z * scale + shift, 0.0)

    h = linear_bn_relu(h, cp2, w2_vmem, g2_ref, b2_ref)   # 2048 -> 1024
    h = linear_bn_relu(h, cp3, w3_vmem, g3_ref, b3_ref)   # 1024 -> 512
    h = linear_bn_relu(h, cp4, w4_vmem, g4_ref, b4_ref)   # 512  -> 256

    # l5 (output lanes padded to 128) + log_softmax over the 10 real columns.
    cp5.wait()
    logits = jnp.dot(h.astype(jnp.bfloat16), w5_vmem[...],
                     preferred_element_type=jnp.float32)
    col = jax.lax.broadcasted_iota(jnp.int32, logits.shape, 1)
    logits = jnp.where(col < NUM_CLASSES, logits, -jnp.inf)
    m = jnp.max(logits, axis=1, keepdims=True)
    shifted = logits - m
    lse = jnp.log(jnp.sum(jnp.exp(shifted), axis=1, keepdims=True))
    o_ref[...] = shifted - lse


def mnist_forward(x_nchw, packed):
    """x_nchw: (B, 1, 28, 28) float32. packed: kernel-ready params."""
    B = x_nchw.shape[0]
    x2d = x_nchw.reshape(B, -1).astype(jnp.float32)          # flatten(start_dim=1)
    x2d = jnp.pad(x2d, ((0, 0), (0, PADDED_IN - IN_FEATURES)))
    x2d = x2d.astype(jnp.bfloat16)

    (w1, w2, g2, b2, w3, g3, b3, w4, g4, b4, w5) = packed
    vmem = pl.BlockSpec(memory_space=pltpu.MemorySpace.VMEM)
    hbm = pl.BlockSpec(memory_space=pl.ANY)   # weights: manual DMA inside kernel

    out_pad = pl.pallas_call(
        mnist_kernel,
        out_shape=jax.ShapeDtypeStruct((B, PADDED_OUT), jnp.float32),
        in_specs=[vmem,              # x
                  hbm,               # w1
                  hbm, vmem, vmem,   # w2, g2, b2
                  hbm, vmem, vmem,   # w3, g3, b3
                  hbm, vmem, vmem,   # w4, g4, b4
                  hbm],              # w5
        out_specs=vmem,
        scratch_shapes=[
            pltpu.VMEM((PADDED_IN, H1), jnp.bfloat16),   # w1 (padded rows zeroed)
            pltpu.VMEM((H1, H2), jnp.bfloat16),          # w2
            pltpu.VMEM((H2, H3), jnp.bfloat16),          # w3
            pltpu.VMEM((H3, H4), jnp.bfloat16),          # w4
            pltpu.VMEM((H4, PADDED_OUT), jnp.bfloat16),  # w5
            pltpu.SemaphoreType.DMA((5,)),
        ],
        compiler_params=pltpu.CompilerParams(vmem_limit_bytes=32 << 20),
    )(x2d, w1, w2, g2, b2, w3, g3, b3, w4, g4, b4, w5)

    return out_pad[:, :NUM_CLASSES]


def init_torch_style_params(key):
    """PyTorch-layout params: Linear weights are (out, in) f32; BN gamma=1, beta=0."""
    dims = [(H1, IN_FEATURES), (H2, H1), (H3, H2), (H4, H3), (NUM_CLASSES, H4)]
    keys = jax.random.split(key, len(dims))
    ws = []
    for k, (fan_out, fan_in) in zip(keys, dims):
        bound = 1.0 / jnp.sqrt(fan_in)
        ws.append(jax.random.uniform(k, (fan_out, fan_in), jnp.float32,
                                     minval=-bound, maxval=bound))
    w1, w2, w3, w4, w5 = ws
    g2, b2 = jnp.ones((H2,), jnp.float32), jnp.zeros((H2,), jnp.float32)
    g3, b3 = jnp.ones((H3,), jnp.float32), jnp.zeros((H3,), jnp.float32)
    g4, b4 = jnp.ones((H4,), jnp.float32), jnp.zeros((H4,), jnp.float32)
    return (w1, w2, g2, b2, w3, g3, b3, w4, g4, b4, w5)


def pack_params(torch_params):
    """Transpose to (in, out); w1 kept un-padded, w5 padded to 128 lanes; bf16."""
    (w1, w2, g2, b2, w3, g3, b3, w4, g4, b4, w5) = torch_params
    t = lambda w: jnp.asarray(w, jnp.float32).T
    w1k = t(w1).astype(jnp.bfloat16)                                   # (784, 2048)
    w2k = t(w2).astype(jnp.bfloat16)
    w3k = t(w3).astype(jnp.bfloat16)
    w4k = t(w4).astype(jnp.bfloat16)
    w5k = jnp.pad(t(w5), ((0, 0), (0, PADDED_OUT - NUM_CLASSES))).astype(jnp.bfloat16)
    r2 = lambda v: jnp.asarray(v, jnp.float32).reshape(1, -1)
    return (w1k, w2k, r2(g2), r2(b2), w3k, r2(g3), r2(b3),
            w4k, r2(g4), r2(b4), w5k)


def mnist_reference(x_nchw, packed):
    """Pure-JAX reference mirroring the kernel's bf16-operand / f32-accum dtypes."""
    (w1, w2, g2, b2, w3, g3, b3, w4, g4, b4, w5) = packed
    B = x_nchw.shape[0]
    x = x_nchw.reshape(B, -1).astype(jnp.float32).astype(jnp.bfloat16)

    def dot(a, w):
        return jnp.dot(a.astype(jnp.bfloat16), w, preferred_element_type=jnp.float32)

    def bn(z, g, b):
        mean = jnp.mean(z, axis=0, keepdims=True)
        var = jnp.maximum(jnp.mean(z * z, axis=0, keepdims=True) - mean * mean, 0.0)
        return (z - mean) * (g * jax.lax.rsqrt(var + BN_EPS)) + b

    h = jnp.maximum(dot(x, w1), 0.0)
    h = jnp.maximum(bn(dot(h, w2), g2, b2), 0.0)
    h = jnp.maximum(bn(dot(h, w3), g3, b3), 0.0)
    h = jnp.maximum(bn(dot(h, w4), g4, b4), 0.0)
    logits = dot(h, w5)[:, :NUM_CLASSES]
    return jax.nn.log_softmax(logits, axis=1)


if __name__ == "__main__":
    key = jax.random.PRNGKey(0)
    pkey, xkey = jax.random.split(key)

    torch_params = init_torch_style_params(pkey)
    packed = pack_params(torch_params)

    # MNIST-shaped input (28x28 fixed by the 784-wide first Linear).
    # B=16 fills a full bf16 sublane tile; BN is over the whole batch.
    B = 16
    x = jax.random.normal(xkey, (B, 1, 28, 28), jnp.float32)

    out = jax.block_until_ready(mnist_forward(x, packed))

    assert out.shape == (B, NUM_CLASSES) and out.dtype == jnp.float32
    # log_softmax rows must exponentiate-sum to ~1
    assert jnp.allclose(jnp.sum(jnp.exp(out), axis=1), 1.0, atol=1e-3)
    # Match the pure-JAX reference (same bf16 weight/activation quantization).
    ref = jax.block_until_ready(mnist_reference(x, packed))
    assert jnp.allclose(out, ref, atol=3e-2), float(jnp.max(jnp.abs(out - ref)))
    print("KERNEL_OK")
</pallas_src>

<mosaic_0001>
module attributes {stable_mosaic.version = 11 : i64} {
  func.func @mnist_kernel(%arg0: memref<16x896xbf16, #tpu.memory_space<vmem>>, %arg1: memref<784x2048xbf16, #tpu.memory_space<any>>, %arg2: memref<2048x1024xbf16, #tpu.memory_space<any>>, %arg3: memref<1x1024xf32, #tpu.memory_space<vmem>>, %arg4: memref<1x1024xf32, #tpu.memory_space<vmem>>, %arg5: memref<1024x512xbf16, #tpu.memory_space<any>>, %arg6: memref<1x512xf32, #tpu.memory_space<vmem>>, %arg7: memref<1x512xf32, #tpu.memory_space<vmem>>, %arg8: memref<512x256xbf16, #tpu.memory_space<any>>, %arg9: memref<1x256xf32, #tpu.memory_space<vmem>>, %arg10: memref<1x256xf32, #tpu.memory_space<vmem>>, %arg11: memref<256x128xbf16, #tpu.memory_space<any>>, %arg12: memref<16x128xf32, #tpu.memory_space<vmem>>, %arg13: memref<896x2048xbf16, #tpu.memory_space<vmem>>, %arg14: memref<2048x1024xbf16, #tpu.memory_space<vmem>>, %arg15: memref<1024x512xbf16, #tpu.memory_space<vmem>>, %arg16: memref<512x256xbf16, #tpu.memory_space<vmem>>, %arg17: memref<256x128xbf16, #tpu.memory_space<vmem>>, %arg18: memref<5x!tpu.dma_semaphore, #tpu.memory_space<semaphore_mem>>) attributes {dimension_semantics = [], scalar_prefetch = 0 : i64, scratch_operands = 6 : i64, tpu.core_type = #tpu.core_type<tc>} {
    %c0_i32 = arith.constant 0 : i32
    %c0_i32_0 = arith.constant 0 : i32
    %c0_i32_1 = arith.constant 0 : i32
    %0 = tpu.memref_slice %arg13[%c0_i32_0, %c0_i32_1] : memref<896x2048xbf16, #tpu.memory_space<vmem>> -> memref<784x2048xbf16, #tpu.memory_space<vmem>>
    %1 = tpu.memref_slice %arg18[%c0_i32] : memref<5x!tpu.dma_semaphore, #tpu.memory_space<semaphore_mem>> -> memref<1x!tpu.dma_semaphore, #tpu.memory_space<semaphore_mem>>
    %2 = tpu.memref_squeeze %1 : memref<1x!tpu.dma_semaphore, #tpu.memory_space<semaphore_mem>> -> memref<!tpu.dma_semaphore, #tpu.memory_space<semaphore_mem>>
    tpu.enqueue_dma source(%arg1 : memref<784x2048xbf16, #tpu.memory_space<any>>) target(%0 : memref<784x2048xbf16, #tpu.memory_space<vmem>>) target_semaphore(%2 : memref<!tpu.dma_semaphore, #tpu.memory_space<semaphore_mem>>)
    %c1_i32 = arith.constant 1 : i32
    %3 = tpu.memref_slice %arg18[%c1_i32] : memref<5x!tpu.dma_semaphore, #tpu.memory_space<semaphore_mem>> -> memref<1x!tpu.dma_semaphore, #tpu.memory_space<semaphore_mem>>
    %4 = tpu.memref_squeeze %3 : memref<1x!tpu.dma_semaphore, #tpu.memory_space<semaphore_mem>> -> memref<!tpu.dma_semaphore, #tpu.memory_space<semaphore_mem>>
    tpu.enqueue_dma source(%arg2 : memref<2048x1024xbf16, #tpu.memory_space<any>>) target(%arg14 : memref<2048x1024xbf16, #tpu.memory_space<vmem>>) target_semaphore(%4 : memref<!tpu.dma_semaphore, #tpu.memory_space<semaphore_mem>>)
    %c2_i32 = arith.constant 2 : i32
    %5 = tpu.memref_slice %arg18[%c2_i32] : memref<5x!tpu.dma_semaphore, #tpu.memory_space<semaphore_mem>> -> memref<1x!tpu.dma_semaphore, #tpu.memory_space<semaphore_mem>>
    %6 = tpu.memref_squeeze %5 : memref<1x!tpu.dma_semaphore, #tpu.memory_space<semaphore_mem>> -> memref<!tpu.dma_semaphore, #tpu.memory_space<semaphore_mem>>
    tpu.enqueue_dma source(%arg5 : memref<1024x512xbf16, #tpu.memory_space<any>>) target(%arg15 : memref<1024x512xbf16, #tpu.memory_space<vmem>>) target_semaphore(%6 : memref<!tpu.dma_semaphore, #tpu.memory_space<semaphore_mem>>)
    %c3_i32 = arith.constant 3 : i32
    %7 = tpu.memref_slice %arg18[%c3_i32] : memref<5x!tpu.dma_semaphore, #tpu.memory_space<semaphore_mem>> -> memref<1x!tpu.dma_semaphore, #tpu.memory_space<semaphore_mem>>
    %8 = tpu.memref_squeeze %7 : memref<1x!tpu.dma_semaphore, #tpu.memory_space<semaphore_mem>> -> memref<!tpu.dma_semaphore, #tpu.memory_space<semaphore_mem>>
    tpu.enqueue_dma source(%arg8 : memref<512x256xbf16, #tpu.memory_space<any>>) target(%arg16 : memref<512x256xbf16, #tpu.memory_space<vmem>>) target_semaphore(%8 : memref<!tpu.dma_semaphore, #tpu.memory_space<semaphore_mem>>)
    %c4_i32 = arith.constant 4 : i32
    %9 = tpu.memref_slice %arg18[%c4_i32] : memref<5x!tpu.dma_semaphore, #tpu.memory_space<semaphore_mem>> -> memref<1x!tpu.dma_semaphore, #tpu.memory_space<semaphore_mem>>
    %10 = tpu.memref_squeeze %9 : memref<1x!tpu.dma_semaphore, #tpu.memory_space<semaphore_mem>> -> memref<!tpu.dma_semaphore, #tpu.memory_space<semaphore_mem>>
    tpu.enqueue_dma source(%arg11 : memref<256x128xbf16, #tpu.memory_space<any>>) target(%arg17 : memref<256x128xbf16, #tpu.memory_space<vmem>>) target_semaphore(%10 : memref<!tpu.dma_semaphore, #tpu.memory_space<semaphore_mem>>)
    %cst = arith.constant 0.000000e+00 : bf16
    %11 = vector.broadcast %cst : bf16 to vector<112x2048xbf16>
    %c784 = arith.constant 784 : index
    %c0 = arith.constant 0 : index
    %12 = vector.load %arg13[%c784, %c0] : memref<896x2048xbf16, #tpu.memory_space<vmem>>, vector<112x2048xbf16>
    tpu.vector_store %arg13[%c784, %c0], %11 {strides = array<i32>} : memref<896x2048xbf16, #tpu.memory_space<vmem>>, vector<112x2048xbf16>,
    %c0_i32_2 = arith.constant 0 : i32
    %c0_i32_3 = arith.constant 0 : i32
    %c0_i32_4 = arith.constant 0 : i32
    %13 = tpu.memref_slice %arg13[%c0_i32_3, %c0_i32_4] : memref<896x2048xbf16, #tpu.memory_space<vmem>> -> memref<784x2048xbf16, #tpu.memory_space<vmem>>
    %14 = tpu.memref_slice %arg18[%c0_i32_2] : memref<5x!tpu.dma_semaphore, #tpu.memory_space<semaphore_mem>> -> memref<1x!tpu.dma_semaphore, #tpu.memory_space<semaphore_mem>>
    %15 = tpu.memref_squeeze %14 : memref<1x!tpu.dma_semaphore, #tpu.memory_space<semaphore_mem>> -> memref<!tpu.dma_semaphore, #tpu.memory_space<semaphore_mem>>
    tpu.wait_dma2 semaphore(%15 : memref<!tpu.dma_semaphore, #tpu.memory_space<semaphore_mem>>) src(%arg1 : memref<784x2048xbf16, #tpu.memory_space<any>>) dst(%13 : memref<784x2048xbf16, #tpu.memory_space<vmem>>)
    %c0_5 = arith.constant 0 : index
    %c0_6 = arith.constant 0 : index
    %16 = vector.load %arg0[%c0_5, %c0_6] : memref<16x896xbf16, #tpu.memory_space<vmem>>, vector<16x896xbf16>
    %c0_7 = arith.constant 0 : index
    %c0_8 = arith.constant 0 : index
    %17 = vector.load %arg13[%c0_7, %c0_8] : memref<896x2048xbf16, #tpu.memory_space<vmem>>, vector<896x2048xbf16>
    %cst_9 = arith.constant dense<0.000000e+00> : vector<16x2048xf32>
    %18 = tpu.matmul %16, %17, %cst_9 {dimension_numbers = #tpu.dot_dimension_numbers<[1], [0], [0], [1], [0, 0, 1, 1], [], []>} : vector<16x896xbf16>, vector<896x2048xbf16>, vector<16x2048xf32> -> vector<16x2048xf32>
    %cst_10 = arith.constant 0.000000e+00 : f32
    %19 = vector.broadcast %cst_10 : f32 to vector<16x2048xf32>
    %20 = arith.maximumf %18, %19 : vector<16x2048xf32>
    %c1_i32_11 = arith.constant 1 : i32
    %21 = tpu.memref_slice %arg18[%c1_i32_11] : memref<5x!tpu.dma_semaphore, #tpu.memory_space<semaphore_mem>> -> memref<1x!tpu.dma_semaphore, #tpu.memory_space<semaphore_mem>>
    %22 = tpu.memref_squeeze %21 : memref<1x!tpu.dma_semaphore, #tpu.memory_space<semaphore_mem>> -> memref<!tpu.dma_semaphore, #tpu.memory_space<semaphore_mem>>
    tpu.wait_dma2 semaphore(%22 : memref<!tpu.dma_semaphore, #tpu.memory_space<semaphore_mem>>) src(%arg2 : memref<2048x1024xbf16, #tpu.memory_space<any>>) dst(%arg14 : memref<2048x1024xbf16, #tpu.memory_space<vmem>>)
    %23 = arith.truncf %20 : vector<16x2048xf32> to vector<16x2048xbf16>
    %c0_12 = arith.constant 0 : index
    %c0_13 = arith.constant 0 : index
    %24 = vector.load %arg14[%c0_12, %c0_13] : memref<2048x1024xbf16, #tpu.memory_space<vmem>>, vector<2048x1024xbf16>
    %cst_14 = arith.constant dense<0.000000e+00> : vector<16x1024xf32>
    %25 = tpu.matmul %23, %24, %cst_14 {dimension_numbers = #tpu.dot_dimension_numbers<[1], [0], [0], [1], [0, 0, 1, 1], [], []>} : vector<16x2048xbf16>, vector<2048x1024xbf16>, vector<16x1024xf32> -> vector<16x1024xf32>
    %cst_15 = arith.constant dense<0.000000e+00> : vector<1024xf32>
    %26 = vector.multi_reduction <add>, %25, %cst_15 [0] : vector<16x1024xf32> to vector<1024xf32>
    %27 = vector.shape_cast %26 : vector<1024xf32> to vector<1x1024xf32>
    %cst_16 = arith.constant 6.250000e-02 : f32
    %28 = vector.broadcast %cst_16 : f32 to vector<1x1024xf32>
    %29 = arith.mulf %27, %28 : vector<1x1024xf32>
    %30 = arith.mulf %25, %25 : vector<16x1024xf32>
    %cst_17 = arith.constant dense<0.000000e+00> : vector<1024xf32>
    %31 = vector.multi_reduction <add>, %30, %cst_17 [0] : vector<16x1024xf32> to vector<1024xf32>
    %32 = vector.shape_cast %31 : vector<1024xf32> to vector<1x1024xf32>
    %cst_18 = arith.constant 6.250000e-02 : f32
    %33 = vector.broadcast %cst_18 : f32 to vector<1x1024xf32>
    %34 = arith.mulf %32, %33 : vector<1x1024xf32>
    %35 = arith.mulf %29, %29 : vector<1x1024xf32>
    %36 = arith.subf %34, %35 : vector<1x1024xf32>
    %cst_19 = arith.constant 0.000000e+00 : f32
    %37 = vector.broadcast %cst_19 : f32 to vector<1x1024xf32>
    %38 = arith.maximumf %36, %37 : vector<1x1024xf32>
    %c0_20 = arith.constant 0 : index
    %c0_21 = arith.constant 0 : index
    %39 = vector.load %arg3[%c0_20, %c0_21] : memref<1x1024xf32, #tpu.memory_space<vmem>>, vector<1x1024xf32>
    %cst_22 = arith.constant 9.99999974E-6 : f32
    %40 = vector.broadcast %cst_22 : f32 to vector<1x1024xf32>
    %41 = arith.addf %38, %40 : vector<1x1024xf32>
    %42 = math.rsqrt %41 : vector<1x1024xf32>
    %43 = arith.mulf %39, %42 : vector<1x1024xf32>
    %c0_23 = arith.constant 0 : index
    %c0_24 = arith.constant 0 : index
    %44 = vector.load %arg4[%c0_23, %c0_24] : memref<1x1024xf32, #tpu.memory_space<vmem>>, vector<1x1024xf32>
    %45 = arith.mulf %29, %43 : vector<1x1024xf32>
    %46 = arith.subf %44, %45 : vector<1x1024xf32>
    %47 = vector.broadcast %43 : vector<1x1024xf32> to vector<16x1024xf32>
    %48 = arith.mulf %25, %47 : vector<16x1024xf32>
    %49 = vector.broadcast %46 : vector<1x1024xf32> to vector<16x1024xf32>
    %50 = arith.addf %48, %49 : vector<16x1024xf32>
    %cst_25 = arith.constant 0.000000e+00 : f32
    %51 = vector.broadcast %cst_25 : f32 to vector<16x1024xf32>
    %52 = arith.maximumf %50, %51 : vector<16x1024xf32>
    %c2_i32_26 = arith.constant 2 : i32
    %53 = tpu.memref_slice %arg18[%c2_i32_26] : memref<5x!tpu.dma_semaphore, #tpu.memory_space<semaphore_mem>> -> memref<1x!tpu.dma_semaphore, #tpu.memory_space<semaphore_mem>>
    %54 = tpu.memref_squeeze %53 : memref<1x!tpu.dma_semaphore, #tpu.memory_space<semaphore_mem>> -> memref<!tpu.dma_semaphore, #tpu.memory_space<semaphore_mem>>
    tpu.wait_dma2 semaphore(%54 : memref<!tpu.dma_semaphore, #tpu.memory_space<semaphore_mem>>) src(%arg5 : memref<1024x512xbf16, #tpu.memory_space<any>>) dst(%arg15 : memref<1024x512xbf16, #tpu.memory_space<vmem>>)
    %55 = arith.truncf %52 : vector<16x1024xf32> to vector<16x1024xbf16>
    %c0_27 = arith.constant 0 : index
    %c0_28 = arith.constant 0 : index
    %56 = vector.load %arg15[%c0_27, %c0_28] : memref<1024x512xbf16, #tpu.memory_space<vmem>>, vector<1024x512xbf16>
    %cst_29 = arith.constant dense<0.000000e+00> : vector<16x512xf32>
    %57 = tpu.matmul %55, %56, %cst_29 {dimension_numbers = #tpu.dot_dimension_numbers<[1], [0], [0], [1], [0, 0, 1, 1], [], []>} : vector<16x1024xbf16>, vector<1024x512xbf16>, vector<16x512xf32> -> vector<16x512xf32>
    %cst_30 = arith.constant dense<0.000000e+00> : vector<512xf32>
    %58 = vector.multi_reduction <add>, %57, %cst_30 [0] : vector<16x512xf32> to vector<512xf32>
    %59 = vector.shape_cast %58 : vector<512xf32> to vector<1x512xf32>
    %cst_31 = arith.constant 6.250000e-02 : f32
    %60 = vector.broadcast %cst_31 : f32 to vector<1x512xf32>
    %61 = arith.mulf %59, %60 : vector<1x512xf32>
    %62 = arith.mulf %57, %57 : vector<16x512xf32>
    %cst_32 = arith.constant dense<0.000000e+00> : vector<512xf32>
    %63 = vector.multi_reduction <add>, %62, %cst_32 [0] : vector<16x512xf32> to vector<512xf32>
    %64 = vector.shape_cast %63 : vector<512xf32> to vector<1x512xf32>
    %cst_33 = arith.constant 6.250000e-02 : f32
    %65 = vector.broadcast %cst_33 : f32 to vector<1x512xf32>
    %66 = arith.mulf %64, %65 : vector<1x512xf32>
    %67 = arith.mulf %61, %61 : vector<1x512xf32>
    %68 = arith.subf %66, %67 : vector<1x512xf32>
    %cst_34 = arith.constant 0.000000e+00 : f32
    %69 = vector.broadcast %cst_34 : f32 to vector<1x512xf32>
    %70 = arith.maximumf %68, %69 : vector<1x512xf32>
    %c0_35 = arith.constant 0 : index
    %c0_36 = arith.constant 0 : index
    %71 = vector.load %arg6[%c0_35, %c0_36] : memref<1x512xf32, #tpu.memory_space<vmem>>, vector<1x512xf32>
    %cst_37 = arith.constant 9.99999974E-6 : f32
    %72 = vector.broadcast %cst_37 : f32 to vector<1x512xf32>
    %73 = arith.addf %70, %72 : vector<1x512xf32>
    %74 = math.rsqrt %73 : vector<1x512xf32>
    %75 = arith.mulf %71, %74 : vector<1x512xf32>
    %c0_38 = arith.constant 0 : index
    %c0_39 = arith.constant 0 : index
    %76 = vector.load %arg7[%c0_38, %c0_39] : memref<1x512xf32, #tpu.memory_space<vmem>>, vector<1x512xf32>
    %77 = arith.mulf %61, %75 : vector<1x512xf32>
    %78 = arith.subf %76, %77 : vector<1x512xf32>
    %79 = vector.broadcast %75 : vector<1x512xf32> to vector<16x512xf32>
    %80 = arith.mulf %57, %79 : vector<16x512xf32>
    %81 = vector.broadcast %78 : vector<1x512xf32> to vector<16x512xf32>
    %82 = arith.addf %80, %81 : vector<16x512xf32>
    %cst_40 = arith.constant 0.000000e+00 : f32
    %83 = vector.broadcast %cst_40 : f32 to vector<16x512xf32>
    %84 = arith.maximumf %82, %83 : vector<16x512xf32>
    %c3_i32_41 = arith.constant 3 : i32
    %85 = tpu.memref_slice %arg18[%c3_i32_41] : memref<5x!tpu.dma_semaphore, #tpu.memory_space<semaphore_mem>> -> memref<1x!tpu.dma_semaphore, #tpu.memory_space<semaphore_mem>>
    %86 = tpu.memref_squeeze %85 : memref<1x!tpu.dma_semaphore, #tpu.memory_space<semaphore_mem>> -> memref<!tpu.dma_semaphore, #tpu.memory_space<semaphore_mem>>
    tpu.wait_dma2 semaphore(%86 : memref<!tpu.dma_semaphore, #tpu.memory_space<semaphore_mem>>) src(%arg8 : memref<512x256xbf16, #tpu.memory_space<any>>) dst(%arg16 : memref<512x256xbf16, #tpu.memory_space<vmem>>)
    %87 = arith.truncf %84 : vector<16x512xf32> to vector<16x512xbf16>
    %c0_42 = arith.constant 0 : index
    %c0_43 = arith.constant 0 : index
    %88 = vector.load %arg16[%c0_42, %c0_43] : memref<512x256xbf16, #tpu.memory_space<vmem>>, vector<512x256xbf16>
    %cst_44 = arith.constant dense<0.000000e+00> : vector<16x256xf32>
    %89 = tpu.matmul %87, %88, %cst_44 {dimension_numbers = #tpu.dot_dimension_numbers<[1], [0], [0], [1], [0, 0, 1, 1], [], []>} : vector<16x512xbf16>, vector<512x256xbf16>, vector<16x256xf32> -> vector<16x256xf32>
    %cst_45 = arith.constant dense<0.000000e+00> : vector<256xf32>
    %90 = vector.multi_reduction <add>, %89, %cst_45 [0] : vector<16x256xf32> to vector<256xf32>
    %91 = vector.shape_cast %90 : vector<256xf32> to vector<1x256xf32>
    %cst_46 = arith.constant 6.250000e-02 : f32
    %92 = vector.broadcast %cst_46 : f32 to vector<1x256xf32>
    %93 = arith.mulf %91, %92 : vector<1x256xf32>
    %94 = arith.mulf %89, %89 : vector<16x256xf32>
    %cst_47 = arith.constant dense<0.000000e+00> : vector<256xf32>
    %95 = vector.multi_reduction <add>, %94, %cst_47 [0] : vector<16x256xf32> to vector<256xf32>
    %96 = vector.shape_cast %95 : vector<256xf32> to vector<1x256xf32>
    %cst_48 = arith.constant 6.250000e-02 : f32
    %97 = vector.broadcast %cst_48 : f32 to vector<1x256xf32>
    %98 = arith.mulf %96, %97 : vector<1x256xf32>
    %99 = arith.mulf %93, %93 : vector<1x256xf32>
    %100 = arith.subf %98, %99 : vector<1x256xf32>
    %cst_49 = arith.constant 0.000000e+00 : f32
    %101 = vector.broadcast %cst_49 : f32 to vector<1x256xf32>
    %102 = arith.maximumf %100, %101 : vector<1x256xf32>
    %c0_50 = arith.constant 0 : index
    %c0_51 = arith.constant 0 : index
    %103 = vector.load %arg9[%c0_50, %c0_51] : memref<1x256xf32, #tpu.memory_space<vmem>>, vector<1x256xf32>
    %cst_52 = arith.constant 9.99999974E-6 : f32
    %104 = vector.broadcast %cst_52 : f32 to vector<1x256xf32>
    %105 = arith.addf %102, %104 : vector<1x256xf32>
    %106 = math.rsqrt %105 : vector<1x256xf32>
    %107 = arith.mulf %103, %106 : vector<1x256xf32>
    %c0_53 = arith.constant 0 : index
    %c0_54 = arith.constant 0 : index
    %108 = vector.load %arg10[%c0_53, %c0_54] : memref<1x256xf32, #tpu.memory_space<vmem>>, vector<1x256xf32>
    %109 = arith.mulf %93, %107 : vector<1x256xf32>
    %110 = arith.subf %108, %109 : vector<1x256xf32>
    %111 = vector.broadcast %107 : vector<1x256xf32> to vector<16x256xf32>
    %112 = arith.mulf %89, %111 : vector<16x256xf32>
    %113 = vector.broadcast %110 : vector<1x256xf32> to vector<16x256xf32>
    %114 = arith.addf %112, %113 : vector<16x256xf32>
    %cst_55 = arith.constant 0.000000e+00 : f32
    %115 = vector.broadcast %cst_55 : f32 to vector<16x256xf32>
    %116 = arith.maximumf %114, %115 : vector<16x256xf32>
    %c4_i32_56 = arith.constant 4 : i32
    %117 = tpu.memref_slice %arg18[%c4_i32_56] : memref<5x!tpu.dma_semaphore, #tpu.memory_space<semaphore_mem>> -> memref<1x!tpu.dma_semaphore, #tpu.memory_space<semaphore_mem>>
    %118 = tpu.memref_squeeze %117 : memref<1x!tpu.dma_semaphore, #tpu.memory_space<semaphore_mem>> -> memref<!tpu.dma_semaphore, #tpu.memory_space<semaphore_mem>>
    tpu.wait_dma2 semaphore(%118 : memref<!tpu.dma_semaphore, #tpu.memory_space<semaphore_mem>>) src(%arg11 : memref<256x128xbf16, #tpu.memory_space<any>>) dst(%arg17 : memref<256x128xbf16, #tpu.memory_space<vmem>>)
    %119 = arith.truncf %116 : vector<16x256xf32> to vector<16x256xbf16>
    %c0_57 = arith.constant 0 : index
    %c0_58 = arith.constant 0 : index
    %120 = vector.load %arg17[%c0_57, %c0_58] : memref<256x128xbf16, #tpu.memory_space<vmem>>, vector<256x128xbf16>
    %cst_59 = arith.constant dense<0.000000e+00> : vector<16x128xf32>
    %121 = tpu.matmul %119, %120, %cst_59 {dimension_numbers = #tpu.dot_dimension_numbers<[1], [0], [0], [1], [0, 0, 1, 1], [], []>} : vector<16x256xbf16>, vector<256x128xbf16>, vector<16x128xf32> -> vector<16x128xf32>
    %122 = tpu.iota {dimensions = array<i32: 1>} : vector<16x128xi32>
    %c10_i32 = arith.constant 10 : i32
    %123 = vector.broadcast %c10_i32 : i32 to vector<16x128xi32>
    %124 = arith.cmpi slt, %122, %123 : vector<16x128xi32>
    %cst_60 = arith.constant 0xFF800000 : f32
    %125 = vector.broadcast %cst_60 : f32 to vector<16x128xf32>
    %126 = arith.select %124, %121, %125 : vector<16x128xi1>, vector<16x128xf32>
    %cst_61 = arith.constant dense<0xFF800000> : vector<16xf32>
    %127 = vector.multi_reduction <maximumf>, %126, %cst_61 [1] : vector<16x128xf32> to vector<16xf32>
    %128 = vector.shape_cast %127 : vector<16xf32> to vector<16x1xf32>
    %129 = vector.broadcast %128 : vector<16x1xf32> to vector<16x128xf32>
    %130 = arith.subf %126, %129 : vector<16x128xf32>
    %131 = math.exp %130 : vector<16x128xf32>
    %cst_62 = arith.constant dense<0.000000e+00> : vector<16xf32>
    %132 = vector.multi_reduction <add>, %131, %cst_62 [1] : vector<16x128xf32> to vector<16xf32>
    %133 = vector.shape_cast %132 : vector<16xf32> to vector<16x1xf32>
    %134 = math.log %133 : vector<16x1xf32>
    %135 = vector.broadcast %134 : vector<16x1xf32> to vector<16x128xf32>
    %136 = arith.subf %130, %135 : vector<16x128xf32>
    %c0_63 = arith.constant 0 : index
    %c0_64 = arith.constant 0 : index
    %137 = vector.load %arg12[%c0_63, %c0_64] : memref<16x128xf32, #tpu.memory_space<vmem>>, vector<16x128xf32>
    tpu.vector_store %arg12[%c0_63, %c0_64], %136 {strides = array<i32>} : memref<16x128xf32, #tpu.memory_space<vmem>>, vector<16x128xf32>,
    return
  }
}

</mosaic_0001>

<bundles_post_ra>
// kernel: tpu_custom_call.1
= control target key start
LH: loop header
LB: loop body
LE: loop exit
PB: predicated region body
PF: predicated region fallthrough
CT: control target
= control target key end

     0   :  { %17 = vsyncpa [#allocation9], 0  ;;  %s8549_s0 = inlined_call_operand.hbm [shape: bf16[16,896], index: 0, kind: input, shape index: {}]   ;;  %s8550_s1 = inlined_call_operand.hbm [shape: bf16[784,2048], index: 1, kind: input, shape index: {}]   ;;  %s8551_s2 = inlined_call_operand.hbm [shape: bf16[2048,1024], index: 2, kind: input, shape index: {}]   ;;  %s8552_s3 = inlined_call_operand.hbm [shape: f32[1,1024], index: 3, kind: input, shape index: {}]   ;;  %s8553_s4 = inlined_call_operand.hbm [shape: f32[1,1024], index: 4, kind: input, shape index: {}]   ;;  %s8554_s5 = inlined_call_operand.hbm [shape: bf16[1024,512], index: 5, kind: input, shape index: {}]   ;;  %s8555_s6 = inlined_call_operand.hbm [shape: f32[1,512], index: 6, kind: input, shape index: {}]   ;;  %s8556_s7 = inlined_call_operand.hbm [shape: f32[1,512], index: 7, kind: input, shape index: {}]   ;;  %s8557_s8 = inlined_call_operand.hbm [shape: bf16[512,256], index: 8, kind: input, shape index: {}]   ;;  %s8558_s9 = inlined_call_operand.hbm [shape: f32[1,256], index: 9, kind: input, shape index: {}]   ;;  %s8559_s10 = inlined_call_operand.hbm [shape: f32[1,256], index: 10, kind: input, shape index: {}]   ;;  %s8560_s11 = inlined_call_operand.hbm [shape: bf16[256,128], index: 11, kind: input, shape index: {}]   ;;  %s8561_s12 = inlined_call_operand.hbm [shape: f32[16,128], index: 12, kind: output, shape index: {}]  }
   0x1   :  { %18 = vsyncpa [#allocation12], 0 }
   0x2   :  { %19 = vsyncpa [#allocation15], 0 }
   0x3   :  { %20 = vsyncpa [#allocation18], 0 }
   0x4   :  { %21 = vsyncpa [#allocation10], 0  ;;  %s7445_s21 = smov [#allocation11]   ;;  %s7446_s23 = smov [#allocation14]  }
   0x5   :  { %s40_s22 = sshll.u32 %s7445_s21, 4  ;;  %s60_s24 = sshll.u32 %s7446_s23, 4  ;;  %s41_s22 = int_to_ptr.vmem [resolvable:$true] %s40_s22  ;;  %s61_s24 = int_to_ptr.vmem [resolvable:$true] %s60_s24 }
   0x6   :  { %s7227_s27 = scalar_lea.hbm %s8552_s3, 128 }
   0x7   :  { %p7228_p0 = scmp.ne.s32.totalorder %s8552_s3, %s7227_s27  ;;  %p7231_p1 = scmp.lt.u32.totalorder %s7227_s27, %s8552_s3 }
   0x9   :  { %p7233_p2 = pnand %p7231_p1, %p7228_p0 }
   0xb   :  { %7236 = shalt.err (!%p7233_p2)
}
   0xc   :  { %s7237_s14 = scalar_lea.vmem %s41_s22, 128  ;;  %p7242_p4 = scmp.lt.s32.totalorder %s41_s22, %s41_s22 }
   0xd   :  { %p7238_p3 = scmp.ne.s32.totalorder %s41_s22, %s7237_s14  ;;  %p7243_p5 = scmp.lt.s32.totalorder %s7237_s14, %s7237_s14 }
   0xf   :  { %p7244_p6 = por %p7243_p5, %p7242_p4 }
  0x11   :  { %p7245_p7 = pnand %p7244_p6, %p7238_p3 }
  0x13   :  { %7248 = shalt.err (!%p7245_p7)
}
  0x14   :  { %43 = dma.hbm_to_vmem [thread:$0]  %s8552_s3, 128, %s41_s22, [#allocation12]  }
  0x15   :  { %s7249_s19 = scalar_lea.hbm %s8555_s6, 64 }
  0x16   :  { %p7250_p8 = scmp.ne.s32.totalorder %s8555_s6, %s7249_s19  ;;  %p7253_p9 = scmp.lt.u32.totalorder %s7249_s19, %s8555_s6 }
  0x18   :  { %p7255_p10 = pnand %p7253_p9, %p7250_p8 }
  0x1a   :  { %7258 = shalt.err (!%p7255_p10)
}
  0x1b   :  { %s7259_s26 = scalar_lea.vmem %s61_s24, 64  ;;  %p7264_p12 = scmp.lt.s32.totalorder %s61_s24, %s61_s24 }
  0x1c   :  { %p7260_p11 = scmp.ne.s32.totalorder %s61_s24, %s7259_s26  ;;  %p7265_p13 = scmp.lt.s32.totalorder %s7259_s26, %s7259_s26 }
  0x1e   :  { %p7266_p0 = por %p7265_p13, %p7264_p12 }
  0x20   :  { %p7267_p1 = pnand %p7266_p0, %p7260_p11 }
  0x22   :  { %7270 = shalt.err (!%p7267_p1)
}
  0x23   :  { %63 = dma.hbm_to_vmem [thread:$0]  %s8555_s6, 64, %s61_s24, [#allocation15]  }
  0x24   :  { %s7447_s27 = smov [#allocation17]   ;;  %s7448_s29 = smov [#allocation8]  }
  0x25   :  { %s80_s28 = sshll.u32 %s7447_s27, 4  ;;  %s27_s30 = sshll.u32 %s7448_s29, 4  ;;  %s81_s28 = int_to_ptr.vmem [resolvable:$true] %s80_s28  ;;  %s7569_s30 = int_to_ptr.vmem [resolvable:$true] %s27_s30 }
  0x26   :  { %s7271_s15 = scalar_lea.hbm %s8558_s9, 32 }
  0x27   :  { %p7272_p2 = scmp.ne.s32.totalorder %s8558_s9, %s7271_s15  ;;  %p7275_p3 = scmp.lt.u32.totalorder %s7271_s15, %s8558_s9 }
  0x29   :  { %p7277_p4 = pnand %p7275_p3, %p7272_p2 }
  0x2b   :  { %7280 = shalt.err (!%p7277_p4)
}
  0x2c   :  { %s7281_s6 = scalar_lea.vmem %s81_s28, 32  ;;  %p7286_p6 = scmp.lt.s32.totalorder %s81_s28, %s81_s28 }
  0x2d   :  { %p7282_p5 = scmp.ne.s32.totalorder %s81_s28, %s7281_s6  ;;  %p7287_p7 = scmp.lt.s32.totalorder %s7281_s6, %s7281_s6 }
  0x2f   :  { %p7288_p8 = por %p7287_p7, %p7286_p6 }
  0x31   :  { %p7289_p9 = pnand %p7288_p8, %p7282_p5 }
  0x33   :  { %7292 = shalt.err (!%p7289_p9)
}
  0x34   :  { %83 = dma.hbm_to_vmem [thread:$0]  %s8558_s9, 32, %s81_s28, [#allocation18]  }
  0x35   :  { %s7293_s25 = scalar_lea.hbm %s8549_s0, 896 }
  0x36   :  { %p7294_p10 = scmp.ne.s32.totalorder %s8549_s0, %s7293_s25  ;;  %p7297_p11 = scmp.lt.u32.totalorder %s7293_s25, %s8549_s0 }
  0x38   :  { %p7299_p12 = pnand %p7297_p11, %p7294_p10 }
  0x3a   :  { %7302 = shalt.err (!%p7299_p12)
}
  0x3b   :  { %s7303_s29 = scalar_lea.vmem %s7569_s30, 896  ;;  %p7308_p0 = scmp.lt.s32.totalorder %s7569_s30, %s7569_s30 }
  0x3c   :  { %p7304_p13 = scmp.ne.s32.totalorder %s7569_s30, %s7303_s29  ;;  %p7309_p1 = scmp.lt.s32.totalorder %s7303_s29, %s7303_s29 }
  0x3e   :  { %p7310_p2 = por %p7309_p1, %p7308_p0 }
  0x40   :  { %p7311_p3 = pnand %p7310_p2, %p7304_p13 }
  0x42   :  { %7314 = shalt.err (!%p7311_p3)
}
  0x43   :  { %s7449_s9 = smov 448   ;;  %s7450_s28 = smov 28  }
  0x44   :  { %33 = dma.hbm_to_vmem [thread:$0]  %s8549_s0, 896, %s7569_s30, [#allocation9], %s7449_s9, %s7449_s9, %s7450_s28  }
  0x45   :  { %s7451_s15 = smov [#allocation13]   ;;  %s7452_s17 = smov [#allocation16]  }
  0x46   :  { %s50_s16 = sshll.u32 %s7451_s15, 4  ;;  %s70_s18 = sshll.u32 %s7452_s17, 4  ;;  %s51_s16 = int_to_ptr.vmem [resolvable:$true] %s50_s16  ;;  %s71_s18 = int_to_ptr.vmem [resolvable:$true] %s70_s18 }
  0x47   :  { %s7315_s24 = scalar_lea.hbm %s8553_s4, 128 }
  0x48   :  { %p7316_p4 = scmp.ne.s32.totalorder %s8553_s4, %s7315_s24  ;;  %p7319_p5 = scmp.lt.u32.totalorder %s7315_s24, %s8553_s4 }
  0x4a   :  { %p7321_p6 = pnand %p7319_p5, %p7316_p4 }
  0x4c   :  { %7324 = shalt.err (!%p7321_p6)
}
  0x4d   :  { %s7325_s0 = scalar_lea.vmem %s51_s16, 128  ;;  %p7330_p8 = scmp.lt.s32.totalorder %s51_s16, %s51_s16 }
  0x4e   :  { %p7326_p7 = scmp.ne.s32.totalorder %s51_s16, %s7325_s0  ;;  %p7331_p9 = scmp.lt.s32.totalorder %s7325_s0, %s7325_s0 }
  0x50   :  { %p7332_p10 = por %p7331_p9, %p7330_p8 }
  0x52   :  { %p7333_p11 = pnand %p7332_p10, %p7326_p7 }
  0x54   :  { %7336 = shalt.err (!%p7333_p11)
}
  0x55   :  { %53 = dma.hbm_to_vmem [thread:$0]  %s8553_s4, 128, %s51_s16, [#allocation12]  }
  0x56   :  { %s7337_s27 = scalar_lea.hbm %s8556_s7, 64 }
  0x57   :  { %p7338_p12 = scmp.ne.s32.totalorder %s8556_s7, %s7337_s27  ;;  %p7341_p13 = scmp.lt.u32.totalorder %s7337_s27, %s8556_s7 }
  0x59   :  { %p7343_p0 = pnand %p7341_p13, %p7338_p12 }
  0x5b   :  { %7346 = shalt.err (!%p7343_p0)
}
  0x5c   :  { %s7347_s14 = scalar_lea.vmem %s71_s18, 64  ;;  %p7352_p2 = scmp.lt.s32.totalorder %s71_s18, %s71_s18 }
  0x5d   :  { %p7348_p1 = scmp.ne.s32.totalorder %s71_s18, %s7347_s14  ;;  %p7353_p3 = scmp.lt.s32.totalorder %s7347_s14, %s7347_s14 }
  0x5f   :  { %p7354_p4 = por %p7353_p3, %p7352_p2 }
  0x61   :  { %p7355_p5 = pnand %p7354_p4, %p7348_p1 }
  0x63   :  { %7358 = shalt.err (!%p7355_p5)
}
  0x64   :  { %73 = dma.hbm_to_vmem [thread:$0]  %s8556_s7, 64, %s71_s18, [#allocation15]  }
  0x65   :  { %s7453_s16 = smov [#allocation19]   ;;  %s7359_s24 = scalar_lea.hbm %s8559_s10, 32 }
  0x66   :  { %s90_s17 = sshll.u32 %s7453_s16, 4  ;;  %p7360_p6 = scmp.ne.s32.totalorder %s8559_s10, %s7359_s24  ;;  %s91_s17 = int_to_ptr.vmem [resolvable:$true] %s90_s17 }
  0x67   :  { %p7363_p7 = scmp.lt.u32.totalorder %s7359_s24, %s8559_s10 }
  0x69   :  { %p7365_p8 = pnand %p7363_p7, %p7360_p6 }
  0x6b   :  { %7368 = shalt.err (!%p7365_p8)
}
  0x6c   :  { %s7369_s0 = scalar_lea.vmem %s91_s17, 32  ;;  %p7374_p10 = scmp.lt.s32.totalorder %s91_s17, %s91_s17 }
  0x6d   :  { %p7370_p9 = scmp.ne.s32.totalorder %s91_s17, %s7369_s0  ;;  %p7375_p11 = scmp.lt.s32.totalorder %s7369_s0, %s7369_s0 }
  0x6f   :  { %p7376_p12 = por %p7375_p11, %p7374_p10 }
  0x71   :  { %p7377_p13 = pnand %p7376_p12, %p7370_p9 }
  0x73   :  { %7380 = shalt.err (!%p7377_p13)
}
  0x74   :  { %93 = dma.hbm_to_vmem [thread:$0]  %s8559_s10, 32, %s91_s17, [#allocation18]  }
  0x75   :  { %7425 = dma.done.wait [#allocation9], 896  }
  0x76   :  { %7426 = vsyncadd [#allocation9], 4294966400 }
  0x77   :  { %7427 = dma.done.wait [#allocation12], 256  }
  0x78   :  { %7428 = vsyncadd [#allocation12], 4294967040 }
  0x79   :  { %7429 = dma.done.wait [#allocation15], 128  }
  0x7a   :  { %7430 = vsyncadd [#allocation15], 4294967168 }
  0x7b   :  { %7431 = dma.done.wait [#allocation18], 64  }
  0x7c   :  { %7432 = vsyncadd [#allocation18], 4294967232  ;;  %s120_s30 = sld [smem:[#allocation0]]   ;;  %s7454_s26 = smov 2048  }
  0x7d   :  { %132 = sst [smem:[#allocation22]] %s7454_s26  ;;  %s7455_s3 = smov 16  }
  0x7e   :  { %134 = sst [smem:[#allocation22 + $0x1]] %s7454_s26  ;;  %s7456_s22 = smov 64  }
  0x7f   :  { %136 = sst [smem:[#allocation22 + $0x2]] %s7455_s3  ;;  %s7457_s27 = smov 128  }
  0x80   :  { %138 = sst [smem:[#allocation22 + $0x3]] %s7456_s22  ;;  %s7458_s10 = smov 2  }
  0x81   :  { %140 = sst [smem:[#allocation22 + $0x4]] %s7457_s27  ;;  %s7459_s28 = smov 4  }
  0x82   :  { %142 = sst [smem:[#allocation22 + $0x5]] %s7458_s10  ;;  %s6854_s29 = sshll.u32 %s120_s30, 26 }
  0x83   :  { %146 = sst [smem:[#allocation22 + $0x7]] %s7456_s22  ;;  %s7640_s9 = sadd.s32 134217728, %s6854_s29 }
  0x84   :  { %148 = sst [smem:[#allocation22 + $0x8]] %s7459_s28  ;;  %s7460_s13 = smov [#allocation2]  }
  0x85   :  { %s128_s14 = sshll.u32 %s7460_s13, 4  ;;  %s7461_s4 = smov 1024   ;;  %s129_s14 = int_to_ptr.vmem [resolvable:$true] %s128_s14 }
  0x86   :  { %144 = sst [smem:[#allocation22 + $0x6]] %s7461_s4  ;;  %s7462_s15 = smov [#allocation7]  }
  0x87   :  { %s7463_s16 = smov [#allocation21]   ;;  %s7464_s6 = smov 8  }
  0x88   :  { %150 = dma.general %s8550_s1, 100352, %s129_s14, %s7462_s15, %s7463_s16, [#allocation22], %s7640_s9, 0  }
  0x89   :  { %167 = sst [smem:[#allocation24]] %s7461_s4  ;;  %s7465_s24 = smov [#allocation3]  }
  0x8a   :  { %169 = sst [smem:[#allocation24 + $0x1]] %s7461_s4  ;;  %s163_s20 = sshll.u32 %s7465_s24, 4  ;;  %s164_s20 = int_to_ptr.vmem [resolvable:$true] %s163_s20 }
  0x8b   :  { %171 = sst [smem:[#allocation24 + $0x2]] %s7464_s6  ;;  %s7466_s21 = smov 512  }
  0x8c   :  { %173 = sst [smem:[#allocation24 + $0x3]] %s7456_s22  ;;  %s7467_s1 = smov [#allocation7 + $0x1]  }
  0x8d   :  { %175 = sst [smem:[#allocation24 + $0x4]] %s7457_s27  ;;  %s7468_s23 = smov [#allocation23]  }
  0x8e   :  { %177 = sst [smem:[#allocation24 + $0x5]] %s7458_s10  ;;  %s7469_s7 = smov [#allocation4]  }
  0x8f   :  { %179 = sst [smem:[#allocation24 + $0x6]] %s7466_s21  ;;  %s198_s18 = sshll.u32 %s7469_s7, 4  ;;  %s199_s18 = int_to_ptr.vmem [resolvable:$true] %s198_s18 }
  0x90   :  { %181 = sst [smem:[#allocation24 + $0x7]] %s7456_s22  ;;  %s7470_s30 = smov 256  }
  0x91   :  { %183 = sst [smem:[#allocation24 + $0x8]] %s7459_s28  ;;  %s7472_s26 = smov [#allocation25]  }
  0x92   :  { %185 = dma.general %s8551_s2, 131072, %s164_s20, %s7467_s1, %s7468_s23, [#allocation24], %s7640_s9, 0  }
  0x93   :  { %202 = sst [smem:[#allocation26]] %s7466_s21  ;;  %s7471_s2 = smov [#allocation7 + $0x2]  }
  0x94   :  { %204 = sst [smem:[#allocation26 + $0x1]] %s7466_s21  ;;  %s7473_s13 = smov [#allocation5]  }
  0x95   :  { %206 = sst [smem:[#allocation26 + $0x2]] %s7459_s28  ;;  %s233_s14 = sshll.u32 %s7473_s13, 4  ;;  %s234_s14 = int_to_ptr.vmem [resolvable:$true] %s233_s14 }
  0x96   :  { %208 = sst [smem:[#allocation26 + $0x3]] %s7456_s22  ;;  %s7474_s4 = smov [#allocation6]  }
  0x97   :  { %210 = sst [smem:[#allocation26 + $0x4]] %s7457_s27  ;;  %s264_s15 = sshll.u32 %s7474_s4, 4  ;;  %s265_s15 = int_to_ptr.vmem [resolvable:$true] %s264_s15 }
  0x98   :  { %212 = sst [smem:[#allocation26 + $0x5]] %s7458_s10  ;;  %s7476_s16 = smov [#allocation27]  }
  0x99   :  { %214 = sst [smem:[#allocation26 + $0x6]] %s7470_s30  ;;  %s7381_s21 = scalar_lea.hbm %s8560_s11, 2048 }
  0x9a   :  { %216 = sst [smem:[#allocation26 + $0x7]] %s7456_s22  ;;  %p7382_p0 = scmp.ne.s32.totalorder %s8560_s11, %s7381_s21 }
  0x9b   :  { %218 = sst [smem:[#allocation26 + $0x8]] %s7459_s28  ;;  %p7385_p1 = scmp.lt.u32.totalorder %s7381_s21, %s8560_s11 }
  0x9c   :  { %220 = dma.general %s8554_s5, 32768, %s199_s18, %s7471_s2, %s7472_s26, [#allocation26], %s7640_s9, 0  }
  0x9d   :  { %237 = sst [smem:[#allocation28]] %s7470_s30  ;;  %s7475_s5 = smov [#allocation7 + $0x3]  }
  0x9e   :  { %239 = sst [smem:[#allocation28 + $0x1]] %s7470_s30  ;;  %p7387_p2 = pnand %p7385_p1, %p7382_p0 }
  0x9f   :  { %241 = sst [smem:[#allocation28 + $0x2]] %s7458_s10 }
  0xa0   :  { %243 = sst [smem:[#allocation28 + $0x3]] %s7456_s22 }
  0xa1   :  { %245 = sst [smem:[#allocation28 + $0x4]] %s7457_s27 }
  0xa2   :  { %247 = sst [smem:[#allocation28 + $0x5]] %s7458_s10 }
  0xa3   :  { %249 = sst [smem:[#allocation28 + $0x6]] %s7457_s27 }
  0xa4   :  { %251 = sst [smem:[#allocation28 + $0x7]] %s7456_s22 }
  0xa5   :  { %253 = sst [smem:[#allocation28 + $0x8]] %s7459_s28 }
  0xa6   :  { %255 = dma.general %s8557_s8, 8192, %s234_s14, %s7475_s5, %s7476_s16, [#allocation28], %s7640_s9, 0  }
  0xa7   :  { %7390 = shalt.err (!%p7387_p2)  }
  0xa8   :  { %s7391_s22 = scalar_lea.vmem %s265_s15, 2048  ;;  %p7396_p4 = scmp.lt.s32.totalorder %s265_s15, %s265_s15 }
  0xa9   :  { %p7392_p3 = scmp.ne.s32.totalorder %s265_s15, %s7391_s22  ;;  %p7397_p5 = scmp.lt.s32.totalorder %s7391_s22, %s7391_s22 }
  0xab   :  { %p7398_p6 = por %p7397_p5, %p7396_p4 }
  0xad   :  { %p7399_p7 = pnand %p7398_p6, %p7392_p3 }
  0xaf   :  { %7402 = shalt.err (!%p7399_p7)  }
  0xb0   :  { %267 = dma.hbm_to_vmem [thread:$0]  %s8560_s11, 2048, %s265_s15, [#allocation7 + $0x4]  ;;  %v7477_v0 = vmov 0  }
  0xb1   :  { %268 = vst [vmem:[#allocation2 + $0x1880] sm:$0xff] %v7477_v0  ;;  %269 = vst [vmem:[#allocation2 + $0x1888] sm:$0xff] %v7477_v0 }
  0xb2   :  { %270 = vst [vmem:[#allocation2 + $0x1890] sm:$0xff] %v7477_v0  ;;  %271 = vst [vmem:[#allocation2 + $0x1898] sm:$0xff] %v7477_v0 }
  0xb3   :  { %272 = vst [vmem:[#allocation2 + $0x18a0] sm:$0xff] %v7477_v0  ;;  %273 = vst [vmem:[#allocation2 + $0x18a8] sm:$0xff] %v7477_v0 }
  0xb4   :  { %274 = vst [vmem:[#allocation2 + $0x18b0] sm:$0xff] %v7477_v0  ;;  %275 = vst [vmem:[#allocation2 + $0x18b8] sm:$0xff] %v7477_v0 }
  0xb5   :  { %276 = vst [vmem:[#allocation2 + $0x18c0] sm:$0xff] %v7477_v0  ;;  %277 = vst [vmem:[#allocation2 + $0x18c8] sm:$0xff] %v7477_v0 }
  0xb6   :  { %278 = vst [vmem:[#allocation2 + $0x18d0] sm:$0xff] %v7477_v0  ;;  %279 = vst [vmem:[#allocation2 + $0x18d8] sm:$0xff] %v7477_v0 }
  0xb7   :  { %280 = vst [vmem:[#allocation2 + $0x18e0] sm:$0xff] %v7477_v0  ;;  %281 = vst [vmem:[#allocation2 + $0x18e8] sm:$0xff] %v7477_v0 }
  0xb8   :  { %282 = vst [vmem:[#allocation2 + $0x18f0] sm:$0xff] %v7477_v0  ;;  %283 = vst [vmem:[#allocation2 + $0x18f8] sm:$0xff] %v7477_v0 }
  0xb9   :  { %284 = vst [vmem:[#allocation2 + $0x1900] sm:$0xff] %v7477_v0  ;;  %285 = vst [vmem:[#allocation2 + $0x1908] sm:$0xff] %v7477_v0 }
  0xba   :  { %286 = vst [vmem:[#allocation2 + $0x1910] sm:$0xff] %v7477_v0  ;;  %287 = vst [vmem:[#allocation2 + $0x1918] sm:$0xff] %v7477_v0 }
  0xbb   :  { %288 = vst [vmem:[#allocation2 + $0x1920] sm:$0xff] %v7477_v0  ;;  %289 = vst [vmem:[#allocation2 + $0x1928] sm:$0xff] %v7477_v0 }
  0xbc   :  { %290 = vst [vmem:[#allocation2 + $0x1930] sm:$0xff] %v7477_v0  ;;  %291 = vst [vmem:[#allocation2 + $0x1938] sm:$0xff] %v7477_v0 }
  0xbd   :  { %292 = vst [vmem:[#allocation2 + $0x1940] sm:$0xff] %v7477_v0  ;;  %293 = vst [vmem:[#allocation2 + $0x1948] sm:$0xff] %v7477_v0 }
  0xbe   :  { %294 = vst [vmem:[#allocation2 + $0x1950] sm:$0xff] %v7477_v0  ;;  %295 = vst [vmem:[#allocation2 + $0x1958] sm:$0xff] %v7477_v0 }
  0xbf   :  { %296 = vst [vmem:[#allocation2 + $0x1960] sm:$0xff] %v7477_v0  ;;  %297 = vst [vmem:[#allocation2 + $0x1968] sm:$0xff] %v7477_v0 }
  0xc0   :  { %298 = vst [vmem:[#allocation2 + $0x1970] sm:$0xff] %v7477_v0  ;;  %299 = vst [vmem:[#allocation2 + $0x1978] sm:$0xff] %v7477_v0 }
  0xc1   :  { %300 = vst [vmem:[#allocation2 + $0x1980] sm:$0xff] %v7477_v0  ;;  %301 = vst [vmem:[#allocation2 + $0x1988] sm:$0xff] %v7477_v0 }
  0xc2   :  { %302 = vst [vmem:[#allocation2 + $0x1990] sm:$0xff] %v7477_v0  ;;  %303 = vst [vmem:[#allocation2 + $0x1998] sm:$0xff] %v7477_v0 }
  0xc3   :  { %304 = vst [vmem:[#allocation2 + $0x19a0] sm:$0xff] %v7477_v0  ;;  %305 = vst [vmem:[#allocation2 + $0x19a8] sm:$0xff] %v7477_v0 }
  0xc4   :  { %306 = vst [vmem:[#allocation2 + $0x19b0] sm:$0xff] %v7477_v0  ;;  %307 = vst [vmem:[#allocation2 + $0x19b8] sm:$0xff] %v7477_v0 }
  0xc5   :  { %308 = vst [vmem:[#allocation2 + $0x19c0] sm:$0xff] %v7477_v0  ;;  %309 = vst [vmem:[#allocation2 + $0x19c8] sm:$0xff] %v7477_v0 }
  0xc6   :  { %310 = vst [vmem:[#allocation2 + $0x19d0] sm:$0xff] %v7477_v0  ;;  %311 = vst [vmem:[#allocation2 + $0x19d8] sm:$0xff] %v7477_v0 }
  0xc7   :  { %312 = vst [vmem:[#allocation2 + $0x19e0] sm:$0xff] %v7477_v0  ;;  %313 = vst [vmem:[#allocation2 + $0x19e8] sm:$0xff] %v7477_v0 }
  0xc8   :  { %314 = vst [vmem:[#allocation2 + $0x19f0] sm:$0xff] %v7477_v0  ;;  %315 = vst [vmem:[#allocation2 + $0x19f8] sm:$0xff] %v7477_v0 }
  0xc9   :  { %316 = vst [vmem:[#allocation2 + $0x1a00] sm:$0xff] %v7477_v0  ;;  %317 = vst [vmem:[#allocation2 + $0x1a08] sm:$0xff] %v7477_v0 }
  0xca   :  { %318 = vst [vmem:[#allocation2 + $0x1a10] sm:$0xff] %v7477_v0  ;;  %319 = vst [vmem:[#allocation2 + $0x1a18] sm:$0xff] %v7477_v0 }
  0xcb   :  { %320 = vst [vmem:[#allocation2 + $0x1a20] sm:$0xff] %v7477_v0  ;;  %321 = vst [vmem:[#allocation2 + $0x1a28] sm:$0xff] %v7477_v0 }
  0xcc   :  { %322 = vst [vmem:[#allocation2 + $0x1a30] sm:$0xff] %v7477_v0  ;;  %323 = vst [vmem:[#allocation2 + $0x1a38] sm:$0xff] %v7477_v0 }
  0xcd   :  { %324 = vst [vmem:[#allocation2 + $0x1a40] sm:$0xff] %v7477_v0  ;;  %325 = vst [vmem:[#allocation2 + $0x1a48] sm:$0xff] %v7477_v0 }
  0xce   :  { %326 = vst [vmem:[#allocation2 + $0x1a50] sm:$0xff] %v7477_v0  ;;  %327 = vst [vmem:[#allocation2 + $0x1a58] sm:$0xff] %v7477_v0 }
  0xcf   :  { %328 = vst [vmem:[#allocation2 + $0x1a60] sm:$0xff] %v7477_v0  ;;  %329 = vst [vmem:[#allocation2 + $0x1a68] sm:$0xff] %v7477_v0 }
  0xd0   :  { %330 = vst [vmem:[#allocation2 + $0x1a70] sm:$0xff] %v7477_v0  ;;  %331 = vst [vmem:[#allocation2 + $0x1a78] sm:$0xff] %v7477_v0 }
  0xd1   :  { %332 = vst [vmem:[#allocation2 + $0x1a80] sm:$0xff] %v7477_v0  ;;  %333 = vst [vmem:[#allocation2 + $0x1a88] sm:$0xff] %v7477_v0 }
  0xd2   :  { %334 = vst [vmem:[#allocation2 + $0x1a90] sm:$0xff] %v7477_v0  ;;  %335 = vst [vmem:[#allocation2 + $0x1a98] sm:$0xff] %v7477_v0 }
  0xd3   :  { %336 = vst [vmem:[#allocation2 + $0x1aa0] sm:$0xff] %v7477_v0  ;;  %337 = vst [vmem:[#allocation2 + $0x1aa8] sm:$0xff] %v7477_v0 }
  0xd4   :  { %338 = vst [vmem:[#allocation2 + $0x1ab0] sm:$0xff] %v7477_v0  ;;  %339 = vst [vmem:[#allocation2 + $0x1ab8] sm:$0xff] %v7477_v0 }
  0xd5   :  { %340 = vst [vmem:[#allocation2 + $0x1ac0] sm:$0xff] %v7477_v0  ;;  %341 = vst [vmem:[#allocation2 + $0x1ac8] sm:$0xff] %v7477_v0 }
  0xd6   :  { %342 = vst [vmem:[#allocation2 + $0x1ad0] sm:$0xff] %v7477_v0  ;;  %343 = vst [vmem:[#allocation2 + $0x1ad8] sm:$0xff] %v7477_v0 }
  0xd7   :  { %344 = vst [vmem:[#allocation2 + $0x1ae0] sm:$0xff] %v7477_v0  ;;  %345 = vst [vmem:[#allocation2 + $0x1ae8] sm:$0xff] %v7477_v0 }
  0xd8   :  { %346 = vst [vmem:[#allocation2 + $0x1af0] sm:$0xff] %v7477_v0  ;;  %347 = vst [vmem:[#allocation2 + $0x1af8] sm:$0xff] %v7477_v0 }
  0xd9   :  { %348 = vst [vmem:[#allocation2 + $0x1b00] sm:$0xff] %v7477_v0  ;;  %349 = vst [vmem:[#allocation2 + $0x1b08] sm:$0xff] %v7477_v0 }
  0xda   :  { %350 = vst [vmem:[#allocation2 + $0x1b10] sm:$0xff] %v7477_v0  ;;  %351 = vst [vmem:[#allocation2 + $0x1b18] sm:$0xff] %v7477_v0 }
  0xdb   :  { %352 = vst [vmem:[#allocation2 + $0x1b20] sm:$0xff] %v7477_v0  ;;  %353 = vst [vmem:[#allocation2 + $0x1b28] sm:$0xff] %v7477_v0 }
  0xdc   :  { %354 = vst [vmem:[#allocation2 + $0x1b30] sm:$0xff] %v7477_v0  ;;  %355 = vst [vmem:[#allocation2 + $0x1b38] sm:$0xff] %v7477_v0 }
  0xdd   :  { %356 = vst [vmem:[#allocation2 + $0x1b40] sm:$0xff] %v7477_v0  ;;  %357 = vst [vmem:[#allocation2 + $0x1b48] sm:$0xff] %v7477_v0 }
  0xde   :  { %358 = vst [vmem:[#allocation2 + $0x1b50] sm:$0xff] %v7477_v0  ;;  %359 = vst [vmem:[#allocation2 + $0x1b58] sm:$0xff] %v7477_v0 }
  0xdf   :  { %360 = vst [vmem:[#allocation2 + $0x1b60] sm:$0xff] %v7477_v0  ;;  %361 = vst [vmem:[#allocation2 + $0x1b68] sm:$0xff] %v7477_v0 }
  0xe0   :  { %362 = vst [vmem:[#allocation2 + $0x1b70] sm:$0xff] %v7477_v0  ;;  %363 = vst [vmem:[#allocation2 + $0x1b78] sm:$0xff] %v7477_v0 }
  0xe1   :  { %364 = vst [vmem:[#allocation2 + $0x1b80] sm:$0xff] %v7477_v0  ;;  %365 = vst [vmem:[#allocation2 + $0x1b88] sm:$0xff] %v7477_v0 }
  0xe2   :  { %366 = vst [vmem:[#allocation2 + $0x1b90] sm:$0xff] %v7477_v0  ;;  %367 = vst [vmem:[#allocation2 + $0x1b98] sm:$0xff] %v7477_v0 }
  0xe3   :  { %368 = vst [vmem:[#allocation2 + $0x1ba0] sm:$0xff] %v7477_v0  ;;  %369 = vst [vmem:[#allocation2 + $0x1ba8] sm:$0xff] %v7477_v0 }
  0xe4   :  { %370 = vst [vmem:[#allocation2 + $0x1bb0] sm:$0xff] %v7477_v0  ;;  %371 = vst [vmem:[#allocation2 + $0x1bb8] sm:$0xff] %v7477_v0 }
  0xe5   :  { %372 = vst [vmem:[#allocation2 + $0x1bc0] sm:$0xff] %v7477_v0  ;;  %373 = vst [vmem:[#allocation2 + $0x1bc8] sm:$0xff] %v7477_v0 }
  0xe6   :  { %374 = vst [vmem:[#allocation2 + $0x1bd0] sm:$0xff] %v7477_v0  ;;  %375 = vst [vmem:[#allocation2 + $0x1bd8] sm:$0xff] %v7477_v0 }
  0xe7   :  { %376 = vst [vmem:[#allocation2 + $0x1be0] sm:$0xff] %v7477_v0  ;;  %377 = vst [vmem:[#allocation2 + $0x1be8] sm:$0xff] %v7477_v0 }
  0xe8   :  { %378 = vst [vmem:[#allocation2 + $0x1bf0] sm:$0xff] %v7477_v0  ;;  %379 = vst [vmem:[#allocation2 + $0x1bf8] sm:$0xff] %v7477_v0 }
  0xe9   :  { %7433 = dma.done.wait [#allocation7], 100352 }
  0xea   :  { %7434 = vsyncadd [#allocation7], 4294866944  ;;  %v393_v1 = vld [vmem:[#allocation2 + $0x8] sm:$0xff]  ;;  %v392_v3 = vld [vmem:[#allocation2] sm:$0xff] }
  0xeb   :  { %v649_v2 = vld [vmem:[#allocation2 + $0x808] sm:$0xff]  ;;  %1324 = vmatprep.subr.bf16.mxu1 %v393_v1  ;;  %v648_v4 = vld [vmem:[#allocation2 + $0x800] sm:$0xff] }
  0xec   :  { %1367 = vmatprep.subr.bf16.mxu0 %v649_v2  ;;  %v409_v5 = vld [vmem:[#allocation2 + $0x88] sm:$0xff]  ;;  %1325 = vmatpush1.bf16.msra.mxu1 %v392_v3  ;;  %v408_v7 = vld [vmem:[#allocation2 + $0x80] sm:$0xff] }
  0xed   :  { %v665_v6 = vld [vmem:[#allocation2 + $0x888] sm:$0xff]  ;;  %1368 = vmatpush1.bf16.msra.mxu0 %v648_v4  ;;  %1326 = vmatprep.subr.bf16.mxu1 %v409_v5  ;;  %v664_v8 = vld [vmem:[#allocation2 + $0x880] sm:$0xff]  ;;  %v395_v5 = vld [vmem:[#allocation2 + $0x18] sm:$0xff] }
  0xee   :  { %1369 = vmatprep.subr.bf16.mxu0 %v665_v6  ;;  %v425_v9 = vld [vmem:[#allocation2 + $0x108] sm:$0xff]  ;;  %v424_v11 = vld [vmem:[#allocation2 + $0x100] sm:$0xff] }
  0xef   :  { %v681_v10 = vld [vmem:[#allocation2 + $0x908] sm:$0xff]  ;;  %v680_v12 = vld [vmem:[#allocation2 + $0x900] sm:$0xff] }
  0xf0   :  { %1327 = vmatpush1.bf16.msra.mxu1 %v408_v7  ;;  %v441_v13 = vld [vmem:[#allocation2 + $0x188] sm:$0xff]  ;;  %v440_v15 = vld [vmem:[#allocation2 + $0x180] sm:$0xff] }
  0xf1   :  { %1370 = vmatpush1.bf16.msra.mxu0 %v664_v8  ;;  %1328 = vmatprep.subr.bf16.mxu1 %v425_v9  ;;  %v697_v14 = vld [vmem:[#allocation2 + $0x988] sm:$0xff]  ;;  %v696_v16 = vld [vmem:[#allocation2 + $0x980] sm:$0xff]  ;;  %v394_v9 = vld [vmem:[#allocation2 + $0x10] sm:$0xff] }
  0xf2   :  { %1371 = vmatprep.subr.bf16.mxu0 %v681_v10  ;;  %v457_v17 = vld [vmem:[#allocation2 + $0x208] sm:$0xff]  ;;  %v456_v19 = vld [vmem:[#allocation2 + $0x200] sm:$0xff] }
  0xf3   :  { %v713_v18 = vld [vmem:[#allocation2 + $0xa08] sm:$0xff]  ;;  %v712_v20 = vld [vmem:[#allocation2 + $0xa00] sm:$0xff] }
  0xf4   :  { %1329 = vmatpush1.bf16.msra.mxu1 %v424_v11  ;;  %v473_v21 = vld [vmem:[#allocation2 + $0x288] sm:$0xff]  ;;  %v472_v23 = vld [vmem:[#allocation2 + $0x280] sm:$0xff]  ;;  %v411_v11 = vld [vmem:[#allocation2 + $0x98] sm:$0xff] }
  0xf5   :  { %1372 = vmatpush1.bf16.msra.mxu0 %v680_v12  ;;  %1330 = vmatprep.subr.bf16.mxu1 %v441_v13  ;;  %v729_v22 = vld [vmem:[#allocation2 + $0xa88] sm:$0xff]  ;;  %v728_v24 = vld [vmem:[#allocation2 + $0xa80] sm:$0xff]  ;;  %v7812_v12 = vld [vmem:[#allocation8 + $0x14] ss:$28 sps:$4 sm:$0xff]  }
  0xf6   :  { %1373 = vmatprep.subr.bf16.mxu0 %v697_v14  ;;  %v489_v25 = vld [vmem:[#allocation2 + $0x308] sm:$0xff]  ;;  %v488_v27 = vld [vmem:[#allocation2 + $0x300] sm:$0xff]  ;;  %v410_v14 = vld [vmem:[#allocation2 + $0x90] sm:$0xff] }
  0xf7   :  { %v745_v26 = vld [vmem:[#allocation2 + $0xb08] sm:$0xff]  ;;  %v7802_v28 = vld [vmem:[#allocation8 + $0x4] ss:$28 sps:$4 sm:$0xff]  }
  0xf8   :  { %1331 = vmatpush1.bf16.msra.mxu1 %v440_v15  ;;  %v744_v29 = vld [vmem:[#allocation2 + $0xb00] sm:$0xff]  ;;  %v7804_v30 = vld [vmem:[#allocation8 + $0xc] ss:$28 sps:$4 sm:$0xff]   ;;  %1356 = vmatprep.mubr.bf16.mxu1 %v7802_v28 }
  0xf9   :  { %1374 = vmatpush1.bf16.msra.mxu0 %v696_v16  ;;  %1332 = vmatprep.subr.bf16.mxu1 %v457_v17  ;;  %v505_v31 = vld [vmem:[#allocation2 + $0x388] sm:$0xff]  ;;  %v504_v33 = vld [vmem:[#allocation2 + $0x380] sm:$0xff]  ;;  %v427_v16 = vld [vmem:[#allocation2 + $0x118] sm:$0xff] }
  0xfa   :  { %1375 = vmatprep.subr.bf16.mxu0 %v713_v18  ;;  %v761_v32 = vld [vmem:[#allocation2 + $0xb88] sm:$0xff]  ;;  %1399 = vmatprep.mubr.bf16.mxu0 %v7804_v30  ;;  %v760_v34 = vld [vmem:[#allocation2 + $0xb80] sm:$0xff]  ;;  %v426_v18 = vld [vmem:[#allocation2 + $0x110] sm:$0xff] }
  0xfb   :  { %v521_v35 = vld [vmem:[#allocation2 + $0x408] sm:$0xff]  ;;  %v520_v37 = vld [vmem:[#allocation2 + $0x400] sm:$0xff] }
  0xfc   :  { %1333 = vmatpush1.bf16.msra.mxu1 %v456_v19  ;;  %v777_v36 = vld [vmem:[#allocation2 + $0xc08] sm:$0xff]  ;;  %v776_v38 = vld [vmem:[#allocation2 + $0xc00] sm:$0xff] }
  0xfd   :  { %1376 = vmatpush1.bf16.msra.mxu0 %v712_v20  ;;  %1334 = vmatprep.subr.bf16.mxu1 %v473_v21  ;;  %v537_v39 = vld [vmem:[#allocation2 + $0x488] sm:$0xff]  ;;  %v536_v41 = vld [vmem:[#allocation2 + $0x480] sm:$0xff]  ;;  %v443_v20 = vld [vmem:[#allocation2 + $0x198] sm:$0xff] }
  0xfe   :  { %1377 = vmatprep.subr.bf16.mxu0 %v729_v22  ;;  %v793_v40 = vld [vmem:[#allocation2 + $0xc88] sm:$0xff]  ;;  %v792_v42 = vld [vmem:[#allocation2 + $0xc80] sm:$0xff]  ;;  %v442_v22 = vld [vmem:[#allocation2 + $0x190] sm:$0xff] }
  0xff   :  { %v553_v43 = vld [vmem:[#allocation2 + $0x508] sm:$0xff]  ;;  %v552_v45 = vld [vmem:[#allocation2 + $0x500] sm:$0xff] }
 0x100   :  { %1335 = vmatpush1.bf16.msra.mxu1 %v472_v23  ;;  %v809_v44 = vld [vmem:[#allocation2 + $0xd08] sm:$0xff]  ;;  %v808_v46 = vld [vmem:[#allocation2 + $0xd00] sm:$0xff] }
 0x101   :  { %1378 = vmatpush1.bf16.msra.mxu0 %v728_v24  ;;  %1336 = vmatprep.subr.bf16.mxu1 %v489_v25  ;;  %v569_v47 = vld [vmem:[#allocation2 + $0x588] sm:$0xff]  ;;  %v568_v49 = vld [vmem:[#allocation2 + $0x580] sm:$0xff]  ;;  %v459_v24 = vld [vmem:[#allocation2 + $0x218] sm:$0xff] }
 0x102   :  { %1379 = vmatprep.subr.bf16.mxu0 %v745_v26  ;;  %v825_v48 = vld [vmem:[#allocation2 + $0xd88] sm:$0xff]  ;;  %v824_v50 = vld [vmem:[#allocation2 + $0xd80] sm:$0xff]  ;;  %v458_v26 = vld [vmem:[#allocation2 + $0x210] sm:$0xff] }
 0x103   :  { %v585_v51 = vld [vmem:[#allocation2 + $0x608] sm:$0xff]  ;;  %v584_v53 = vld [vmem:[#allocation2 + $0x600] sm:$0xff] }
 0x104   :  { %1337 = vmatpush1.bf16.msra.mxu1 %v488_v27  ;;  %v841_v52 = vld [vmem:[#allocation2 + $0xe08] sm:$0xff]  ;;  %v840_v54 = vld [vmem:[#allocation2 + $0xe00] sm:$0xff] }
 0x105   :  { %1380 = vmatpush1.bf16.msra.mxu0 %v744_v29  ;;  %1338 = vmatprep.subr.bf16.mxu1 %v505_v31  ;;  %v601_v55 = vld [vmem:[#allocation2 + $0x688] sm:$0xff]  ;;  %v600_v57 = vld [vmem:[#allocation2 + $0x680] sm:$0xff]  ;;  %v475_v29 = vld [vmem:[#allocation2 + $0x298] sm:$0xff] }
 0x106   :  { %1381 = vmatprep.subr.bf16.mxu0 %v761_v32  ;;  %v857_v56 = vld [vmem:[#allocation2 + $0xe88] sm:$0xff]  ;;  %v856_v58 = vld [vmem:[#allocation2 + $0xe80] sm:$0xff]  ;;  %v474_v32 = vld [vmem:[#allocation2 + $0x290] sm:$0xff] }
 0x107   :  { %v617_v59 = vld [vmem:[#allocation2 + $0x708] sm:$0xff]  ;;  %v616_v61 = vld [vmem:[#allocation2 + $0x700] sm:$0xff] }
 0x108   :  { %1339 = vmatpush1.bf16.msra.mxu1 %v504_v33  ;;  %v873_v60 = vld [vmem:[#allocation2 + $0xf08] sm:$0xff]  ;;  %v872_v62 = vld [vmem:[#allocation2 + $0xf00] sm:$0xff] }
 0x109   :  { %1382 = vmatpush1.bf16.msra.mxu0 %v760_v34  ;;  %1340 = vmatprep.subr.bf16.mxu1 %v521_v35  ;;  %v633_v63 = vld [vmem:[#allocation2 + $0x788] sm:$0xff]  ;;  %v632_v2 = vld [vmem:[#allocation2 + $0x780] sm:$0xff]  ;;  %v491_v34 = vld [vmem:[#allocation2 + $0x318] sm:$0xff] }
 0x10a   :  { %1383 = vmatprep.subr.bf16.mxu0 %v777_v36  ;;  %v889_v1 = vld [vmem:[#allocation2 + $0xf88] sm:$0xff]  ;;  %v888_v3 = vld [vmem:[#allocation2 + $0xf80] sm:$0xff]  ;;  %v490_v36 = vld [vmem:[#allocation2 + $0x310] sm:$0xff] }
 0x10b   :  { %v905_v4 = vld [vmem:[#allocation2 + $0x1008] sm:$0xff]  ;;  %v7808_v6 = vld [vmem:[#allocation8] ss:$28 sps:$4 sm:$0xff]  }
 0x10c   :  { %1341 = vmatpush1.bf16.msra.mxu1 %v520_v37  ;;  %v7810_v7 = vld [vmem:[#allocation8 + $0x8] ss:$28 sps:$4 sm:$0xff]  }
 0x10d   :  { %1384 = vmatpush1.bf16.msra.mxu0 %v776_v38  ;;  %1342 = vmatprep.subr.bf16.mxu1 %v537_v39  ;;  %v904_v8 = vld [vmem:[#allocation2 + $0x1000] sm:$0xff]  ;;  %v921_v10 = vld [vmem:[#allocation2 + $0x1088] sm:$0xff]  ;;  %v507_v38 = vld [vmem:[#allocation2 + $0x398] sm:$0xff] }
 0x10e   :  { %1385 = vmatprep.subr.bf16.mxu0 %v793_v40  ;;  %v920_v13 = vld [vmem:[#allocation2 + $0x1080] sm:$0xff]  ;;  %v937_v15 = vld [vmem:[#allocation2 + $0x1108] sm:$0xff]  ;;  %v506_v40 = vld [vmem:[#allocation2 + $0x390] sm:$0xff] }
 0x10f   :  { %v936_v17 = vld [vmem:[#allocation2 + $0x1100] sm:$0xff]  ;;  %v953_v19 = vld [vmem:[#allocation2 + $0x1188] sm:$0xff] }
 0x110   :  { %1343 = vmatpush1.bf16.msra.mxu1 %v536_v41  ;;  %v952_v21 = vld [vmem:[#allocation2 + $0x1180] sm:$0xff]  ;;  %v969_v23 = vld [vmem:[#allocation2 + $0x1208] sm:$0xff] }
 0x111   :  { %1386 = vmatpush1.bf16.msra.mxu0 %v792_v42  ;;  %1344 = vmatprep.subr.bf16.mxu1 %v553_v43  ;;  %v968_v25 = vld [vmem:[#allocation2 + $0x1200] sm:$0xff]  ;;  %v985_v27 = vld [vmem:[#allocation2 + $0x1288] sm:$0xff]  ;;  %v523_v42 = vld [vmem:[#allocation2 + $0x418] sm:$0xff] }
 0x112   :  { %1387 = vmatprep.subr.bf16.mxu0 %v809_v44  ;;  %v984_v31 = vld [vmem:[#allocation2 + $0x1280] sm:$0xff]  ;;  %v1001_v33 = vld [vmem:[#allocation2 + $0x1308] sm:$0xff]  ;;  %v522_v44 = vld [vmem:[#allocation2 + $0x410] sm:$0xff] }
 0x113   :  { %v1000_v35 = vld [vmem:[#allocation2 + $0x1300] sm:$0xff]  ;;  %v1017_v37 = vld [vmem:[#allocation2 + $0x1388] sm:$0xff] }
 0x114   :  { %1345 = vmatpush1.bf16.msra.mxu1 %v552_v45  ;;  %v1016_v39 = vld [vmem:[#allocation2 + $0x1380] sm:$0xff]  ;;  %v1033_v41 = vld [vmem:[#allocation2 + $0x1408] sm:$0xff] }
 0x115   :  { %1388 = vmatpush1.bf16.msra.mxu0 %v808_v46  ;;  %1346 = vmatprep.subr.bf16.mxu1 %v569_v47  ;;  %v1032_v43 = vld [vmem:[#allocation2 + $0x1400] sm:$0xff]  ;;  %v1049_v45 = vld [vmem:[#allocation2 + $0x1488] sm:$0xff]  ;;  %v539_v46 = vld [vmem:[#allocation2 + $0x498] sm:$0xff] }
 0x116   :  { %1389 = vmatprep.subr.bf16.mxu0 %v825_v48  ;;  %v1048_v47 = vld [vmem:[#allocation2 + $0x1480] sm:$0xff]  ;;  %v538_v48 = vld [vmem:[#allocation2 + $0x490] sm:$0xff] }
 0x118   :  { %1347 = vmatpush1.bf16.msra.mxu1 %v568_v49  ;;  %v1065_v49 = vld [vmem:[#allocation2 + $0x1508] sm:$0xff] }
 0x119   :  { %1390 = vmatpush1.bf16.msra.mxu0 %v824_v50  ;;  %1348 = vmatprep.subr.bf16.mxu1 %v585_v51  ;;  %v555_v50 = vld [vmem:[#allocation2 + $0x518] sm:$0xff]  ;;  %v1064_v51 = vld [vmem:[#allocation2 + $0x1500] sm:$0xff] }
 0x11a   :  { %1391 = vmatprep.subr.bf16.mxu0 %v841_v52  ;;  %v554_v52 = vld [vmem:[#allocation2 + $0x510] sm:$0xff] }
 0x11c   :  { %1349 = vmatpush1.bf16.msra.mxu1 %v584_v53  ;;  %v1081_v53 = vld [vmem:[#allocation2 + $0x1588] sm:$0xff] }
 0x11d   :  { %1392 = vmatpush1.bf16.msra.mxu0 %v840_v54  ;;  %1350 = vmatprep.subr.bf16.mxu1 %v601_v55  ;;  %v571_v54 = vld [vmem:[#allocation2 + $0x598] sm:$0xff]  ;;  %v1080_v55 = vld [vmem:[#allocation2 + $0x1580] sm:$0xff] }
 0x11e   :  { %1393 = vmatprep.subr.bf16.mxu0 %v857_v56  ;;  %v570_v56 = vld [vmem:[#allocation2 + $0x590] sm:$0xff] }
 0x120   :  { %1351 = vmatpush1.bf16.msra.mxu1 %v600_v57  ;;  %v1097_v57 = vld [vmem:[#allocation2 + $0x1608] sm:$0xff] }
 0x121   :  { %1394 = vmatpush1.bf16.msra.mxu0 %v856_v58  ;;  %1352 = vmatprep.subr.bf16.mxu1 %v617_v59  ;;  %v587_v58 = vld [vmem:[#allocation2 + $0x618] sm:$0xff]  ;;  %v1096_v59 = vld [vmem:[#allocation2 + $0x1600] sm:$0xff] }
 0x122   :  { %1395 = vmatprep.subr.bf16.mxu0 %v873_v60  ;;  %v586_v60 = vld [vmem:[#allocation2 + $0x610] sm:$0xff] }
 0x124   :  { %1353 = vmatpush1.bf16.msra.mxu1 %v616_v61  ;;  %v1113_v61 = vld [vmem:[#allocation2 + $0x1688] sm:$0xff] }
 0x125   :  { %1396 = vmatpush1.bf16.msra.mxu0 %v872_v62  ;;  %1354 = vmatprep.subr.bf16.mxu1 %v633_v63  ;;  %v603_v62 = vld [vmem:[#allocation2 + $0x698] sm:$0xff]  ;;  %v1112_v63 = vld [vmem:[#allocation2 + $0x1680] sm:$0xff] }
 0x126   :  { %1397 = vmatprep.subr.bf16.mxu0 %v889_v1  ;;  %v602_v1 = vld [vmem:[#allocation2 + $0x690] sm:$0xff] }
 0x128   :  { %1355 = vmatpush1.bf16.msra.mxu1 %v632_v2  ;;  %v1129_v2 = vld [vmem:[#allocation2 + $0x1708] sm:$0xff] }
 0x129   :  { %1398 = vmatpush1.bf16.msra.mxu0 %v888_v3  ;;  %1496 = vmatprep.subr.bf16.mxu1 %v395_v5  ;;  %v619_v3 = vld [vmem:[#allocation2 + $0x718] sm:$0xff]  ;;  %v618_v5 = vld [vmem:[#allocation2 + $0x710] sm:$0xff] }
 0x12a   :  { %1410 = vmatprep.subr.bf16.mxu0 %v905_v4  ;;  %v1128_v4 = vld [vmem:[#allocation2 + $0x1700] sm:$0xff] }
 0x12b   :  { %1357 = vmatmul.mubr.bf16.vlgmr.msra.gmra.mrb[0].mxu1 %v7808_v6 }
 0x12c   :  { %1400 = vmatmul.mubr.bf16.vlgmr.msra.gmra.mrb[0].mxu0 %v7810_v7  ;;  %1497 = vmatpush1.bf16.msra.mxu1 %v394_v9  ;;  %v635_v9 = vld [vmem:[#allocation2 + $0x798] sm:$0xff] }
 0x12d   :  { %1411 = vmatpush1.bf16.msra.mxu0 %v904_v8  ;;  %1498 = vmatprep.subr.bf16.mxu1 %v411_v11  ;;  %v1145_v8 = vld [vmem:[#allocation2 + $0x1788] sm:$0xff]  ;;  %v634_v11 = vld [vmem:[#allocation2 + $0x790] sm:$0xff] }
 0x12e   :  { %1412 = vmatprep.subr.bf16.mxu0 %v921_v10  ;;  %1442 = vmatprep.mubr.bf16.mxu0 %v7812_v12  ;;  %v1144_v10 = vld [vmem:[#allocation2 + $0x1780] sm:$0xff] }
 0x12f   :  { %1528 = vmatprep.mubr.bf16.mxu1 %v7802_v28 }
 0x130   :  { %1499 = vmatpush1.bf16.msra.mxu1 %v410_v14  ;;  %v651_v14 = vld [vmem:[#allocation2 + $0x818] sm:$0xff] }
 0x131   :  { %1413 = vmatpush1.bf16.msra.mxu0 %v920_v13  ;;  %1500 = vmatprep.subr.bf16.mxu1 %v427_v16  ;;  %v1161_v13 = vld [vmem:[#allocation2 + $0x1808] sm:$0xff]  ;;  %v1160_v16 = vld [vmem:[#allocation2 + $0x1800] sm:$0xff] }
 0x132   :  { %1414 = vmatprep.subr.bf16.mxu0 %v937_v15  ;;  %v7818_v15 = vld [vmem:[#allocation8 + $0x10] ss:$28 sps:$4 sm:$0xff]  }
 0x134   :  { %1501 = vmatpush1.bf16.msra.mxu1 %v426_v18  ;;  %v1177_v18 = vld [vmem:[#allocation2 + $0x1888] sm:$0xff] }
 0x135   :  { %1415 = vmatpush1.bf16.msra.mxu0 %v936_v17  ;;  %1502 = vmatprep.subr.bf16.mxu1 %v443_v20  ;;  %v650_v17 = vld [vmem:[#allocation2 + $0x810] sm:$0xff]  ;;  %v1176_v20 = vld [vmem:[#allocation2 + $0x1880] sm:$0xff] }
 0x136   :  { %1416 = vmatprep.subr.bf16.mxu0 %v953_v19  ;;  %v667_v19 = vld [vmem:[#allocation2 + $0x898] sm:$0xff] }
 0x138   :  { %1503 = vmatpush1.bf16.msra.mxu1 %v442_v22  ;;  %v1193_v22 = vld [vmem:[#allocation2 + $0x1908] sm:$0xff] }
 0x139   :  { %1417 = vmatpush1.bf16.msra.mxu0 %v952_v21  ;;  %1504 = vmatprep.subr.bf16.mxu1 %v459_v24  ;;  %v666_v21 = vld [vmem:[#allocation2 + $0x890] sm:$0xff]  ;;  %v1192_v24 = vld [vmem:[#allocation2 + $0x1900] sm:$0xff] }
 0x13a   :  { %1418 = vmatprep.subr.bf16.mxu0 %v969_v23  ;;  %v683_v23 = vld [vmem:[#allocation2 + $0x918] sm:$0xff] }
 0x13c   :  { %1505 = vmatpush1.bf16.msra.mxu1 %v458_v26  ;;  %v1209_v26 = vld [vmem:[#allocation2 + $0x1988] sm:$0xff] }
 0x13d   :  { %1419 = vmatpush1.bf16.msra.mxu0 %v968_v25  ;;  %1506 = vmatprep.subr.bf16.mxu1 %v475_v29  ;;  %v682_v25 = vld [vmem:[#allocation2 + $0x910] sm:$0xff]  ;;  %v1208_v29 = vld [vmem:[#allocation2 + $0x1980] sm:$0xff] }
 0x13e   :  { %1420 = vmatprep.subr.bf16.mxu0 %v985_v27  ;;  %v699_v27 = vld [vmem:[#allocation2 + $0x998] sm:$0xff] }
 0x140   :  { %1507 = vmatpush1.bf16.msra.mxu1 %v474_v32  ;;  %v1225_v32 = vld [vmem:[#allocation2 + $0x1a08] sm:$0xff] }
 0x141   :  { %1421 = vmatpush1.bf16.msra.mxu0 %v984_v31  ;;  %1508 = vmatprep.subr.bf16.mxu1 %v491_v34  ;;  %v698_v31 = vld [vmem:[#allocation2 + $0x990] sm:$0xff]  ;;  %v1224_v34 = vld [vmem:[#allocation2 + $0x1a00] sm:$0xff] }
 0x142   :  { %1422 = vmatprep.subr.bf16.mxu0 %v1001_v33  ;;  %v715_v33 = vld [vmem:[#allocation2 + $0xa18] sm:$0xff] }
 0x144   :  { %1509 = vmatpush1.bf16.msra.mxu1 %v490_v36  ;;  %v1241_v36 = vld [vmem:[#allocation2 + $0x1a88] sm:$0xff] }
 0x145   :  { %1423 = vmatpush1.bf16.msra.mxu0 %v1000_v35  ;;  %1510 = vmatprep.subr.bf16.mxu1 %v507_v38  ;;  %v714_v35 = vld [vmem:[#allocation2 + $0xa10] sm:$0xff]  ;;  %v1240_v38 = vld [vmem:[#allocation2 + $0x1a80] sm:$0xff] }
 0x146   :  { %1424 = vmatprep.subr.bf16.mxu0 %v1017_v37  ;;  %v731_v37 = vld [vmem:[#allocation2 + $0xa98] sm:$0xff] }
 0x148   :  { %1511 = vmatpush1.bf16.msra.mxu1 %v506_v40  ;;  %v1257_v40 = vld [vmem:[#allocation2 + $0x1b08] sm:$0xff] }
 0x149   :  { %1425 = vmatpush1.bf16.msra.mxu0 %v1016_v39  ;;  %1512 = vmatprep.subr.bf16.mxu1 %v523_v42  ;;  %v730_v39 = vld [vmem:[#allocation2 + $0xa90] sm:$0xff]  ;;  %v1256_v42 = vld [vmem:[#allocation2 + $0x1b00] sm:$0xff] }
 0x14a   :  { %1426 = vmatprep.subr.bf16.mxu0 %v1033_v41  ;;  %v747_v41 = vld [vmem:[#allocation2 + $0xb18] sm:$0xff] }
 0x14c   :  { %1513 = vmatpush1.bf16.msra.mxu1 %v522_v44  ;;  %v1273_v44 = vld [vmem:[#allocation2 + $0x1b88] sm:$0xff] }
 0x14d   :  { %1427 = vmatpush1.bf16.msra.mxu0 %v1032_v43  ;;  %1514 = vmatprep.subr.bf16.mxu1 %v539_v46  ;;  %v746_v43 = vld [vmem:[#allocation2 + $0xb10] sm:$0xff]  ;;  %v1272_v46 = vld [vmem:[#allocation2 + $0x1b80] sm:$0xff] }
 0x14e   :  { %1428 = vmatprep.subr.bf16.mxu0 %v1049_v45  ;;  %v763_v45 = vld [vmem:[#allocation2 + $0xb98] sm:$0xff] }
 0x150   :  { %1515 = vmatpush1.bf16.msra.mxu1 %v538_v48  ;;  %v779_v48 = vld [vmem:[#allocation2 + $0xc18] sm:$0xff] }
 0x151   :  { %1429 = vmatpush1.bf16.msra.mxu0 %v1048_v47  ;;  %1516 = vmatprep.subr.bf16.mxu1 %v555_v50  ;;  %v762_v47 = vld [vmem:[#allocation2 + $0xb90] sm:$0xff] }
 0x152   :  { %1430 = vmatprep.subr.bf16.mxu0 %v1065_v49  ;;  %v397_v49 = vld [vmem:[#allocation2 + $0x28] sm:$0xff]  ;;  %v7824_v50 = vld [vmem:[#allocation8 + $0x18] ss:$28 sps:$4 sm:$0xff]  }
 0x154   :  { %1517 = vmatpush1.bf16.msra.mxu1 %v554_v52  ;;  %v396_v52 = vld [vmem:[#allocation2 + $0x20] sm:$0xff] }
 0x155   :  { %1431 = vmatpush1.bf16.msra.mxu0 %v1064_v51  ;;  %1518 = vmatprep.subr.bf16.mxu1 %v571_v54  ;;  %v778_v51 = vld [vmem:[#allocation2 + $0xc10] sm:$0xff]  ;;  %v413_v54 = vld [vmem:[#allocation2 + $0xa8] sm:$0xff] }
 0x156   :  { %1432 = vmatprep.subr.bf16.mxu0 %v1081_v53  ;;  %v795_v53 = vld [vmem:[#allocation2 + $0xc98] sm:$0xff] }
 0x158   :  { %1519 = vmatpush1.bf16.msra.mxu1 %v570_v56  ;;  %v412_v56 = vld [vmem:[#allocation2 + $0xa0] sm:$0xff] }
 0x159   :  { %1433 = vmatpush1.bf16.msra.mxu0 %v1080_v55  ;;  %1520 = vmatprep.subr.bf16.mxu1 %v587_v58  ;;  %v794_v55 = vld [vmem:[#allocation2 + $0xc90] sm:$0xff]  ;;  %v429_v58 = vld [vmem:[#allocation2 + $0x128] sm:$0xff] }
 0x15a   :  { %1434 = vmatprep.subr.bf16.mxu0 %v1097_v57  ;;  %v811_v57 = vld [vmem:[#allocation2 + $0xd18] sm:$0xff] }
 0x15c   :  { %1521 = vmatpush1.bf16.msra.mxu1 %v586_v60  ;;  %v428_v60 = vld [vmem:[#allocation2 + $0x120] sm:$0xff] }
 0x15d   :  { %1435 = vmatpush1.bf16.msra.mxu0 %v1096_v59  ;;  %1522 = vmatprep.subr.bf16.mxu1 %v603_v62  ;;  %v810_v59 = vld [vmem:[#allocation2 + $0xd10] sm:$0xff]  ;;  %v445_v62 = vld [vmem:[#allocation2 + $0x1a8] sm:$0xff] }
 0x15e   :  { %1436 = vmatprep.subr.bf16.mxu0 %v1113_v61  ;;  %v827_v61 = vld [vmem:[#allocation2 + $0xd98] sm:$0xff] }
 0x160   :  { %1523 = vmatpush1.bf16.msra.mxu1 %v602_v1  ;;  %v444_v1 = vld [vmem:[#allocation2 + $0x1a0] sm:$0xff] }
 0x161   :  { %1437 = vmatpush1.bf16.msra.mxu0 %v1112_v63  ;;  %1524 = vmatprep.subr.bf16.mxu1 %v619_v3  ;;  %v826_v63 = vld [vmem:[#allocation2 + $0xd90] sm:$0xff]  ;;  %v461_v3 = vld [vmem:[#allocation2 + $0x228] sm:$0xff] }
 0x162   :  { %1438 = vmatprep.subr.bf16.mxu0 %v1129_v2  ;;  %v843_v2 = vld [vmem:[#allocation2 + $0xe18] sm:$0xff] }
 0x164   :  { %1525 = vmatpush1.bf16.msra.mxu1 %v618_v5  ;;  %v859_v5 = vld [vmem:[#allocation2 + $0xe98] sm:$0xff] }
 0x165   :  { %1439 = vmatpush1.bf16.msra.mxu0 %v1128_v4  ;;  %1526 = vmatprep.subr.bf16.mxu1 %v635_v9  ;;  %v460_v4 = vld [vmem:[#allocation2 + $0x220] sm:$0xff]  ;;  %v858_v9 = vld [vmem:[#allocation2 + $0xe90] sm:$0xff] }
 0x166   :  { %1440 = vmatprep.subr.bf16.mxu0 %v1145_v8  ;;  %v477_v8 = vld [vmem:[#allocation2 + $0x2a8] sm:$0xff] }
 0x168   :  { %1527 = vmatpush1.bf16.msra.mxu1 %v634_v11  ;;  %v875_v11 = vld [vmem:[#allocation2 + $0xf18] sm:$0xff] }
 0x169   :  { %1441 = vmatpush1.bf16.msra.mxu0 %v1144_v10  ;;  %1539 = vmatprep.subr.bf16.mxu1 %v651_v14  ;;  %v476_v10 = vld [vmem:[#allocation2 + $0x2a0] sm:$0xff]  ;;  %v874_v14 = vld [vmem:[#allocation2 + $0xf10] sm:$0xff] }
 0x16a   :  { %1453 = vmatprep.subr.bf16.mxu0 %v1161_v13  ;;  %v493_v13 = vld [vmem:[#allocation2 + $0x328] sm:$0xff] }
 0x16b   :  { %1529 = vmatmul.mubr.bf16.vlgmr.msra.gmra.mrb[4].mxu1 %v7808_v6 }
 0x16c   :  { %1443 = vmatmul.mubr.bf16.vlgmr.msra.gmra.mrb[0].mxu0 %v7818_v15  ;;  %1540 = vmatpush1.bf16.msra.mxu1 %v650_v17  ;;  %v891_v17 = vld [vmem:[#allocation2 + $0xf98] sm:$0xff] }
 0x16d   :  { %1454 = vmatpush1.bf16.msra.mxu0 %v1160_v16  ;;  %1541 = vmatprep.subr.bf16.mxu1 %v667_v19  ;;  %v492_v16 = vld [vmem:[#allocation2 + $0x320] sm:$0xff]  ;;  %v890_v19 = vld [vmem:[#allocation2 + $0xf90] sm:$0xff] }
 0x16e   :  { %1455 = vmatprep.subr.bf16.mxu0 %v1177_v18  ;;  %1485 = vmatprep.mubr.bf16.mxu0 %v7477_v0  ;;  %v509_v18 = vld [vmem:[#allocation2 + $0x3a8] sm:$0xff] }
 0x16f   :  { %1571 = vmatprep.mubr.bf16.mxu1 %v7804_v30 }
 0x170   :  { %1542 = vmatpush1.bf16.msra.mxu1 %v666_v21  ;;  %v907_v21 = vld [vmem:[#allocation2 + $0x1018] sm:$0xff] }
 0x171   :  { %1456 = vmatpush1.bf16.msra.mxu0 %v1176_v20  ;;  %1543 = vmatprep.subr.bf16.mxu1 %v683_v23  ;;  %v508_v20 = vld [vmem:[#allocation2 + $0x3a0] sm:$0xff]  ;;  %v906_v23 = vld [vmem:[#allocation2 + $0x1010] sm:$0xff] }
 0x172   :  { %1457 = vmatprep.subr.bf16.mxu0 %v1193_v22  ;;  %v525_v22 = vld [vmem:[#allocation2 + $0x428] sm:$0xff] }
 0x174   :  { %1544 = vmatpush1.bf16.msra.mxu1 %v682_v25  ;;  %v923_v25 = vld [vmem:[#allocation2 + $0x1098] sm:$0xff] }
 0x175   :  { %1458 = vmatpush1.bf16.msra.mxu0 %v1192_v24  ;;  %1545 = vmatprep.subr.bf16.mxu1 %v699_v27  ;;  %v524_v24 = vld [vmem:[#allocation2 + $0x420] sm:$0xff]  ;;  %v922_v27 = vld [vmem:[#allocation2 + $0x1090] sm:$0xff] }
 0x176   :  { %1459 = vmatprep.subr.bf16.mxu0 %v1209_v26  ;;  %v541_v26 = vld [vmem:[#allocation2 + $0x4a8] sm:$0xff] }
 0x178   :  { %1546 = vmatpush1.bf16.msra.mxu1 %v698_v31  ;;  %v939_v31 = vld [vmem:[#allocation2 + $0x1118] sm:$0xff] }
 0x179   :  { %1460 = vmatpush1.bf16.msra.mxu0 %v1208_v29  ;;  %1547 = vmatprep.subr.bf16.mxu1 %v715_v33  ;;  %v540_v29 = vld [vmem:[#allocation2 + $0x4a0] sm:$0xff]  ;;  %v938_v33 = vld [vmem:[#allocation2 + $0x1110] sm:$0xff] }
 0x17a   :  { %1461 = vmatprep.subr.bf16.mxu0 %v1225_v32  ;;  %v557_v32 = vld [vmem:[#allocation2 + $0x528] sm:$0xff] }
 0x17c   :  { %1548 = vmatpush1.bf16.msra.mxu1 %v714_v35  ;;  %v955_v35 = vld [vmem:[#allocation2 + $0x1198] sm:$0xff] }
 0x17d   :  { %1462 = vmatpush1.bf16.msra.mxu0 %v1224_v34  ;;  %1549 = vmatprep.subr.bf16.mxu1 %v731_v37  ;;  %v556_v34 = vld [vmem:[#allocation2 + $0x520] sm:$0xff]  ;;  %v954_v37 = vld [vmem:[#allocation2 + $0x1190] sm:$0xff] }
 0x17e   :  { %1463 = vmatprep.subr.bf16.mxu0 %v1241_v36  ;;  %v573_v36 = vld [vmem:[#allocation2 + $0x5a8] sm:$0xff] }
 0x180   :  { %1550 = vmatpush1.bf16.msra.mxu1 %v730_v39  ;;  %v971_v39 = vld [vmem:[#allocation2 + $0x1218] sm:$0xff] }
 0x181   :  { %1464 = vmatpush1.bf16.msra.mxu0 %v1240_v38  ;;  %1551 = vmatprep.subr.bf16.mxu1 %v747_v41  ;;  %v572_v38 = vld [vmem:[#allocation2 + $0x5a0] sm:$0xff]  ;;  %v970_v41 = vld [vmem:[#allocation2 + $0x1210] sm:$0xff] }
 0x182   :  { %1465 = vmatprep.subr.bf16.mxu0 %v1257_v40  ;;  %v589_v40 = vld [vmem:[#allocation2 + $0x628] sm:$0xff] }
 0x184   :  { %1552 = vmatpush1.bf16.msra.mxu1 %v746_v43  ;;  %v987_v43 = vld [vmem:[#allocation2 + $0x1298] sm:$0xff] }
 0x185   :  { %1466 = vmatpush1.bf16.msra.mxu0 %v1256_v42  ;;  %1553 = vmatprep.subr.bf16.mxu1 %v763_v45  ;;  %v588_v42 = vld [vmem:[#allocation2 + $0x620] sm:$0xff]  ;;  %v986_v45 = vld [vmem:[#allocation2 + $0x1290] sm:$0xff] }
 0x186   :  { %1467 = vmatprep.subr.bf16.mxu0 %v1273_v44  ;;  %v605_v44 = vld [vmem:[#allocation2 + $0x6a8] sm:$0xff] }
 0x188   :  { %1554 = vmatpush1.bf16.msra.mxu1 %v762_v47  ;;  %v1003_v47 = vld [vmem:[#allocation2 + $0x1318] sm:$0xff] }
 0x189   :  { %1468 = vmatpush1.bf16.msra.mxu0 %v1272_v46  ;;  %1555 = vmatprep.subr.bf16.mxu1 %v779_v48  ;;  %v604_v46 = vld [vmem:[#allocation2 + $0x6a0] sm:$0xff]  ;;  %v621_v48 = vld [vmem:[#allocation2 + $0x728] sm:$0xff] }
 0x18a   :  { %1668 = vmatprep.subr.bf16.mxu0 %v397_v49  ;;  %v1002_v49 = vld [vmem:[#allocation2 + $0x1310] sm:$0xff] }
 0x18c   :  { %1486 = vmatmul.mubr.bf16.vlgmr.msra.gmra.mrb[0].mxu0 %v7824_v50  ;;  %1556 = vmatpush1.bf16.msra.mxu1 %v778_v51  ;;  %v620_v51 = vld [vmem:[#allocation2 + $0x720] sm:$0xff] }
 0x18d   :  { %1669 = vmatpush1.bf16.msra.mxu0 %v396_v52  ;;  %1557 = vmatprep.subr.bf16.mxu1 %v795_v53  ;;  %v1019_v52 = vld [vmem:[#allocation2 + $0x1398] sm:$0xff]  ;;  %v637_v53 = vld [vmem:[#allocation2 + $0x7a8] sm:$0xff] }
 0x18e   :  { %1670 = vmatprep.subr.bf16.mxu0 %v413_v54  ;;  %1700 = vmatprep.mubr.bf16.mxu0 %v7802_v28  ;;  %v842_v28 = vld [vmem:[#allocation2 + $0xe10] sm:$0xff] }
 0x18f   :  { %v1018_v54 = vld [vmem:[#allocation2 + $0x1390] sm:$0xff] }
 0x190   :  { %1558 = vmatpush1.bf16.msra.mxu1 %v794_v55  ;;  %v636_v55 = vld [vmem:[#allocation2 + $0x7a0] sm:$0xff] }
 0x191   :  { %1671 = vmatpush1.bf16.msra.mxu0 %v412_v56  ;;  %1559 = vmatprep.subr.bf16.mxu1 %v811_v57  ;;  %v1035_v56 = vld [vmem:[#allocation2 + $0x1418] sm:$0xff]  ;;  %v653_v57 = vld [vmem:[#allocation2 + $0x828] sm:$0xff] }
 0x192   :  { %1672 = vmatprep.subr.bf16.mxu0 %v429_v58  ;;  %v1034_v58 = vld [vmem:[#allocation2 + $0x1410] sm:$0xff] }
 0x194   :  { %1560 = vmatpush1.bf16.msra.mxu1 %v810_v59  ;;  %v652_v59 = vld [vmem:[#allocation2 + $0x820] sm:$0xff] }
 0x195   :  { %1673 = vmatpush1.bf16.msra.mxu0 %v428_v60  ;;  %1561 = vmatprep.subr.bf16.mxu1 %v827_v61  ;;  %v1051_v60 = vld [vmem:[#allocation2 + $0x1498] sm:$0xff]  ;;  %v669_v61 = vld [vmem:[#allocation2 + $0x8a8] sm:$0xff] }
 0x196   :  { %1674 = vmatprep.subr.bf16.mxu0 %v445_v62  ;;  %v1050_v62 = vld [vmem:[#allocation2 + $0x1490] sm:$0xff] }
 0x198   :  { %1562 = vmatpush1.bf16.msra.mxu1 %v826_v63  ;;  %v668_v63 = vld [vmem:[#allocation2 + $0x8a0] sm:$0xff] }
 0x199   :  { %1675 = vmatpush1.bf16.msra.mxu0 %v444_v1  ;;  %1563 = vmatprep.subr.bf16.mxu1 %v843_v2  ;;  %v1067_v1 = vld [vmem:[#allocation2 + $0x1518] sm:$0xff]  ;;  %v685_v2 = vld [vmem:[#allocation2 + $0x928] sm:$0xff] }
 0x19a   :  { %1676 = vmatprep.subr.bf16.mxu0 %v461_v3  ;;  %v1066_v3 = vld [vmem:[#allocation2 + $0x1510] sm:$0xff] }
 0x19c   :  { %1564 = vmatpush1.bf16.msra.mxu1 %v842_v28  ;;  %v684_v28 = vld [vmem:[#allocation2 + $0x920] sm:$0xff] }
 0x19d   :  { %1677 = vmatpush1.bf16.msra.mxu0 %v460_v4  ;;  %1565 = vmatprep.subr.bf16.mxu1 %v859_v5  ;;  %v1083_v4 = vld [vmem:[#allocation2 + $0x1598] sm:$0xff]  ;;  %v701_v5 = vld [vmem:[#allocation2 + $0x9a8] sm:$0xff] }
 0x19e   :  { %1678 = vmatprep.subr.bf16.mxu0 %v477_v8  ;;  %v700_v8 = vld [vmem:[#allocation2 + $0x9a0] sm:$0xff] }
 0x1a0   :  { %1566 = vmatpush1.bf16.msra.mxu1 %v858_v9  ;;  %v1099_v9 = vld [vmem:[#allocation2 + $0x1618] sm:$0xff] }
 0x1a1   :  { %1679 = vmatpush1.bf16.msra.mxu0 %v476_v10  ;;  %1567 = vmatprep.subr.bf16.mxu1 %v875_v11  ;;  %v717_v10 = vld [vmem:[#allocation2 + $0xa28] sm:$0xff]  ;;  %v716_v11 = vld [vmem:[#allocation2 + $0xa20] sm:$0xff] }
 0x1a2   :  { %1680 = vmatprep.subr.bf16.mxu0 %v493_v13  ;;  %v1115_v13 = vld [vmem:[#allocation2 + $0x1698] sm:$0xff] }
 0x1a4   :  { %1568 = vmatpush1.bf16.msra.mxu1 %v874_v14  ;;  %v733_v14 = vld [vmem:[#allocation2 + $0xaa8] sm:$0xff] }
 0x1a5   :  { %1681 = vmatpush1.bf16.msra.mxu0 %v492_v16  ;;  %1569 = vmatprep.subr.bf16.mxu1 %v891_v17  ;;  %v1114_v16 = vld [vmem:[#allocation2 + $0x1690] sm:$0xff]  ;;  %v732_v17 = vld [vmem:[#allocation2 + $0xaa0] sm:$0xff] }
 0x1a6   :  { %1682 = vmatprep.subr.bf16.mxu0 %v509_v18  ;;  %v1131_v18 = vld [vmem:[#allocation2 + $0x1718] sm:$0xff] }
 0x1a8   :  { %1570 = vmatpush1.bf16.msra.mxu1 %v890_v19  ;;  %v749_v19 = vld [vmem:[#allocation2 + $0xb28] sm:$0xff] }
 0x1a9   :  { %1683 = vmatpush1.bf16.msra.mxu0 %v508_v20  ;;  %1582 = vmatprep.subr.bf16.mxu1 %v907_v21  ;;  %v1130_v20 = vld [vmem:[#allocation2 + $0x1710] sm:$0xff]  ;;  %v748_v21 = vld [vmem:[#allocation2 + $0xb20] sm:$0xff] }
 0x1aa   :  { %1684 = vmatprep.subr.bf16.mxu0 %v525_v22  ;;  %v1147_v22 = vld [vmem:[#allocation2 + $0x1798] sm:$0xff] }
 0x1ab   :  { %1572 = vmatmul.mubr.bf16.vlgmr.msra.gmra.mrb[4].mxu1 %v7810_v7 }
 0x1ac   :  { %1583 = vmatpush1.bf16.msra.mxu1 %v906_v23  ;;  %1614 = vmatprep.mubr.bf16.mxu1 %v7812_v12  ;;  %v765_v23 = vld [vmem:[#allocation2 + $0xba8] sm:$0xff] }
 0x1ad   :  { %1685 = vmatpush1.bf16.msra.mxu0 %v524_v24  ;;  %1584 = vmatprep.subr.bf16.mxu1 %v923_v25  ;;  %v1146_v24 = vld [vmem:[#allocation2 + $0x1790] sm:$0xff]  ;;  %v764_v25 = vld [vmem:[#allocation2 + $0xba0] sm:$0xff] }
 0x1ae   :  { %1686 = vmatprep.subr.bf16.mxu0 %v541_v26  ;;  %v1163_v26 = vld [vmem:[#allocation2 + $0x1818] sm:$0xff] }
 0x1b0   :  { %1585 = vmatpush1.bf16.msra.mxu1 %v922_v27  ;;  %v781_v27 = vld [vmem:[#allocation2 + $0xc28] sm:$0xff] }
 0x1b1   :  { %1687 = vmatpush1.bf16.msra.mxu0 %v540_v29  ;;  %1586 = vmatprep.subr.bf16.mxu1 %v939_v31  ;;  %v1162_v29 = vld [vmem:[#allocation2 + $0x1810] sm:$0xff]  ;;  %v780_v31 = vld [vmem:[#allocation2 + $0xc20] sm:$0xff] }
 0x1b2   :  { %1688 = vmatprep.subr.bf16.mxu0 %v557_v32  ;;  %v1179_v32 = vld [vmem:[#allocation2 + $0x1898] sm:$0xff] }
 0x1b4   :  { %1587 = vmatpush1.bf16.msra.mxu1 %v938_v33  ;;  %v797_v33 = vld [vmem:[#allocation2 + $0xca8] sm:$0xff] }
 0x1b5   :  { %1689 = vmatpush1.bf16.msra.mxu0 %v556_v34  ;;  %1588 = vmatprep.subr.bf16.mxu1 %v955_v35  ;;  %v1178_v34 = vld [vmem:[#allocation2 + $0x1890] sm:$0xff]  ;;  %v796_v35 = vld [vmem:[#allocation2 + $0xca0] sm:$0xff] }
 0x1b6   :  { %1690 = vmatprep.subr.bf16.mxu0 %v573_v36  ;;  %v1195_v36 = vld [vmem:[#allocation2 + $0x1918] sm:$0xff] }
 0x1b8   :  { %1589 = vmatpush1.bf16.msra.mxu1 %v954_v37  ;;  %v813_v37 = vld [vmem:[#allocation2 + $0xd28] sm:$0xff] }
 0x1b9   :  { %1691 = vmatpush1.bf16.msra.mxu0 %v572_v38  ;;  %1590 = vmatprep.subr.bf16.mxu1 %v971_v39  ;;  %v1194_v38 = vld [vmem:[#allocation2 + $0x1910] sm:$0xff]  ;;  %v812_v39 = vld [vmem:[#allocation2 + $0xd20] sm:$0xff] }
 0x1ba   :  { %1692 = vmatprep.subr.bf16.mxu0 %v589_v40  ;;  %v1211_v40 = vld [vmem:[#allocation2 + $0x1998] sm:$0xff] }
 0x1bc   :  { %1591 = vmatpush1.bf16.msra.mxu1 %v970_v41  ;;  %v829_v41 = vld [vmem:[#allocation2 + $0xda8] sm:$0xff] }
 0x1bd   :  { %1693 = vmatpush1.bf16.msra.mxu0 %v588_v42  ;;  %1592 = vmatprep.subr.bf16.mxu1 %v987_v43  ;;  %v1210_v42 = vld [vmem:[#allocation2 + $0x1990] sm:$0xff]  ;;  %v828_v43 = vld [vmem:[#allocation2 + $0xda0] sm:$0xff] }
 0x1be   :  { %1694 = vmatprep.subr.bf16.mxu0 %v605_v44  ;;  %v1227_v44 = vld [vmem:[#allocation2 + $0x1a18] sm:$0xff] }
 0x1c0   :  { %1593 = vmatpush1.bf16.msra.mxu1 %v986_v45  ;;  %v845_v45 = vld [vmem:[#allocation2 + $0xe28] sm:$0xff] }
 0x1c1   :  { %1695 = vmatpush1.bf16.msra.mxu0 %v604_v46  ;;  %1594 = vmatprep.subr.bf16.mxu1 %v1003_v47  ;;  %v1226_v46 = vld [vmem:[#allocation2 + $0x1a10] sm:$0xff]  ;;  %v844_v47 = vld [vmem:[#allocation2 + $0xe20] sm:$0xff] }
 0x1c2   :  { %1696 = vmatprep.subr.bf16.mxu0 %v621_v48  ;;  %v1243_v48 = vld [vmem:[#allocation2 + $0x1a98] sm:$0xff] }
 0x1c4   :  { %1595 = vmatpush1.bf16.msra.mxu1 %v1002_v49  ;;  %v861_v49 = vld [vmem:[#allocation2 + $0xea8] sm:$0xff] }
 0x1c5   :  { %1697 = vmatpush1.bf16.msra.mxu0 %v620_v51  ;;  %1596 = vmatprep.subr.bf16.mxu1 %v1019_v52  ;;  %v1242_v51 = vld [vmem:[#allocation2 + $0x1a90] sm:$0xff]  ;;  %v860_v52 = vld [vmem:[#allocation2 + $0xea0] sm:$0xff] }
 0x1c6   :  { %1698 = vmatprep.subr.bf16.mxu0 %v637_v53 }
 0x1c8   :  { %1597 = vmatpush1.bf16.msra.mxu1 %v1018_v54  ;;  %v1259_v54 = vld [vmem:[#allocation2 + $0x1b18] sm:$0xff] }
 0x1c9   :  { %1699 = vmatpush1.bf16.msra.mxu0 %v636_v55  ;;  %1598 = vmatprep.subr.bf16.mxu1 %v1035_v56  ;;  %v877_v55 = vld [vmem:[#allocation2 + $0xf28] sm:$0xff] }
 0x1ca   :  { %1711 = vmatprep.subr.bf16.mxu0 %v653_v57 }
 0x1cc   :  { %1701 = vmatmul.mubr.bf16.vlgmr.msra.gmra.mrb[4].mxu0 %v7808_v6  ;;  %1599 = vmatpush1.bf16.msra.mxu1 %v1034_v58  ;;  %v1082_v6 = vld [vmem:[#allocation2 + $0x1590] sm:$0xff] }
 0x1cd   :  { %1712 = vmatpush1.bf16.msra.mxu0 %v652_v59  ;;  %1600 = vmatprep.subr.bf16.mxu1 %v1051_v60  ;;  %v1258_v59 = vld [vmem:[#allocation2 + $0x1b10] sm:$0xff]  ;;  %v876_v60 = vld [vmem:[#allocation2 + $0xf20] sm:$0xff] }
 0x1ce   :  { %1713 = vmatprep.subr.bf16.mxu0 %v669_v61  ;;  %1743 = vmatprep.mubr.bf16.mxu0 %v7804_v30  ;;  %v1098_v30 = vld [vmem:[#allocation2 + $0x1610] sm:$0xff]  ;;  %v1275_v61 = vld [vmem:[#allocation2 + $0x1b98] sm:$0xff] }
 0x1d0   :  { %1601 = vmatpush1.bf16.msra.mxu1 %v1050_v62  ;;  %v893_v62 = vld [vmem:[#allocation2 + $0xfa8] sm:$0xff] }
 0x1d1   :  { %1714 = vmatpush1.bf16.msra.mxu0 %v668_v63  ;;  %1602 = vmatprep.subr.bf16.mxu1 %v1067_v1  ;;  %v1274_v63 = vld [vmem:[#allocation2 + $0x1b90] sm:$0xff]  ;;  %v892_v1 = vld [vmem:[#allocation2 + $0xfa0] sm:$0xff] }
 0x1d2   :  { %1715 = vmatprep.subr.bf16.mxu0 %v685_v2  ;;  %v909_v2 = vld [vmem:[#allocation2 + $0x1028] sm:$0xff] }
 0x1d4   :  { %1603 = vmatpush1.bf16.msra.mxu1 %v1066_v3  ;;  %v399_v3 = vld [vmem:[#allocation2 + $0x38] sm:$0xff] }
 0x1d5   :  { %1716 = vmatpush1.bf16.msra.mxu0 %v684_v28  ;;  %1604 = vmatprep.subr.bf16.mxu1 %v1083_v4  ;;  %v908_v28 = vld [vmem:[#allocation2 + $0x1020] sm:$0xff]  ;;  %v398_v4 = vld [vmem:[#allocation2 + $0x30] sm:$0xff] }
 0x1d6   :  { %1717 = vmatprep.subr.bf16.mxu0 %v701_v5  ;;  %v925_v5 = vld [vmem:[#allocation2 + $0x10a8] sm:$0xff] }
 0x1d8   :  { %1605 = vmatpush1.bf16.msra.mxu1 %v1082_v6  ;;  %v415_v6 = vld [vmem:[#allocation2 + $0xb8] sm:$0xff] }
 0x1d9   :  { %1718 = vmatpush1.bf16.msra.mxu0 %v700_v8  ;;  %1606 = vmatprep.subr.bf16.mxu1 %v1099_v9  ;;  %v924_v8 = vld [vmem:[#allocation2 + $0x10a0] sm:$0xff]  ;;  %v414_v9 = vld [vmem:[#allocation2 + $0xb0] sm:$0xff] }
 0x1da   :  { %1719 = vmatprep.subr.bf16.mxu0 %v717_v10  ;;  %v941_v10 = vld [vmem:[#allocation2 + $0x1128] sm:$0xff] }
 0x1dc   :  { %1607 = vmatpush1.bf16.msra.mxu1 %v1098_v30  ;;  %v431_v30 = vld [vmem:[#allocation2 + $0x138] sm:$0xff] }
 0x1dd   :  { %1720 = vmatpush1.bf16.msra.mxu0 %v716_v11  ;;  %1608 = vmatprep.subr.bf16.mxu1 %v1115_v13  ;;  %v7845_v11 = vld [vmem:[#allocation8 + $0x4] ss:$28 sps:$4 sm:$0xff]  }
 0x1de   :  { %1721 = vmatprep.subr.bf16.mxu0 %v733_v14  ;;  %v940_v13 = vld [vmem:[#allocation2 + $0x1120] sm:$0xff]  ;;  %v957_v14 = vld [vmem:[#allocation2 + $0x11a8] sm:$0xff] }
 0x1e0   :  { %1609 = vmatpush1.bf16.msra.mxu1 %v1114_v16  ;;  %v447_v16 = vld [vmem:[#allocation2 + $0x1b8] sm:$0xff] }
 0x1e1   :  { %1722 = vmatpush1.bf16.msra.mxu0 %v732_v17  ;;  %1610 = vmatprep.subr.bf16.mxu1 %v1131_v18  ;;  %v956_v17 = vld [vmem:[#allocation2 + $0x11a0] sm:$0xff]  ;;  %v446_v18 = vld [vmem:[#allocation2 + $0x1b0] sm:$0xff] }
 0x1e2   :  { %1723 = vmatprep.subr.bf16.mxu0 %v749_v19  ;;  %v973_v19 = vld [vmem:[#allocation2 + $0x1228] sm:$0xff] }
 0x1e4   :  { %1611 = vmatpush1.bf16.msra.mxu1 %v1130_v20  ;;  %v972_v20 = vld [vmem:[#allocation2 + $0x1220] sm:$0xff] }
 0x1e5   :  { %1724 = vmatpush1.bf16.msra.mxu0 %v748_v21  ;;  %1612 = vmatprep.subr.bf16.mxu1 %v1147_v22  ;;  %v462_v21 = vld [vmem:[#allocation2 + $0x230] sm:$0xff]  ;;  %v989_v22 = vld [vmem:[#allocation2 + $0x12a8] sm:$0xff] }
 0x1e6   :  { %1725 = vmatprep.subr.bf16.mxu0 %v765_v23  ;;  %v479_v23 = vld [vmem:[#allocation2 + $0x2b8] sm:$0xff] }
 0x1e8   :  { %1613 = vmatpush1.bf16.msra.mxu1 %v1146_v24  ;;  %v988_v24 = vld [vmem:[#allocation2 + $0x12a0] sm:$0xff] }
 0x1e9   :  { %1726 = vmatpush1.bf16.msra.mxu0 %v764_v25  ;;  %1625 = vmatprep.subr.bf16.mxu1 %v1163_v26  ;;  %v478_v25 = vld [vmem:[#allocation2 + $0x2b0] sm:$0xff]  ;;  %v1005_v26 = vld [vmem:[#allocation2 + $0x1328] sm:$0xff] }
 0x1ea   :  { %1727 = vmatprep.subr.bf16.mxu0 %v781_v27  ;;  %v495_v27 = vld [vmem:[#allocation2 + $0x338] sm:$0xff] }
 0x1eb   :  { %1615 = vmatmul.mubr.bf16.vlgmr.msra.gmra.mrb[4].mxu1 %v7818_v15 }
 0x1ec   :  { %1626 = vmatpush1.bf16.msra.mxu1 %v1162_v29  ;;  %1657 = vmatprep.mubr.bf16.mxu1 %v7477_v0  ;;  %v1004_v29 = vld [vmem:[#allocation2 + $0x1320] sm:$0xff] }
 0x1ed   :  { %1728 = vmatpush1.bf16.msra.mxu0 %v780_v31  ;;  %1627 = vmatprep.subr.bf16.mxu1 %v1179_v32  ;;  %v494_v31 = vld [vmem:[#allocation2 + $0x330] sm:$0xff]  ;;  %v1021_v32 = vld [vmem:[#allocation2 + $0x13a8] sm:$0xff] }
 0x1ee   :  { %1729 = vmatprep.subr.bf16.mxu0 %v797_v33  ;;  %v511_v33 = vld [vmem:[#allocation2 + $0x3b8] sm:$0xff] }
 0x1f0   :  { %1628 = vmatpush1.bf16.msra.mxu1 %v1178_v34  ;;  %v1020_v34 = vld [vmem:[#allocation2 + $0x13a0] sm:$0xff] }
 0x1f1   :  { %1730 = vmatpush1.bf16.msra.mxu0 %v796_v35  ;;  %1629 = vmatprep.subr.bf16.mxu1 %v1195_v36  ;;  %v510_v35 = vld [vmem:[#allocation2 + $0x3b0] sm:$0xff]  ;;  %v1037_v36 = vld [vmem:[#allocation2 + $0x1428] sm:$0xff] }
 0x1f2   :  { %1731 = vmatprep.subr.bf16.mxu0 %v813_v37  ;;  %v527_v37 = vld [vmem:[#allocation2 + $0x438] sm:$0xff] }
 0x1f4   :  { %1630 = vmatpush1.bf16.msra.mxu1 %v1194_v38  ;;  %v1036_v38 = vld [vmem:[#allocation2 + $0x1420] sm:$0xff] }
 0x1f5   :  { %1732 = vmatpush1.bf16.msra.mxu0 %v812_v39  ;;  %1631 = vmatprep.subr.bf16.mxu1 %v1211_v40  ;;  %v526_v39 = vld [vmem:[#allocation2 + $0x430] sm:$0xff]  ;;  %v1053_v40 = vld [vmem:[#allocation2 + $0x14a8] sm:$0xff] }
 0x1f6   :  { %1733 = vmatprep.subr.bf16.mxu0 %v829_v41  ;;  %v543_v41 = vld [vmem:[#allocation2 + $0x4b8] sm:$0xff] }
 0x1f8   :  { %1632 = vmatpush1.bf16.msra.mxu1 %v1210_v42  ;;  %v1052_v42 = vld [vmem:[#allocation2 + $0x14a0] sm:$0xff] }
 0x1f9   :  { %1734 = vmatpush1.bf16.msra.mxu0 %v828_v43  ;;  %1633 = vmatprep.subr.bf16.mxu1 %v1227_v44  ;;  %v542_v43 = vld [vmem:[#allocation2 + $0x4b0] sm:$0xff]  ;;  %v1069_v44 = vld [vmem:[#allocation2 + $0x1528] sm:$0xff] }
 0x1fa   :  { %1735 = vmatprep.subr.bf16.mxu0 %v845_v45  ;;  %v559_v45 = vld [vmem:[#allocation2 + $0x538] sm:$0xff] }
 0x1fc   :  { %1634 = vmatpush1.bf16.msra.mxu1 %v1226_v46  ;;  %v1068_v46 = vld [vmem:[#allocation2 + $0x1520] sm:$0xff] }
 0x1fd   :  { %1736 = vmatpush1.bf16.msra.mxu0 %v844_v47  ;;  %1635 = vmatprep.subr.bf16.mxu1 %v1243_v48  ;;  %v558_v47 = vld [vmem:[#allocation2 + $0x530] sm:$0xff]  ;;  %v1085_v48 = vld [vmem:[#allocation2 + $0x15a8] sm:$0xff] }
 0x1fe   :  { %1737 = vmatprep.subr.bf16.mxu0 %v861_v49  ;;  %v7834_v53 = vpop.f32.mrb[0].mxu1  ;;  %v575_v49 = vld [vmem:[#allocation2 + $0x5b8] sm:$0xff] }
 0x1ff   :  { %v7836_v56 = vpop.f32.mrb[1].mxu1 }
 0x200   :  { %v7838_v57 = vpop.f32.mrb[2].mxu1  ;;  %1636 = vmatpush1.bf16.msra.mxu1 %v1242_v51  ;;  %v1084_v51 = vld [vmem:[#allocation2 + $0x15a0] sm:$0xff] }
 0x201   :  { %1738 = vmatpush1.bf16.msra.mxu0 %v860_v52  ;;  %v7840_v58 = vpop.f32.mrb[3].mxu1  ;;  %1637 = vmatprep.subr.bf16.mxu1 %v1259_v54  ;;  %v574_v52 = vld [vmem:[#allocation2 + $0x5b0] sm:$0xff]  ;;  %v1101_v54 = vld [vmem:[#allocation2 + $0x1628] sm:$0xff] }
 0x202   :  { %1739 = vmatprep.subr.bf16.mxu0 %v877_v55  ;;  %v591_v55 = vld [vmem:[#allocation2 + $0x638] sm:$0xff] }
 0x204   :  { %1638 = vmatpush1.bf16.msra.mxu1 %v1258_v59  ;;  %v1100_v59 = vld [vmem:[#allocation2 + $0x1620] sm:$0xff] }
 0x205   :  { %1740 = vmatpush1.bf16.msra.mxu0 %v876_v60  ;;  %1639 = vmatprep.subr.bf16.mxu1 %v1275_v61  ;;  %v590_v60 = vld [vmem:[#allocation2 + $0x630] sm:$0xff]  ;;  %v1117_v61 = vld [vmem:[#allocation2 + $0x16a8] sm:$0xff] }
 0x206   :  { %1741 = vmatprep.subr.bf16.mxu0 %v893_v62  ;;  %v607_v62 = vld [vmem:[#allocation2 + $0x6b8] sm:$0xff] }
 0x208   :  { %1640 = vmatpush1.bf16.msra.mxu1 %v1274_v63  ;;  %v1116_v63 = vld [vmem:[#allocation2 + $0x16a0] sm:$0xff] }
 0x209   :  { %1742 = vmatpush1.bf16.msra.mxu0 %v892_v1  ;;  %1840 = vmatprep.subr.bf16.mxu1 %v399_v3  ;;  %v606_v1 = vld [vmem:[#allocation2 + $0x6b0] sm:$0xff]  ;;  %v623_v3 = vld [vmem:[#allocation2 + $0x738] sm:$0xff] }
 0x20a   :  { %1754 = vmatprep.subr.bf16.mxu0 %v909_v2  ;;  %v1133_v2 = vld [vmem:[#allocation2 + $0x1728] sm:$0xff] }
 0x20b   :  { %1658 = vmatmul.mubr.bf16.vlgmr.msra.gmra.mrb[4].mxu1 %v7824_v50 }
 0x20c   :  { %1744 = vmatmul.mubr.bf16.vlgmr.msra.gmra.mrb[4].mxu0 %v7810_v7  ;;  %1841 = vmatpush1.bf16.msra.mxu1 %v398_v4  ;;  %v430_v7 = vld [vmem:[#allocation2 + $0x130] sm:$0xff] }
 0x20d   :  { %1755 = vmatpush1.bf16.msra.mxu0 %v908_v28  ;;  %1842 = vmatprep.subr.bf16.mxu1 %v415_v6  ;;  %v1132_v28 = vld [vmem:[#allocation2 + $0x1720] sm:$0xff]  ;;  %v622_v4 = vld [vmem:[#allocation2 + $0x730] sm:$0xff]  ;;  %v639_v6 = vld [vmem:[#allocation2 + $0x7b8] sm:$0xff] }
 0x20e   :  { %1756 = vmatprep.subr.bf16.mxu0 %v925_v5  ;;  %1786 = vmatprep.mubr.bf16.mxu0 %v7812_v12  ;;  %v463_v12 = vld [vmem:[#allocation2 + $0x238] sm:$0xff]  ;;  %v1149_v5 = vld [vmem:[#allocation2 + $0x17a8] sm:$0xff] }
 0x20f   :  { %1872 = vmatprep.mubr.bf16.mxu1 %v7845_v11 }
 0x210   :  { %1843 = vmatpush1.bf16.msra.mxu1 %v414_v9  ;;  %v638_v9 = vld [vmem:[#allocation2 + $0x7b0] sm:$0xff] }
 0x211   :  { %1757 = vmatpush1.bf16.msra.mxu0 %v924_v8  ;;  %1844 = vmatprep.subr.bf16.mxu1 %v431_v30  ;;  %v1148_v8 = vld [vmem:[#allocation2 + $0x17a0] sm:$0xff]  ;;  %v655_v30 = vld [vmem:[#allocation2 + $0x838] sm:$0xff] }
 0x212   :  { %1758 = vmatprep.subr.bf16.mxu0 %v941_v10  ;;  %v1165_v10 = vld [vmem:[#allocation2 + $0x1828] sm:$0xff] }
 0x214   :  { %1845 = vmatpush1.bf16.msra.mxu1 %v430_v7  ;;  %v654_v7 = vld [vmem:[#allocation2 + $0x830] sm:$0xff] }
 0x215   :  { %1759 = vmatpush1.bf16.msra.mxu0 %v940_v13  ;;  %1846 = vmatprep.subr.bf16.mxu1 %v447_v16  ;;  %v1164_v13 = vld [vmem:[#allocation2 + $0x1820] sm:$0xff]  ;;  %v671_v16 = vld [vmem:[#allocation2 + $0x8b8] sm:$0xff] }
 0x216   :  { %1760 = vmatprep.subr.bf16.mxu0 %v957_v14  ;;  %v1181_v14 = vld [vmem:[#allocation2 + $0x18a8] sm:$0xff] }
 0x218   :  { %1847 = vmatpush1.bf16.msra.mxu1 %v446_v18  ;;  %v1180_v18 = vld [vmem:[#allocation2 + $0x18a0] sm:$0xff] }
 0x219   :  { %1761 = vmatpush1.bf16.msra.mxu0 %v956_v17  ;;  %1848 = vmatprep.subr.bf16.mxu1 %v463_v12  ;;  %v7849_v17 = vld [vmem:[#allocation8] ss:$28 sps:$4 sm:$0xff]   ;;  %v1197_v12 = vld [vmem:[#allocation2 + $0x1928] sm:$0xff] }
 0x21a   :  { %1762 = vmatprep.subr.bf16.mxu0 %v973_v19  ;;  %v670_v19 = vld [vmem:[#allocation2 + $0x8b0] sm:$0xff] }
 0x21c   :  { %1849 = vmatpush1.bf16.msra.mxu1 %v462_v21  ;;  %v7853_v21 = vld [vmem:[#allocation8 + $0xc] ss:$28 sps:$4 sm:$0xff]  }
 0x21d   :  { %1763 = vmatpush1.bf16.msra.mxu0 %v972_v20  ;;  %1850 = vmatprep.subr.bf16.mxu1 %v479_v23  ;;  %v687_v20 = vld [vmem:[#allocation2 + $0x938] sm:$0xff]  ;;  %v1213_v23 = vld [vmem:[#allocation2 + $0x19a8] sm:$0xff] }
 0x21e   :  { %1764 = vmatprep.subr.bf16.mxu0 %v989_v22  ;;  %v686_v22 = vld [vmem:[#allocation2 + $0x930] sm:$0xff] }
 0x220   :  { %1851 = vmatpush1.bf16.msra.mxu1 %v478_v25  ;;  %v1212_v25 = vld [vmem:[#allocation2 + $0x19a0] sm:$0xff] }
 0x221   :  { %1765 = vmatpush1.bf16.msra.mxu0 %v988_v24  ;;  %1852 = vmatprep.subr.bf16.mxu1 %v495_v27  ;;  %v703_v24 = vld [vmem:[#allocation2 + $0x9b8] sm:$0xff]  ;;  %v1229_v27 = vld [vmem:[#allocation2 + $0x1a28] sm:$0xff] }
 0x222   :  { %1766 = vmatprep.subr.bf16.mxu0 %v1005_v26  ;;  %v702_v26 = vld [vmem:[#allocation2 + $0x9b0] sm:$0xff] }
 0x224   :  { %1853 = vmatpush1.bf16.msra.mxu1 %v494_v31  ;;  %v1228_v31 = vld [vmem:[#allocation2 + $0x1a20] sm:$0xff] }
 0x225   :  { %1767 = vmatpush1.bf16.msra.mxu0 %v1004_v29  ;;  %1854 = vmatprep.subr.bf16.mxu1 %v511_v33  ;;  %v719_v29 = vld [vmem:[#allocation2 + $0xa38] sm:$0xff]  ;;  %v1245_v33 = vld [vmem:[#allocation2 + $0x1aa8] sm:$0xff] }
 0x226   :  { %1768 = vmatprep.subr.bf16.mxu0 %v1021_v32  ;;  %v718_v32 = vld [vmem:[#allocation2 + $0xa30] sm:$0xff] }
 0x228   :  { %1855 = vmatpush1.bf16.msra.mxu1 %v510_v35  ;;  %v1244_v35 = vld [vmem:[#allocation2 + $0x1aa0] sm:$0xff] }
 0x229   :  { %1769 = vmatpush1.bf16.msra.mxu0 %v1020_v34  ;;  %1856 = vmatprep.subr.bf16.mxu1 %v527_v37  ;;  %v735_v34 = vld [vmem:[#allocation2 + $0xab8] sm:$0xff] }
 0x22a   :  { %1770 = vmatprep.subr.bf16.mxu0 %v1037_v36  ;;  %v734_v36 = vld [vmem:[#allocation2 + $0xab0] sm:$0xff] }
 0x22c   :  { %1857 = vmatpush1.bf16.msra.mxu1 %v526_v39  ;;  %v751_v39 = vld [vmem:[#allocation2 + $0xb38] sm:$0xff] }
 0x22d   :  { %1771 = vmatpush1.bf16.msra.mxu0 %v1036_v38  ;;  %1858 = vmatprep.subr.bf16.mxu1 %v543_v41  ;;  %v1261_v38 = vld [vmem:[#allocation2 + $0x1b28] sm:$0xff] }
 0x22e   :  { %1772 = vmatprep.subr.bf16.mxu0 %v1053_v40 }
 0x230   :  { %1859 = vmatpush1.bf16.msra.mxu1 %v542_v43 }
 0x231   :  { %1773 = vmatpush1.bf16.msra.mxu0 %v1052_v42  ;;  %1860 = vmatprep.subr.bf16.mxu1 %v559_v45 }
 0x232   :  { %1774 = vmatprep.subr.bf16.mxu0 %v1069_v44 }
 0x234   :  { %1861 = vmatpush1.bf16.msra.mxu1 %v558_v47  ;;  %v1260_v47 = vld [vmem:[#allocation2 + $0x1b20] sm:$0xff] }
 0x235   :  { %1775 = vmatpush1.bf16.msra.mxu0 %v1068_v46  ;;  %1862 = vmatprep.subr.bf16.mxu1 %v575_v49 }
 0x236   :  { %1776 = vmatprep.subr.bf16.mxu0 %v1085_v48  ;;  %v750_v48 = vld [vmem:[#allocation2 + $0xb30] sm:$0xff] }
 0x238   :  { %1863 = vmatpush1.bf16.msra.mxu1 %v574_v52 }
 0x239   :  { %1777 = vmatpush1.bf16.msra.mxu0 %v1084_v51  ;;  %1864 = vmatprep.subr.bf16.mxu1 %v591_v55  ;;  %v767_v51 = vld [vmem:[#allocation2 + $0xbb8] sm:$0xff]  ;;  %v766_v55 = vld [vmem:[#allocation2 + $0xbb0] sm:$0xff] }
 0x23a   :  { %1778 = vmatprep.subr.bf16.mxu0 %v1101_v54 }
 0x23c   :  { %1865 = vmatpush1.bf16.msra.mxu1 %v590_v60  ;;  %v401_v60 = vld [vmem:[#allocation2 + $0x48] sm:$0xff] }
 0x23d   :  { %1779 = vmatpush1.bf16.msra.mxu0 %v1100_v59  ;;  %1866 = vmatprep.subr.bf16.mxu1 %v607_v62  ;;  %v783_v59 = vld [vmem:[#allocation2 + $0xc38] sm:$0xff] }
 0x23e   :  { %1780 = vmatprep.subr.bf16.mxu0 %v1117_v61  ;;  %v400_v61 = vld [vmem:[#allocation2 + $0x40] sm:$0xff]  ;;  %v799_v62 = vld [vmem:[#allocation2 + $0xcb8] sm:$0xff] }
 0x240   :  { %1867 = vmatpush1.bf16.msra.mxu1 %v606_v1  ;;  %v798_v1 = vld [vmem:[#allocation2 + $0xcb0] sm:$0xff] }
 0x241   :  { %1781 = vmatpush1.bf16.msra.mxu0 %v1116_v63  ;;  %1868 = vmatprep.subr.bf16.mxu1 %v623_v3  ;;  %v417_v63 = vld [vmem:[#allocation2 + $0xc8] sm:$0xff]  ;;  %v815_v3 = vld [vmem:[#allocation2 + $0xd38] sm:$0xff] }
 0x242   :  { %1782 = vmatprep.subr.bf16.mxu0 %v1133_v2  ;;  %v416_v2 = vld [vmem:[#allocation2 + $0xc0] sm:$0xff] }
 0x244   :  { %1869 = vmatpush1.bf16.msra.mxu1 %v622_v4  ;;  %v814_v4 = vld [vmem:[#allocation2 + $0xd30] sm:$0xff] }
 0x245   :  { %1783 = vmatpush1.bf16.msra.mxu0 %v1132_v28  ;;  %1870 = vmatprep.subr.bf16.mxu1 %v639_v6  ;;  %v433_v28 = vld [vmem:[#allocation2 + $0x148] sm:$0xff]  ;;  %v831_v6 = vld [vmem:[#allocation2 + $0xdb8] sm:$0xff] }
 0x246   :  { %1784 = vmatprep.subr.bf16.mxu0 %v1149_v5  ;;  %v432_v5 = vld [vmem:[#allocation2 + $0x140] sm:$0xff] }
 0x248   :  { %1871 = vmatpush1.bf16.msra.mxu1 %v638_v9  ;;  %v448_v9 = vld [vmem:[#allocation2 + $0x1c0] sm:$0xff] }
 0x249   :  { %1785 = vmatpush1.bf16.msra.mxu0 %v1148_v8  ;;  %1883 = vmatprep.subr.bf16.mxu1 %v655_v30  ;;  %v449_v8 = vld [vmem:[#allocation2 + $0x1c8] sm:$0xff] }
 0x24a   :  { %1797 = vmatprep.subr.bf16.mxu0 %v1165_v10  ;;  %v847_v10 = vld [vmem:[#allocation2 + $0xe38] sm:$0xff]  ;;  %v465_v30 = vld [vmem:[#allocation2 + $0x248] sm:$0xff] }
 0x24b   :  { %1873 = vmatmul.mubr.bf16.vlgmr.msra.gmra.mrb[8].mxu1 %v7849_v17 }
 0x24c   :  { %1787 = vmatmul.mubr.bf16.vlgmr.msra.gmra.mrb[4].mxu0 %v7818_v15  ;;  %1884 = vmatpush1.bf16.msra.mxu1 %v654_v7  ;;  %v1196_v15 = vld [vmem:[#allocation2 + $0x1920] sm:$0xff] }
 0x24d   :  { %1798 = vmatpush1.bf16.msra.mxu0 %v1164_v13  ;;  %1885 = vmatprep.subr.bf16.mxu1 %v671_v16  ;;  %v846_v13 = vld [vmem:[#allocation2 + $0xe30] sm:$0xff]  ;;  %v464_v7 = vld [vmem:[#allocation2 + $0x240] sm:$0xff]  ;;  %v481_v16 = vld [vmem:[#allocation2 + $0x2c8] sm:$0xff] }
 0x24e   :  { %1799 = vmatprep.subr.bf16.mxu0 %v1181_v14  ;;  %1829 = vmatprep.mubr.bf16.mxu0 %v7477_v0  ;;  %v863_v14 = vld [vmem:[#allocation2 + $0xeb8] sm:$0xff] }
 0x24f   :  { %1915 = vmatprep.mubr.bf16.mxu1 %v7853_v21 }
 0x250   :  { %1886 = vmatpush1.bf16.msra.mxu1 %v670_v19  ;;  %v480_v19 = vld [vmem:[#allocation2 + $0x2c0] sm:$0xff] }
 0x251   :  { %1800 = vmatpush1.bf16.msra.mxu0 %v1180_v18  ;;  %1887 = vmatprep.subr.bf16.mxu1 %v687_v20  ;;  %v862_v18 = vld [vmem:[#allocation2 + $0xeb0] sm:$0xff]  ;;  %v497_v20 = vld [vmem:[#allocation2 + $0x348] sm:$0xff] }
 0x252   :  { %1801 = vmatprep.subr.bf16.mxu0 %v1197_v12  ;;  %v879_v12 = vld [vmem:[#allocation2 + $0xf38] sm:$0xff] }
 0x254   :  { %1888 = vmatpush1.bf16.msra.mxu1 %v686_v22  ;;  %v496_v22 = vld [vmem:[#allocation2 + $0x340] sm:$0xff] }
 0x255   :  { %1802 = vmatpush1.bf16.msra.mxu0 %v1196_v15  ;;  %1889 = vmatprep.subr.bf16.mxu1 %v703_v24  ;;  %v878_v15 = vld [vmem:[#allocation2 + $0xf30] sm:$0xff]  ;;  %v513_v24 = vld [vmem:[#allocation2 + $0x3c8] sm:$0xff] }
 0x256   :  { %1803 = vmatprep.subr.bf16.mxu0 %v1213_v23  ;;  %v895_v23 = vld [vmem:[#allocation2 + $0xfb8] sm:$0xff] }
 0x258   :  { %1890 = vmatpush1.bf16.msra.mxu1 %v702_v26  ;;  %v512_v26 = vld [vmem:[#allocation2 + $0x3c0] sm:$0xff] }
 0x259   :  { %1804 = vmatpush1.bf16.msra.mxu0 %v1212_v25  ;;  %1891 = vmatprep.subr.bf16.mxu1 %v719_v29  ;;  %v894_v25 = vld [vmem:[#allocation2 + $0xfb0] sm:$0xff]  ;;  %v529_v29 = vld [vmem:[#allocation2 + $0x448] sm:$0xff] }
 0x25a   :  { %1805 = vmatprep.subr.bf16.mxu0 %v1229_v27  ;;  %v911_v27 = vld [vmem:[#allocation2 + $0x1038] sm:$0xff] }
 0x25c   :  { %1892 = vmatpush1.bf16.msra.mxu1 %v718_v32  ;;  %v528_v32 = vld [vmem:[#allocation2 + $0x440] sm:$0xff] }
 0x25d   :  { %1806 = vmatpush1.bf16.msra.mxu0 %v1228_v31  ;;  %1893 = vmatprep.subr.bf16.mxu1 %v735_v34  ;;  %v910_v31 = vld [vmem:[#allocation2 + $0x1030] sm:$0xff]  ;;  %v545_v34 = vld [vmem:[#allocation2 + $0x4c8] sm:$0xff] }
 0x25e   :  { %1807 = vmatprep.subr.bf16.mxu0 %v1245_v33  ;;  %v927_v33 = vld [vmem:[#allocation2 + $0x10b8] sm:$0xff] }
 0x25f   :  { %v1487_v37 = vpop.f32.mrb[0].mxu0 }
 0x260   :  { %v7857_v40 = vadd.f32 %v1487_v37, %v7834_v53  ;;  %v1489_v41 = vpop.f32.mrb[1].mxu0  ;;  %1894 = vmatpush1.bf16.msra.mxu1 %v734_v36  ;;  %v926_v36 = vld [vmem:[#allocation2 + $0x10b0] sm:$0xff]  ;;  %v544_v37 = vld [vmem:[#allocation2 + $0x4c0] sm:$0xff] }
 0x261   :  { %v7860_v42 = vadd.f32 %v1489_v41, %v7836_v56  ;;  %v1491_v43 = vpop.f32.mrb[2].mxu0  ;;  %1808 = vmatpush1.bf16.msra.mxu0 %v1244_v35  ;;  %1895 = vmatprep.subr.bf16.mxu1 %v751_v39  ;;  %v1277_v56 = vld [vmem:[#allocation2 + $0x1ba8] sm:$0xff]  ;;  %v7877_v41 = vld [vmem:[#allocation8 + $0x14] ss:$28 sps:$4 sm:$0xff]  }
 0x262   :  { %v2700_v44 = vmax.f32 %v7857_v40, 0.0  ;;  %v7864_v45 = vadd.f32 %v1491_v43, %v7838_v57  ;;  %v1493_v46 = vpop.f32.mrb[3].mxu0  ;;  %1809 = vmatprep.subr.bf16.mxu0 %v1261_v38  ;;  %v1276_v57 = vld [vmem:[#allocation2 + $0x1ba0] sm:$0xff]  ;;  %v943_v38 = vld [vmem:[#allocation2 + $0x1138] sm:$0xff]  ;;  %v561_v39 = vld [vmem:[#allocation2 + $0x548] sm:$0xff] }
 0x263   :  { %v2701_v53 = vmax.f32 %v7860_v42, 0.0  ;;  %v7868_v49 = vadd.f32 %v1493_v46, %v7840_v58  ;;  %v782_v58 = vld [vmem:[#allocation2 + $0xc30] sm:$0xff]  ;;  %v7874_v35 = vld [vmem:[#allocation8 + $0x8] ss:$28 sps:$4 sm:$0xff]  }
 0x264   :  { %v2716_v52 = vmax.f32 %v7864_v45, 0.0  ;;  %1896 = vmatpush1.bf16.msra.mxu1 %v750_v48  ;;  %v942_v43 = vld [vmem:[#allocation2 + $0x1130] sm:$0xff]  ;;  %v560_v46 = vld [vmem:[#allocation2 + $0x540] sm:$0xff]  ;;  %v577_v48 = vld [vmem:[#allocation2 + $0x5c8] sm:$0xff] }
 0x265   :  { %v2717_v54 = vmax.f32 %v7868_v49, 0.0  ;;  %1810 = vmatpush1.bf16.msra.mxu0 %v1260_v47  ;;  %1897 = vmatprep.subr.bf16.mxu1 %v767_v51  ;;  %v959_v47 = vld [vmem:[#allocation2 + $0x11b8] sm:$0xff]  ;;  %v576_v51 = vld [vmem:[#allocation2 + $0x5c0] sm:$0xff] }
 0x266   :  { %1811 = vmatprep.subr.bf16.mxu0 %v1277_v56  ;;  %v958_v56 = vld [vmem:[#allocation2 + $0x11b0] sm:$0xff] }
 0x268   :  { %1898 = vmatpush1.bf16.msra.mxu1 %v766_v55  ;;  %v593_v55 = vld [vmem:[#allocation2 + $0x648] sm:$0xff] }
 0x269   :  { %1812 = vmatpush1.bf16.msra.mxu0 %v1276_v57  ;;  %1899 = vmatprep.subr.bf16.mxu1 %v783_v59  ;;  %v975_v57 = vld [vmem:[#allocation2 + $0x1238] sm:$0xff]  ;;  %v974_v59 = vld [vmem:[#allocation2 + $0x1230] sm:$0xff] }
 0x26a   :  { %2012 = vmatprep.subr.bf16.mxu0 %v401_v60  ;;  %v592_v60 = vld [vmem:[#allocation2 + $0x640] sm:$0xff] }
 0x26c   :  { %1830 = vmatmul.mubr.bf16.vlgmr.msra.gmra.mrb[4].mxu0 %v7824_v50  ;;  %1900 = vmatpush1.bf16.msra.mxu1 %v782_v58  ;;  %v830_v50 = vld [vmem:[#allocation2 + $0xdb0] sm:$0xff]  ;;  %v991_v58 = vld [vmem:[#allocation2 + $0x12b8] sm:$0xff] }
 0x26d   :  { %2013 = vmatpush1.bf16.msra.mxu0 %v400_v61  ;;  %1901 = vmatprep.subr.bf16.mxu1 %v799_v62  ;;  %v609_v61 = vld [vmem:[#allocation2 + $0x6c8] sm:$0xff]  ;;  %v990_v62 = vld [vmem:[#allocation2 + $0x12b0] sm:$0xff] }
 0x26e   :  { %2014 = vmatprep.subr.bf16.mxu0 %v417_v63  ;;  %2044 = vmatprep.mubr.bf16.mxu0 %v7845_v11  ;;  %v608_v63 = vld [vmem:[#allocation2 + $0x6c0] sm:$0xff] }
 0x270   :  { %1902 = vmatpush1.bf16.msra.mxu1 %v798_v1  ;;  %v1007_v1 = vld [vmem:[#allocation2 + $0x1338] sm:$0xff] }
 0x271   :  { %2015 = vmatpush1.bf16.msra.mxu0 %v416_v2  ;;  %1903 = vmatprep.subr.bf16.mxu1 %v815_v3  ;;  %v625_v2 = vld [vmem:[#allocation2 + $0x748] sm:$0xff]  ;;  %v1006_v3 = vld [vmem:[#allocation2 + $0x1330] sm:$0xff] }
 0x272   :  { %2016 = vmatprep.subr.bf16.mxu0 %v433_v28  ;;  %v624_v28 = vld [vmem:[#allocation2 + $0x740] sm:$0xff] }
 0x274   :  { %1904 = vmatpush1.bf16.msra.mxu1 %v814_v4  ;;  %v1023_v4 = vld [vmem:[#allocation2 + $0x13b8] sm:$0xff] }
 0x275   :  { %2017 = vmatpush1.bf16.msra.mxu0 %v432_v5  ;;  %1905 = vmatprep.subr.bf16.mxu1 %v831_v6  ;;  %v641_v5 = vld [vmem:[#allocation2 + $0x7c8] sm:$0xff]  ;;  %v1022_v6 = vld [vmem:[#allocation2 + $0x13b0] sm:$0xff] }
 0x276   :  { %2018 = vmatprep.subr.bf16.mxu0 %v449_v8  ;;  %v640_v8 = vld [vmem:[#allocation2 + $0x7c0] sm:$0xff] }
 0x278   :  { %1906 = vmatpush1.bf16.msra.mxu1 %v830_v50  ;;  %v1039_v50 = vld [vmem:[#allocation2 + $0x1438] sm:$0xff] }
 0x279   :  { %2019 = vmatpush1.bf16.msra.mxu0 %v448_v9  ;;  %1907 = vmatprep.subr.bf16.mxu1 %v847_v10  ;;  %v657_v9 = vld [vmem:[#allocation2 + $0x848] sm:$0xff]  ;;  %v1038_v10 = vld [vmem:[#allocation2 + $0x1430] sm:$0xff] }
 0x27a   :  { %2020 = vmatprep.subr.bf16.mxu0 %v465_v30  ;;  %v656_v30 = vld [vmem:[#allocation2 + $0x840] sm:$0xff] }
 0x27c   :  { %1908 = vmatpush1.bf16.msra.mxu1 %v846_v13  ;;  %v1055_v13 = vld [vmem:[#allocation2 + $0x14b8] sm:$0xff] }
 0x27d   :  { %2021 = vmatpush1.bf16.msra.mxu0 %v464_v7  ;;  %1909 = vmatprep.subr.bf16.mxu1 %v863_v14  ;;  %v673_v7 = vld [vmem:[#allocation2 + $0x8c8] sm:$0xff]  ;;  %v1054_v14 = vld [vmem:[#allocation2 + $0x14b0] sm:$0xff] }
 0x27e   :  { %2022 = vmatprep.subr.bf16.mxu0 %v481_v16  ;;  %v672_v16 = vld [vmem:[#allocation2 + $0x8c0] sm:$0xff] }
 0x280   :  { %1910 = vmatpush1.bf16.msra.mxu1 %v862_v18  ;;  %v1071_v18 = vld [vmem:[#allocation2 + $0x1538] sm:$0xff] }
 0x281   :  { %2023 = vmatpush1.bf16.msra.mxu0 %v480_v19  ;;  %1911 = vmatprep.subr.bf16.mxu1 %v879_v12  ;;  %v689_v19 = vld [vmem:[#allocation2 + $0x948] sm:$0xff]  ;;  %v1070_v12 = vld [vmem:[#allocation2 + $0x1530] sm:$0xff] }
 0x282   :  { %2024 = vmatprep.subr.bf16.mxu0 %v497_v20  ;;  %v688_v20 = vld [vmem:[#allocation2 + $0x940] sm:$0xff] }
 0x284   :  { %1912 = vmatpush1.bf16.msra.mxu1 %v878_v15  ;;  %v1087_v15 = vld [vmem:[#allocation2 + $0x15b8] sm:$0xff] }
 0x285   :  { %2025 = vmatpush1.bf16.msra.mxu0 %v496_v22  ;;  %1913 = vmatprep.subr.bf16.mxu1 %v895_v23  ;;  %v705_v22 = vld [vmem:[#allocation2 + $0x9c8] sm:$0xff]  ;;  %v1086_v23 = vld [vmem:[#allocation2 + $0x15b0] sm:$0xff] }
 0x286   :  { %2026 = vmatprep.subr.bf16.mxu0 %v513_v24  ;;  %v704_v24 = vld [vmem:[#allocation2 + $0x9c0] sm:$0xff] }
 0x288   :  { %1914 = vmatpush1.bf16.msra.mxu1 %v894_v25  ;;  %v1103_v25 = vld [vmem:[#allocation2 + $0x1638] sm:$0xff] }
 0x289   :  { %2027 = vmatpush1.bf16.msra.mxu0 %v512_v26  ;;  %1926 = vmatprep.subr.bf16.mxu1 %v911_v27  ;;  %v721_v26 = vld [vmem:[#allocation2 + $0xa48] sm:$0xff]  ;;  %v1102_v27 = vld [vmem:[#allocation2 + $0x1630] sm:$0xff] }
 0x28a   :  { %2028 = vmatprep.subr.bf16.mxu0 %v529_v29  ;;  %v720_v29 = vld [vmem:[#allocation2 + $0xa40] sm:$0xff] }
 0x28b   :  { %1916 = vmatmul.mubr.bf16.vlgmr.msra.gmra.mrb[8].mxu1 %v7874_v35 }
 0x28c   :  { %1927 = vmatpush1.bf16.msra.mxu1 %v910_v31  ;;  %1958 = vmatprep.mubr.bf16.mxu1 %v7877_v41  ;;  %v1119_v31 = vld [vmem:[#allocation2 + $0x16b8] sm:$0xff] }
 0x28d   :  { %2029 = vmatpush1.bf16.msra.mxu0 %v528_v32  ;;  %1928 = vmatprep.subr.bf16.mxu1 %v927_v33  ;;  %v737_v32 = vld [vmem:[#allocation2 + $0xac8] sm:$0xff]  ;;  %v1118_v33 = vld [vmem:[#allocation2 + $0x16b0] sm:$0xff] }
 0x28e   :  { %2030 = vmatprep.subr.bf16.mxu0 %v545_v34  ;;  %v736_v34 = vld [vmem:[#allocation2 + $0xac0] sm:$0xff] }
 0x290   :  { %1929 = vmatpush1.bf16.msra.mxu1 %v926_v36  ;;  %v1135_v36 = vld [vmem:[#allocation2 + $0x1738] sm:$0xff] }
 0x291   :  { %2031 = vmatpush1.bf16.msra.mxu0 %v544_v37  ;;  %1930 = vmatprep.subr.bf16.mxu1 %v943_v38  ;;  %v753_v37 = vld [vmem:[#allocation2 + $0xb48] sm:$0xff]  ;;  %v1134_v38 = vld [vmem:[#allocation2 + $0x1730] sm:$0xff] }
 0x292   :  { %2032 = vmatprep.subr.bf16.mxu0 %v561_v39  ;;  %v752_v39 = vld [vmem:[#allocation2 + $0xb40] sm:$0xff] }
 0x294   :  { %1931 = vmatpush1.bf16.msra.mxu1 %v942_v43  ;;  %v1151_v43 = vld [vmem:[#allocation2 + $0x17b8] sm:$0xff] }
 0x295   :  { %2033 = vmatpush1.bf16.msra.mxu0 %v560_v46  ;;  %1932 = vmatprep.subr.bf16.mxu1 %v959_v47  ;;  %v769_v46 = vld [vmem:[#allocation2 + $0xbc8] sm:$0xff]  ;;  %v1150_v47 = vld [vmem:[#allocation2 + $0x17b0] sm:$0xff] }
 0x296   :  { %2034 = vmatprep.subr.bf16.mxu0 %v577_v48  ;;  %v768_v48 = vld [vmem:[#allocation2 + $0xbc0] sm:$0xff] }
 0x298   :  { %1933 = vmatpush1.bf16.msra.mxu1 %v958_v56  ;;  %v1167_v56 = vld [vmem:[#allocation2 + $0x1838] sm:$0xff] }
 0x299   :  { %2035 = vmatpush1.bf16.msra.mxu0 %v576_v51  ;;  %1934 = vmatprep.subr.bf16.mxu1 %v975_v57  ;;  %v785_v51 = vld [vmem:[#allocation2 + $0xc48] sm:$0xff]  ;;  %v1166_v57 = vld [vmem:[#allocation2 + $0x1830] sm:$0xff] }
 0x29a   :  { %2036 = vmatprep.subr.bf16.mxu0 %v593_v55  ;;  %v784_v55 = vld [vmem:[#allocation2 + $0xc40] sm:$0xff] }
 0x29c   :  { %1935 = vmatpush1.bf16.msra.mxu1 %v974_v59  ;;  %v1183_v59 = vld [vmem:[#allocation2 + $0x18b8] sm:$0xff] }
 0x29d   :  { %2037 = vmatpush1.bf16.msra.mxu0 %v592_v60  ;;  %1936 = vmatprep.subr.bf16.mxu1 %v991_v58  ;;  %v801_v60 = vld [vmem:[#allocation2 + $0xcc8] sm:$0xff] }
 0x29e   :  { %2038 = vmatprep.subr.bf16.mxu0 %v609_v61  ;;  %v7882_v58 = vld [vmem:[#allocation8 + $0x10] ss:$28 sps:$4 sm:$0xff]  }
 0x29f   :  { %v1182_v61 = vld [vmem:[#allocation2 + $0x18b0] sm:$0xff] }
 0x2a0   :  { %1937 = vmatpush1.bf16.msra.mxu1 %v990_v62  ;;  %v800_v62 = vld [vmem:[#allocation2 + $0xcc0] sm:$0xff] }
 0x2a1   :  { %2039 = vmatpush1.bf16.msra.mxu0 %v608_v63  ;;  %1938 = vmatprep.subr.bf16.mxu1 %v1007_v1  ;;  %v1199_v63 = vld [vmem:[#allocation2 + $0x1938] sm:$0xff]  ;;  %v817_v1 = vld [vmem:[#allocation2 + $0xd48] sm:$0xff] }
 0x2a2   :  { %2040 = vmatprep.subr.bf16.mxu0 %v625_v2  ;;  %v1198_v2 = vld [vmem:[#allocation2 + $0x1930] sm:$0xff] }
 0x2a4   :  { %1939 = vmatpush1.bf16.msra.mxu1 %v1006_v3  ;;  %v816_v3 = vld [vmem:[#allocation2 + $0xd40] sm:$0xff] }
 0x2a5   :  { %2041 = vmatpush1.bf16.msra.mxu0 %v624_v28  ;;  %1940 = vmatprep.subr.bf16.mxu1 %v1023_v4  ;;  %v1215_v28 = vld [vmem:[#allocation2 + $0x19b8] sm:$0xff]  ;;  %v833_v4 = vld [vmem:[#allocation2 + $0xdc8] sm:$0xff] }
 0x2a6   :  { %2042 = vmatprep.subr.bf16.mxu0 %v641_v5  ;;  %v1214_v5 = vld [vmem:[#allocation2 + $0x19b0] sm:$0xff] }
 0x2a8   :  { %1941 = vmatpush1.bf16.msra.mxu1 %v1022_v6  ;;  %v832_v6 = vld [vmem:[#allocation2 + $0xdc0] sm:$0xff] }
 0x2a9   :  { %2043 = vmatpush1.bf16.msra.mxu0 %v640_v8  ;;  %1942 = vmatprep.subr.bf16.mxu1 %v1039_v50  ;;  %v1231_v8 = vld [vmem:[#allocation2 + $0x1a38] sm:$0xff]  ;;  %v849_v50 = vld [vmem:[#allocation2 + $0xe48] sm:$0xff] }
 0x2aa   :  { %2055 = vmatprep.subr.bf16.mxu0 %v657_v9  ;;  %v1230_v9 = vld [vmem:[#allocation2 + $0x1a30] sm:$0xff] }
 0x2ac   :  { %2045 = vmatmul.mubr.bf16.vlgmr.msra.gmra.mrb[8].mxu0 %v7849_v17  ;;  %1943 = vmatpush1.bf16.msra.mxu1 %v1038_v10  ;;  %v848_v10 = vld [vmem:[#allocation2 + $0xe40] sm:$0xff] }
 0x2ad   :  { %2056 = vmatpush1.bf16.msra.mxu0 %v656_v30  ;;  %1944 = vmatprep.subr.bf16.mxu1 %v1055_v13  ;;  %v1247_v30 = vld [vmem:[#allocation2 + $0x1ab8] sm:$0xff]  ;;  %v865_v13 = vld [vmem:[#allocation2 + $0xec8] sm:$0xff] }
 0x2ae   :  { %2057 = vmatprep.subr.bf16.mxu0 %v673_v7  ;;  %2087 = vmatprep.mubr.bf16.mxu0 %v7853_v21  ;;  %v1246_v7 = vld [vmem:[#allocation2 + $0x1ab0] sm:$0xff] }
 0x2b0   :  { %1945 = vmatpush1.bf16.msra.mxu1 %v1054_v14  ;;  %v864_v14 = vld [vmem:[#allocation2 + $0xec0] sm:$0xff] }
 0x2b1   :  { %2058 = vmatpush1.bf16.msra.mxu0 %v672_v16  ;;  %1946 = vmatprep.subr.bf16.mxu1 %v1071_v18  ;;  %v1263_v18 = vld [vmem:[#allocation2 + $0x1b38] sm:$0xff] }
 0x2b2   :  { %2059 = vmatprep.subr.bf16.mxu0 %v689_v19  ;;  %v881_v19 = vld [vmem:[#allocation2 + $0xf48] sm:$0xff] }
 0x2b4   :  { %1947 = vmatpush1.bf16.msra.mxu1 %v1070_v12 }
 0x2b5   :  { %2060 = vmatpush1.bf16.msra.mxu0 %v688_v20  ;;  %1948 = vmatprep.subr.bf16.mxu1 %v1087_v15 }
 0x2b6   :  { %2061 = vmatprep.subr.bf16.mxu0 %v705_v22 }
 0x2b8   :  { %1949 = vmatpush1.bf16.msra.mxu1 %v1086_v23 }
 0x2b9   :  { %2062 = vmatpush1.bf16.msra.mxu0 %v704_v24  ;;  %1950 = vmatprep.subr.bf16.mxu1 %v1103_v25  ;;  %v1262_v25 = vld [vmem:[#allocation2 + $0x1b30] sm:$0xff] }
 0x2ba   :  { %2063 = vmatprep.subr.bf16.mxu0 %v721_v26  ;;  %v880_v26 = vld [vmem:[#allocation2 + $0xf40] sm:$0xff] }
 0x2bc   :  { %1951 = vmatpush1.bf16.msra.mxu1 %v1102_v27 }
 0x2bd   :  { %2064 = vmatpush1.bf16.msra.mxu0 %v720_v29  ;;  %1952 = vmatprep.subr.bf16.mxu1 %v1119_v31  ;;  %v1279_v29 = vld [vmem:[#allocation2 + $0x1bb8] sm:$0xff]  ;;  %v897_v31 = vld [vmem:[#allocation2 + $0xfc8] sm:$0xff] }
 0x2be   :  { %2065 = vmatprep.subr.bf16.mxu0 %v737_v32  ;;  %v1278_v32 = vld [vmem:[#allocation2 + $0x1bb0] sm:$0xff] }
 0x2c0   :  { %1953 = vmatpush1.bf16.msra.mxu1 %v1118_v33  ;;  %v896_v33 = vld [vmem:[#allocation2 + $0xfc0] sm:$0xff] }
 0x2c1   :  { %2066 = vmatpush1.bf16.msra.mxu0 %v736_v34  ;;  %1954 = vmatprep.subr.bf16.mxu1 %v1135_v36  ;;  %v913_v34 = vld [vmem:[#allocation2 + $0x1048] sm:$0xff]  ;;  %v403_v36 = vld [vmem:[#allocation2 + $0x58] sm:$0xff] }
 0x2c2   :  { %2067 = vmatprep.subr.bf16.mxu0 %v753_v37  ;;  %v912_v37 = vld [vmem:[#allocation2 + $0x1040] sm:$0xff] }
 0x2c4   :  { %1955 = vmatpush1.bf16.msra.mxu1 %v1134_v38  ;;  %v402_v38 = vld [vmem:[#allocation2 + $0x50] sm:$0xff] }
 0x2c5   :  { %2068 = vmatpush1.bf16.msra.mxu0 %v752_v39  ;;  %1956 = vmatprep.subr.bf16.mxu1 %v1151_v43  ;;  %v929_v39 = vld [vmem:[#allocation2 + $0x10c8] sm:$0xff]  ;;  %v419_v43 = vld [vmem:[#allocation2 + $0xd8] sm:$0xff] }
 0x2c6   :  { %2069 = vmatprep.subr.bf16.mxu0 %v769_v46  ;;  %v7898_v46 = vld [vmem:[#allocation8 + $0x18] ss:$28 sps:$4 sm:$0xff]  }
 0x2c8   :  { %1957 = vmatpush1.bf16.msra.mxu1 %v1150_v47  ;;  %v928_v47 = vld [vmem:[#allocation2 + $0x10c0] sm:$0xff] }
 0x2c9   :  { %2070 = vmatpush1.bf16.msra.mxu0 %v768_v48  ;;  %1969 = vmatprep.subr.bf16.mxu1 %v1167_v56  ;;  %v418_v48 = vld [vmem:[#allocation2 + $0xd0] sm:$0xff]  ;;  %v945_v56 = vld [vmem:[#allocation2 + $0x1148] sm:$0xff] }
 0x2ca   :  { %2071 = vmatprep.subr.bf16.mxu0 %v785_v51  ;;  %v435_v51 = vld [vmem:[#allocation2 + $0x158] sm:$0xff] }
 0x2cb   :  { %1959 = vmatmul.mubr.bf16.vlgmr.msra.gmra.mrb[8].mxu1 %v7882_v58 }
 0x2cc   :  { %1970 = vmatpush1.bf16.msra.mxu1 %v1166_v57  ;;  %2001 = vmatprep.mubr.bf16.mxu1 %v7477_v0  ;;  %v944_v57 = vld [vmem:[#allocation2 + $0x1140] sm:$0xff] }
 0x2cd   :  { %2072 = vmatpush1.bf16.msra.mxu0 %v784_v55  ;;  %1971 = vmatprep.subr.bf16.mxu1 %v1183_v59  ;;  %v434_v55 = vld [vmem:[#allocation2 + $0x150] sm:$0xff]  ;;  %v961_v59 = vld [vmem:[#allocation2 + $0x11c8] sm:$0xff] }
 0x2ce   :  { %2073 = vmatprep.subr.bf16.mxu0 %v801_v60  ;;  %v451_v60 = vld [vmem:[#allocation2 + $0x1d8] sm:$0xff] }
 0x2d0   :  { %1972 = vmatpush1.bf16.msra.mxu1 %v1182_v61  ;;  %v960_v61 = vld [vmem:[#allocation2 + $0x11c0] sm:$0xff] }
 0x2d1   :  { %2074 = vmatpush1.bf16.msra.mxu0 %v800_v62  ;;  %1973 = vmatprep.subr.bf16.mxu1 %v1199_v63  ;;  %v450_v62 = vld [vmem:[#allocation2 + $0x1d0] sm:$0xff]  ;;  %v977_v63 = vld [vmem:[#allocation2 + $0x1248] sm:$0xff] }
 0x2d2   :  { %2075 = vmatprep.subr.bf16.mxu0 %v817_v1  ;;  %v467_v1 = vld [vmem:[#allocation2 + $0x258] sm:$0xff] }
 0x2d4   :  { %1974 = vmatpush1.bf16.msra.mxu1 %v1198_v2  ;;  %v466_v2 = vld [vmem:[#allocation2 + $0x250] sm:$0xff] }
 0x2d5   :  { %2076 = vmatpush1.bf16.msra.mxu0 %v816_v3  ;;  %1975 = vmatprep.subr.bf16.mxu1 %v1215_v28  ;;  %v993_v3 = vld [vmem:[#allocation2 + $0x12c8] sm:$0xff]  ;;  %v483_v28 = vld [vmem:[#allocation2 + $0x2d8] sm:$0xff] }
 0x2d6   :  { %2077 = vmatprep.subr.bf16.mxu0 %v833_v4  ;;  %v992_v4 = vld [vmem:[#allocation2 + $0x12c0] sm:$0xff] }
 0x2d8   :  { %1976 = vmatpush1.bf16.msra.mxu1 %v1214_v5  ;;  %v482_v5 = vld [vmem:[#allocation2 + $0x2d0] sm:$0xff] }
 0x2d9   :  { %2078 = vmatpush1.bf16.msra.mxu0 %v832_v6  ;;  %1977 = vmatprep.subr.bf16.mxu1 %v1231_v8  ;;  %v1009_v6 = vld [vmem:[#allocation2 + $0x1348] sm:$0xff]  ;;  %v499_v8 = vld [vmem:[#allocation2 + $0x358] sm:$0xff] }
 0x2da   :  { %2079 = vmatprep.subr.bf16.mxu0 %v849_v50  ;;  %v1008_v50 = vld [vmem:[#allocation2 + $0x1340] sm:$0xff] }
 0x2dc   :  { %1978 = vmatpush1.bf16.msra.mxu1 %v1230_v9  ;;  %v498_v9 = vld [vmem:[#allocation2 + $0x350] sm:$0xff] }
 0x2dd   :  { %2080 = vmatpush1.bf16.msra.mxu0 %v848_v10  ;;  %1979 = vmatprep.subr.bf16.mxu1 %v1247_v30  ;;  %v1025_v10 = vld [vmem:[#allocation2 + $0x13c8] sm:$0xff]  ;;  %v515_v30 = vld [vmem:[#allocation2 + $0x3d8] sm:$0xff] }
 0x2de   :  { %2081 = vmatprep.subr.bf16.mxu0 %v865_v13  ;;  %v7886_v16 = vpop.f32.mrb[4].mxu1  ;;  %v1024_v13 = vld [vmem:[#allocation2 + $0x13c0] sm:$0xff] }
 0x2df   :  { %v2702_v12 = vmax.f32 %v7886_v16, 0.0  ;;  %v7889_v20 = vpop.f32.mrb[5].mxu1 }
 0x2e0   :  { %v2703_v15 = vmax.f32 %v7889_v20, 0.0  ;;  %v7892_v22 = vpop.f32.mrb[6].mxu1  ;;  %1980 = vmatpush1.bf16.msra.mxu1 %v1246_v7  ;;  %v514_v7 = vld [vmem:[#allocation2 + $0x3d0] sm:$0xff] }
 0x2e1   :  { %2082 = vmatpush1.bf16.msra.mxu0 %v864_v14  ;;  %v2718_v23 = vmax.f32 %v7892_v22, 0.0  ;;  %v7895_v24 = vpop.f32.mrb[7].mxu1  ;;  %1981 = vmatprep.subr.bf16.mxu1 %v1263_v18  ;;  %v1041_v14 = vld [vmem:[#allocation2 + $0x1448] sm:$0xff]  ;;  %v531_v18 = vld [vmem:[#allocation2 + $0x458] sm:$0xff] }
 0x2e2   :  { %2083 = vmatprep.subr.bf16.mxu0 %v881_v19  ;;  %v2719_v27 = vmax.f32 %v7895_v24, 0.0  ;;  %v1040_v19 = vld [vmem:[#allocation2 + $0x1440] sm:$0xff] }
 0x2e4   :  { %1982 = vmatpush1.bf16.msra.mxu1 %v1262_v25  ;;  %v530_v25 = vld [vmem:[#allocation2 + $0x450] sm:$0xff] }
 0x2e5   :  { %2084 = vmatpush1.bf16.msra.mxu0 %v880_v26  ;;  %1983 = vmatprep.subr.bf16.mxu1 %v1279_v29  ;;  %v1057_v26 = vld [vmem:[#allocation2 + $0x14c8] sm:$0xff]  ;;  %v547_v29 = vld [vmem:[#allocation2 + $0x4d8] sm:$0xff] }
 0x2e6   :  { %2085 = vmatprep.subr.bf16.mxu0 %v897_v31  ;;  %v1056_v31 = vld [vmem:[#allocation2 + $0x14c0] sm:$0xff] }
 0x2e8   :  { %1984 = vmatpush1.bf16.msra.mxu1 %v1278_v32  ;;  %v546_v32 = vld [vmem:[#allocation2 + $0x4d0] sm:$0xff] }
 0x2e9   :  { %2086 = vmatpush1.bf16.msra.mxu0 %v896_v33  ;;  %2184 = vmatprep.subr.bf16.mxu1 %v403_v36  ;;  %v1073_v33 = vld [vmem:[#allocation2 + $0x1548] sm:$0xff]  ;;  %v1072_v36 = vld [vmem:[#allocation2 + $0x1540] sm:$0xff] }
 0x2ea   :  { %2098 = vmatprep.subr.bf16.mxu0 %v913_v34  ;;  %v563_v34 = vld [vmem:[#allocation2 + $0x558] sm:$0xff] }
 0x2eb   :  { %2002 = vmatmul.mubr.bf16.vlgmr.msra.gmra.mrb[8].mxu1 %v7898_v46 }
 0x2ec   :  { %2088 = vmatmul.mubr.bf16.vlgmr.msra.gmra.mrb[8].mxu0 %v7874_v35  ;;  %2185 = vmatpush1.bf16.msra.mxu1 %v402_v38  ;;  %v1089_v38 = vld [vmem:[#allocation2 + $0x15c8] sm:$0xff] }
 0x2ed   :  { %2099 = vmatpush1.bf16.msra.mxu0 %v912_v37  ;;  %2186 = vmatprep.subr.bf16.mxu1 %v419_v43  ;;  %v562_v37 = vld [vmem:[#allocation2 + $0x550] sm:$0xff]  ;;  %v1088_v43 = vld [vmem:[#allocation2 + $0x15c0] sm:$0xff] }
 0x2ee   :  { %2100 = vmatprep.subr.bf16.mxu0 %v929_v39  ;;  %2130 = vmatprep.mubr.bf16.mxu0 %v7877_v41  ;;  %v579_v39 = vld [vmem:[#allocation2 + $0x5d8] sm:$0xff] }
 0x2ef   :  { %2216 = vmatprep.mubr.bf16.mxu1 %v7845_v11  ;;  %v976_v11 = vld [vmem:[#allocation2 + $0x1240] sm:$0xff] }
 0x2f0   :  { %2187 = vmatpush1.bf16.msra.mxu1 %v418_v48  ;;  %v1105_v48 = vld [vmem:[#allocation2 + $0x1648] sm:$0xff] }
 0x2f1   :  { %2101 = vmatpush1.bf16.msra.mxu0 %v928_v47  ;;  %2188 = vmatprep.subr.bf16.mxu1 %v435_v51  ;;  %v578_v47 = vld [vmem:[#allocation2 + $0x5d0] sm:$0xff]  ;;  %v1104_v51 = vld [vmem:[#allocation2 + $0x1640] sm:$0xff] }
 0x2f2   :  { %2102 = vmatprep.subr.bf16.mxu0 %v945_v56  ;;  %v595_v56 = vld [vmem:[#allocation2 + $0x658] sm:$0xff] }
 0x2f4   :  { %2189 = vmatpush1.bf16.msra.mxu1 %v434_v55  ;;  %v1121_v55 = vld [vmem:[#allocation2 + $0x16c8] sm:$0xff] }
 0x2f5   :  { %2103 = vmatpush1.bf16.msra.mxu0 %v944_v57  ;;  %2190 = vmatprep.subr.bf16.mxu1 %v451_v60  ;;  %v594_v57 = vld [vmem:[#allocation2 + $0x650] sm:$0xff]  ;;  %v1120_v60 = vld [vmem:[#allocation2 + $0x16c0] sm:$0xff] }
 0x2f6   :  { %2104 = vmatprep.subr.bf16.mxu0 %v961_v59  ;;  %v611_v59 = vld [vmem:[#allocation2 + $0x6d8] sm:$0xff] }
 0x2f8   :  { %2191 = vmatpush1.bf16.msra.mxu1 %v450_v62  ;;  %v1137_v62 = vld [vmem:[#allocation2 + $0x1748] sm:$0xff] }
 0x2f9   :  { %2105 = vmatpush1.bf16.msra.mxu0 %v960_v61  ;;  %2192 = vmatprep.subr.bf16.mxu1 %v467_v1  ;;  %v610_v61 = vld [vmem:[#allocation2 + $0x6d0] sm:$0xff]  ;;  %v1136_v1 = vld [vmem:[#allocation2 + $0x1740] sm:$0xff] }
 0x2fa   :  { %2106 = vmatprep.subr.bf16.mxu0 %v977_v63  ;;  %v627_v63 = vld [vmem:[#allocation2 + $0x758] sm:$0xff] }
 0x2fc   :  { %2193 = vmatpush1.bf16.msra.mxu1 %v466_v2  ;;  %v1153_v2 = vld [vmem:[#allocation2 + $0x17c8] sm:$0xff] }
 0x2fd   :  { %2107 = vmatpush1.bf16.msra.mxu0 %v976_v11  ;;  %2194 = vmatprep.subr.bf16.mxu1 %v483_v28  ;;  %v626_v11 = vld [vmem:[#allocation2 + $0x750] sm:$0xff]  ;;  %v1152_v28 = vld [vmem:[#allocation2 + $0x17c0] sm:$0xff] }
 0x2fe   :  { %2108 = vmatprep.subr.bf16.mxu0 %v993_v3  ;;  %v643_v3 = vld [vmem:[#allocation2 + $0x7d8] sm:$0xff] }
 0x300   :  { %2195 = vmatpush1.bf16.msra.mxu1 %v482_v5  ;;  %v1169_v5 = vld [vmem:[#allocation2 + $0x1848] sm:$0xff] }
 0x301   :  { %2109 = vmatpush1.bf16.msra.mxu0 %v992_v4  ;;  %2196 = vmatprep.subr.bf16.mxu1 %v499_v8  ;;  %v642_v4 = vld [vmem:[#allocation2 + $0x7d0] sm:$0xff]  ;;  %v1168_v8 = vld [vmem:[#allocation2 + $0x1840] sm:$0xff] }
 0x302   :  { %2110 = vmatprep.subr.bf16.mxu0 %v1009_v6  ;;  %v659_v6 = vld [vmem:[#allocation2 + $0x858] sm:$0xff] }
 0x304   :  { %2197 = vmatpush1.bf16.msra.mxu1 %v498_v9  ;;  %v1185_v9 = vld [vmem:[#allocation2 + $0x18c8] sm:$0xff] }
 0x305   :  { %2111 = vmatpush1.bf16.msra.mxu0 %v1008_v50  ;;  %2198 = vmatprep.subr.bf16.mxu1 %v515_v30  ;;  %v658_v50 = vld [vmem:[#allocation2 + $0x850] sm:$0xff]  ;;  %v1184_v30 = vld [vmem:[#allocation2 + $0x18c0] sm:$0xff] }
 0x306   :  { %2112 = vmatprep.subr.bf16.mxu0 %v1025_v10  ;;  %v675_v10 = vld [vmem:[#allocation2 + $0x8d8] sm:$0xff] }
 0x308   :  { %2199 = vmatpush1.bf16.msra.mxu1 %v514_v7  ;;  %v1201_v7 = vld [vmem:[#allocation2 + $0x1948] sm:$0xff] }
 0x309   :  { %2113 = vmatpush1.bf16.msra.mxu0 %v1024_v13  ;;  %2200 = vmatprep.subr.bf16.mxu1 %v531_v18  ;;  %v674_v13 = vld [vmem:[#allocation2 + $0x8d0] sm:$0xff]  ;;  %v1200_v18 = vld [vmem:[#allocation2 + $0x1940] sm:$0xff] }
 0x30a   :  { %2114 = vmatprep.subr.bf16.mxu0 %v1041_v14  ;;  %v691_v14 = vld [vmem:[#allocation2 + $0x958] sm:$0xff] }
 0x30c   :  { %2201 = vmatpush1.bf16.msra.mxu1 %v530_v25  ;;  %v1217_v25 = vld [vmem:[#allocation2 + $0x19c8] sm:$0xff] }
 0x30d   :  { %2115 = vmatpush1.bf16.msra.mxu0 %v1040_v19  ;;  %2202 = vmatprep.subr.bf16.mxu1 %v547_v29  ;;  %v690_v19 = vld [vmem:[#allocation2 + $0x950] sm:$0xff] }
 0x30e   :  { %2116 = vmatprep.subr.bf16.mxu0 %v1057_v26  ;;  %v1216_v26 = vld [vmem:[#allocation2 + $0x19c0] sm:$0xff]  ;;  %v706_v29 = vld [vmem:[#allocation2 + $0x9d0] sm:$0xff] }
 0x310   :  { %2203 = vmatpush1.bf16.msra.mxu1 %v546_v32  ;;  %v723_v32 = vld [vmem:[#allocation2 + $0xa58] sm:$0xff] }
 0x311   :  { %2117 = vmatpush1.bf16.msra.mxu0 %v1056_v31  ;;  %2204 = vmatprep.subr.bf16.mxu1 %v563_v34  ;;  %v1233_v31 = vld [vmem:[#allocation2 + $0x1a48] sm:$0xff] }
 0x312   :  { %2118 = vmatprep.subr.bf16.mxu0 %v1073_v33  ;;  %v722_v33 = vld [vmem:[#allocation2 + $0xa50] sm:$0xff]  ;;  %v1249_v34 = vld [vmem:[#allocation2 + $0x1ac8] sm:$0xff] }
 0x314   :  { %2205 = vmatpush1.bf16.msra.mxu1 %v562_v37  ;;  %v1248_v37 = vld [vmem:[#allocation2 + $0x1ac0] sm:$0xff] }
 0x315   :  { %2119 = vmatpush1.bf16.msra.mxu0 %v1072_v36  ;;  %2206 = vmatprep.subr.bf16.mxu1 %v579_v39  ;;  %v739_v36 = vld [vmem:[#allocation2 + $0xad8] sm:$0xff] }
 0x316   :  { %2120 = vmatprep.subr.bf16.mxu0 %v1089_v38  ;;  %v738_v38 = vld [vmem:[#allocation2 + $0xad0] sm:$0xff] }
 0x318   :  { %2207 = vmatpush1.bf16.msra.mxu1 %v578_v47  ;;  %v755_v47 = vld [vmem:[#allocation2 + $0xb58] sm:$0xff] }
 0x319   :  { %2121 = vmatpush1.bf16.msra.mxu0 %v1088_v43  ;;  %2208 = vmatprep.subr.bf16.mxu1 %v595_v56  ;;  %v1265_v43 = vld [vmem:[#allocation2 + $0x1b48] sm:$0xff] }
 0x31a   :  { %2122 = vmatprep.subr.bf16.mxu0 %v1105_v48 }
 0x31c   :  { %2209 = vmatpush1.bf16.msra.mxu1 %v594_v57 }
 0x31d   :  { %2123 = vmatpush1.bf16.msra.mxu0 %v1104_v51  ;;  %2210 = vmatprep.subr.bf16.mxu1 %v611_v59 }
 0x31e   :  { %2124 = vmatprep.subr.bf16.mxu0 %v1121_v55 }
 0x320   :  { %2211 = vmatpush1.bf16.msra.mxu1 %v610_v61  ;;  %v754_v61 = vld [vmem:[#allocation2 + $0xb50] sm:$0xff] }
 0x321   :  { %2125 = vmatpush1.bf16.msra.mxu0 %v1120_v60  ;;  %2212 = vmatprep.subr.bf16.mxu1 %v627_v63  ;;  %v1264_v60 = vld [vmem:[#allocation2 + $0x1b40] sm:$0xff]  ;;  %v1281_v63 = vld [vmem:[#allocation2 + $0x1bc8] sm:$0xff] }
 0x322   :  { %2126 = vmatprep.subr.bf16.mxu0 %v1137_v62 }
 0x324   :  { %2213 = vmatpush1.bf16.msra.mxu1 %v626_v11  ;;  %v1280_v11 = vld [vmem:[#allocation2 + $0x1bc0] sm:$0xff] }
 0x325   :  { %2127 = vmatpush1.bf16.msra.mxu0 %v1136_v1  ;;  %2214 = vmatprep.subr.bf16.mxu1 %v643_v3  ;;  %v771_v1 = vld [vmem:[#allocation2 + $0xbd8] sm:$0xff] }
 0x326   :  { %2128 = vmatprep.subr.bf16.mxu0 %v1153_v2  ;;  %v770_v2 = vld [vmem:[#allocation2 + $0xbd0] sm:$0xff]  ;;  %v787_v3 = vld [vmem:[#allocation2 + $0xc58] sm:$0xff] }
 0x328   :  { %2215 = vmatpush1.bf16.msra.mxu1 %v642_v4  ;;  %v786_v4 = vld [vmem:[#allocation2 + $0xc50] sm:$0xff] }
 0x329   :  { %2129 = vmatpush1.bf16.msra.mxu0 %v1152_v28  ;;  %2227 = vmatprep.subr.bf16.mxu1 %v659_v6  ;;  %v405_v28 = vld [vmem:[#allocation2 + $0x68] sm:$0xff]  ;;  %v803_v6 = vld [vmem:[#allocation2 + $0xcd8] sm:$0xff] }
 0x32a   :  { %2141 = vmatprep.subr.bf16.mxu0 %v1169_v5  ;;  %v404_v5 = vld [vmem:[#allocation2 + $0x60] sm:$0xff] }
 0x32b   :  { %2217 = vmatmul.mubr.bf16.vlgmr.msra.gmra.mrb[12].mxu1 %v7849_v17  ;;  %v707_v17 = vld [vmem:[#allocation2 + $0x9d8] sm:$0xff] }
 0x32c   :  { %2131 = vmatmul.mubr.bf16.vlgmr.msra.gmra.mrb[8].mxu0 %v7882_v58  ;;  %2228 = vmatpush1.bf16.msra.mxu1 %v658_v50  ;;  %v802_v50 = vld [vmem:[#allocation2 + $0xcd0] sm:$0xff] }
 0x32d   :  { %2142 = vmatpush1.bf16.msra.mxu0 %v1168_v8  ;;  %2229 = vmatprep.subr.bf16.mxu1 %v675_v10  ;;  %v421_v8 = vld [vmem:[#allocation2 + $0xe8] sm:$0xff]  ;;  %v819_v10 = vld [vmem:[#allocation2 + $0xd58] sm:$0xff] }
 0x32e   :  { %2143 = vmatprep.subr.bf16.mxu0 %v1185_v9  ;;  %2173 = vmatprep.mubr.bf16.mxu0 %v7477_v0  ;;  %v420_v9 = vld [vmem:[#allocation2 + $0xe0] sm:$0xff] }
 0x32f   :  { %2259 = vmatprep.mubr.bf16.mxu1 %v7853_v21  ;;  %v1232_v21 = vld [vmem:[#allocation2 + $0x1a40] sm:$0xff] }
 0x330   :  { %2230 = vmatpush1.bf16.msra.mxu1 %v674_v13  ;;  %v7921_v13 = vld [vmem:[#allocation8 + $0x4] ss:$28 sps:$4 sm:$0xff]  }
 0x331   :  { %2144 = vmatpush1.bf16.msra.mxu0 %v1184_v30  ;;  %2231 = vmatprep.subr.bf16.mxu1 %v691_v14  ;;  %v437_v30 = vld [vmem:[#allocation2 + $0x168] sm:$0xff]  ;;  %v436_v14 = vld [vmem:[#allocation2 + $0x160] sm:$0xff] }
 0x332   :  { %2145 = vmatprep.subr.bf16.mxu0 %v1201_v7  ;;  %v818_v7 = vld [vmem:[#allocation2 + $0xd50] sm:$0xff] }
 0x334   :  { %2232 = vmatpush1.bf16.msra.mxu1 %v690_v19  ;;  %v453_v19 = vld [vmem:[#allocation2 + $0x1e8] sm:$0xff] }
 0x335   :  { %2146 = vmatpush1.bf16.msra.mxu0 %v1200_v18  ;;  %2233 = vmatprep.subr.bf16.mxu1 %v707_v17  ;;  %v835_v18 = vld [vmem:[#allocation2 + $0xdd8] sm:$0xff]  ;;  %v452_v17 = vld [vmem:[#allocation2 + $0x1e0] sm:$0xff] }
 0x336   :  { %2147 = vmatprep.subr.bf16.mxu0 %v1217_v25  ;;  %v834_v25 = vld [vmem:[#allocation2 + $0xdd0] sm:$0xff] }
 0x338   :  { %2234 = vmatpush1.bf16.msra.mxu1 %v706_v29  ;;  %v469_v29 = vld [vmem:[#allocation2 + $0x268] sm:$0xff] }
 0x339   :  { %2148 = vmatpush1.bf16.msra.mxu0 %v1216_v26  ;;  %2235 = vmatprep.subr.bf16.mxu1 %v723_v32  ;;  %v851_v26 = vld [vmem:[#allocation2 + $0xe58] sm:$0xff]  ;;  %v468_v32 = vld [vmem:[#allocation2 + $0x260] sm:$0xff] }
 0x33a   :  { %2149 = vmatprep.subr.bf16.mxu0 %v1233_v31  ;;  %v850_v31 = vld [vmem:[#allocation2 + $0xe50] sm:$0xff] }
 0x33c   :  { %2236 = vmatpush1.bf16.msra.mxu1 %v722_v33  ;;  %v485_v33 = vld [vmem:[#allocation2 + $0x2e8] sm:$0xff] }
 0x33d   :  { %2150 = vmatpush1.bf16.msra.mxu0 %v1232_v21  ;;  %2237 = vmatprep.subr.bf16.mxu1 %v739_v36  ;;  %v867_v21 = vld [vmem:[#allocation2 + $0xed8] sm:$0xff]  ;;  %v484_v36 = vld [vmem:[#allocation2 + $0x2e0] sm:$0xff] }
 0x33e   :  { %2151 = vmatprep.subr.bf16.mxu0 %v1249_v34  ;;  %v866_v34 = vld [vmem:[#allocation2 + $0xed0] sm:$0xff] }
 0x33f   :  { %v7908_v39 = vpop.f32.mrb[4].mxu0 }
 0x340   :  { %v2704_v48 = vmax.f32 %v7908_v39, 0.0  ;;  %v7911_v56 = vpop.f32.mrb[5].mxu0  ;;  %2238 = vmatpush1.bf16.msra.mxu1 %v738_v38  ;;  %v501_v38 = vld [vmem:[#allocation2 + $0x368] sm:$0xff] }
 0x341   :  { %v2705_v51 = vmax.f32 %v7911_v56, 0.0  ;;  %v7914_v57 = vpop.f32.mrb[6].mxu0  ;;  %2152 = vmatpush1.bf16.msra.mxu0 %v1248_v37  ;;  %2239 = vmatprep.subr.bf16.mxu1 %v755_v47  ;;  %v883_v37 = vld [vmem:[#allocation2 + $0xf58] sm:$0xff]  ;;  %v500_v47 = vld [vmem:[#allocation2 + $0x360] sm:$0xff] }
 0x342   :  { %v2720_v55 = vmax.f32 %v7914_v57, 0.0  ;;  %v7917_v59 = vpop.f32.mrb[7].mxu0  ;;  %2153 = vmatprep.subr.bf16.mxu0 %v1265_v43  ;;  %v882_v43 = vld [vmem:[#allocation2 + $0xf50] sm:$0xff] }
 0x343   :  { %v2721_v62 = vmax.f32 %v7917_v59, 0.0 }
 0x344   :  { %2240 = vmatpush1.bf16.msra.mxu1 %v754_v61  ;;  %v517_v61 = vld [vmem:[#allocation2 + $0x3e8] sm:$0xff] }
 0x345   :  { %2154 = vmatpush1.bf16.msra.mxu0 %v1264_v60  ;;  %2241 = vmatprep.subr.bf16.mxu1 %v771_v1  ;;  %v899_v60 = vld [vmem:[#allocation2 + $0xfd8] sm:$0xff]  ;;  %v516_v1 = vld [vmem:[#allocation2 + $0x3e0] sm:$0xff] }
 0x346   :  { %2155 = vmatprep.subr.bf16.mxu0 %v1281_v63  ;;  %v898_v63 = vld [vmem:[#allocation2 + $0xfd0] sm:$0xff] }
 0x348   :  { %2242 = vmatpush1.bf16.msra.mxu1 %v770_v2  ;;  %v533_v2 = vld [vmem:[#allocation2 + $0x468] sm:$0xff] }
 0x349   :  { %2156 = vmatpush1.bf16.msra.mxu0 %v1280_v11  ;;  %2243 = vmatprep.subr.bf16.mxu1 %v787_v3  ;;  %v915_v11 = vld [vmem:[#allocation2 + $0x1058] sm:$0xff]  ;;  %v914_v3 = vld [vmem:[#allocation2 + $0x1050] sm:$0xff] }
 0x34a   :  { %2356 = vmatprep.subr.bf16.mxu0 %v405_v28  ;;  %v532_v28 = vld [vmem:[#allocation2 + $0x460] sm:$0xff] }
 0x34c   :  { %2174 = vmatmul.mubr.bf16.vlgmr.msra.gmra.mrb[8].mxu0 %v7898_v46  ;;  %2244 = vmatpush1.bf16.msra.mxu1 %v786_v4  ;;  %v931_v4 = vld [vmem:[#allocation2 + $0x10d8] sm:$0xff] }
 0x34d   :  { %2357 = vmatpush1.bf16.msra.mxu0 %v404_v5  ;;  %2245 = vmatprep.subr.bf16.mxu1 %v803_v6  ;;  %v549_v5 = vld [vmem:[#allocation2 + $0x4e8] sm:$0xff]  ;;  %v930_v6 = vld [vmem:[#allocation2 + $0x10d0] sm:$0xff] }
 0x34e   :  { %2358 = vmatprep.subr.bf16.mxu0 %v421_v8  ;;  %2388 = vmatprep.mubr.bf16.mxu0 %v7921_v13  ;;  %v548_v8 = vld [vmem:[#allocation2 + $0x4e0] sm:$0xff] }
 0x350   :  { %2246 = vmatpush1.bf16.msra.mxu1 %v802_v50  ;;  %v947_v50 = vld [vmem:[#allocation2 + $0x1158] sm:$0xff] }
 0x351   :  { %2359 = vmatpush1.bf16.msra.mxu0 %v420_v9  ;;  %2247 = vmatprep.subr.bf16.mxu1 %v819_v10  ;;  %v565_v9 = vld [vmem:[#allocation2 + $0x568] sm:$0xff]  ;;  %v946_v10 = vld [vmem:[#allocation2 + $0x1150] sm:$0xff] }
 0x352   :  { %2360 = vmatprep.subr.bf16.mxu0 %v437_v30  ;;  %v564_v30 = vld [vmem:[#allocation2 + $0x560] sm:$0xff] }
 0x354   :  { %2248 = vmatpush1.bf16.msra.mxu1 %v818_v7  ;;  %v963_v7 = vld [vmem:[#allocation2 + $0x11d8] sm:$0xff] }
 0x355   :  { %2361 = vmatpush1.bf16.msra.mxu0 %v436_v14  ;;  %2249 = vmatprep.subr.bf16.mxu1 %v835_v18  ;;  %v581_v14 = vld [vmem:[#allocation2 + $0x5e8] sm:$0xff]  ;;  %v580_v18 = vld [vmem:[#allocation2 + $0x5e0] sm:$0xff] }
 0x356   :  { %2362 = vmatprep.subr.bf16.mxu0 %v453_v19  ;;  %v979_v19 = vld [vmem:[#allocation2 + $0x1258] sm:$0xff] }
 0x358   :  { %2250 = vmatpush1.bf16.msra.mxu1 %v834_v25  ;;  %v597_v25 = vld [vmem:[#allocation2 + $0x668] sm:$0xff] }
 0x359   :  { %2363 = vmatpush1.bf16.msra.mxu0 %v452_v17  ;;  %2251 = vmatprep.subr.bf16.mxu1 %v851_v26  ;;  %v596_v17 = vld [vmem:[#allocation2 + $0x660] sm:$0xff]  ;;  %v995_v26 = vld [vmem:[#allocation2 + $0x12d8] sm:$0xff] }
 0x35a   :  { %2364 = vmatprep.subr.bf16.mxu0 %v469_v29  ;;  %v613_v29 = vld [vmem:[#allocation2 + $0x6e8] sm:$0xff] }
 0x35c   :  { %2252 = vmatpush1.bf16.msra.mxu1 %v850_v31  ;;  %v994_v31 = vld [vmem:[#allocation2 + $0x12d0] sm:$0xff] }
 0x35d   :  { %2365 = vmatpush1.bf16.msra.mxu0 %v468_v32  ;;  %2253 = vmatprep.subr.bf16.mxu1 %v867_v21  ;;  %v612_v32 = vld [vmem:[#allocation2 + $0x6e0] sm:$0xff]  ;;  %v1011_v21 = vld [vmem:[#allocation2 + $0x1358] sm:$0xff] }
 0x35e   :  { %2366 = vmatprep.subr.bf16.mxu0 %v485_v33  ;;  %v629_v33 = vld [vmem:[#allocation2 + $0x768] sm:$0xff] }
 0x360   :  { %2254 = vmatpush1.bf16.msra.mxu1 %v866_v34  ;;  %v1010_v34 = vld [vmem:[#allocation2 + $0x1350] sm:$0xff] }
 0x361   :  { %2367 = vmatpush1.bf16.msra.mxu0 %v484_v36  ;;  %2255 = vmatprep.subr.bf16.mxu1 %v883_v37  ;;  %v628_v36 = vld [vmem:[#allocation2 + $0x760] sm:$0xff]  ;;  %v1027_v37 = vld [vmem:[#allocation2 + $0x13d8] sm:$0xff] }
 0x362   :  { %2368 = vmatprep.subr.bf16.mxu0 %v501_v38  ;;  %v645_v38 = vld [vmem:[#allocation2 + $0x7e8] sm:$0xff] }
 0x364   :  { %2256 = vmatpush1.bf16.msra.mxu1 %v882_v43  ;;  %v1026_v43 = vld [vmem:[#allocation2 + $0x13d0] sm:$0xff] }
 0x365   :  { %2369 = vmatpush1.bf16.msra.mxu0 %v500_v47  ;;  %2257 = vmatprep.subr.bf16.mxu1 %v899_v60  ;;  %v644_v47 = vld [vmem:[#allocation2 + $0x7e0] sm:$0xff]  ;;  %v1043_v60 = vld [vmem:[#allocation2 + $0x1458] sm:$0xff] }
 0x366   :  { %2370 = vmatprep.subr.bf16.mxu0 %v517_v61  ;;  %v661_v61 = vld [vmem:[#allocation2 + $0x868] sm:$0xff] }
 0x368   :  { %2258 = vmatpush1.bf16.msra.mxu1 %v898_v63  ;;  %v1042_v63 = vld [vmem:[#allocation2 + $0x1450] sm:$0xff] }
 0x369   :  { %2371 = vmatpush1.bf16.msra.mxu0 %v516_v1  ;;  %2270 = vmatprep.subr.bf16.mxu1 %v915_v11  ;;  %v660_v1 = vld [vmem:[#allocation2 + $0x860] sm:$0xff]  ;;  %v1059_v11 = vld [vmem:[#allocation2 + $0x14d8] sm:$0xff] }
 0x36a   :  { %2372 = vmatprep.subr.bf16.mxu0 %v533_v2  ;;  %v677_v2 = vld [vmem:[#allocation2 + $0x8e8] sm:$0xff] }
 0x36b   :  { %2260 = vmatmul.mubr.bf16.vlgmr.msra.gmra.mrb[12].mxu1 %v7874_v35  ;;  %v962_v35 = vld [vmem:[#allocation2 + $0x11d0] sm:$0xff] }
 0x36c   :  { %2271 = vmatpush1.bf16.msra.mxu1 %v914_v3  ;;  %2302 = vmatprep.mubr.bf16.mxu1 %v7877_v41  ;;  %v978_v41 = vld [vmem:[#allocation2 + $0x1250] sm:$0xff]  ;;  %v7926_v3 = vld [vmem:[#allocation8] ss:$28 sps:$4 sm:$0xff]  }
 0x36d   :  { %2373 = vmatpush1.bf16.msra.mxu0 %v532_v28  ;;  %2272 = vmatprep.subr.bf16.mxu1 %v931_v4  ;;  %v1058_v28 = vld [vmem:[#allocation2 + $0x14d0] sm:$0xff]  ;;  %v676_v4 = vld [vmem:[#allocation2 + $0x8e0] sm:$0xff] }
 0x36e   :  { %2374 = vmatprep.subr.bf16.mxu0 %v549_v5  ;;  %v1075_v5 = vld [vmem:[#allocation2 + $0x1558] sm:$0xff] }
 0x370   :  { %2273 = vmatpush1.bf16.msra.mxu1 %v930_v6  ;;  %v693_v6 = vld [vmem:[#allocation2 + $0x968] sm:$0xff] }
 0x371   :  { %2375 = vmatpush1.bf16.msra.mxu0 %v548_v8  ;;  %2274 = vmatprep.subr.bf16.mxu1 %v947_v50  ;;  %v7929_v8 = vld [vmem:[#allocation8 + $0xc] ss:$28 sps:$4 sm:$0xff]   ;;  %v1074_v50 = vld [vmem:[#allocation2 + $0x1550] sm:$0xff] }
 0x372   :  { %2376 = vmatprep.subr.bf16.mxu0 %v565_v9  ;;  %v692_v9 = vld [vmem:[#allocation2 + $0x960] sm:$0xff] }
 0x374   :  { %2275 = vmatpush1.bf16.msra.mxu1 %v946_v10  ;;  %v1091_v10 = vld [vmem:[#allocation2 + $0x15d8] sm:$0xff] }
 0x375   :  { %2377 = vmatpush1.bf16.msra.mxu0 %v564_v30  ;;  %2276 = vmatprep.subr.bf16.mxu1 %v963_v7  ;;  %v709_v30 = vld [vmem:[#allocation2 + $0x9e8] sm:$0xff]  ;;  %v1090_v7 = vld [vmem:[#allocation2 + $0x15d0] sm:$0xff] }
 0x376   :  { %2378 = vmatprep.subr.bf16.mxu0 %v581_v14  ;;  %v708_v14 = vld [vmem:[#allocation2 + $0x9e0] sm:$0xff] }
 0x378   :  { %2277 = vmatpush1.bf16.msra.mxu1 %v962_v35  ;;  %v1107_v35 = vld [vmem:[#allocation2 + $0x1658] sm:$0xff] }
 0x379   :  { %2379 = vmatpush1.bf16.msra.mxu0 %v580_v18  ;;  %2278 = vmatprep.subr.bf16.mxu1 %v979_v19  ;;  %v725_v18 = vld [vmem:[#allocation2 + $0xa68] sm:$0xff]  ;;  %v1106_v19 = vld [vmem:[#allocation2 + $0x1650] sm:$0xff] }
 0x37a   :  { %2380 = vmatprep.subr.bf16.mxu0 %v597_v25  ;;  %v724_v25 = vld [vmem:[#allocation2 + $0xa60] sm:$0xff] }
 0x37c   :  { %2279 = vmatpush1.bf16.msra.mxu1 %v978_v41  ;;  %v1123_v41 = vld [vmem:[#allocation2 + $0x16d8] sm:$0xff] }
 0x37d   :  { %2381 = vmatpush1.bf16.msra.mxu0 %v596_v17  ;;  %2280 = vmatprep.subr.bf16.mxu1 %v995_v26  ;;  %v741_v17 = vld [vmem:[#allocation2 + $0xae8] sm:$0xff]  ;;  %v1122_v26 = vld [vmem:[#allocation2 + $0x16d0] sm:$0xff] }
 0x37e   :  { %2382 = vmatprep.subr.bf16.mxu0 %v613_v29  ;;  %v740_v29 = vld [vmem:[#allocation2 + $0xae0] sm:$0xff] }
 0x380   :  { %2281 = vmatpush1.bf16.msra.mxu1 %v994_v31  ;;  %v1139_v31 = vld [vmem:[#allocation2 + $0x1758] sm:$0xff] }
 0x381   :  { %2383 = vmatpush1.bf16.msra.mxu0 %v612_v32  ;;  %2282 = vmatprep.subr.bf16.mxu1 %v1011_v21  ;;  %v757_v32 = vld [vmem:[#allocation2 + $0xb68] sm:$0xff]  ;;  %v1138_v21 = vld [vmem:[#allocation2 + $0x1750] sm:$0xff] }
 0x382   :  { %2384 = vmatprep.subr.bf16.mxu0 %v629_v33  ;;  %v756_v33 = vld [vmem:[#allocation2 + $0xb60] sm:$0xff] }
 0x384   :  { %2283 = vmatpush1.bf16.msra.mxu1 %v1010_v34  ;;  %v1155_v34 = vld [vmem:[#allocation2 + $0x17d8] sm:$0xff] }
 0x385   :  { %2385 = vmatpush1.bf16.msra.mxu0 %v628_v36  ;;  %2284 = vmatprep.subr.bf16.mxu1 %v1027_v37  ;;  %v773_v36 = vld [vmem:[#allocation2 + $0xbe8] sm:$0xff]  ;;  %v1154_v37 = vld [vmem:[#allocation2 + $0x17d0] sm:$0xff] }
 0x386   :  { %2386 = vmatprep.subr.bf16.mxu0 %v645_v38  ;;  %v772_v38 = vld [vmem:[#allocation2 + $0xbe0] sm:$0xff] }
 0x388   :  { %2285 = vmatpush1.bf16.msra.mxu1 %v1026_v43  ;;  %v1171_v43 = vld [vmem:[#allocation2 + $0x1858] sm:$0xff] }
 0x389   :  { %2387 = vmatpush1.bf16.msra.mxu0 %v644_v47  ;;  %2286 = vmatprep.subr.bf16.mxu1 %v1043_v60  ;;  %v789_v47 = vld [vmem:[#allocation2 + $0xc68] sm:$0xff]  ;;  %v1170_v60 = vld [vmem:[#allocation2 + $0x1850] sm:$0xff] }
 0x38a   :  { %2399 = vmatprep.subr.bf16.mxu0 %v661_v61  ;;  %v788_v61 = vld [vmem:[#allocation2 + $0xc60] sm:$0xff] }
 0x38c   :  { %2389 = vmatmul.mubr.bf16.vlgmr.msra.gmra.mrb[12].mxu0 %v7926_v3  ;;  %2287 = vmatpush1.bf16.msra.mxu1 %v1042_v63  ;;  %v1187_v63 = vld [vmem:[#allocation2 + $0x18d8] sm:$0xff] }
 0x38d   :  { %2400 = vmatpush1.bf16.msra.mxu0 %v660_v1  ;;  %2288 = vmatprep.subr.bf16.mxu1 %v1059_v11  ;;  %v805_v1 = vld [vmem:[#allocation2 + $0xce8] sm:$0xff]  ;;  %v1186_v11 = vld [vmem:[#allocation2 + $0x18d0] sm:$0xff] }
 0x38e   :  { %2401 = vmatprep.subr.bf16.mxu0 %v677_v2  ;;  %2431 = vmatprep.mubr.bf16.mxu0 %v7929_v8  ;;  %v804_v2 = vld [vmem:[#allocation2 + $0xce0] sm:$0xff] }
 0x390   :  { %2289 = vmatpush1.bf16.msra.mxu1 %v1058_v28  ;;  %v1203_v28 = vld [vmem:[#allocation2 + $0x1958] sm:$0xff] }
 0x391   :  { %2402 = vmatpush1.bf16.msra.mxu0 %v676_v4  ;;  %2290 = vmatprep.subr.bf16.mxu1 %v1075_v5  ;;  %v821_v4 = vld [vmem:[#allocation2 + $0xd68] sm:$0xff]  ;;  %v1202_v5 = vld [vmem:[#allocation2 + $0x1950] sm:$0xff] }
 0x392   :  { %2403 = vmatprep.subr.bf16.mxu0 %v693_v6  ;;  %v820_v6 = vld [vmem:[#allocation2 + $0xd60] sm:$0xff] }
 0x394   :  { %2291 = vmatpush1.bf16.msra.mxu1 %v1074_v50  ;;  %v1219_v50 = vld [vmem:[#allocation2 + $0x19d8] sm:$0xff] }
 0x395   :  { %2404 = vmatpush1.bf16.msra.mxu0 %v692_v9  ;;  %2292 = vmatprep.subr.bf16.mxu1 %v1091_v10  ;;  %v837_v9 = vld [vmem:[#allocation2 + $0xde8] sm:$0xff]  ;;  %v836_v10 = vld [vmem:[#allocation2 + $0xde0] sm:$0xff] }
 0x396   :  { %2405 = vmatprep.subr.bf16.mxu0 %v709_v30  ;;  %v1235_v30 = vld [vmem:[#allocation2 + $0x1a58] sm:$0xff] }
 0x398   :  { %2293 = vmatpush1.bf16.msra.mxu1 %v1090_v7  ;;  %v853_v7 = vld [vmem:[#allocation2 + $0xe68] sm:$0xff] }
 0x399   :  { %2406 = vmatpush1.bf16.msra.mxu0 %v708_v14  ;;  %2294 = vmatprep.subr.bf16.mxu1 %v1107_v35  ;;  %v1234_v14 = vld [vmem:[#allocation2 + $0x1a50] sm:$0xff]  ;;  %v852_v35 = vld [vmem:[#allocation2 + $0xe60] sm:$0xff] }
 0x39a   :  { %2407 = vmatprep.subr.bf16.mxu0 %v725_v18  ;;  %v1251_v18 = vld [vmem:[#allocation2 + $0x1ad8] sm:$0xff] }
 0x39c   :  { %2295 = vmatpush1.bf16.msra.mxu1 %v1106_v19  ;;  %v869_v19 = vld [vmem:[#allocation2 + $0xee8] sm:$0xff] }
 0x39d   :  { %2408 = vmatpush1.bf16.msra.mxu0 %v724_v25  ;;  %2296 = vmatprep.subr.bf16.mxu1 %v1123_v41  ;;  %v1250_v25 = vld [vmem:[#allocation2 + $0x1ad0] sm:$0xff]  ;;  %v868_v41 = vld [vmem:[#allocation2 + $0xee0] sm:$0xff] }
 0x39e   :  { %2409 = vmatprep.subr.bf16.mxu0 %v741_v17 }
 0x3a0   :  { %2297 = vmatpush1.bf16.msra.mxu1 %v1122_v26  ;;  %v1267_v26 = vld [vmem:[#allocation2 + $0x1b58] sm:$0xff] }
 0x3a1   :  { %2410 = vmatpush1.bf16.msra.mxu0 %v740_v29  ;;  %2298 = vmatprep.subr.bf16.mxu1 %v1139_v31  ;;  %v885_v29 = vld [vmem:[#allocation2 + $0xf68] sm:$0xff] }
 0x3a2   :  { %2411 = vmatprep.subr.bf16.mxu0 %v757_v32 }
 0x3a4   :  { %2299 = vmatpush1.bf16.msra.mxu1 %v1138_v21 }
 0x3a5   :  { %2412 = vmatpush1.bf16.msra.mxu0 %v756_v33  ;;  %2300 = vmatprep.subr.bf16.mxu1 %v1155_v34 }
 0x3a6   :  { %2413 = vmatprep.subr.bf16.mxu0 %v773_v36 }
 0x3a8   :  { %2301 = vmatpush1.bf16.msra.mxu1 %v1154_v37  ;;  %v1266_v37 = vld [vmem:[#allocation2 + $0x1b50] sm:$0xff] }
 0x3a9   :  { %2414 = vmatpush1.bf16.msra.mxu0 %v772_v38  ;;  %2313 = vmatprep.subr.bf16.mxu1 %v1171_v43  ;;  %v884_v38 = vld [vmem:[#allocation2 + $0xf60] sm:$0xff] }
 0x3aa   :  { %2415 = vmatprep.subr.bf16.mxu0 %v789_v47  ;;  %v1283_v47 = vld [vmem:[#allocation2 + $0x1bd8] sm:$0xff] }
 0x3ab   :  { %2303 = vmatmul.mubr.bf16.vlgmr.msra.gmra.mrb[12].mxu1 %v7882_v58  ;;  %v1218_v58 = vld [vmem:[#allocation2 + $0x19d0] sm:$0xff] }
 0x3ac   :  { %2314 = vmatpush1.bf16.msra.mxu1 %v1170_v60  ;;  %2345 = vmatprep.mubr.bf16.mxu1 %v7477_v0  ;;  %v901_v60 = vld [vmem:[#allocation2 + $0xfe8] sm:$0xff] }
 0x3ad   :  { %2416 = vmatpush1.bf16.msra.mxu0 %v788_v61  ;;  %2315 = vmatprep.subr.bf16.mxu1 %v1187_v63  ;;  %v1282_v61 = vld [vmem:[#allocation2 + $0x1bd0] sm:$0xff]  ;;  %v900_v63 = vld [vmem:[#allocation2 + $0xfe0] sm:$0xff] }
 0x3ae   :  { %2417 = vmatprep.subr.bf16.mxu0 %v805_v1  ;;  %v917_v1 = vld [vmem:[#allocation2 + $0x1068] sm:$0xff] }
 0x3b0   :  { %2316 = vmatpush1.bf16.msra.mxu1 %v1186_v11  ;;  %v407_v11 = vld [vmem:[#allocation2 + $0x78] sm:$0xff] }
 0x3b1   :  { %2418 = vmatpush1.bf16.msra.mxu0 %v804_v2  ;;  %2317 = vmatprep.subr.bf16.mxu1 %v1203_v28  ;;  %v916_v2 = vld [vmem:[#allocation2 + $0x1060] sm:$0xff]  ;;  %v406_v28 = vld [vmem:[#allocation2 + $0x70] sm:$0xff] }
 0x3b2   :  { %2419 = vmatprep.subr.bf16.mxu0 %v821_v4  ;;  %v933_v4 = vld [vmem:[#allocation2 + $0x10e8] sm:$0xff] }
 0x3b4   :  { %2318 = vmatpush1.bf16.msra.mxu1 %v1202_v5  ;;  %v423_v5 = vld [vmem:[#allocation2 + $0xf8] sm:$0xff] }
 0x3b5   :  { %2420 = vmatpush1.bf16.msra.mxu0 %v820_v6  ;;  %2319 = vmatprep.subr.bf16.mxu1 %v1219_v50  ;;  %v7947_v6 = vld [vmem:[#allocation8 + $0x8] ss:$28 sps:$4 sm:$0xff]  }
 0x3b6   :  { %2421 = vmatprep.subr.bf16.mxu0 %v837_v9  ;;  %v932_v50 = vld [vmem:[#allocation2 + $0x10e0] sm:$0xff]  ;;  %v422_v9 = vld [vmem:[#allocation2 + $0xf0] sm:$0xff] }
 0x3b8   :  { %2320 = vmatpush1.bf16.msra.mxu1 %v1218_v58  ;;  %v949_v58 = vld [vmem:[#allocation2 + $0x1168] sm:$0xff] }
 0x3b9   :  { %2422 = vmatpush1.bf16.msra.mxu0 %v836_v10  ;;  %2321 = vmatprep.subr.bf16.mxu1 %v1235_v30  ;;  %v439_v10 = vld [vmem:[#allocation2 + $0x178] sm:$0xff]  ;;  %v7950_v30 = vld [vmem:[#allocation8 + $0x14] ss:$28 sps:$4 sm:$0xff]  }
 0x3ba   :  { %2423 = vmatprep.subr.bf16.mxu0 %v853_v7  ;;  %v438_v7 = vld [vmem:[#allocation2 + $0x170] sm:$0xff] }
 0x3bc   :  { %2322 = vmatpush1.bf16.msra.mxu1 %v1234_v14  ;;  %v965_v14 = vld [vmem:[#allocation2 + $0x11e8] sm:$0xff] }
 0x3bd   :  { %2424 = vmatpush1.bf16.msra.mxu0 %v852_v35  ;;  %2323 = vmatprep.subr.bf16.mxu1 %v1251_v18  ;;  %v455_v35 = vld [vmem:[#allocation2 + $0x1f8] sm:$0xff]  ;;  %v964_v18 = vld [vmem:[#allocation2 + $0x11e0] sm:$0xff] }
 0x3be   :  { %2425 = vmatprep.subr.bf16.mxu0 %v869_v19  ;;  %v7934_v17 = vpop.f32.mrb[8].mxu1  ;;  %v454_v19 = vld [vmem:[#allocation2 + $0x1f0] sm:$0xff] }
 0x3bf   :  { %v2706_v31 = vmax.f32 %v7934_v17, 0.0  ;;  %v7937_v32 = vpop.f32.mrb[9].mxu1 }
 0x3c0   :  { %v2707_v21 = vmax.f32 %v7937_v32, 0.0  ;;  %v7940_v33 = vpop.f32.mrb[10].mxu1  ;;  %2324 = vmatpush1.bf16.msra.mxu1 %v1250_v25  ;;  %v981_v25 = vld [vmem:[#allocation2 + $0x1268] sm:$0xff] }
 0x3c1   :  { %2426 = vmatpush1.bf16.msra.mxu0 %v868_v41  ;;  %v2722_v34 = vmax.f32 %v7940_v33, 0.0  ;;  %v7943_v36 = vpop.f32.mrb[11].mxu1  ;;  %2325 = vmatprep.subr.bf16.mxu1 %v1267_v26  ;;  %v471_v41 = vld [vmem:[#allocation2 + $0x278] sm:$0xff]  ;;  %v470_v26 = vld [vmem:[#allocation2 + $0x270] sm:$0xff] }
 0x3c2   :  { %2427 = vmatprep.subr.bf16.mxu0 %v885_v29  ;;  %v2723_v43 = vmax.f32 %v7943_v36, 0.0  ;;  %v997_v29 = vld [vmem:[#allocation2 + $0x12e8] sm:$0xff] }
 0x3c4   :  { %2326 = vmatpush1.bf16.msra.mxu1 %v1266_v37  ;;  %v487_v37 = vld [vmem:[#allocation2 + $0x2f8] sm:$0xff] }
 0x3c5   :  { %2428 = vmatpush1.bf16.msra.mxu0 %v884_v38  ;;  %2327 = vmatprep.subr.bf16.mxu1 %v1283_v47  ;;  %v996_v38 = vld [vmem:[#allocation2 + $0x12e0] sm:$0xff]  ;;  %v486_v47 = vld [vmem:[#allocation2 + $0x2f0] sm:$0xff] }
 0x3c6   :  { %2429 = vmatprep.subr.bf16.mxu0 %v901_v60  ;;  %v1013_v60 = vld [vmem:[#allocation2 + $0x1368] sm:$0xff] }
 0x3c8   :  { %2328 = vmatpush1.bf16.msra.mxu1 %v1282_v61  ;;  %v503_v61 = vld [vmem:[#allocation2 + $0x378] sm:$0xff] }
 0x3c9   :  { %2430 = vmatpush1.bf16.msra.mxu0 %v900_v63  ;;  %2528 = vmatprep.subr.bf16.mxu1 %v407_v11  ;;  %v1012_v63 = vld [vmem:[#allocation2 + $0x1360] sm:$0xff]  ;;  %v1029_v11 = vld [vmem:[#allocation2 + $0x13e8] sm:$0xff] }
 0x3ca   :  { %2442 = vmatprep.subr.bf16.mxu0 %v917_v1  ;;  %v502_v1 = vld [vmem:[#allocation2 + $0x370] sm:$0xff] }
 0x3cb   :  { %2346 = vmatmul.mubr.bf16.vlgmr.msra.gmra.mrb[12].mxu1 %v7898_v46  ;;  %v948_v46 = vld [vmem:[#allocation2 + $0x1160] sm:$0xff] }
 0x3cc   :  { %2432 = vmatmul.mubr.bf16.vlgmr.msra.gmra.mrb[12].mxu0 %v7947_v6  ;;  %2529 = vmatpush1.bf16.msra.mxu1 %v406_v28  ;;  %v1028_v28 = vld [vmem:[#allocation2 + $0x13e0] sm:$0xff] }
 0x3cd   :  { %2443 = vmatpush1.bf16.msra.mxu0 %v916_v2  ;;  %2530 = vmatprep.subr.bf16.mxu1 %v423_v5  ;;  %v519_v2 = vld [vmem:[#allocation2 + $0x3f8] sm:$0xff]  ;;  %v1045_v5 = vld [vmem:[#allocation2 + $0x1468] sm:$0xff] }
 0x3ce   :  { %2444 = vmatprep.subr.bf16.mxu0 %v933_v4  ;;  %2474 = vmatprep.mubr.bf16.mxu0 %v7950_v30  ;;  %v518_v4 = vld [vmem:[#allocation2 + $0x3f0] sm:$0xff] }
 0x3cf   :  { %2560 = vmatprep.mubr.bf16.mxu1 %v7921_v13  ;;  %v980_v13 = vld [vmem:[#allocation2 + $0x1260] sm:$0xff] }
 0x3d0   :  { %2531 = vmatpush1.bf16.msra.mxu1 %v422_v9  ;;  %v1044_v9 = vld [vmem:[#allocation2 + $0x1460] sm:$0xff] }
 0x3d1   :  { %2445 = vmatpush1.bf16.msra.mxu0 %v932_v50  ;;  %2532 = vmatprep.subr.bf16.mxu1 %v439_v10  ;;  %v535_v50 = vld [vmem:[#allocation2 + $0x478] sm:$0xff]  ;;  %v1061_v10 = vld [vmem:[#allocation2 + $0x14e8] sm:$0xff] }
 0x3d2   :  { %2446 = vmatprep.subr.bf16.mxu0 %v949_v58  ;;  %v534_v58 = vld [vmem:[#allocation2 + $0x470] sm:$0xff] }
 0x3d4   :  { %2533 = vmatpush1.bf16.msra.mxu1 %v438_v7  ;;  %v1060_v7 = vld [vmem:[#allocation2 + $0x14e0] sm:$0xff] }
 0x3d5   :  { %2447 = vmatpush1.bf16.msra.mxu0 %v948_v46  ;;  %2534 = vmatprep.subr.bf16.mxu1 %v455_v35  ;;  %v551_v46 = vld [vmem:[#allocation2 + $0x4f8] sm:$0xff]  ;;  %v1077_v35 = vld [vmem:[#allocation2 + $0x1568] sm:$0xff] }
 0x3d6   :  { %2448 = vmatprep.subr.bf16.mxu0 %v965_v14  ;;  %v550_v14 = vld [vmem:[#allocation2 + $0x4f0] sm:$0xff] }
 0x3d8   :  { %2535 = vmatpush1.bf16.msra.mxu1 %v454_v19  ;;  %v1076_v19 = vld [vmem:[#allocation2 + $0x1560] sm:$0xff] }
 0x3d9   :  { %2449 = vmatpush1.bf16.msra.mxu0 %v964_v18  ;;  %2536 = vmatprep.subr.bf16.mxu1 %v471_v41  ;;  %v567_v18 = vld [vmem:[#allocation2 + $0x578] sm:$0xff]  ;;  %v1093_v41 = vld [vmem:[#allocation2 + $0x15e8] sm:$0xff] }
 0x3da   :  { %2450 = vmatprep.subr.bf16.mxu0 %v981_v25  ;;  %v566_v25 = vld [vmem:[#allocation2 + $0x570] sm:$0xff] }
 0x3dc   :  { %2537 = vmatpush1.bf16.msra.mxu1 %v470_v26  ;;  %v1092_v26 = vld [vmem:[#allocation2 + $0x15e0] sm:$0xff] }
 0x3dd   :  { %2451 = vmatpush1.bf16.msra.mxu0 %v980_v13  ;;  %2538 = vmatprep.subr.bf16.mxu1 %v487_v37  ;;  %v583_v13 = vld [vmem:[#allocation2 + $0x5f8] sm:$0xff]  ;;  %v1109_v37 = vld [vmem:[#allocation2 + $0x1668] sm:$0xff] }
 0x3de   :  { %2452 = vmatprep.subr.bf16.mxu0 %v997_v29  ;;  %v582_v29 = vld [vmem:[#allocation2 + $0x5f0] sm:$0xff] }
 0x3e0   :  { %2539 = vmatpush1.bf16.msra.mxu1 %v486_v47  ;;  %v1108_v47 = vld [vmem:[#allocation2 + $0x1660] sm:$0xff] }
 0x3e1   :  { %2453 = vmatpush1.bf16.msra.mxu0 %v996_v38  ;;  %2540 = vmatprep.subr.bf16.mxu1 %v503_v61  ;;  %v599_v38 = vld [vmem:[#allocation2 + $0x678] sm:$0xff]  ;;  %v1125_v61 = vld [vmem:[#allocation2 + $0x16e8] sm:$0xff] }
 0x3e2   :  { %2454 = vmatprep.subr.bf16.mxu0 %v1013_v60  ;;  %v598_v60 = vld [vmem:[#allocation2 + $0x670] sm:$0xff] }
 0x3e4   :  { %2541 = vmatpush1.bf16.msra.mxu1 %v502_v1  ;;  %v1124_v1 = vld [vmem:[#allocation2 + $0x16e0] sm:$0xff] }
 0x3e5   :  { %2455 = vmatpush1.bf16.msra.mxu0 %v1012_v63  ;;  %2542 = vmatprep.subr.bf16.mxu1 %v519_v2  ;;  %v615_v63 = vld [vmem:[#allocation2 + $0x6f8] sm:$0xff]  ;;  %v1141_v2 = vld [vmem:[#allocation2 + $0x1768] sm:$0xff] }
 0x3e6   :  { %2456 = vmatprep.subr.bf16.mxu0 %v1029_v11  ;;  %v614_v11 = vld [vmem:[#allocation2 + $0x6f0] sm:$0xff] }
 0x3e8   :  { %2543 = vmatpush1.bf16.msra.mxu1 %v518_v4  ;;  %v1140_v4 = vld [vmem:[#allocation2 + $0x1760] sm:$0xff] }
 0x3e9   :  { %2457 = vmatpush1.bf16.msra.mxu0 %v1028_v28  ;;  %2544 = vmatprep.subr.bf16.mxu1 %v535_v50  ;;  %v631_v28 = vld [vmem:[#allocation2 + $0x778] sm:$0xff]  ;;  %v1157_v50 = vld [vmem:[#allocation2 + $0x17e8] sm:$0xff] }
 0x3ea   :  { %2458 = vmatprep.subr.bf16.mxu0 %v1045_v5  ;;  %v630_v5 = vld [vmem:[#allocation2 + $0x770] sm:$0xff] }
 0x3ec   :  { %2545 = vmatpush1.bf16.msra.mxu1 %v534_v58  ;;  %v1156_v58 = vld [vmem:[#allocation2 + $0x17e0] sm:$0xff] }
 0x3ed   :  { %2459 = vmatpush1.bf16.msra.mxu0 %v1044_v9  ;;  %2546 = vmatprep.subr.bf16.mxu1 %v551_v46  ;;  %v647_v9 = vld [vmem:[#allocation2 + $0x7f8] sm:$0xff]  ;;  %v1173_v46 = vld [vmem:[#allocation2 + $0x1868] sm:$0xff] }
 0x3ee   :  { %2460 = vmatprep.subr.bf16.mxu0 %v1061_v10  ;;  %v646_v10 = vld [vmem:[#allocation2 + $0x7f0] sm:$0xff] }
 0x3f0   :  { %2547 = vmatpush1.bf16.msra.mxu1 %v550_v14  ;;  %v1172_v14 = vld [vmem:[#allocation2 + $0x1860] sm:$0xff] }
 0x3f1   :  { %2461 = vmatpush1.bf16.msra.mxu0 %v1060_v7  ;;  %2548 = vmatprep.subr.bf16.mxu1 %v567_v18  ;;  %v663_v7 = vld [vmem:[#allocation2 + $0x878] sm:$0xff]  ;;  %v1189_v18 = vld [vmem:[#allocation2 + $0x18e8] sm:$0xff] }
 0x3f2   :  { %2462 = vmatprep.subr.bf16.mxu0 %v1077_v35  ;;  %v662_v35 = vld [vmem:[#allocation2 + $0x870] sm:$0xff] }
 0x3f4   :  { %2549 = vmatpush1.bf16.msra.mxu1 %v566_v25  ;;  %v7954_v25 = vld [vmem:[#allocation8 + $0x10] ss:$28 sps:$4 sm:$0xff]  }
 0x3f5   :  { %2463 = vmatpush1.bf16.msra.mxu0 %v1076_v19  ;;  %2550 = vmatprep.subr.bf16.mxu1 %v583_v13  ;;  %v679_v19 = vld [vmem:[#allocation2 + $0x8f8] sm:$0xff]  ;;  %v678_v13 = vld [vmem:[#allocation2 + $0x8f0] sm:$0xff] }
 0x3f6   :  { %2464 = vmatprep.subr.bf16.mxu0 %v1093_v41  ;;  %v1188_v41 = vld [vmem:[#allocation2 + $0x18e0] sm:$0xff] }
 0x3f8   :  { %2551 = vmatpush1.bf16.msra.mxu1 %v582_v29  ;;  %v695_v29 = vld [vmem:[#allocation2 + $0x978] sm:$0xff] }
 0x3f9   :  { %2465 = vmatpush1.bf16.msra.mxu0 %v1092_v26  ;;  %2552 = vmatprep.subr.bf16.mxu1 %v599_v38  ;;  %v1205_v26 = vld [vmem:[#allocation2 + $0x1968] sm:$0xff]  ;;  %v694_v38 = vld [vmem:[#allocation2 + $0x970] sm:$0xff] }
 0x3fa   :  { %2466 = vmatprep.subr.bf16.mxu0 %v1109_v37  ;;  %v1204_v37 = vld [vmem:[#allocation2 + $0x1960] sm:$0xff] }
 0x3fc   :  { %2553 = vmatpush1.bf16.msra.mxu1 %v598_v60  ;;  %v1220_v60 = vld [vmem:[#allocation2 + $0x19e0] sm:$0xff] }
 0x3fd   :  { %2467 = vmatpush1.bf16.msra.mxu0 %v1108_v47  ;;  %2554 = vmatprep.subr.bf16.mxu1 %v615_v63  ;;  %v1221_v47 = vld [vmem:[#allocation2 + $0x19e8] sm:$0xff] }
 0x3fe   :  { %2468 = vmatprep.subr.bf16.mxu0 %v1125_v61  ;;  %v710_v61 = vld [vmem:[#allocation2 + $0x9f0] sm:$0xff]  ;;  %v1237_v63 = vld [vmem:[#allocation2 + $0x1a68] sm:$0xff] }
 0x400   :  { %2555 = vmatpush1.bf16.msra.mxu1 %v614_v11  ;;  %v726_v11 = vld [vmem:[#allocation2 + $0xa70] sm:$0xff] }
 0x401   :  { %2469 = vmatpush1.bf16.msra.mxu0 %v1124_v1  ;;  %2556 = vmatprep.subr.bf16.mxu1 %v631_v28  ;;  %v727_v1 = vld [vmem:[#allocation2 + $0xa78] sm:$0xff] }
 0x402   :  { %2470 = vmatprep.subr.bf16.mxu0 %v1141_v2  ;;  %v1253_v2 = vld [vmem:[#allocation2 + $0x1ae8] sm:$0xff]  ;;  %v743_v28 = vld [vmem:[#allocation2 + $0xaf8] sm:$0xff] }
 0x404   :  { %2557 = vmatpush1.bf16.msra.mxu1 %v630_v5  ;;  %v742_v5 = vld [vmem:[#allocation2 + $0xaf0] sm:$0xff] }
 0x405   :  { %2471 = vmatpush1.bf16.msra.mxu0 %v1140_v4  ;;  %2558 = vmatprep.subr.bf16.mxu1 %v647_v9  ;;  %v1252_v4 = vld [vmem:[#allocation2 + $0x1ae0] sm:$0xff]  ;;  %v1269_v9 = vld [vmem:[#allocation2 + $0x1b68] sm:$0xff] }
 0x406   :  { %2472 = vmatprep.subr.bf16.mxu0 %v1157_v50 }
 0x408   :  { %2559 = vmatpush1.bf16.msra.mxu1 %v646_v10 }
 0x409   :  { %2473 = vmatpush1.bf16.msra.mxu0 %v1156_v58  ;;  %2571 = vmatprep.subr.bf16.mxu1 %v663_v7  ;;  %v759_v58 = vld [vmem:[#allocation2 + $0xb78] sm:$0xff] }
 0x40a   :  { %2485 = vmatprep.subr.bf16.mxu0 %v1173_v46 }
 0x40b   :  { %2561 = vmatmul.mubr.bf16.vlgmr.msra.gmra.mrb[16].mxu1 %v7926_v3  ;;  %v711_v3 = vld [vmem:[#allocation2 + $0x9f8] sm:$0xff] }
 0x40c   :  { %2475 = vmatmul.mubr.bf16.vlgmr.msra.gmra.mrb[12].mxu0 %v7954_v25  ;;  %2572 = vmatpush1.bf16.msra.mxu1 %v662_v35 }
 0x40d   :  { %2486 = vmatpush1.bf16.msra.mxu0 %v1172_v14  ;;  %2573 = vmatprep.subr.bf16.mxu1 %v679_v19  ;;  %v1268_v19 = vld [vmem:[#allocation2 + $0x1b60] sm:$0xff] }
 0x40e   :  { %2487 = vmatprep.subr.bf16.mxu0 %v1189_v18  ;;  %2517 = vmatprep.mubr.bf16.mxu0 %v7477_v0 }
 0x40f   :  { %2603 = vmatprep.mubr.bf16.mxu1 %v7929_v8  ;;  %v1236_v8 = vld [vmem:[#allocation2 + $0x1a60] sm:$0xff] }
 0x410   :  { %2574 = vmatpush1.bf16.msra.mxu1 %v678_v13 }
 0x411   :  { %2488 = vmatpush1.bf16.msra.mxu0 %v1188_v41  ;;  %2575 = vmatprep.subr.bf16.mxu1 %v695_v29  ;;  %v758_v41 = vld [vmem:[#allocation2 + $0xb70] sm:$0xff]  ;;  %v775_v29 = vld [vmem:[#allocation2 + $0xbf8] sm:$0xff] }
 0x412   :  { %2489 = vmatprep.subr.bf16.mxu0 %v1205_v26  ;;  %v1285_v26 = vld [vmem:[#allocation2 + $0x1be8] sm:$0xff] }
 0x414   :  { %2576 = vmatpush1.bf16.msra.mxu1 %v694_v38  ;;  %v774_v38 = vld [vmem:[#allocation2 + $0xbf0] sm:$0xff] }
 0x415   :  { %2490 = vmatpush1.bf16.msra.mxu0 %v1204_v37  ;;  %2577 = vmatprep.subr.bf16.mxu1 %v711_v3  ;;  %v1284_v37 = vld [vmem:[#allocation2 + $0x1be0] sm:$0xff]  ;;  %v790_v3 = vld [vmem:[#allocation2 + $0xc70] sm:$0xff] }
 0x416   :  { %2491 = vmatprep.subr.bf16.mxu0 %v1221_v47  ;;  %v791_v47 = vld [vmem:[#allocation2 + $0xc78] sm:$0xff] }
 0x418   :  { %2578 = vmatpush1.bf16.msra.mxu1 %v710_v61  ;;  %v7972_v61 = vld [vmem:[#allocation8 + $0x18] ss:$28 sps:$4 sm:$0xff]  }
 0x419   :  { %2492 = vmatpush1.bf16.msra.mxu0 %v1220_v60  ;;  %2579 = vmatprep.subr.bf16.mxu1 %v727_v1  ;;  %v807_v60 = vld [vmem:[#allocation2 + $0xcf8] sm:$0xff] }
 0x41a   :  { %2493 = vmatprep.subr.bf16.mxu0 %v1237_v63  ;;  %v806_v63 = vld [vmem:[#allocation2 + $0xcf0] sm:$0xff]  ;;  %v823_v1 = vld [vmem:[#allocation2 + $0xd78] sm:$0xff] }
 0x41c   :  { %2580 = vmatpush1.bf16.msra.mxu1 %v726_v11  ;;  %v839_v11 = vld [vmem:[#allocation2 + $0xdf8] sm:$0xff] }
 0x41d   :  { %2494 = vmatpush1.bf16.msra.mxu0 %v1236_v8  ;;  %2581 = vmatprep.subr.bf16.mxu1 %v743_v28  ;;  %v822_v8 = vld [vmem:[#allocation2 + $0xd70] sm:$0xff]  ;;  %v855_v28 = vld [vmem:[#allocation2 + $0xe78] sm:$0xff] }
 0x41e   :  { %2495 = vmatprep.subr.bf16.mxu0 %v1253_v2  ;;  %v838_v2 = vld [vmem:[#allocation2 + $0xdf0] sm:$0xff] }
 0x41f   :  { %v7960_v50 = vpop.f32.mrb[8].mxu0 }
 0x420   :  { %v2708_v10 = vmax.f32 %v7960_v50, 0.0  ;;  %v7963_v46 = vpop.f32.mrb[9].mxu0  ;;  %2582 = vmatpush1.bf16.msra.mxu1 %v742_v5  ;;  %v871_v5 = vld [vmem:[#allocation2 + $0xef8] sm:$0xff] }
 0x421   :  { %v2709_v7 = vmax.f32 %v7963_v46, 0.0  ;;  %v7966_v14 = vpop.f32.mrb[10].mxu0  ;;  %2496 = vmatpush1.bf16.msra.mxu0 %v1252_v4  ;;  %2583 = vmatprep.subr.bf16.mxu1 %v759_v58  ;;  %v854_v4 = vld [vmem:[#allocation2 + $0xe70] sm:$0xff]  ;;  %v887_v58 = vld [vmem:[#allocation2 + $0xf78] sm:$0xff] }
 0x422   :  { %v2724_v35 = vmax.f32 %v7966_v14, 0.0  ;;  %v7969_v18 = vpop.f32.mrb[11].mxu0  ;;  %2497 = vmatprep.subr.bf16.mxu0 %v1269_v9  ;;  %v870_v9 = vld [vmem:[#allocation2 + $0xef0] sm:$0xff] }
 0x423   :  { %v2725_v13 = vmax.f32 %v7969_v18, 0.0 }
 0x424   :  { %2584 = vmatpush1.bf16.msra.mxu1 %v758_v41  ;;  %v903_v41 = vld [vmem:[#allocation2 + $0xff8] sm:$0xff] }
 0x425   :  { %2498 = vmatpush1.bf16.msra.mxu0 %v1268_v19  ;;  %2585 = vmatprep.subr.bf16.mxu1 %v775_v29  ;;  %v886_v19 = vld [vmem:[#allocation2 + $0xf70] sm:$0xff]  ;;  %v919_v29 = vld [vmem:[#allocation2 + $0x1078] sm:$0xff] }
 0x426   :  { %2499 = vmatprep.subr.bf16.mxu0 %v1285_v26  ;;  %v902_v26 = vld [vmem:[#allocation2 + $0xff0] sm:$0xff] }
 0x428   :  { %2586 = vmatpush1.bf16.msra.mxu1 %v774_v38  ;;  %v935_v38 = vld [vmem:[#allocation2 + $0x10f8] sm:$0xff] }
 0x429   :  { %2500 = vmatpush1.bf16.msra.mxu0 %v1284_v37  ;;  %2587 = vmatprep.subr.bf16.mxu1 %v791_v47  ;;  %v918_v37 = vld [vmem:[#allocation2 + $0x1070] sm:$0xff] }
 0x42a   :  { %v934_v47 = vld [vmem:[#allocation2 + $0x10f0] sm:$0xff] }
 0x42c   :  { %2518 = vmatmul.mubr.bf16.vlgmr.msra.gmra.mrb[12].mxu0 %v7972_v61  ;;  %2588 = vmatpush1.bf16.msra.mxu1 %v790_v3  ;;  %v951_v3 = vld [vmem:[#allocation2 + $0x1178] sm:$0xff] }
 0x42d   :  { %2589 = vmatprep.subr.bf16.mxu1 %v807_v60  ;;  %v950_v60 = vld [vmem:[#allocation2 + $0x1170] sm:$0xff] }
 0x430   :  { %2590 = vmatpush1.bf16.msra.mxu1 %v806_v63  ;;  %v967_v63 = vld [vmem:[#allocation2 + $0x11f8] sm:$0xff] }
 0x431   :  { %2591 = vmatprep.subr.bf16.mxu1 %v823_v1  ;;  %v966_v1 = vld [vmem:[#allocation2 + $0x11f0] sm:$0xff] }
 0x434   :  { %2592 = vmatpush1.bf16.msra.mxu1 %v822_v8  ;;  %v983_v8 = vld [vmem:[#allocation2 + $0x1278] sm:$0xff] }
 0x435   :  { %2593 = vmatprep.subr.bf16.mxu1 %v839_v11  ;;  %v982_v11 = vld [vmem:[#allocation2 + $0x1270] sm:$0xff] }
 0x438   :  { %2594 = vmatpush1.bf16.msra.mxu1 %v838_v2  ;;  %v999_v2 = vld [vmem:[#allocation2 + $0x12f8] sm:$0xff] }
 0x439   :  { %2595 = vmatprep.subr.bf16.mxu1 %v855_v28  ;;  %v1015_v28 = vld [vmem:[#allocation2 + $0x1378] sm:$0xff] }
 0x43c   :  { %2596 = vmatpush1.bf16.msra.mxu1 %v854_v4  ;;  %v1031_v4 = vld [vmem:[#allocation2 + $0x13f8] sm:$0xff] }
 0x43d   :  { %2597 = vmatprep.subr.bf16.mxu1 %v871_v5  ;;  %v1030_v5 = vld [vmem:[#allocation2 + $0x13f0] sm:$0xff] }
 0x440   :  { %2598 = vmatpush1.bf16.msra.mxu1 %v870_v9  ;;  %v1047_v9 = vld [vmem:[#allocation2 + $0x1478] sm:$0xff] }
 0x441   :  { %2599 = vmatprep.subr.bf16.mxu1 %v887_v58  ;;  %v1046_v58 = vld [vmem:[#allocation2 + $0x1470] sm:$0xff] }
 0x444   :  { %2600 = vmatpush1.bf16.msra.mxu1 %v886_v19  ;;  %v1063_v19 = vld [vmem:[#allocation2 + $0x14f8] sm:$0xff] }
 0x445   :  { %2601 = vmatprep.subr.bf16.mxu1 %v903_v41  ;;  %v1062_v41 = vld [vmem:[#allocation2 + $0x14f0] sm:$0xff] }
 0x448   :  { %2602 = vmatpush1.bf16.msra.mxu1 %v902_v26  ;;  %v1079_v26 = vld [vmem:[#allocation2 + $0x1578] sm:$0xff] }
 0x449   :  { %2614 = vmatprep.subr.bf16.mxu1 %v919_v29  ;;  %v1078_v29 = vld [vmem:[#allocation2 + $0x1570] sm:$0xff] }
 0x44b   :  { %2604 = vmatmul.mubr.bf16.vlgmr.msra.gmra.mrb[16].mxu1 %v7947_v6  ;;  %v998_v6 = vld [vmem:[#allocation2 + $0x12f0] sm:$0xff] }
 0x44c   :  { %2615 = vmatpush1.bf16.msra.mxu1 %v918_v37  ;;  %2646 = vmatprep.mubr.bf16.mxu1 %v7950_v30  ;;  %v1014_v30 = vld [vmem:[#allocation2 + $0x1370] sm:$0xff]  ;;  %v1095_v37 = vld [vmem:[#allocation2 + $0x15f8] sm:$0xff] }
 0x44d   :  { %2616 = vmatprep.subr.bf16.mxu1 %v935_v38  ;;  %v1094_v38 = vld [vmem:[#allocation2 + $0x15f0] sm:$0xff] }
 0x450   :  { %2617 = vmatpush1.bf16.msra.mxu1 %v934_v47  ;;  %v1111_v47 = vld [vmem:[#allocation2 + $0x1678] sm:$0xff] }
 0x451   :  { %2618 = vmatprep.subr.bf16.mxu1 %v951_v3  ;;  %v1110_v3 = vld [vmem:[#allocation2 + $0x1670] sm:$0xff] }
 0x454   :  { %2619 = vmatpush1.bf16.msra.mxu1 %v950_v60  ;;  %v1127_v60 = vld [vmem:[#allocation2 + $0x16f8] sm:$0xff] }
 0x455   :  { %2620 = vmatprep.subr.bf16.mxu1 %v967_v63  ;;  %v1126_v63 = vld [vmem:[#allocation2 + $0x16f0] sm:$0xff] }
 0x458   :  { %2621 = vmatpush1.bf16.msra.mxu1 %v966_v1  ;;  %v1143_v1 = vld [vmem:[#allocation2 + $0x1778] sm:$0xff] }
 0x459   :  { %2622 = vmatprep.subr.bf16.mxu1 %v983_v8  ;;  %v1142_v8 = vld [vmem:[#allocation2 + $0x1770] sm:$0xff] }
 0x45c   :  { %2623 = vmatpush1.bf16.msra.mxu1 %v982_v11  ;;  %v1159_v11 = vld [vmem:[#allocation2 + $0x17f8] sm:$0xff] }
 0x45d   :  { %2624 = vmatprep.subr.bf16.mxu1 %v999_v2  ;;  %v1158_v2 = vld [vmem:[#allocation2 + $0x17f0] sm:$0xff] }
 0x460   :  { %2625 = vmatpush1.bf16.msra.mxu1 %v998_v6  ;;  %v1175_v6 = vld [vmem:[#allocation2 + $0x1878] sm:$0xff] }
 0x461   :  { %2626 = vmatprep.subr.bf16.mxu1 %v1015_v28  ;;  %v1174_v28 = vld [vmem:[#allocation2 + $0x1870] sm:$0xff] }
 0x464   :  { %2627 = vmatpush1.bf16.msra.mxu1 %v1014_v30  ;;  %v1191_v30 = vld [vmem:[#allocation2 + $0x18f8] sm:$0xff] }
 0x465   :  { %2628 = vmatprep.subr.bf16.mxu1 %v1031_v4  ;;  %v1190_v4 = vld [vmem:[#allocation2 + $0x18f0] sm:$0xff] }
 0x468   :  { %2629 = vmatpush1.bf16.msra.mxu1 %v1030_v5  ;;  %v1207_v5 = vld [vmem:[#allocation2 + $0x1978] sm:$0xff] }
 0x469   :  { %2630 = vmatprep.subr.bf16.mxu1 %v1047_v9  ;;  %v1206_v9 = vld [vmem:[#allocation2 + $0x1970] sm:$0xff] }
 0x46c   :  { %2631 = vmatpush1.bf16.msra.mxu1 %v1046_v58  ;;  %v1223_v58 = vld [vmem:[#allocation2 + $0x19f8] sm:$0xff] }
 0x46d   :  { %2632 = vmatprep.subr.bf16.mxu1 %v1063_v19  ;;  %v1222_v19 = vld [vmem:[#allocation2 + $0x19f0] sm:$0xff] }
 0x470   :  { %2633 = vmatpush1.bf16.msra.mxu1 %v1062_v41  ;;  %v1239_v41 = vld [vmem:[#allocation2 + $0x1a78] sm:$0xff] }
 0x471   :  { %2634 = vmatprep.subr.bf16.mxu1 %v1079_v26  ;;  %v1238_v26 = vld [vmem:[#allocation2 + $0x1a70] sm:$0xff] }
 0x474   :  { %2635 = vmatpush1.bf16.msra.mxu1 %v1078_v29  ;;  %v1255_v29 = vld [vmem:[#allocation2 + $0x1af8] sm:$0xff] }
 0x475   :  { %2636 = vmatprep.subr.bf16.mxu1 %v1095_v37 }
 0x478   :  { %2637 = vmatpush1.bf16.msra.mxu1 %v1094_v38 }
 0x479   :  { %2638 = vmatprep.subr.bf16.mxu1 %v1111_v47 }
 0x47c   :  { %2639 = vmatpush1.bf16.msra.mxu1 %v1110_v3 }
 0x47d   :  { %2640 = vmatprep.subr.bf16.mxu1 %v1127_v60 }
 0x480   :  { %2641 = vmatpush1.bf16.msra.mxu1 %v1126_v63 }
 0x481   :  { %2642 = vmatprep.subr.bf16.mxu1 %v1143_v1 }
 0x484   :  { %2643 = vmatpush1.bf16.msra.mxu1 %v1142_v8  ;;  %v1270_v8 = vld [vmem:[#allocation2 + $0x1b70] sm:$0xff] }
 0x485   :  { %2644 = vmatprep.subr.bf16.mxu1 %v1159_v11 }
 0x488   :  { %2645 = vmatpush1.bf16.msra.mxu1 %v1158_v2  ;;  %v1287_v2 = vld [vmem:[#allocation2 + $0x1bf8] sm:$0xff] }
 0x489   :  { %2657 = vmatprep.subr.bf16.mxu1 %v1175_v6  ;;  %v1286_v6 = vld [vmem:[#allocation2 + $0x1bf0] sm:$0xff] }
 0x48b   :  { %2647 = vmatmul.mubr.bf16.vlgmr.msra.gmra.mrb[16].mxu1 %v7954_v25  ;;  %v1254_v25 = vld [vmem:[#allocation2 + $0x1af0] sm:$0xff] }
 0x48c   :  { %2658 = vmatpush1.bf16.msra.mxu1 %v1174_v28  ;;  %2689 = vmatprep.mubr.bf16.mxu1 %v7477_v0  ;;  %v1271_v0 = vld [vmem:[#allocation2 + $0x1b78] sm:$0xff] }
 0x48d   :  { %2659 = vmatprep.subr.bf16.mxu1 %v1191_v30 }
 0x490   :  { %2660 = vmatpush1.bf16.msra.mxu1 %v1190_v4 }
 0x491   :  { %2661 = vmatprep.subr.bf16.mxu1 %v1207_v5 }
 0x494   :  { %2662 = vmatpush1.bf16.msra.mxu1 %v1206_v9 }
 0x495   :  { %2663 = vmatprep.subr.bf16.mxu1 %v1223_v58 }
 0x498   :  { %2664 = vmatpush1.bf16.msra.mxu1 %v1222_v19 }
 0x499   :  { %2665 = vmatprep.subr.bf16.mxu1 %v1239_v41 }
 0x49c   :  { %2666 = vmatpush1.bf16.msra.mxu1 %v1238_v26 }
 0x49d   :  { %2667 = vmatprep.subr.bf16.mxu1 %v1255_v29 }
 0x49e   :  { %v7979_v37 = vpop.f32.mrb[12].mxu1 }
 0x49f   :  { %v7982_v47 = vpop.f32.mrb[13].mxu1 }
 0x4a0   :  { %v2711_v3 = vmax.f32 %v7982_v47, 0.0  ;;  %v7985_v60 = vpop.f32.mrb[14].mxu1  ;;  %2668 = vmatpush1.bf16.msra.mxu1 %v1254_v25 }
 0x4a1   :  { %v7988_v1 = vpop.f32.mrb[15].mxu1  ;;  %2669 = vmatprep.subr.bf16.mxu1 %v1271_v0 }
 0x4a2   :  { %v2727_v11 = vmax.f32 %v7988_v1, 0.0 }
 0x4a4   :  { %2670 = vmatpush1.bf16.msra.mxu1 %v1270_v8 }
 0x4a5   :  { %2671 = vmatprep.subr.bf16.mxu1 %v1287_v2 }
 0x4a8   :  { %2672 = vmatpush1.bf16.msra.mxu1 %v1286_v6 }
 0x4ab   :  { %2690 = vmatmul.mubr.bf16.vlgmr.msra.gmra.mrb[16].mxu1 %v7972_v61 }
 0x4ff   :  { %v7992_v28 = vpop.f32.mrb[12].mxu0 }
 0x500   :  { %v7995_v4 = vpop.f32.mrb[13].mxu0 }
 0x501   :  { %v7998_v9 = vpop.f32.mrb[14].mxu0 }
 0x502   :  { %v8001_v19 = vpop.f32.mrb[15].mxu0 }
 0x57e   :  { %v8004_v26 = vpop.f32.mrb[16].mxu1 }
 0x57f   :  { %v8007_v29 = vpop.f32.mrb[17].mxu1 }
 0x580   :  { %v8010_v0 = vpop.f32.mrb[18].mxu1 }
 0x581   :  { %v8013_v2 = vpop.f32.mrb[19].mxu1 }
 0x582   :  { %7435 = dma.done.wait [#allocation7 + $0x1], 131072 }
 0x583   :  { %7436 = vsyncadd [#allocation7 + $0x1], 4294836224  ;;  %v8020_v58 = vpack.c.bf16 %v2717_v54, %v2701_v53  ;;  %v2753_v61 = vld [vmem:[#allocation3 + $0x8] sm:$0xff]  ;;  %v2755_v25 = vld [vmem:[#allocation3 + $0x18] sm:$0xff] }
 0x584   :  { %v2752_v30 = vld [vmem:[#allocation3] sm:$0xff]  ;;  %3776 = vmatprep.subr.bf16.mxu0 %v2753_v61  ;;  %4120 = vmatprep.subr.bf16.mxu1 %v2755_v25  ;;  %v2754_v8 = vld [vmem:[#allocation3 + $0x10] sm:$0xff]  ;;  %v2761_v41 = vld [vmem:[#allocation3 + $0x48] sm:$0xff] }
 0x585   :  { %3808 = vmatprep.mubr.bf16.mxu0 %v8020_v58  ;;  %4152 = vmatprep.mubr.bf16.mxu1 %v8020_v58  ;;  %v2763_v6 = vld [vmem:[#allocation3 + $0x58] sm:$0xff]  ;;  %v2760_v42 = vld [vmem:[#allocation3 + $0x40] sm:$0xff]  ;;  %v2762_v49 = vld [vmem:[#allocation3 + $0x50] sm:$0xff] }
 0x586   :  { %3777 = vmatpush1.bf16.msra.mxu0 %v2752_v30  ;;  %4121 = vmatpush1.bf16.msra.mxu1 %v2754_v8  ;;  %v2769_v53 = vld [vmem:[#allocation3 + $0x88] sm:$0xff]  ;;  %v2771_v54 = vld [vmem:[#allocation3 + $0x98] sm:$0xff]  ;;  %v2768_v5 = vld [vmem:[#allocation3 + $0x80] sm:$0xff] }
 0x587   :  { %3778 = vmatprep.subr.bf16.mxu0 %v2761_v41  ;;  %4122 = vmatprep.subr.bf16.mxu1 %v2763_v6  ;;  %v2770_v63 = vld [vmem:[#allocation3 + $0x90] sm:$0xff]  ;;  %v2777_v38 = vld [vmem:[#allocation3 + $0xc8] sm:$0xff]  ;;  %v2779_v61 = vld [vmem:[#allocation3 + $0xd8] sm:$0xff] }
 0x588   :  { %v2776_v30 = vld [vmem:[#allocation3 + $0xc0] sm:$0xff]  ;;  %v2778_v25 = vld [vmem:[#allocation3 + $0xd0] sm:$0xff]  ;;  %v2785_v41 = vld [vmem:[#allocation3 + $0x108] sm:$0xff] }
 0x589   :  { %v2787_v8 = vld [vmem:[#allocation3 + $0x118] sm:$0xff]  ;;  %v2784_v6 = vld [vmem:[#allocation3 + $0x100] sm:$0xff]  ;;  %v2897_v45 = vld [vmem:[#allocation3 + $0x488] sm:$0xff] }
 0x58a   :  { %3779 = vmatpush1.bf16.msra.mxu0 %v2760_v42  ;;  %4123 = vmatpush1.bf16.msra.mxu1 %v2762_v49  ;;  %v2786_v42 = vld [vmem:[#allocation3 + $0x110] sm:$0xff]  ;;  %v2793_v49 = vld [vmem:[#allocation3 + $0x148] sm:$0xff]  ;;  %v2888_v40 = vld [vmem:[#allocation3 + $0x440] sm:$0xff] }
 0x58b   :  { %3780 = vmatprep.subr.bf16.mxu0 %v2769_v53  ;;  %4124 = vmatprep.subr.bf16.mxu1 %v2771_v54  ;;  %v2795_v53 = vld [vmem:[#allocation3 + $0x158] sm:$0xff]  ;;  %v2896_v20 = vld [vmem:[#allocation3 + $0x480] sm:$0xff]  ;;  %v2905_v24 = vld [vmem:[#allocation3 + $0x4c8] sm:$0xff] }
 0x58c   :  { %v2803_v54 = vld [vmem:[#allocation3 + $0x198] sm:$0xff]  ;;  %v3016_v16 = vld [vmem:[#allocation3 + $0x840] sm:$0xff]  ;;  %v3025_v22 = vld [vmem:[#allocation3 + $0x888] sm:$0xff] }
 0x58d   :  { %v3024_v56 = vld [vmem:[#allocation3 + $0x880] sm:$0xff]  ;;  %v3033_v59 = vld [vmem:[#allocation3 + $0x8c8] sm:$0xff] }
 0x58e   :  { %3781 = vmatpush1.bf16.msra.mxu0 %v2768_v5  ;;  %4125 = vmatpush1.bf16.msra.mxu1 %v2770_v63  ;;  %v2792_v5 = vld [vmem:[#allocation3 + $0x140] sm:$0xff]  ;;  %v2794_v63 = vld [vmem:[#allocation3 + $0x150] sm:$0xff]  ;;  %v3153_v57 = vld [vmem:[#allocation3 + $0xc88] sm:$0xff] }
 0x58f   :  { %3782 = vmatprep.subr.bf16.mxu0 %v2777_v38  ;;  %4126 = vmatprep.subr.bf16.mxu1 %v2779_v61  ;;  %v2801_v38 = vld [vmem:[#allocation3 + $0x188] sm:$0xff]  ;;  %v2800_v61 = vld [vmem:[#allocation3 + $0x180] sm:$0xff] }
 0x590   :  { %v3144_v39 = vld [vmem:[#allocation3 + $0xc40] sm:$0xff]  ;;  %v3161_v36 = vld [vmem:[#allocation3 + $0xcc8] sm:$0xff] }
 0x591   :  { %v3152_v32 = vld [vmem:[#allocation3 + $0xc80] sm:$0xff]  ;;  %v3281_v33 = vld [vmem:[#allocation3 + $0x1088] sm:$0xff] }
 0x592   :  { %3783 = vmatpush1.bf16.msra.mxu0 %v2776_v30  ;;  %4127 = vmatpush1.bf16.msra.mxu1 %v2778_v25  ;;  %v2802_v30 = vld [vmem:[#allocation3 + $0x190] sm:$0xff]  ;;  %v2809_v25 = vld [vmem:[#allocation3 + $0x1c8] sm:$0xff]  ;;  %v3272_v17 = vld [vmem:[#allocation3 + $0x1040] sm:$0xff] }
 0x593   :  { %3784 = vmatprep.subr.bf16.mxu0 %v2785_v41  ;;  %4128 = vmatprep.subr.bf16.mxu1 %v2787_v8  ;;  %v2811_v41 = vld [vmem:[#allocation3 + $0x1d8] sm:$0xff]  ;;  %v2808_v8 = vld [vmem:[#allocation3 + $0x1c0] sm:$0xff]  ;;  %v3289_v18 = vld [vmem:[#allocation3 + $0x10c8] sm:$0xff] }
 0x594   :  { %v3280_v46 = vld [vmem:[#allocation3 + $0x1080] sm:$0xff]  ;;  %v3409_v14 = vld [vmem:[#allocation3 + $0x1488] sm:$0xff] }
 0x595   :  { %v3400_v50 = vld [vmem:[#allocation3 + $0x1440] sm:$0xff]  ;;  %v3417_v1 = vld [vmem:[#allocation3 + $0x14c8] sm:$0xff] }
 0x596   :  { %3785 = vmatpush1.bf16.msra.mxu0 %v2784_v6  ;;  %4129 = vmatpush1.bf16.msra.mxu1 %v2786_v42  ;;  %v2810_v6 = vld [vmem:[#allocation3 + $0x1d0] sm:$0xff]  ;;  %v2817_v42 = vld [vmem:[#allocation3 + $0x208] sm:$0xff]  ;;  %v3408_v47 = vld [vmem:[#allocation3 + $0x1480] sm:$0xff] }
 0x597   :  { %3786 = vmatprep.subr.bf16.mxu0 %v2793_v49  ;;  %4130 = vmatprep.subr.bf16.mxu1 %v2795_v53  ;;  %v2819_v49 = vld [vmem:[#allocation3 + $0x218] sm:$0xff]  ;;  %v2816_v53 = vld [vmem:[#allocation3 + $0x200] sm:$0xff] }
 0x59a   :  { %3787 = vmatpush1.bf16.msra.mxu0 %v2792_v5  ;;  %4131 = vmatpush1.bf16.msra.mxu1 %v2794_v63  ;;  %v2818_v5 = vld [vmem:[#allocation3 + $0x210] sm:$0xff]  ;;  %v2825_v63 = vld [vmem:[#allocation3 + $0x248] sm:$0xff] }
 0x59b   :  { %3788 = vmatprep.subr.bf16.mxu0 %v2801_v38  ;;  %4132 = vmatprep.subr.bf16.mxu1 %v2803_v54  ;;  %v2827_v38 = vld [vmem:[#allocation3 + $0x258] sm:$0xff]  ;;  %v2824_v54 = vld [vmem:[#allocation3 + $0x240] sm:$0xff] }
 0x59e   :  { %3789 = vmatpush1.bf16.msra.mxu0 %v2800_v61  ;;  %4133 = vmatpush1.bf16.msra.mxu1 %v2802_v30  ;;  %v2826_v61 = vld [vmem:[#allocation3 + $0x250] sm:$0xff]  ;;  %v2833_v30 = vld [vmem:[#allocation3 + $0x288] sm:$0xff] }
 0x59f   :  { %3790 = vmatprep.subr.bf16.mxu0 %v2809_v25  ;;  %4134 = vmatprep.subr.bf16.mxu1 %v2811_v41  ;;  %v2835_v25 = vld [vmem:[#allocation3 + $0x298] sm:$0xff]  ;;  %v2832_v41 = vld [vmem:[#allocation3 + $0x280] sm:$0xff] }
 0x5a2   :  { %3791 = vmatpush1.bf16.msra.mxu0 %v2808_v8  ;;  %4135 = vmatpush1.bf16.msra.mxu1 %v2810_v6  ;;  %v2834_v8 = vld [vmem:[#allocation3 + $0x290] sm:$0xff]  ;;  %v2841_v6 = vld [vmem:[#allocation3 + $0x2c8] sm:$0xff] }
 0x5a3   :  { %3792 = vmatprep.subr.bf16.mxu0 %v2817_v42  ;;  %4136 = vmatprep.subr.bf16.mxu1 %v2819_v49  ;;  %v2843_v42 = vld [vmem:[#allocation3 + $0x2d8] sm:$0xff]  ;;  %v2840_v49 = vld [vmem:[#allocation3 + $0x2c0] sm:$0xff] }
 0x5a6   :  { %3793 = vmatpush1.bf16.msra.mxu0 %v2816_v53  ;;  %4137 = vmatpush1.bf16.msra.mxu1 %v2818_v5  ;;  %v2842_v53 = vld [vmem:[#allocation3 + $0x2d0] sm:$0xff]  ;;  %v2849_v5 = vld [vmem:[#allocation3 + $0x308] sm:$0xff] }
 0x5a7   :  { %3794 = vmatprep.subr.bf16.mxu0 %v2825_v63  ;;  %4138 = vmatprep.subr.bf16.mxu1 %v2827_v38  ;;  %v2851_v63 = vld [vmem:[#allocation3 + $0x318] sm:$0xff]  ;;  %v2848_v38 = vld [vmem:[#allocation3 + $0x300] sm:$0xff] }
 0x5aa   :  { %3795 = vmatpush1.bf16.msra.mxu0 %v2824_v54  ;;  %4139 = vmatpush1.bf16.msra.mxu1 %v2826_v61  ;;  %v2850_v54 = vld [vmem:[#allocation3 + $0x310] sm:$0xff]  ;;  %v2857_v61 = vld [vmem:[#allocation3 + $0x348] sm:$0xff] }
 0x5ab   :  { %3796 = vmatprep.subr.bf16.mxu0 %v2833_v30  ;;  %4140 = vmatprep.subr.bf16.mxu1 %v2835_v25  ;;  %v2859_v30 = vld [vmem:[#allocation3 + $0x358] sm:$0xff]  ;;  %v2856_v25 = vld [vmem:[#allocation3 + $0x340] sm:$0xff] }
 0x5ae   :  { %3797 = vmatpush1.bf16.msra.mxu0 %v2832_v41  ;;  %4141 = vmatpush1.bf16.msra.mxu1 %v2834_v8  ;;  %v2858_v41 = vld [vmem:[#allocation3 + $0x350] sm:$0xff]  ;;  %v2865_v8 = vld [vmem:[#allocation3 + $0x388] sm:$0xff] }
 0x5af   :  { %3798 = vmatprep.subr.bf16.mxu0 %v2841_v6  ;;  %4142 = vmatprep.subr.bf16.mxu1 %v2843_v42  ;;  %v2867_v6 = vld [vmem:[#allocation3 + $0x398] sm:$0xff]  ;;  %v2864_v42 = vld [vmem:[#allocation3 + $0x380] sm:$0xff] }
 0x5b2   :  { %3799 = vmatpush1.bf16.msra.mxu0 %v2840_v49  ;;  %4143 = vmatpush1.bf16.msra.mxu1 %v2842_v53  ;;  %v2866_v49 = vld [vmem:[#allocation3 + $0x390] sm:$0xff]  ;;  %v2873_v53 = vld [vmem:[#allocation3 + $0x3c8] sm:$0xff] }
 0x5b3   :  { %3800 = vmatprep.subr.bf16.mxu0 %v2849_v5  ;;  %4144 = vmatprep.subr.bf16.mxu1 %v2851_v63  ;;  %v2875_v5 = vld [vmem:[#allocation3 + $0x3d8] sm:$0xff]  ;;  %v2872_v63 = vld [vmem:[#allocation3 + $0x3c0] sm:$0xff] }
 0x5b6   :  { %3801 = vmatpush1.bf16.msra.mxu0 %v2848_v38  ;;  %4145 = vmatpush1.bf16.msra.mxu1 %v2850_v54  ;;  %v2874_v38 = vld [vmem:[#allocation3 + $0x3d0] sm:$0xff]  ;;  %v2881_v54 = vld [vmem:[#allocation3 + $0x408] sm:$0xff] }
 0x5b7   :  { %3802 = vmatprep.subr.bf16.mxu0 %v2857_v61  ;;  %4146 = vmatprep.subr.bf16.mxu1 %v2859_v30  ;;  %v2883_v61 = vld [vmem:[#allocation3 + $0x418] sm:$0xff]  ;;  %v8028_v30 = vpack.c.bf16 %v2716_v52, %v2700_v44  ;;  %v2890_v44 = vld [vmem:[#allocation3 + $0x450] sm:$0xff] }
 0x5b8   :  { %v2899_v52 = vld [vmem:[#allocation3 + $0x498] sm:$0xff] }
 0x5ba   :  { %3803 = vmatpush1.bf16.msra.mxu0 %v2856_v25  ;;  %4147 = vmatpush1.bf16.msra.mxu1 %v2858_v41  ;;  %v2880_v25 = vld [vmem:[#allocation3 + $0x400] sm:$0xff]  ;;  %v2882_v41 = vld [vmem:[#allocation3 + $0x410] sm:$0xff] }
 0x5bb   :  { %3804 = vmatprep.subr.bf16.mxu0 %v2865_v8  ;;  %4148 = vmatprep.subr.bf16.mxu1 %v2867_v6  ;;  %v2889_v8 = vld [vmem:[#allocation3 + $0x448] sm:$0xff]  ;;  %v2891_v6 = vld [vmem:[#allocation3 + $0x458] sm:$0xff] }
 0x5be   :  { %3805 = vmatpush1.bf16.msra.mxu0 %v2864_v42  ;;  %4149 = vmatpush1.bf16.msra.mxu1 %v2866_v49  ;;  %v8034_v42 = vpack.c.bf16 %v2719_v27, %v2703_v15  ;;  %v2898_v15 = vld [vmem:[#allocation3 + $0x490] sm:$0xff]  ;;  %v2907_v27 = vld [vmem:[#allocation3 + $0x4d8] sm:$0xff]  ;;  %v2904_v49 = vld [vmem:[#allocation3 + $0x4c0] sm:$0xff] }
 0x5bf   :  { %3806 = vmatprep.subr.bf16.mxu0 %v2873_v53  ;;  %4150 = vmatprep.subr.bf16.mxu1 %v2875_v5  ;;  %v2906_v53 = vld [vmem:[#allocation3 + $0x4d0] sm:$0xff]  ;;  %v2913_v5 = vld [vmem:[#allocation3 + $0x508] sm:$0xff] }
 0x5c2   :  { %3807 = vmatpush1.bf16.msra.mxu0 %v2872_v63  ;;  %4151 = vmatpush1.bf16.msra.mxu1 %v2874_v38  ;;  %v2915_v63 = vld [vmem:[#allocation3 + $0x518] sm:$0xff]  ;;  %v2912_v38 = vld [vmem:[#allocation3 + $0x500] sm:$0xff] }
 0x5c3   :  { %3819 = vmatprep.subr.bf16.mxu0 %v2881_v54  ;;  %4163 = vmatprep.subr.bf16.mxu1 %v2883_v61  ;;  %v2914_v54 = vld [vmem:[#allocation3 + $0x510] sm:$0xff]  ;;  %v2921_v61 = vld [vmem:[#allocation3 + $0x548] sm:$0xff] }
 0x5c5   :  { %3809 = vmatmul.mubr.bf16.vlgmr.msra.gmra.mrb[16].mxu0 %v8028_v30  ;;  %4153 = vmatmul.mubr.bf16.vlgmr.msra.gmra.mrb[20].mxu1 %v8028_v30 }
 0x5c6   :  { %3820 = vmatpush1.bf16.msra.mxu0 %v2880_v25  ;;  %4164 = vmatpush1.bf16.msra.mxu1 %v2882_v41  ;;  %v2923_v25 = vld [vmem:[#allocation3 + $0x558] sm:$0xff]  ;;  %v2920_v41 = vld [vmem:[#allocation3 + $0x540] sm:$0xff] }
 0x5c7   :  { %3821 = vmatprep.subr.bf16.mxu0 %v2889_v8  ;;  %4165 = vmatprep.subr.bf16.mxu1 %v2891_v6  ;;  %v2922_v8 = vld [vmem:[#allocation3 + $0x550] sm:$0xff]  ;;  %v2929_v6 = vld [vmem:[#allocation3 + $0x588] sm:$0xff] }
 0x5c8   :  { %3851 = vmatprep.mubr.bf16.mxu0 %v8034_v42  ;;  %4195 = vmatprep.mubr.bf16.mxu1 %v8034_v42 }
 0x5ca   :  { %3822 = vmatpush1.bf16.msra.mxu0 %v2888_v40  ;;  %4166 = vmatpush1.bf16.msra.mxu1 %v2890_v44  ;;  %v2931_v40 = vld [vmem:[#allocation3 + $0x598] sm:$0xff]  ;;  %v2928_v44 = vld [vmem:[#allocation3 + $0x580] sm:$0xff] }
 0x5cb   :  { %3823 = vmatprep.subr.bf16.mxu0 %v2897_v45  ;;  %4167 = vmatprep.subr.bf16.mxu1 %v2899_v52  ;;  %v2930_v45 = vld [vmem:[#allocation3 + $0x590] sm:$0xff]  ;;  %v2937_v52 = vld [vmem:[#allocation3 + $0x5c8] sm:$0xff] }
 0x5ce   :  { %3824 = vmatpush1.bf16.msra.mxu0 %v2896_v20  ;;  %4168 = vmatpush1.bf16.msra.mxu1 %v2898_v15  ;;  %v2939_v20 = vld [vmem:[#allocation3 + $0x5d8] sm:$0xff]  ;;  %v2936_v15 = vld [vmem:[#allocation3 + $0x5c0] sm:$0xff] }
 0x5cf   :  { %3825 = vmatprep.subr.bf16.mxu0 %v2905_v24  ;;  %4169 = vmatprep.subr.bf16.mxu1 %v2907_v27  ;;  %v2938_v24 = vld [vmem:[#allocation3 + $0x5d0] sm:$0xff]  ;;  %v2945_v27 = vld [vmem:[#allocation3 + $0x608] sm:$0xff] }
 0x5d2   :  { %3826 = vmatpush1.bf16.msra.mxu0 %v2904_v49  ;;  %4170 = vmatpush1.bf16.msra.mxu1 %v2906_v53  ;;  %v2947_v49 = vld [vmem:[#allocation3 + $0x618] sm:$0xff]  ;;  %v2944_v53 = vld [vmem:[#allocation3 + $0x600] sm:$0xff] }
 0x5d3   :  { %3827 = vmatprep.subr.bf16.mxu0 %v2913_v5  ;;  %4171 = vmatprep.subr.bf16.mxu1 %v2915_v63  ;;  %v2946_v5 = vld [vmem:[#allocation3 + $0x610] sm:$0xff]  ;;  %v2953_v63 = vld [vmem:[#allocation3 + $0x648] sm:$0xff] }
 0x5d6   :  { %3828 = vmatpush1.bf16.msra.mxu0 %v2912_v38  ;;  %4172 = vmatpush1.bf16.msra.mxu1 %v2914_v54  ;;  %v2955_v38 = vld [vmem:[#allocation3 + $0x658] sm:$0xff]  ;;  %v2952_v54 = vld [vmem:[#allocation3 + $0x640] sm:$0xff] }
 0x5d7   :  { %3829 = vmatprep.subr.bf16.mxu0 %v2921_v61  ;;  %4173 = vmatprep.subr.bf16.mxu1 %v2923_v25  ;;  %v2954_v61 = vld [vmem:[#allocation3 + $0x650] sm:$0xff]  ;;  %v2961_v25 = vld [vmem:[#allocation3 + $0x688] sm:$0xff] }
 0x5da   :  { %3830 = vmatpush1.bf16.msra.mxu0 %v2920_v41  ;;  %4174 = vmatpush1.bf16.msra.mxu1 %v2922_v8  ;;  %v2963_v41 = vld [vmem:[#allocation3 + $0x698] sm:$0xff]  ;;  %v2960_v8 = vld [vmem:[#allocation3 + $0x680] sm:$0xff] }
 0x5db   :  { %3831 = vmatprep.subr.bf16.mxu0 %v2929_v6  ;;  %4175 = vmatprep.subr.bf16.mxu1 %v2931_v40  ;;  %v2962_v6 = vld [vmem:[#allocation3 + $0x690] sm:$0xff]  ;;  %v2969_v40 = vld [vmem:[#allocation3 + $0x6c8] sm:$0xff] }
 0x5de   :  { %3832 = vmatpush1.bf16.msra.mxu0 %v2928_v44  ;;  %4176 = vmatpush1.bf16.msra.mxu1 %v2930_v45  ;;  %v2971_v44 = vld [vmem:[#allocation3 + $0x6d8] sm:$0xff]  ;;  %v2968_v45 = vld [vmem:[#allocation3 + $0x6c0] sm:$0xff] }
 0x5df   :  { %3833 = vmatprep.subr.bf16.mxu0 %v2937_v52  ;;  %4177 = vmatprep.subr.bf16.mxu1 %v2939_v20  ;;  %v2970_v52 = vld [vmem:[#allocation3 + $0x6d0] sm:$0xff]  ;;  %v2977_v20 = vld [vmem:[#allocation3 + $0x708] sm:$0xff] }
 0x5e2   :  { %3834 = vmatpush1.bf16.msra.mxu0 %v2936_v15  ;;  %4178 = vmatpush1.bf16.msra.mxu1 %v2938_v24  ;;  %v2979_v15 = vld [vmem:[#allocation3 + $0x718] sm:$0xff]  ;;  %v2976_v24 = vld [vmem:[#allocation3 + $0x700] sm:$0xff] }
 0x5e3   :  { %3835 = vmatprep.subr.bf16.mxu0 %v2945_v27  ;;  %4179 = vmatprep.subr.bf16.mxu1 %v2947_v49  ;;  %v2978_v27 = vld [vmem:[#allocation3 + $0x710] sm:$0xff]  ;;  %v2985_v49 = vld [vmem:[#allocation3 + $0x748] sm:$0xff] }
 0x5e6   :  { %3836 = vmatpush1.bf16.msra.mxu0 %v2944_v53  ;;  %4180 = vmatpush1.bf16.msra.mxu1 %v2946_v5  ;;  %v2987_v53 = vld [vmem:[#allocation3 + $0x758] sm:$0xff]  ;;  %v2984_v5 = vld [vmem:[#allocation3 + $0x740] sm:$0xff] }
 0x5e7   :  { %3837 = vmatprep.subr.bf16.mxu0 %v2953_v63  ;;  %4181 = vmatprep.subr.bf16.mxu1 %v2955_v38  ;;  %v2986_v63 = vld [vmem:[#allocation3 + $0x750] sm:$0xff]  ;;  %v2993_v38 = vld [vmem:[#allocation3 + $0x788] sm:$0xff] }
 0x5ea   :  { %3838 = vmatpush1.bf16.msra.mxu0 %v2952_v54  ;;  %4182 = vmatpush1.bf16.msra.mxu1 %v2954_v61  ;;  %v2995_v54 = vld [vmem:[#allocation3 + $0x798] sm:$0xff]  ;;  %v2992_v61 = vld [vmem:[#allocation3 + $0x780] sm:$0xff] }
 0x5eb   :  { %3839 = vmatprep.subr.bf16.mxu0 %v2961_v25  ;;  %4183 = vmatprep.subr.bf16.mxu1 %v2963_v41  ;;  %v2994_v25 = vld [vmem:[#allocation3 + $0x790] sm:$0xff]  ;;  %v3001_v41 = vld [vmem:[#allocation3 + $0x7c8] sm:$0xff] }
 0x5ee   :  { %3840 = vmatpush1.bf16.msra.mxu0 %v2960_v8  ;;  %4184 = vmatpush1.bf16.msra.mxu1 %v2962_v6  ;;  %v3003_v8 = vld [vmem:[#allocation3 + $0x7d8] sm:$0xff]  ;;  %v3000_v6 = vld [vmem:[#allocation3 + $0x7c0] sm:$0xff] }
 0x5ef   :  { %3841 = vmatprep.subr.bf16.mxu0 %v2969_v40  ;;  %4185 = vmatprep.subr.bf16.mxu1 %v2971_v44  ;;  %v3002_v40 = vld [vmem:[#allocation3 + $0x7d0] sm:$0xff]  ;;  %v3009_v44 = vld [vmem:[#allocation3 + $0x808] sm:$0xff] }
 0x5f2   :  { %3842 = vmatpush1.bf16.msra.mxu0 %v2968_v45  ;;  %4186 = vmatpush1.bf16.msra.mxu1 %v2970_v52  ;;  %v3011_v45 = vld [vmem:[#allocation3 + $0x818] sm:$0xff]  ;;  %v8044_v52 = vpack.c.bf16 %v2718_v23, %v2702_v12  ;;  %v3018_v12 = vld [vmem:[#allocation3 + $0x850] sm:$0xff] }
 0x5f3   :  { %3843 = vmatprep.subr.bf16.mxu0 %v2977_v20  ;;  %4187 = vmatprep.subr.bf16.mxu1 %v2979_v15  ;;  %v3008_v20 = vld [vmem:[#allocation3 + $0x800] sm:$0xff]  ;;  %v3010_v15 = vld [vmem:[#allocation3 + $0x810] sm:$0xff]  ;;  %v3027_v23 = vld [vmem:[#allocation3 + $0x898] sm:$0xff] }
 0x5f6   :  { %3844 = vmatpush1.bf16.msra.mxu0 %v2976_v24  ;;  %4188 = vmatpush1.bf16.msra.mxu1 %v2978_v27  ;;  %v3017_v24 = vld [vmem:[#allocation3 + $0x848] sm:$0xff]  ;;  %v3019_v27 = vld [vmem:[#allocation3 + $0x858] sm:$0xff] }
 0x5f7   :  { %3845 = vmatprep.subr.bf16.mxu0 %v2985_v49  ;;  %4189 = vmatprep.subr.bf16.mxu1 %v2987_v53  ;;  %v8050_v49 = vpack.c.bf16 %v2721_v62, %v2705_v51  ;;  %v3026_v51 = vld [vmem:[#allocation3 + $0x890] sm:$0xff]  ;;  %v3035_v62 = vld [vmem:[#allocation3 + $0x8d8] sm:$0xff]  ;;  %v3032_v53 = vld [vmem:[#allocation3 + $0x8c0] sm:$0xff] }
 0x5fa   :  { %3846 = vmatpush1.bf16.msra.mxu0 %v2984_v5  ;;  %4190 = vmatpush1.bf16.msra.mxu1 %v2986_v63  ;;  %v3034_v5 = vld [vmem:[#allocation3 + $0x8d0] sm:$0xff]  ;;  %v3041_v63 = vld [vmem:[#allocation3 + $0x908] sm:$0xff] }
 0x5fb   :  { %3847 = vmatprep.subr.bf16.mxu0 %v2993_v38  ;;  %4191 = vmatprep.subr.bf16.mxu1 %v2995_v54  ;;  %v3043_v38 = vld [vmem:[#allocation3 + $0x918] sm:$0xff]  ;;  %v3040_v54 = vld [vmem:[#allocation3 + $0x900] sm:$0xff] }
 0x5fe   :  { %3848 = vmatpush1.bf16.msra.mxu0 %v2992_v61  ;;  %4192 = vmatpush1.bf16.msra.mxu1 %v2994_v25  ;;  %v3042_v61 = vld [vmem:[#allocation3 + $0x910] sm:$0xff]  ;;  %v3049_v25 = vld [vmem:[#allocation3 + $0x948] sm:$0xff] }
 0x5ff   :  { %3849 = vmatprep.subr.bf16.mxu0 %v3001_v41  ;;  %4193 = vmatprep.subr.bf16.mxu1 %v3003_v8  ;;  %v3051_v41 = vld [vmem:[#allocation3 + $0x958] sm:$0xff]  ;;  %v3048_v8 = vld [vmem:[#allocation3 + $0x940] sm:$0xff] }
 0x602   :  { %3850 = vmatpush1.bf16.msra.mxu0 %v3000_v6  ;;  %4194 = vmatpush1.bf16.msra.mxu1 %v3002_v40  ;;  %v3050_v6 = vld [vmem:[#allocation3 + $0x950] sm:$0xff]  ;;  %v3057_v40 = vld [vmem:[#allocation3 + $0x988] sm:$0xff] }
 0x603   :  { %3862 = vmatprep.subr.bf16.mxu0 %v3009_v44  ;;  %4206 = vmatprep.subr.bf16.mxu1 %v3011_v45  ;;  %v3059_v44 = vld [vmem:[#allocation3 + $0x998] sm:$0xff]  ;;  %v3056_v45 = vld [vmem:[#allocation3 + $0x980] sm:$0xff] }
 0x605   :  { %3852 = vmatmul.mubr.bf16.vlgmr.msra.gmra.mrb[16].mxu0 %v8044_v52  ;;  %4196 = vmatmul.mubr.bf16.vlgmr.msra.gmra.mrb[20].mxu1 %v8044_v52 }
 0x606   :  { %3863 = vmatpush1.bf16.msra.mxu0 %v3008_v20  ;;  %4207 = vmatpush1.bf16.msra.mxu1 %v3010_v15  ;;  %v3058_v20 = vld [vmem:[#allocation3 + $0x990] sm:$0xff]  ;;  %v3065_v15 = vld [vmem:[#allocation3 + $0x9c8] sm:$0xff] }
 0x607   :  { %3864 = vmatprep.subr.bf16.mxu0 %v3017_v24  ;;  %4208 = vmatprep.subr.bf16.mxu1 %v3019_v27  ;;  %v3067_v24 = vld [vmem:[#allocation3 + $0x9d8] sm:$0xff]  ;;  %v3064_v27 = vld [vmem:[#allocation3 + $0x9c0] sm:$0xff] }
 0x608   :  { %3894 = vmatprep.mubr.bf16.mxu0 %v8050_v49  ;;  %4238 = vmatprep.mubr.bf16.mxu1 %v8050_v49 }
 0x60a   :  { %3865 = vmatpush1.bf16.msra.mxu0 %v3016_v16  ;;  %4209 = vmatpush1.bf16.msra.mxu1 %v3018_v12  ;;  %v3066_v16 = vld [vmem:[#allocation3 + $0x9d0] sm:$0xff]  ;;  %v3073_v12 = vld [vmem:[#allocation3 + $0xa08] sm:$0xff] }
 0x60b   :  { %3866 = vmatprep.subr.bf16.mxu0 %v3025_v22  ;;  %4210 = vmatprep.subr.bf16.mxu1 %v3027_v23  ;;  %v3075_v22 = vld [vmem:[#allocation3 + $0xa18] sm:$0xff]  ;;  %v3072_v23 = vld [vmem:[#allocation3 + $0xa00] sm:$0xff] }
 0x60e   :  { %3867 = vmatpush1.bf16.msra.mxu0 %v3024_v56  ;;  %4211 = vmatpush1.bf16.msra.mxu1 %v3026_v51  ;;  %v3074_v56 = vld [vmem:[#allocation3 + $0xa10] sm:$0xff]  ;;  %v3081_v51 = vld [vmem:[#allocation3 + $0xa48] sm:$0xff] }
 0x60f   :  { %3868 = vmatprep.subr.bf16.mxu0 %v3033_v59  ;;  %4212 = vmatprep.subr.bf16.mxu1 %v3035_v62  ;;  %v3083_v59 = vld [vmem:[#allocation3 + $0xa58] sm:$0xff]  ;;  %v3080_v62 = vld [vmem:[#allocation3 + $0xa40] sm:$0xff] }
 0x612   :  { %3869 = vmatpush1.bf16.msra.mxu0 %v3032_v53  ;;  %4213 = vmatpush1.bf16.msra.mxu1 %v3034_v5  ;;  %v3082_v53 = vld [vmem:[#allocation3 + $0xa50] sm:$0xff]  ;;  %v3089_v5 = vld [vmem:[#allocation3 + $0xa88] sm:$0xff] }
 0x613   :  { %3870 = vmatprep.subr.bf16.mxu0 %v3041_v63  ;;  %4214 = vmatprep.subr.bf16.mxu1 %v3043_v38  ;;  %v3091_v63 = vld [vmem:[#allocation3 + $0xa98] sm:$0xff]  ;;  %v3088_v38 = vld [vmem:[#allocation3 + $0xa80] sm:$0xff] }
 0x616   :  { %3871 = vmatpush1.bf16.msra.mxu0 %v3040_v54  ;;  %4215 = vmatpush1.bf16.msra.mxu1 %v3042_v61  ;;  %v3090_v54 = vld [vmem:[#allocation3 + $0xa90] sm:$0xff]  ;;  %v3097_v61 = vld [vmem:[#allocation3 + $0xac8] sm:$0xff] }
 0x617   :  { %3872 = vmatprep.subr.bf16.mxu0 %v3049_v25  ;;  %4216 = vmatprep.subr.bf16.mxu1 %v3051_v41  ;;  %v3099_v25 = vld [vmem:[#allocation3 + $0xad8] sm:$0xff]  ;;  %v3096_v41 = vld [vmem:[#allocation3 + $0xac0] sm:$0xff] }
 0x61a   :  { %3873 = vmatpush1.bf16.msra.mxu0 %v3048_v8  ;;  %4217 = vmatpush1.bf16.msra.mxu1 %v3050_v6  ;;  %v3098_v8 = vld [vmem:[#allocation3 + $0xad0] sm:$0xff]  ;;  %v3105_v6 = vld [vmem:[#allocation3 + $0xb08] sm:$0xff] }
 0x61b   :  { %3874 = vmatprep.subr.bf16.mxu0 %v3057_v40  ;;  %4218 = vmatprep.subr.bf16.mxu1 %v3059_v44  ;;  %v3107_v40 = vld [vmem:[#allocation3 + $0xb18] sm:$0xff]  ;;  %v3104_v44 = vld [vmem:[#allocation3 + $0xb00] sm:$0xff] }
 0x61e   :  { %3875 = vmatpush1.bf16.msra.mxu0 %v3056_v45  ;;  %4219 = vmatpush1.bf16.msra.mxu1 %v3058_v20  ;;  %v3106_v45 = vld [vmem:[#allocation3 + $0xb10] sm:$0xff]  ;;  %v3113_v20 = vld [vmem:[#allocation3 + $0xb48] sm:$0xff] }
 0x61f   :  { %3876 = vmatprep.subr.bf16.mxu0 %v3065_v15  ;;  %4220 = vmatprep.subr.bf16.mxu1 %v3067_v24  ;;  %v3115_v15 = vld [vmem:[#allocation3 + $0xb58] sm:$0xff]  ;;  %v3112_v24 = vld [vmem:[#allocation3 + $0xb40] sm:$0xff] }
 0x622   :  { %3877 = vmatpush1.bf16.msra.mxu0 %v3064_v27  ;;  %4221 = vmatpush1.bf16.msra.mxu1 %v3066_v16  ;;  %v3114_v27 = vld [vmem:[#allocation3 + $0xb50] sm:$0xff]  ;;  %v3121_v16 = vld [vmem:[#allocation3 + $0xb88] sm:$0xff] }
 0x623   :  { %3878 = vmatprep.subr.bf16.mxu0 %v3073_v12  ;;  %4222 = vmatprep.subr.bf16.mxu1 %v3075_v22  ;;  %v3123_v12 = vld [vmem:[#allocation3 + $0xb98] sm:$0xff]  ;;  %v3120_v22 = vld [vmem:[#allocation3 + $0xb80] sm:$0xff] }
 0x626   :  { %3879 = vmatpush1.bf16.msra.mxu0 %v3072_v23  ;;  %4223 = vmatpush1.bf16.msra.mxu1 %v3074_v56  ;;  %v3122_v23 = vld [vmem:[#allocation3 + $0xb90] sm:$0xff]  ;;  %v3129_v56 = vld [vmem:[#allocation3 + $0xbc8] sm:$0xff] }
 0x627   :  { %3880 = vmatprep.subr.bf16.mxu0 %v3081_v51  ;;  %4224 = vmatprep.subr.bf16.mxu1 %v3083_v59  ;;  %v3131_v51 = vld [vmem:[#allocation3 + $0xbd8] sm:$0xff]  ;;  %v3128_v59 = vld [vmem:[#allocation3 + $0xbc0] sm:$0xff] }
 0x62a   :  { %3881 = vmatpush1.bf16.msra.mxu0 %v3080_v62  ;;  %4225 = vmatpush1.bf16.msra.mxu1 %v3082_v53  ;;  %v3130_v62 = vld [vmem:[#allocation3 + $0xbd0] sm:$0xff]  ;;  %v3137_v53 = vld [vmem:[#allocation3 + $0xc08] sm:$0xff] }
 0x62b   :  { %3882 = vmatprep.subr.bf16.mxu0 %v3089_v5  ;;  %4226 = vmatprep.subr.bf16.mxu1 %v3091_v63  ;;  %v3139_v5 = vld [vmem:[#allocation3 + $0xc18] sm:$0xff]  ;;  %v8060_v63 = vpack.c.bf16 %v2720_v55, %v2704_v48  ;;  %v3146_v48 = vld [vmem:[#allocation3 + $0xc50] sm:$0xff] }
 0x62c   :  { %v3155_v55 = vld [vmem:[#allocation3 + $0xc98] sm:$0xff] }
 0x62e   :  { %3883 = vmatpush1.bf16.msra.mxu0 %v3088_v38  ;;  %4227 = vmatpush1.bf16.msra.mxu1 %v3090_v54  ;;  %v3136_v38 = vld [vmem:[#allocation3 + $0xc00] sm:$0xff]  ;;  %v3138_v54 = vld [vmem:[#allocation3 + $0xc10] sm:$0xff] }
 0x62f   :  { %3884 = vmatprep.subr.bf16.mxu0 %v3097_v61  ;;  %4228 = vmatprep.subr.bf16.mxu1 %v3099_v25  ;;  %v3145_v61 = vld [vmem:[#allocation3 + $0xc48] sm:$0xff]  ;;  %v3147_v25 = vld [vmem:[#allocation3 + $0xc58] sm:$0xff] }
 0x632   :  { %3885 = vmatpush1.bf16.msra.mxu0 %v3096_v41  ;;  %4229 = vmatpush1.bf16.msra.mxu1 %v3098_v8  ;;  %v8066_v41 = vpack.c.bf16 %v2723_v43, %v2707_v21  ;;  %v3154_v21 = vld [vmem:[#allocation3 + $0xc90] sm:$0xff]  ;;  %v3163_v43 = vld [vmem:[#allocation3 + $0xcd8] sm:$0xff]  ;;  %v3160_v8 = vld [vmem:[#allocation3 + $0xcc0] sm:$0xff] }
 0x633   :  { %3886 = vmatprep.subr.bf16.mxu0 %v3105_v6  ;;  %4230 = vmatprep.subr.bf16.mxu1 %v3107_v40  ;;  %v3162_v6 = vld [vmem:[#allocation3 + $0xcd0] sm:$0xff]  ;;  %v3169_v40 = vld [vmem:[#allocation3 + $0xd08] sm:$0xff] }
 0x636   :  { %3887 = vmatpush1.bf16.msra.mxu0 %v3104_v44  ;;  %4231 = vmatpush1.bf16.msra.mxu1 %v3106_v45  ;;  %v3171_v44 = vld [vmem:[#allocation3 + $0xd18] sm:$0xff]  ;;  %v3168_v45 = vld [vmem:[#allocation3 + $0xd00] sm:$0xff] }
 0x637   :  { %3888 = vmatprep.subr.bf16.mxu0 %v3113_v20  ;;  %4232 = vmatprep.subr.bf16.mxu1 %v3115_v15  ;;  %v3170_v20 = vld [vmem:[#allocation3 + $0xd10] sm:$0xff]  ;;  %v3177_v15 = vld [vmem:[#allocation3 + $0xd48] sm:$0xff] }
 0x63a   :  { %3889 = vmatpush1.bf16.msra.mxu0 %v3112_v24  ;;  %4233 = vmatpush1.bf16.msra.mxu1 %v3114_v27  ;;  %v3179_v24 = vld [vmem:[#allocation3 + $0xd58] sm:$0xff]  ;;  %v3176_v27 = vld [vmem:[#allocation3 + $0xd40] sm:$0xff] }
 0x63b   :  { %3890 = vmatprep.subr.bf16.mxu0 %v3121_v16  ;;  %4234 = vmatprep.subr.bf16.mxu1 %v3123_v12  ;;  %v3178_v16 = vld [vmem:[#allocation3 + $0xd50] sm:$0xff]  ;;  %v3185_v12 = vld [vmem:[#allocation3 + $0xd88] sm:$0xff] }
 0x63e   :  { %3891 = vmatpush1.bf16.msra.mxu0 %v3120_v22  ;;  %4235 = vmatpush1.bf16.msra.mxu1 %v3122_v23  ;;  %v3187_v22 = vld [vmem:[#allocation3 + $0xd98] sm:$0xff]  ;;  %v3184_v23 = vld [vmem:[#allocation3 + $0xd80] sm:$0xff] }
 0x63f   :  { %3892 = vmatprep.subr.bf16.mxu0 %v3129_v56  ;;  %4236 = vmatprep.subr.bf16.mxu1 %v3131_v51  ;;  %v3186_v56 = vld [vmem:[#allocation3 + $0xd90] sm:$0xff]  ;;  %v3193_v51 = vld [vmem:[#allocation3 + $0xdc8] sm:$0xff] }
 0x642   :  { %3893 = vmatpush1.bf16.msra.mxu0 %v3128_v59  ;;  %4237 = vmatpush1.bf16.msra.mxu1 %v3130_v62  ;;  %v3195_v59 = vld [vmem:[#allocation3 + $0xdd8] sm:$0xff]  ;;  %v3192_v62 = vld [vmem:[#allocation3 + $0xdc0] sm:$0xff] }
 0x643   :  { %3905 = vmatprep.subr.bf16.mxu0 %v3137_v53  ;;  %4249 = vmatprep.subr.bf16.mxu1 %v3139_v5  ;;  %v3194_v53 = vld [vmem:[#allocation3 + $0xdd0] sm:$0xff]  ;;  %v3201_v5 = vld [vmem:[#allocation3 + $0xe08] sm:$0xff] }
 0x645   :  { %3895 = vmatmul.mubr.bf16.vlgmr.msra.gmra.mrb[16].mxu0 %v8060_v63  ;;  %4239 = vmatmul.mubr.bf16.vlgmr.msra.gmra.mrb[20].mxu1 %v8060_v63 }
 0x646   :  { %3906 = vmatpush1.bf16.msra.mxu0 %v3136_v38  ;;  %4250 = vmatpush1.bf16.msra.mxu1 %v3138_v54  ;;  %v3203_v38 = vld [vmem:[#allocation3 + $0xe18] sm:$0xff]  ;;  %v3200_v54 = vld [vmem:[#allocation3 + $0xe00] sm:$0xff] }
 0x647   :  { %3907 = vmatprep.subr.bf16.mxu0 %v3145_v61  ;;  %4251 = vmatprep.subr.bf16.mxu1 %v3147_v25  ;;  %v3202_v61 = vld [vmem:[#allocation3 + $0xe10] sm:$0xff]  ;;  %v3209_v25 = vld [vmem:[#allocation3 + $0xe48] sm:$0xff] }
 0x648   :  { %3937 = vmatprep.mubr.bf16.mxu0 %v8066_v41  ;;  %4281 = vmatprep.mubr.bf16.mxu1 %v8066_v41 }
 0x64a   :  { %3908 = vmatpush1.bf16.msra.mxu0 %v3144_v39  ;;  %4252 = vmatpush1.bf16.msra.mxu1 %v3146_v48  ;;  %v3211_v39 = vld [vmem:[#allocation3 + $0xe58] sm:$0xff]  ;;  %v3208_v48 = vld [vmem:[#allocation3 + $0xe40] sm:$0xff] }
 0x64b   :  { %3909 = vmatprep.subr.bf16.mxu0 %v3153_v57  ;;  %4253 = vmatprep.subr.bf16.mxu1 %v3155_v55  ;;  %v3210_v57 = vld [vmem:[#allocation3 + $0xe50] sm:$0xff]  ;;  %v3217_v55 = vld [vmem:[#allocation3 + $0xe88] sm:$0xff] }
 0x64e   :  { %3910 = vmatpush1.bf16.msra.mxu0 %v3152_v32  ;;  %4254 = vmatpush1.bf16.msra.mxu1 %v3154_v21  ;;  %v3219_v32 = vld [vmem:[#allocation3 + $0xe98] sm:$0xff]  ;;  %v3216_v21 = vld [vmem:[#allocation3 + $0xe80] sm:$0xff] }
 0x64f   :  { %3911 = vmatprep.subr.bf16.mxu0 %v3161_v36  ;;  %4255 = vmatprep.subr.bf16.mxu1 %v3163_v43  ;;  %v3218_v36 = vld [vmem:[#allocation3 + $0xe90] sm:$0xff]  ;;  %v3225_v43 = vld [vmem:[#allocation3 + $0xec8] sm:$0xff] }
 0x652   :  { %3912 = vmatpush1.bf16.msra.mxu0 %v3160_v8  ;;  %4256 = vmatpush1.bf16.msra.mxu1 %v3162_v6  ;;  %v3227_v8 = vld [vmem:[#allocation3 + $0xed8] sm:$0xff]  ;;  %v3224_v6 = vld [vmem:[#allocation3 + $0xec0] sm:$0xff] }
 0x653   :  { %3913 = vmatprep.subr.bf16.mxu0 %v3169_v40  ;;  %4257 = vmatprep.subr.bf16.mxu1 %v3171_v44  ;;  %v3226_v40 = vld [vmem:[#allocation3 + $0xed0] sm:$0xff]  ;;  %v3233_v44 = vld [vmem:[#allocation3 + $0xf08] sm:$0xff] }
 0x656   :  { %3914 = vmatpush1.bf16.msra.mxu0 %v3168_v45  ;;  %4258 = vmatpush1.bf16.msra.mxu1 %v3170_v20  ;;  %v3235_v45 = vld [vmem:[#allocation3 + $0xf18] sm:$0xff]  ;;  %v3232_v20 = vld [vmem:[#allocation3 + $0xf00] sm:$0xff] }
 0x657   :  { %3915 = vmatprep.subr.bf16.mxu0 %v3177_v15  ;;  %4259 = vmatprep.subr.bf16.mxu1 %v3179_v24  ;;  %v3234_v15 = vld [vmem:[#allocation3 + $0xf10] sm:$0xff]  ;;  %v3241_v24 = vld [vmem:[#allocation3 + $0xf48] sm:$0xff] }
 0x65a   :  { %3916 = vmatpush1.bf16.msra.mxu0 %v3176_v27  ;;  %4260 = vmatpush1.bf16.msra.mxu1 %v3178_v16  ;;  %v3243_v27 = vld [vmem:[#allocation3 + $0xf58] sm:$0xff]  ;;  %v3240_v16 = vld [vmem:[#allocation3 + $0xf40] sm:$0xff] }
 0x65b   :  { %3917 = vmatprep.subr.bf16.mxu0 %v3185_v12  ;;  %4261 = vmatprep.subr.bf16.mxu1 %v3187_v22  ;;  %v3242_v12 = vld [vmem:[#allocation3 + $0xf50] sm:$0xff]  ;;  %v3249_v22 = vld [vmem:[#allocation3 + $0xf88] sm:$0xff] }
 0x65e   :  { %3918 = vmatpush1.bf16.msra.mxu0 %v3184_v23  ;;  %4262 = vmatpush1.bf16.msra.mxu1 %v3186_v56  ;;  %v3251_v23 = vld [vmem:[#allocation3 + $0xf98] sm:$0xff]  ;;  %v3248_v56 = vld [vmem:[#allocation3 + $0xf80] sm:$0xff] }
 0x65f   :  { %3919 = vmatprep.subr.bf16.mxu0 %v3193_v51  ;;  %4263 = vmatprep.subr.bf16.mxu1 %v3195_v59  ;;  %v3250_v51 = vld [vmem:[#allocation3 + $0xf90] sm:$0xff]  ;;  %v3257_v59 = vld [vmem:[#allocation3 + $0xfc8] sm:$0xff] }
 0x662   :  { %3920 = vmatpush1.bf16.msra.mxu0 %v3192_v62  ;;  %4264 = vmatpush1.bf16.msra.mxu1 %v3194_v53  ;;  %v3259_v62 = vld [vmem:[#allocation3 + $0xfd8] sm:$0xff]  ;;  %v3256_v53 = vld [vmem:[#allocation3 + $0xfc0] sm:$0xff] }
 0x663   :  { %3921 = vmatprep.subr.bf16.mxu0 %v3201_v5  ;;  %4265 = vmatprep.subr.bf16.mxu1 %v3203_v38  ;;  %v3258_v5 = vld [vmem:[#allocation3 + $0xfd0] sm:$0xff]  ;;  %v3265_v38 = vld [vmem:[#allocation3 + $0x1008] sm:$0xff] }
 0x666   :  { %3922 = vmatpush1.bf16.msra.mxu0 %v3200_v54  ;;  %4266 = vmatpush1.bf16.msra.mxu1 %v3202_v61  ;;  %v3267_v54 = vld [vmem:[#allocation3 + $0x1018] sm:$0xff]  ;;  %v8076_v61 = vpack.c.bf16 %v2722_v34, %v2706_v31  ;;  %v3274_v31 = vld [vmem:[#allocation3 + $0x1050] sm:$0xff] }
 0x667   :  { %3923 = vmatprep.subr.bf16.mxu0 %v3209_v25  ;;  %4267 = vmatprep.subr.bf16.mxu1 %v3211_v39  ;;  %v3264_v25 = vld [vmem:[#allocation3 + $0x1000] sm:$0xff]  ;;  %v3266_v39 = vld [vmem:[#allocation3 + $0x1010] sm:$0xff]  ;;  %v3283_v34 = vld [vmem:[#allocation3 + $0x1098] sm:$0xff] }
 0x66a   :  { %3924 = vmatpush1.bf16.msra.mxu0 %v3208_v48  ;;  %4268 = vmatpush1.bf16.msra.mxu1 %v3210_v57  ;;  %v3273_v48 = vld [vmem:[#allocation3 + $0x1048] sm:$0xff]  ;;  %v3275_v57 = vld [vmem:[#allocation3 + $0x1058] sm:$0xff] }
 0x66b   :  { %3925 = vmatprep.subr.bf16.mxu0 %v3217_v55  ;;  %4269 = vmatprep.subr.bf16.mxu1 %v3219_v32  ;;  %v8082_v55 = vpack.c.bf16 %v2725_v13, %v2709_v7  ;;  %v3282_v7 = vld [vmem:[#allocation3 + $0x1090] sm:$0xff]  ;;  %v3291_v13 = vld [vmem:[#allocation3 + $0x10d8] sm:$0xff]  ;;  %v3288_v32 = vld [vmem:[#allocation3 + $0x10c0] sm:$0xff] }
 0x66e   :  { %3926 = vmatpush1.bf16.msra.mxu0 %v3216_v21  ;;  %4270 = vmatpush1.bf16.msra.mxu1 %v3218_v36  ;;  %v3290_v21 = vld [vmem:[#allocation3 + $0x10d0] sm:$0xff]  ;;  %v3297_v36 = vld [vmem:[#allocation3 + $0x1108] sm:$0xff] }
 0x66f   :  { %3927 = vmatprep.subr.bf16.mxu0 %v3225_v43  ;;  %4271 = vmatprep.subr.bf16.mxu1 %v3227_v8  ;;  %v3299_v43 = vld [vmem:[#allocation3 + $0x1118] sm:$0xff]  ;;  %v3296_v8 = vld [vmem:[#allocation3 + $0x1100] sm:$0xff] }
 0x672   :  { %3928 = vmatpush1.bf16.msra.mxu0 %v3224_v6  ;;  %4272 = vmatpush1.bf16.msra.mxu1 %v3226_v40  ;;  %v3298_v6 = vld [vmem:[#allocation3 + $0x1110] sm:$0xff]  ;;  %v3305_v40 = vld [vmem:[#allocation3 + $0x1148] sm:$0xff] }
 0x673   :  { %3929 = vmatprep.subr.bf16.mxu0 %v3233_v44  ;;  %4273 = vmatprep.subr.bf16.mxu1 %v3235_v45  ;;  %v3307_v44 = vld [vmem:[#allocation3 + $0x1158] sm:$0xff]  ;;  %v3304_v45 = vld [vmem:[#allocation3 + $0x1140] sm:$0xff] }
 0x676   :  { %3930 = vmatpush1.bf16.msra.mxu0 %v3232_v20  ;;  %4274 = vmatpush1.bf16.msra.mxu1 %v3234_v15  ;;  %v3306_v20 = vld [vmem:[#allocation3 + $0x1150] sm:$0xff]  ;;  %v3313_v15 = vld [vmem:[#allocation3 + $0x1188] sm:$0xff] }
 0x677   :  { %3931 = vmatprep.subr.bf16.mxu0 %v3241_v24  ;;  %4275 = vmatprep.subr.bf16.mxu1 %v3243_v27  ;;  %v3315_v24 = vld [vmem:[#allocation3 + $0x1198] sm:$0xff]  ;;  %v3312_v27 = vld [vmem:[#allocation3 + $0x1180] sm:$0xff] }
 0x67a   :  { %3932 = vmatpush1.bf16.msra.mxu0 %v3240_v16  ;;  %4276 = vmatpush1.bf16.msra.mxu1 %v3242_v12  ;;  %v3314_v16 = vld [vmem:[#allocation3 + $0x1190] sm:$0xff]  ;;  %v3321_v12 = vld [vmem:[#allocation3 + $0x11c8] sm:$0xff] }
 0x67b   :  { %3933 = vmatprep.subr.bf16.mxu0 %v3249_v22  ;;  %4277 = vmatprep.subr.bf16.mxu1 %v3251_v23  ;;  %v3323_v22 = vld [vmem:[#allocation3 + $0x11d8] sm:$0xff]  ;;  %v3320_v23 = vld [vmem:[#allocation3 + $0x11c0] sm:$0xff] }
 0x67e   :  { %3934 = vmatpush1.bf16.msra.mxu0 %v3248_v56  ;;  %4278 = vmatpush1.bf16.msra.mxu1 %v3250_v51  ;;  %v3322_v56 = vld [vmem:[#allocation3 + $0x11d0] sm:$0xff]  ;;  %v3329_v51 = vld [vmem:[#allocation3 + $0x1208] sm:$0xff] }
 0x67f   :  { %3935 = vmatprep.subr.bf16.mxu0 %v3257_v59  ;;  %4279 = vmatprep.subr.bf16.mxu1 %v3259_v62  ;;  %v3331_v59 = vld [vmem:[#allocation3 + $0x1218] sm:$0xff]  ;;  %v3328_v62 = vld [vmem:[#allocation3 + $0x1200] sm:$0xff] }
 0x682   :  { %3936 = vmatpush1.bf16.msra.mxu0 %v3256_v53  ;;  %4280 = vmatpush1.bf16.msra.mxu1 %v3258_v5  ;;  %v3330_v53 = vld [vmem:[#allocation3 + $0x1210] sm:$0xff]  ;;  %v3337_v5 = vld [vmem:[#allocation3 + $0x1248] sm:$0xff] }
 0x683   :  { %3948 = vmatprep.subr.bf16.mxu0 %v3265_v38  ;;  %4292 = vmatprep.subr.bf16.mxu1 %v3267_v54  ;;  %v3339_v38 = vld [vmem:[#allocation3 + $0x1258] sm:$0xff]  ;;  %v3336_v54 = vld [vmem:[#allocation3 + $0x1240] sm:$0xff] }
 0x685   :  { %3938 = vmatmul.mubr.bf16.vlgmr.msra.gmra.mrb[16].mxu0 %v8076_v61  ;;  %4282 = vmatmul.mubr.bf16.vlgmr.msra.gmra.mrb[20].mxu1 %v8076_v61 }
 0x686   :  { %3949 = vmatpush1.bf16.msra.mxu0 %v3264_v25  ;;  %4293 = vmatpush1.bf16.msra.mxu1 %v3266_v39  ;;  %v3338_v25 = vld [vmem:[#allocation3 + $0x1250] sm:$0xff]  ;;  %v3345_v39 = vld [vmem:[#allocation3 + $0x1288] sm:$0xff] }
 0x687   :  { %3950 = vmatprep.subr.bf16.mxu0 %v3273_v48  ;;  %4294 = vmatprep.subr.bf16.mxu1 %v3275_v57  ;;  %v3347_v48 = vld [vmem:[#allocation3 + $0x1298] sm:$0xff]  ;;  %v3344_v57 = vld [vmem:[#allocation3 + $0x1280] sm:$0xff] }
 0x688   :  { %3980 = vmatprep.mubr.bf16.mxu0 %v8082_v55  ;;  %4324 = vmatprep.mubr.bf16.mxu1 %v8082_v55 }
 0x68a   :  { %3951 = vmatpush1.bf16.msra.mxu0 %v3272_v17  ;;  %4295 = vmatpush1.bf16.msra.mxu1 %v3274_v31  ;;  %v3346_v17 = vld [vmem:[#allocation3 + $0x1290] sm:$0xff]  ;;  %v3353_v31 = vld [vmem:[#allocation3 + $0x12c8] sm:$0xff] }
 0x68b   :  { %3952 = vmatprep.subr.bf16.mxu0 %v3281_v33  ;;  %4296 = vmatprep.subr.bf16.mxu1 %v3283_v34  ;;  %v3355_v33 = vld [vmem:[#allocation3 + $0x12d8] sm:$0xff]  ;;  %v3352_v34 = vld [vmem:[#allocation3 + $0x12c0] sm:$0xff] }
 0x68e   :  { %3953 = vmatpush1.bf16.msra.mxu0 %v3280_v46  ;;  %4297 = vmatpush1.bf16.msra.mxu1 %v3282_v7  ;;  %v3354_v46 = vld [vmem:[#allocation3 + $0x12d0] sm:$0xff]  ;;  %v3361_v7 = vld [vmem:[#allocation3 + $0x1308] sm:$0xff] }
 0x68f   :  { %3954 = vmatprep.subr.bf16.mxu0 %v3289_v18  ;;  %4298 = vmatprep.subr.bf16.mxu1 %v3291_v13  ;;  %v3363_v18 = vld [vmem:[#allocation3 + $0x1318] sm:$0xff]  ;;  %v3360_v13 = vld [vmem:[#allocation3 + $0x1300] sm:$0xff] }
 0x692   :  { %3955 = vmatpush1.bf16.msra.mxu0 %v3288_v32  ;;  %4299 = vmatpush1.bf16.msra.mxu1 %v3290_v21  ;;  %v3362_v32 = vld [vmem:[#allocation3 + $0x1310] sm:$0xff]  ;;  %v3369_v21 = vld [vmem:[#allocation3 + $0x1348] sm:$0xff] }
 0x693   :  { %3956 = vmatprep.subr.bf16.mxu0 %v3297_v36  ;;  %4300 = vmatprep.subr.bf16.mxu1 %v3299_v43  ;;  %v3371_v36 = vld [vmem:[#allocation3 + $0x1358] sm:$0xff]  ;;  %v3368_v43 = vld [vmem:[#allocation3 + $0x1340] sm:$0xff] }
 0x696   :  { %3957 = vmatpush1.bf16.msra.mxu0 %v3296_v8  ;;  %4301 = vmatpush1.bf16.msra.mxu1 %v3298_v6  ;;  %v3370_v8 = vld [vmem:[#allocation3 + $0x1350] sm:$0xff]  ;;  %v3377_v6 = vld [vmem:[#allocation3 + $0x1388] sm:$0xff] }
 0x697   :  { %3958 = vmatprep.subr.bf16.mxu0 %v3305_v40  ;;  %4302 = vmatprep.subr.bf16.mxu1 %v3307_v44  ;;  %v3379_v40 = vld [vmem:[#allocation3 + $0x1398] sm:$0xff]  ;;  %v3376_v44 = vld [vmem:[#allocation3 + $0x1380] sm:$0xff] }
 0x69a   :  { %3959 = vmatpush1.bf16.msra.mxu0 %v3304_v45  ;;  %4303 = vmatpush1.bf16.msra.mxu1 %v3306_v20  ;;  %v3378_v45 = vld [vmem:[#allocation3 + $0x1390] sm:$0xff]  ;;  %v3385_v20 = vld [vmem:[#allocation3 + $0x13c8] sm:$0xff] }
 0x69b   :  { %3960 = vmatprep.subr.bf16.mxu0 %v3313_v15  ;;  %4304 = vmatprep.subr.bf16.mxu1 %v3315_v24  ;;  %v3387_v15 = vld [vmem:[#allocation3 + $0x13d8] sm:$0xff]  ;;  %v3384_v24 = vld [vmem:[#allocation3 + $0x13c0] sm:$0xff] }
 0x69e   :  { %3961 = vmatpush1.bf16.msra.mxu0 %v3312_v27  ;;  %4305 = vmatpush1.bf16.msra.mxu1 %v3314_v16  ;;  %v3386_v27 = vld [vmem:[#allocation3 + $0x13d0] sm:$0xff]  ;;  %v3393_v16 = vld [vmem:[#allocation3 + $0x1408] sm:$0xff] }
 0x69f   :  { %3962 = vmatprep.subr.bf16.mxu0 %v3321_v12  ;;  %4306 = vmatprep.subr.bf16.mxu1 %v3323_v22  ;;  %v3395_v12 = vld [vmem:[#allocation3 + $0x1418] sm:$0xff]  ;;  %v8092_v22 = vpack.c.bf16 %v2724_v35, %v2708_v10  ;;  %v3402_v10 = vld [vmem:[#allocation3 + $0x1450] sm:$0xff] }
 0x6a0   :  { %v3411_v35 = vld [vmem:[#allocation3 + $0x1498] sm:$0xff] }
 0x6a2   :  { %3963 = vmatpush1.bf16.msra.mxu0 %v3320_v23  ;;  %4307 = vmatpush1.bf16.msra.mxu1 %v3322_v56  ;;  %v3392_v23 = vld [vmem:[#allocation3 + $0x1400] sm:$0xff]  ;;  %v3394_v56 = vld [vmem:[#allocation3 + $0x1410] sm:$0xff] }
 0x6a3   :  { %3964 = vmatprep.subr.bf16.mxu0 %v3329_v51  ;;  %4308 = vmatprep.subr.bf16.mxu1 %v3331_v59  ;;  %v3401_v51 = vld [vmem:[#allocation3 + $0x1448] sm:$0xff]  ;;  %v3403_v59 = vld [vmem:[#allocation3 + $0x1458] sm:$0xff] }
 0x6a6   :  { %3965 = vmatpush1.bf16.msra.mxu0 %v3328_v62  ;;  %4309 = vmatpush1.bf16.msra.mxu1 %v3330_v53  ;;  %v8098_v62 = vpack.c.bf16 %v2727_v11, %v2711_v3  ;;  %v3410_v3 = vld [vmem:[#allocation3 + $0x1490] sm:$0xff]  ;;  %v3419_v11 = vld [vmem:[#allocation3 + $0x14d8] sm:$0xff]  ;;  %v3416_v53 = vld [vmem:[#allocation3 + $0x14c0] sm:$0xff] }
 0x6a7   :  { %3966 = vmatprep.subr.bf16.mxu0 %v3337_v5  ;;  %4310 = vmatprep.subr.bf16.mxu1 %v3339_v38  ;;  %v3418_v5 = vld [vmem:[#allocation3 + $0x14d0] sm:$0xff]  ;;  %v3425_v38 = vld [vmem:[#allocation3 + $0x1508] sm:$0xff] }
 0x6aa   :  { %3967 = vmatpush1.bf16.msra.mxu0 %v3336_v54  ;;  %4311 = vmatpush1.bf16.msra.mxu1 %v3338_v25  ;;  %v3427_v54 = vld [vmem:[#allocation3 + $0x1518] sm:$0xff]  ;;  %v3424_v25 = vld [vmem:[#allocation3 + $0x1500] sm:$0xff] }
 0x6ab   :  { %3968 = vmatprep.subr.bf16.mxu0 %v3345_v39  ;;  %4312 = vmatprep.subr.bf16.mxu1 %v3347_v48  ;;  %v3426_v39 = vld [vmem:[#allocation3 + $0x1510] sm:$0xff]  ;;  %v3433_v48 = vld [vmem:[#allocation3 + $0x1548] sm:$0xff] }
 0x6ae   :  { %3969 = vmatpush1.bf16.msra.mxu0 %v3344_v57  ;;  %4313 = vmatpush1.bf16.msra.mxu1 %v3346_v17  ;;  %v3435_v57 = vld [vmem:[#allocation3 + $0x1558] sm:$0xff]  ;;  %v3432_v17 = vld [vmem:[#allocation3 + $0x1540] sm:$0xff] }
 0x6af   :  { %3970 = vmatprep.subr.bf16.mxu0 %v3353_v31  ;;  %4314 = vmatprep.subr.bf16.mxu1 %v3355_v33  ;;  %v3434_v31 = vld [vmem:[#allocation3 + $0x1550] sm:$0xff]  ;;  %v3441_v33 = vld [vmem:[#allocation3 + $0x1588] sm:$0xff] }
 0x6b2   :  { %3971 = vmatpush1.bf16.msra.mxu0 %v3352_v34  ;;  %4315 = vmatpush1.bf16.msra.mxu1 %v3354_v46  ;;  %v3443_v34 = vld [vmem:[#allocation3 + $0x1598] sm:$0xff]  ;;  %v3440_v46 = vld [vmem:[#allocation3 + $0x1580] sm:$0xff] }
 0x6b3   :  { %3972 = vmatprep.subr.bf16.mxu0 %v3361_v7  ;;  %4316 = vmatprep.subr.bf16.mxu1 %v3363_v18  ;;  %v3442_v7 = vld [vmem:[#allocation3 + $0x1590] sm:$0xff]  ;;  %v3449_v18 = vld [vmem:[#allocation3 + $0x15c8] sm:$0xff] }
 0x6b6   :  { %3973 = vmatpush1.bf16.msra.mxu0 %v3360_v13  ;;  %4317 = vmatpush1.bf16.msra.mxu1 %v3362_v32  ;;  %v3451_v13 = vld [vmem:[#allocation3 + $0x15d8] sm:$0xff]  ;;  %v3448_v32 = vld [vmem:[#allocation3 + $0x15c0] sm:$0xff] }
 0x6b7   :  { %3974 = vmatprep.subr.bf16.mxu0 %v3369_v21  ;;  %4318 = vmatprep.subr.bf16.mxu1 %v3371_v36  ;;  %v3450_v21 = vld [vmem:[#allocation3 + $0x15d0] sm:$0xff]  ;;  %v3457_v36 = vld [vmem:[#allocation3 + $0x1608] sm:$0xff] }
 0x6ba   :  { %3975 = vmatpush1.bf16.msra.mxu0 %v3368_v43  ;;  %4319 = vmatpush1.bf16.msra.mxu1 %v3370_v8  ;;  %v3459_v43 = vld [vmem:[#allocation3 + $0x1618] sm:$0xff]  ;;  %v3456_v8 = vld [vmem:[#allocation3 + $0x1600] sm:$0xff] }
 0x6bb   :  { %3976 = vmatprep.subr.bf16.mxu0 %v3377_v6  ;;  %4320 = vmatprep.subr.bf16.mxu1 %v3379_v40  ;;  %v3458_v6 = vld [vmem:[#allocation3 + $0x1610] sm:$0xff]  ;;  %v3465_v40 = vld [vmem:[#allocation3 + $0x1648] sm:$0xff] }
 0x6be   :  { %3977 = vmatpush1.bf16.msra.mxu0 %v3376_v44  ;;  %4321 = vmatpush1.bf16.msra.mxu1 %v3378_v45  ;;  %v3467_v44 = vld [vmem:[#allocation3 + $0x1658] sm:$0xff]  ;;  %v3464_v45 = vld [vmem:[#allocation3 + $0x1640] sm:$0xff] }
 0x6bf   :  { %3978 = vmatprep.subr.bf16.mxu0 %v3385_v20  ;;  %4322 = vmatprep.subr.bf16.mxu1 %v3387_v15  ;;  %v3466_v20 = vld [vmem:[#allocation3 + $0x1650] sm:$0xff]  ;;  %v3473_v15 = vld [vmem:[#allocation3 + $0x1688] sm:$0xff] }
 0x6c2   :  { %3979 = vmatpush1.bf16.msra.mxu0 %v3384_v24  ;;  %4323 = vmatpush1.bf16.msra.mxu1 %v3386_v27  ;;  %v3475_v24 = vld [vmem:[#allocation3 + $0x1698] sm:$0xff]  ;;  %v3472_v27 = vld [vmem:[#allocation3 + $0x1680] sm:$0xff] }
 0x6c3   :  { %3991 = vmatprep.subr.bf16.mxu0 %v3393_v16  ;;  %4335 = vmatprep.subr.bf16.mxu1 %v3395_v12  ;;  %v3474_v16 = vld [vmem:[#allocation3 + $0x1690] sm:$0xff]  ;;  %v3481_v12 = vld [vmem:[#allocation3 + $0x16c8] sm:$0xff] }
 0x6c5   :  { %3981 = vmatmul.mubr.bf16.vlgmr.msra.gmra.mrb[16].mxu0 %v8092_v22  ;;  %4325 = vmatmul.mubr.bf16.vlgmr.msra.gmra.mrb[20].mxu1 %v8092_v22 }
 0x6c6   :  { %3992 = vmatpush1.bf16.msra.mxu0 %v3392_v23  ;;  %4336 = vmatpush1.bf16.msra.mxu1 %v3394_v56  ;;  %v3483_v23 = vld [vmem:[#allocation3 + $0x16d8] sm:$0xff]  ;;  %v3480_v56 = vld [vmem:[#allocation3 + $0x16c0] sm:$0xff] }
 0x6c7   :  { %3993 = vmatprep.subr.bf16.mxu0 %v3401_v51  ;;  %4337 = vmatprep.subr.bf16.mxu1 %v3403_v59  ;;  %v3482_v51 = vld [vmem:[#allocation3 + $0x16d0] sm:$0xff]  ;;  %v3489_v59 = vld [vmem:[#allocation3 + $0x1708] sm:$0xff] }
 0x6c8   :  { %4023 = vmatprep.mubr.bf16.mxu0 %v8098_v62  ;;  %4367 = vmatprep.mubr.bf16.mxu1 %v8098_v62 }
 0x6ca   :  { %3994 = vmatpush1.bf16.msra.mxu0 %v3400_v50  ;;  %4338 = vmatpush1.bf16.msra.mxu1 %v3402_v10  ;;  %v3491_v50 = vld [vmem:[#allocation3 + $0x1718] sm:$0xff]  ;;  %v3488_v10 = vld [vmem:[#allocation3 + $0x1700] sm:$0xff] }
 0x6cb   :  { %3995 = vmatprep.subr.bf16.mxu0 %v3409_v14  ;;  %4339 = vmatprep.subr.bf16.mxu1 %v3411_v35  ;;  %v3490_v14 = vld [vmem:[#allocation3 + $0x1710] sm:$0xff]  ;;  %v3497_v35 = vld [vmem:[#allocation3 + $0x1748] sm:$0xff] }
 0x6ce   :  { %3996 = vmatpush1.bf16.msra.mxu0 %v3408_v47  ;;  %4340 = vmatpush1.bf16.msra.mxu1 %v3410_v3  ;;  %v3499_v47 = vld [vmem:[#allocation3 + $0x1758] sm:$0xff]  ;;  %v3496_v3 = vld [vmem:[#allocation3 + $0x1740] sm:$0xff] }
 0x6cf   :  { %3997 = vmatprep.subr.bf16.mxu0 %v3417_v1  ;;  %4341 = vmatprep.subr.bf16.mxu1 %v3419_v11  ;;  %v3498_v1 = vld [vmem:[#allocation3 + $0x1750] sm:$0xff]  ;;  %v3505_v11 = vld [vmem:[#allocation3 + $0x1788] sm:$0xff] }
 0x6d2   :  { %3998 = vmatpush1.bf16.msra.mxu0 %v3416_v53  ;;  %4342 = vmatpush1.bf16.msra.mxu1 %v3418_v5  ;;  %v3507_v53 = vld [vmem:[#allocation3 + $0x1798] sm:$0xff]  ;;  %v3504_v5 = vld [vmem:[#allocation3 + $0x1780] sm:$0xff] }
 0x6d3   :  { %3999 = vmatprep.subr.bf16.mxu0 %v3425_v38  ;;  %4343 = vmatprep.subr.bf16.mxu1 %v3427_v54  ;;  %v3506_v38 = vld [vmem:[#allocation3 + $0x1790] sm:$0xff]  ;;  %v3513_v54 = vld [vmem:[#allocation3 + $0x17c8] sm:$0xff] }
 0x6d6   :  { %4000 = vmatpush1.bf16.msra.mxu0 %v3424_v25  ;;  %4344 = vmatpush1.bf16.msra.mxu1 %v3426_v39  ;;  %v3515_v25 = vld [vmem:[#allocation3 + $0x17d8] sm:$0xff]  ;;  %v3512_v39 = vld [vmem:[#allocation3 + $0x17c0] sm:$0xff] }
 0x6d7   :  { %4001 = vmatprep.subr.bf16.mxu0 %v3433_v48  ;;  %4345 = vmatprep.subr.bf16.mxu1 %v3435_v57  ;;  %v3514_v48 = vld [vmem:[#allocation3 + $0x17d0] sm:$0xff]  ;;  %v3521_v57 = vld [vmem:[#allocation3 + $0x1808] sm:$0xff] }
 0x6da   :  { %4002 = vmatpush1.bf16.msra.mxu0 %v3432_v17  ;;  %4346 = vmatpush1.bf16.msra.mxu1 %v3434_v31  ;;  %v3523_v17 = vld [vmem:[#allocation3 + $0x1818] sm:$0xff]  ;;  %v8562_v31 = vmax.f32 %v7979_v37, 0.0  ;;  %v3528_v37 = vld [vmem:[#allocation3 + $0x1840] sm:$0xff] }
 0x6db   :  { %4003 = vmatprep.subr.bf16.mxu0 %v3441_v33  ;;  %4347 = vmatprep.subr.bf16.mxu1 %v3443_v34  ;;  %v8563_v33 = vmax.f32 %v7985_v60, 0.0  ;;  %v3530_v60 = vld [vmem:[#allocation3 + $0x1850] sm:$0xff] }
 0x6dd   :  { %v8108_v34 = vpack.c.bf16 %v8563_v33, %v8562_v31  ;;  %v3602_v31 = vld [vmem:[#allocation3 + $0x1a90] sm:$0xff]  ;;  %v3609_v33 = vld [vmem:[#allocation3 + $0x1ac8] sm:$0xff] }
 0x6de   :  { %4004 = vmatpush1.bf16.msra.mxu0 %v3440_v46  ;;  %4348 = vmatpush1.bf16.msra.mxu1 %v3442_v7  ;;  %v3520_v46 = vld [vmem:[#allocation3 + $0x1800] sm:$0xff]  ;;  %v3522_v7 = vld [vmem:[#allocation3 + $0x1810] sm:$0xff] }
 0x6df   :  { %4005 = vmatprep.subr.bf16.mxu0 %v3449_v18  ;;  %4349 = vmatprep.subr.bf16.mxu1 %v3451_v13  ;;  %v3529_v18 = vld [vmem:[#allocation3 + $0x1848] sm:$0xff]  ;;  %v3531_v13 = vld [vmem:[#allocation3 + $0x1858] sm:$0xff] }
 0x6e2   :  { %4006 = vmatpush1.bf16.msra.mxu0 %v3448_v32  ;;  %4350 = vmatpush1.bf16.msra.mxu1 %v3450_v21  ;;  %v8564_v32 = vmax.f32 %v7995_v4, 0.0  ;;  %v8565_v21 = vmax.f32 %v8001_v19, 0.0  ;;  %v3536_v4 = vld [vmem:[#allocation3 + $0x1880] sm:$0xff]  ;;  %v3538_v19 = vld [vmem:[#allocation3 + $0x1890] sm:$0xff] }
 0x6e3   :  { %4007 = vmatprep.subr.bf16.mxu0 %v3457_v36  ;;  %4351 = vmatprep.subr.bf16.mxu1 %v3459_v43  ;;  %v3537_v43 = vld [vmem:[#allocation3 + $0x1888] sm:$0xff] }
 0x6e4   :  { %v8114_v36 = vpack.c.bf16 %v8565_v21, %v8564_v32  ;;  %v3619_v32 = vld [vmem:[#allocation3 + $0x1b18] sm:$0xff]  ;;  %v3616_v21 = vld [vmem:[#allocation3 + $0x1b00] sm:$0xff] }
 0x6e6   :  { %4008 = vmatpush1.bf16.msra.mxu0 %v3456_v8  ;;  %4352 = vmatpush1.bf16.msra.mxu1 %v3458_v6  ;;  %v3539_v8 = vld [vmem:[#allocation3 + $0x1898] sm:$0xff]  ;;  %v3545_v6 = vld [vmem:[#allocation3 + $0x18c8] sm:$0xff] }
 0x6e7   :  { %4009 = vmatprep.subr.bf16.mxu0 %v3465_v40  ;;  %4353 = vmatprep.subr.bf16.mxu1 %v3467_v44  ;;  %v3547_v40 = vld [vmem:[#allocation3 + $0x18d8] sm:$0xff]  ;;  %v3544_v44 = vld [vmem:[#allocation3 + $0x18c0] sm:$0xff] }
 0x6ea   :  { %4010 = vmatpush1.bf16.msra.mxu0 %v3464_v45  ;;  %4354 = vmatpush1.bf16.msra.mxu1 %v3466_v20  ;;  %v3546_v45 = vld [vmem:[#allocation3 + $0x18d0] sm:$0xff]  ;;  %v3553_v20 = vld [vmem:[#allocation3 + $0x1908] sm:$0xff] }
 0x6eb   :  { %4011 = vmatprep.subr.bf16.mxu0 %v3473_v15  ;;  %4355 = vmatprep.subr.bf16.mxu1 %v3475_v24  ;;  %v3555_v15 = vld [vmem:[#allocation3 + $0x1918] sm:$0xff]  ;;  %v3552_v24 = vld [vmem:[#allocation3 + $0x1900] sm:$0xff] }
 0x6ee   :  { %4012 = vmatpush1.bf16.msra.mxu0 %v3472_v27  ;;  %4356 = vmatpush1.bf16.msra.mxu1 %v3474_v16  ;;  %v3554_v27 = vld [vmem:[#allocation3 + $0x1910] sm:$0xff]  ;;  %v3561_v16 = vld [vmem:[#allocation3 + $0x1948] sm:$0xff] }
 0x6ef   :  { %4013 = vmatprep.subr.bf16.mxu0 %v3481_v12  ;;  %4357 = vmatprep.subr.bf16.mxu1 %v3483_v23  ;;  %v3563_v12 = vld [vmem:[#allocation3 + $0x1958] sm:$0xff]  ;;  %v3560_v23 = vld [vmem:[#allocation3 + $0x1940] sm:$0xff] }
 0x6f2   :  { %4014 = vmatpush1.bf16.msra.mxu0 %v3480_v56  ;;  %4358 = vmatpush1.bf16.msra.mxu1 %v3482_v51  ;;  %v3562_v56 = vld [vmem:[#allocation3 + $0x1950] sm:$0xff]  ;;  %v3569_v51 = vld [vmem:[#allocation3 + $0x1988] sm:$0xff] }
 0x6f3   :  { %4015 = vmatprep.subr.bf16.mxu0 %v3489_v59  ;;  %4359 = vmatprep.subr.bf16.mxu1 %v3491_v50  ;;  %v3571_v59 = vld [vmem:[#allocation3 + $0x1998] sm:$0xff]  ;;  %v3568_v50 = vld [vmem:[#allocation3 + $0x1980] sm:$0xff] }
 0x6f6   :  { %4016 = vmatpush1.bf16.msra.mxu0 %v3488_v10  ;;  %4360 = vmatpush1.bf16.msra.mxu1 %v3490_v14  ;;  %v3570_v10 = vld [vmem:[#allocation3 + $0x1990] sm:$0xff]  ;;  %v3577_v14 = vld [vmem:[#allocation3 + $0x19c8] sm:$0xff] }
 0x6f7   :  { %4017 = vmatprep.subr.bf16.mxu0 %v3497_v35  ;;  %4361 = vmatprep.subr.bf16.mxu1 %v3499_v47  ;;  %v3579_v35 = vld [vmem:[#allocation3 + $0x19d8] sm:$0xff]  ;;  %v3576_v47 = vld [vmem:[#allocation3 + $0x19c0] sm:$0xff] }
 0x6fa   :  { %4018 = vmatpush1.bf16.msra.mxu0 %v3496_v3  ;;  %4362 = vmatpush1.bf16.msra.mxu1 %v3498_v1  ;;  %v3578_v3 = vld [vmem:[#allocation3 + $0x19d0] sm:$0xff]  ;;  %v3585_v1 = vld [vmem:[#allocation3 + $0x1a08] sm:$0xff] }
 0x6fb   :  { %4019 = vmatprep.subr.bf16.mxu0 %v3505_v11  ;;  %4363 = vmatprep.subr.bf16.mxu1 %v3507_v53  ;;  %v3587_v11 = vld [vmem:[#allocation3 + $0x1a18] sm:$0xff]  ;;  %v3584_v53 = vld [vmem:[#allocation3 + $0x1a00] sm:$0xff] }
 0x6fe   :  { %4020 = vmatpush1.bf16.msra.mxu0 %v3504_v5  ;;  %4364 = vmatpush1.bf16.msra.mxu1 %v3506_v38  ;;  %v3586_v5 = vld [vmem:[#allocation3 + $0x1a10] sm:$0xff]  ;;  %v3593_v38 = vld [vmem:[#allocation3 + $0x1a48] sm:$0xff] }
 0x6ff   :  { %4021 = vmatprep.subr.bf16.mxu0 %v3513_v54  ;;  %4365 = vmatprep.subr.bf16.mxu1 %v3515_v25  ;;  %v3595_v54 = vld [vmem:[#allocation3 + $0x1a58] sm:$0xff]  ;;  %v3592_v25 = vld [vmem:[#allocation3 + $0x1a40] sm:$0xff] }
 0x702   :  { %4022 = vmatpush1.bf16.msra.mxu0 %v3512_v39  ;;  %4366 = vmatpush1.bf16.msra.mxu1 %v3514_v48  ;;  %v3594_v39 = vld [vmem:[#allocation3 + $0x1a50] sm:$0xff]  ;;  %v3601_v48 = vld [vmem:[#allocation3 + $0x1a88] sm:$0xff] }
 0x703   :  { %4034 = vmatprep.subr.bf16.mxu0 %v3521_v57  ;;  %4378 = vmatprep.subr.bf16.mxu1 %v3523_v17  ;;  %v3603_v57 = vld [vmem:[#allocation3 + $0x1a98] sm:$0xff]  ;;  %v3600_v17 = vld [vmem:[#allocation3 + $0x1a80] sm:$0xff] }
 0x705   :  { %4024 = vmatmul.mubr.bf16.vlgmr.msra.gmra.mrb[16].mxu0 %v8108_v34  ;;  %4368 = vmatmul.mubr.bf16.vlgmr.msra.gmra.mrb[20].mxu1 %v8108_v34 }
 0x706   :  { %4035 = vmatpush1.bf16.msra.mxu0 %v3520_v46  ;;  %4379 = vmatpush1.bf16.msra.mxu1 %v3522_v7  ;;  %v3611_v46 = vld [vmem:[#allocation3 + $0x1ad8] sm:$0xff]  ;;  %v3608_v7 = vld [vmem:[#allocation3 + $0x1ac0] sm:$0xff] }
 0x707   :  { %4036 = vmatprep.subr.bf16.mxu0 %v3529_v18  ;;  %4380 = vmatprep.subr.bf16.mxu1 %v3531_v13  ;;  %v3610_v18 = vld [vmem:[#allocation3 + $0x1ad0] sm:$0xff]  ;;  %v3617_v13 = vld [vmem:[#allocation3 + $0x1b08] sm:$0xff] }
 0x708   :  { %4066 = vmatprep.mubr.bf16.mxu0 %v8114_v36  ;;  %4410 = vmatprep.mubr.bf16.mxu1 %v8114_v36 }
 0x70a   :  { %4037 = vmatpush1.bf16.msra.mxu0 %v3528_v37  ;;  %4381 = vmatpush1.bf16.msra.mxu1 %v3530_v60  ;;  %v3618_v37 = vld [vmem:[#allocation3 + $0x1b10] sm:$0xff]  ;;  %v3625_v60 = vld [vmem:[#allocation3 + $0x1b48] sm:$0xff] }
 0x70b   :  { %4038 = vmatprep.subr.bf16.mxu0 %v3537_v43  ;;  %4382 = vmatprep.subr.bf16.mxu1 %v3539_v8  ;;  %v3627_v43 = vld [vmem:[#allocation3 + $0x1b58] sm:$0xff]  ;;  %v3624_v8 = vld [vmem:[#allocation3 + $0x1b40] sm:$0xff] }
 0x70e   :  { %4039 = vmatpush1.bf16.msra.mxu0 %v3536_v4  ;;  %4383 = vmatpush1.bf16.msra.mxu1 %v3538_v19  ;;  %v3626_v4 = vld [vmem:[#allocation3 + $0x1b50] sm:$0xff]  ;;  %v3633_v19 = vld [vmem:[#allocation3 + $0x1b88] sm:$0xff] }
 0x70f   :  { %4040 = vmatprep.subr.bf16.mxu0 %v3545_v6  ;;  %4384 = vmatprep.subr.bf16.mxu1 %v3547_v40  ;;  %v3635_v6 = vld [vmem:[#allocation3 + $0x1b98] sm:$0xff]  ;;  %v3632_v40 = vld [vmem:[#allocation3 + $0x1b80] sm:$0xff] }
 0x712   :  { %4041 = vmatpush1.bf16.msra.mxu0 %v3544_v44  ;;  %4385 = vmatpush1.bf16.msra.mxu1 %v3546_v45  ;;  %v3634_v44 = vld [vmem:[#allocation3 + $0x1b90] sm:$0xff]  ;;  %v3641_v45 = vld [vmem:[#allocation3 + $0x1bc8] sm:$0xff] }
 0x713   :  { %4042 = vmatprep.subr.bf16.mxu0 %v3553_v20  ;;  %4386 = vmatprep.subr.bf16.mxu1 %v3555_v15  ;;  %v3643_v20 = vld [vmem:[#allocation3 + $0x1bd8] sm:$0xff]  ;;  %v3640_v15 = vld [vmem:[#allocation3 + $0x1bc0] sm:$0xff] }
 0x716   :  { %4043 = vmatpush1.bf16.msra.mxu0 %v3552_v24  ;;  %4387 = vmatpush1.bf16.msra.mxu1 %v3554_v27  ;;  %v3642_v24 = vld [vmem:[#allocation3 + $0x1bd0] sm:$0xff]  ;;  %v3649_v27 = vld [vmem:[#allocation3 + $0x1c08] sm:$0xff] }
 0x717   :  { %4044 = vmatprep.subr.bf16.mxu0 %v3561_v16  ;;  %4388 = vmatprep.subr.bf16.mxu1 %v3563_v12  ;;  %v3651_v16 = vld [vmem:[#allocation3 + $0x1c18] sm:$0xff]  ;;  %v8566_v12 = vmax.f32 %v7992_v28, 0.0  ;;  %v3656_v28 = vld [vmem:[#allocation3 + $0x1c40] sm:$0xff] }
 0x71a   :  { %4045 = vmatpush1.bf16.msra.mxu0 %v3560_v23  ;;  %4389 = vmatpush1.bf16.msra.mxu1 %v3562_v56  ;;  %v8567_v23 = vmax.f32 %v7998_v9, 0.0  ;;  %v3658_v9 = vld [vmem:[#allocation3 + $0x1c50] sm:$0xff] }
 0x71b   :  { %4046 = vmatprep.subr.bf16.mxu0 %v3569_v51  ;;  %4390 = vmatprep.subr.bf16.mxu1 %v3571_v59  ;;  %v3648_v51 = vld [vmem:[#allocation3 + $0x1c00] sm:$0xff]  ;;  %v3650_v59 = vld [vmem:[#allocation3 + $0x1c10] sm:$0xff] }
 0x71c   :  { %v8124_v56 = vpack.c.bf16 %v8567_v23, %v8566_v12  ;;  %v3739_v12 = vld [vmem:[#allocation3 + $0x1ed8] sm:$0xff]  ;;  %v3736_v23 = vld [vmem:[#allocation3 + $0x1ec0] sm:$0xff] }
 0x71e   :  { %4047 = vmatpush1.bf16.msra.mxu0 %v3568_v50  ;;  %4391 = vmatpush1.bf16.msra.mxu1 %v3570_v10  ;;  %v3657_v50 = vld [vmem:[#allocation3 + $0x1c48] sm:$0xff]  ;;  %v3659_v10 = vld [vmem:[#allocation3 + $0x1c58] sm:$0xff] }
 0x71f   :  { %4048 = vmatprep.subr.bf16.mxu0 %v3577_v14  ;;  %4392 = vmatprep.subr.bf16.mxu1 %v3579_v35  ;;  %v8568_v14 = vmax.f32 %v8007_v29, 0.0  ;;  %v8569_v35 = vmax.f32 %v8013_v2, 0.0  ;;  %v3664_v29 = vld [vmem:[#allocation3 + $0x1c80] sm:$0xff]  ;;  %v3666_v2 = vld [vmem:[#allocation3 + $0x1c90] sm:$0xff] }
 0x722   :  { %4049 = vmatpush1.bf16.msra.mxu0 %v3576_v47  ;;  %4393 = vmatpush1.bf16.msra.mxu1 %v3578_v3  ;;  %v8130_v47 = vpack.c.bf16 %v8569_v35, %v8568_v14  ;;  %v3665_v3 = vld [vmem:[#allocation3 + $0x1c88] sm:$0xff]  ;;  %v3746_v14 = vld [vmem:[#allocation3 + $0x1f10] sm:$0xff] }
 0x723   :  { %4050 = vmatprep.subr.bf16.mxu0 %v3585_v1  ;;  %4394 = vmatprep.subr.bf16.mxu1 %v3587_v11  ;;  %v3667_v1 = vld [vmem:[#allocation3 + $0x1c98] sm:$0xff]  ;;  %v3673_v11 = vld [vmem:[#allocation3 + $0x1cc8] sm:$0xff] }
 0x724   :  { %v3753_v35 = vld [vmem:[#allocation3 + $0x1f48] sm:$0xff] }
 0x726   :  { %4051 = vmatpush1.bf16.msra.mxu0 %v3584_v53  ;;  %4395 = vmatpush1.bf16.msra.mxu1 %v3586_v5  ;;  %v3675_v53 = vld [vmem:[#allocation3 + $0x1cd8] sm:$0xff]  ;;  %v3672_v5 = vld [vmem:[#allocation3 + $0x1cc0] sm:$0xff] }
 0x727   :  { %4052 = vmatprep.subr.bf16.mxu0 %v3593_v38  ;;  %4396 = vmatprep.subr.bf16.mxu1 %v3595_v54  ;;  %v3674_v38 = vld [vmem:[#allocation3 + $0x1cd0] sm:$0xff]  ;;  %v3681_v54 = vld [vmem:[#allocation3 + $0x1d08] sm:$0xff] }
 0x72a   :  { %4053 = vmatpush1.bf16.msra.mxu0 %v3592_v25  ;;  %4397 = vmatpush1.bf16.msra.mxu1 %v3594_v39  ;;  %v3683_v25 = vld [vmem:[#allocation3 + $0x1d18] sm:$0xff]  ;;  %v3680_v39 = vld [vmem:[#allocation3 + $0x1d00] sm:$0xff] }
 0x72b   :  { %4054 = vmatprep.subr.bf16.mxu0 %v3601_v48  ;;  %4398 = vmatprep.subr.bf16.mxu1 %v3603_v57  ;;  %v3682_v48 = vld [vmem:[#allocation3 + $0x1d10] sm:$0xff]  ;;  %v3689_v57 = vld [vmem:[#allocation3 + $0x1d48] sm:$0xff] }
 0x72e   :  { %4055 = vmatpush1.bf16.msra.mxu0 %v3600_v17  ;;  %4399 = vmatpush1.bf16.msra.mxu1 %v3602_v31  ;;  %v3691_v17 = vld [vmem:[#allocation3 + $0x1d58] sm:$0xff]  ;;  %v3688_v31 = vld [vmem:[#allocation3 + $0x1d40] sm:$0xff] }
 0x72f   :  { %4056 = vmatprep.subr.bf16.mxu0 %v3609_v33  ;;  %4400 = vmatprep.subr.bf16.mxu1 %v3611_v46  ;;  %v3690_v33 = vld [vmem:[#allocation3 + $0x1d50] sm:$0xff]  ;;  %v3697_v46 = vld [vmem:[#allocation3 + $0x1d88] sm:$0xff] }
 0x732   :  { %4057 = vmatpush1.bf16.msra.mxu0 %v3608_v7  ;;  %4401 = vmatpush1.bf16.msra.mxu1 %v3610_v18  ;;  %v3699_v7 = vld [vmem:[#allocation3 + $0x1d98] sm:$0xff]  ;;  %v3696_v18 = vld [vmem:[#allocation3 + $0x1d80] sm:$0xff] }
 0x733   :  { %4058 = vmatprep.subr.bf16.mxu0 %v3617_v13  ;;  %4402 = vmatprep.subr.bf16.mxu1 %v3619_v32  ;;  %v3698_v13 = vld [vmem:[#allocation3 + $0x1d90] sm:$0xff]  ;;  %v3705_v32 = vld [vmem:[#allocation3 + $0x1dc8] sm:$0xff] }
 0x736   :  { %4059 = vmatpush1.bf16.msra.mxu0 %v3616_v21  ;;  %4403 = vmatpush1.bf16.msra.mxu1 %v3618_v37  ;;  %v3707_v21 = vld [vmem:[#allocation3 + $0x1dd8] sm:$0xff]  ;;  %v3704_v37 = vld [vmem:[#allocation3 + $0x1dc0] sm:$0xff] }
 0x737   :  { %4060 = vmatprep.subr.bf16.mxu0 %v3625_v60  ;;  %4404 = vmatprep.subr.bf16.mxu1 %v3627_v43  ;;  %v3706_v60 = vld [vmem:[#allocation3 + $0x1dd0] sm:$0xff]  ;;  %v3713_v43 = vld [vmem:[#allocation3 + $0x1e08] sm:$0xff] }
 0x73a   :  { %4061 = vmatpush1.bf16.msra.mxu0 %v3624_v8  ;;  %4405 = vmatpush1.bf16.msra.mxu1 %v3626_v4  ;;  %v3715_v8 = vld [vmem:[#allocation3 + $0x1e18] sm:$0xff]  ;;  %v3712_v4 = vld [vmem:[#allocation3 + $0x1e00] sm:$0xff] }
 0x73b   :  { %4062 = vmatprep.subr.bf16.mxu0 %v3633_v19  ;;  %4406 = vmatprep.subr.bf16.mxu1 %v3635_v6  ;;  %v3714_v19 = vld [vmem:[#allocation3 + $0x1e10] sm:$0xff]  ;;  %v3721_v6 = vld [vmem:[#allocation3 + $0x1e48] sm:$0xff] }
 0x73e   :  { %4063 = vmatpush1.bf16.msra.mxu0 %v3632_v40  ;;  %4407 = vmatpush1.bf16.msra.mxu1 %v3634_v44  ;;  %v3723_v40 = vld [vmem:[#allocation3 + $0x1e58] sm:$0xff]  ;;  %v3720_v44 = vld [vmem:[#allocation3 + $0x1e40] sm:$0xff] }
 0x73f   :  { %4064 = vmatprep.subr.bf16.mxu0 %v3641_v45  ;;  %4408 = vmatprep.subr.bf16.mxu1 %v3643_v20  ;;  %v3722_v45 = vld [vmem:[#allocation3 + $0x1e50] sm:$0xff]  ;;  %v3729_v20 = vld [vmem:[#allocation3 + $0x1e88] sm:$0xff] }
 0x742   :  { %4065 = vmatpush1.bf16.msra.mxu0 %v3640_v15  ;;  %4409 = vmatpush1.bf16.msra.mxu1 %v3642_v24  ;;  %v3731_v15 = vld [vmem:[#allocation3 + $0x1e98] sm:$0xff]  ;;  %v3728_v24 = vld [vmem:[#allocation3 + $0x1e80] sm:$0xff] }
 0x743   :  { %4077 = vmatprep.subr.bf16.mxu0 %v3649_v27  ;;  %4421 = vmatprep.subr.bf16.mxu1 %v3651_v16  ;;  %v3730_v27 = vld [vmem:[#allocation3 + $0x1e90] sm:$0xff]  ;;  %v3737_v16 = vld [vmem:[#allocation3 + $0x1ec8] sm:$0xff] }
 0x745   :  { %4067 = vmatmul.mubr.bf16.vlgmr.msra.gmra.mrb[16].mxu0 %v8124_v56  ;;  %4411 = vmatmul.mubr.bf16.vlgmr.msra.gmra.mrb[20].mxu1 %v8124_v56 }
 0x746   :  { %4078 = vmatpush1.bf16.msra.mxu0 %v3648_v51  ;;  %4422 = vmatpush1.bf16.msra.mxu1 %v3650_v59  ;;  %v3738_v51 = vld [vmem:[#allocation3 + $0x1ed0] sm:$0xff]  ;;  %v3745_v59 = vld [vmem:[#allocation3 + $0x1f08] sm:$0xff] }
 0x747   :  { %4079 = vmatprep.subr.bf16.mxu0 %v3657_v50  ;;  %4423 = vmatprep.subr.bf16.mxu1 %v3659_v10  ;;  %v3747_v50 = vld [vmem:[#allocation3 + $0x1f18] sm:$0xff]  ;;  %v3744_v10 = vld [vmem:[#allocation3 + $0x1f00] sm:$0xff] }
 0x748   :  { %4109 = vmatprep.mubr.bf16.mxu0 %v8130_v47  ;;  %4453 = vmatprep.mubr.bf16.mxu1 %v8130_v47 }
 0x74a   :  { %4080 = vmatpush1.bf16.msra.mxu0 %v3656_v28  ;;  %4424 = vmatpush1.bf16.msra.mxu1 %v3658_v9  ;;  %v3755_v28 = vld [vmem:[#allocation3 + $0x1f58] sm:$0xff]  ;;  %v3752_v9 = vld [vmem:[#allocation3 + $0x1f40] sm:$0xff] }
 0x74b   :  { %4081 = vmatprep.subr.bf16.mxu0 %v3665_v3  ;;  %4425 = vmatprep.subr.bf16.mxu1 %v3667_v1  ;;  %v3754_v3 = vld [vmem:[#allocation3 + $0x1f50] sm:$0xff]  ;;  %v3761_v1 = vld [vmem:[#allocation3 + $0x1f88] sm:$0xff] }
 0x74e   :  { %4082 = vmatpush1.bf16.msra.mxu0 %v3664_v29  ;;  %4426 = vmatpush1.bf16.msra.mxu1 %v3666_v2  ;;  %v3763_v29 = vld [vmem:[#allocation3 + $0x1f98] sm:$0xff]  ;;  %v3760_v2 = vld [vmem:[#allocation3 + $0x1f80] sm:$0xff] }
 0x74f   :  { %4083 = vmatprep.subr.bf16.mxu0 %v3673_v11  ;;  %4427 = vmatprep.subr.bf16.mxu1 %v3675_v53  ;;  %v3762_v11 = vld [vmem:[#allocation3 + $0x1f90] sm:$0xff]  ;;  %v3769_v53 = vld [vmem:[#allocation3 + $0x1fc8] sm:$0xff] }
 0x752   :  { %4084 = vmatpush1.bf16.msra.mxu0 %v3672_v5  ;;  %4428 = vmatpush1.bf16.msra.mxu1 %v3674_v38  ;;  %v3771_v5 = vld [vmem:[#allocation3 + $0x1fd8] sm:$0xff]  ;;  %v3768_v38 = vld [vmem:[#allocation3 + $0x1fc0] sm:$0xff] }
 0x753   :  { %4085 = vmatprep.subr.bf16.mxu0 %v3681_v54  ;;  %4429 = vmatprep.subr.bf16.mxu1 %v3683_v25  ;;  %v3770_v54 = vld [vmem:[#allocation3 + $0x1fd0] sm:$0xff]  ;;  %v2757_v25 = vld [vmem:[#allocation3 + $0x28] sm:$0xff] }
 0x756   :  { %4086 = vmatpush1.bf16.msra.mxu0 %v3680_v39  ;;  %4430 = vmatpush1.bf16.msra.mxu1 %v3682_v48  ;;  %v2759_v39 = vld [vmem:[#allocation3 + $0x38] sm:$0xff]  ;;  %v8570_v48 = vmax.f32 %v8004_v26, 0.0  ;;  %v2764_v26 = vld [vmem:[#allocation3 + $0x60] sm:$0xff] }
 0x757   :  { %4087 = vmatprep.subr.bf16.mxu0 %v3689_v57  ;;  %4431 = vmatprep.subr.bf16.mxu1 %v3691_v17  ;;  %v8571_v57 = vmax.f32 %v8010_v0, 0.0  ;;  %v2766_v0 = vld [vmem:[#allocation3 + $0x70] sm:$0xff] }
 0x759   :  { %v8140_v17 = vpack.c.bf16 %v8571_v57, %v8570_v48  ;;  %v2855_v48 = vld [vmem:[#allocation3 + $0x338] sm:$0xff]  ;;  %v2852_v57 = vld [vmem:[#allocation3 + $0x320] sm:$0xff] }
 0x75a   :  { %4088 = vmatpush1.bf16.msra.mxu0 %v3688_v31  ;;  %4432 = vmatpush1.bf16.msra.mxu1 %v3690_v33  ;;  %v2756_v31 = vld [vmem:[#allocation3 + $0x20] sm:$0xff]  ;;  %v2758_v33 = vld [vmem:[#allocation3 + $0x30] sm:$0xff] }
 0x75b   :  { %4089 = vmatprep.subr.bf16.mxu0 %v3697_v46  ;;  %4433 = vmatprep.subr.bf16.mxu1 %v3699_v7  ;;  %v2765_v46 = vld [vmem:[#allocation3 + $0x68] sm:$0xff]  ;;  %v2767_v7 = vld [vmem:[#allocation3 + $0x78] sm:$0xff] }
 0x75e   :  { %4090 = vmatpush1.bf16.msra.mxu0 %v3696_v18  ;;  %4434 = vmatpush1.bf16.msra.mxu1 %v3698_v13  ;;  %v2773_v18 = vld [vmem:[#allocation3 + $0xa8] sm:$0xff]  ;;  %v2775_v13 = vld [vmem:[#allocation3 + $0xb8] sm:$0xff] }
 0x75f   :  { %4091 = vmatprep.subr.bf16.mxu0 %v3705_v32  ;;  %4435 = vmatprep.subr.bf16.mxu1 %v3707_v21  ;;  %v2772_v32 = vld [vmem:[#allocation3 + $0xa0] sm:$0xff]  ;;  %v2774_v21 = vld [vmem:[#allocation3 + $0xb0] sm:$0xff] }
 0x762   :  { %4092 = vmatpush1.bf16.msra.mxu0 %v3704_v37  ;;  %4436 = vmatpush1.bf16.msra.mxu1 %v3706_v60  ;;  %v2781_v37 = vld [vmem:[#allocation3 + $0xe8] sm:$0xff]  ;;  %v2783_v60 = vld [vmem:[#allocation3 + $0xf8] sm:$0xff] }
 0x763   :  { %4093 = vmatprep.subr.bf16.mxu0 %v3713_v43  ;;  %4437 = vmatprep.subr.bf16.mxu1 %v3715_v8  ;;  %v2780_v43 = vld [vmem:[#allocation3 + $0xe0] sm:$0xff]  ;;  %v2782_v8 = vld [vmem:[#allocation3 + $0xf0] sm:$0xff] }
 0x766   :  { %4094 = vmatpush1.bf16.msra.mxu0 %v3712_v4  ;;  %4438 = vmatpush1.bf16.msra.mxu1 %v3714_v19  ;;  %v2789_v4 = vld [vmem:[#allocation3 + $0x128] sm:$0xff]  ;;  %v2791_v19 = vld [vmem:[#allocation3 + $0x138] sm:$0xff] }
 0x767   :  { %4095 = vmatprep.subr.bf16.mxu0 %v3721_v6  ;;  %4439 = vmatprep.subr.bf16.mxu1 %v3723_v40  ;;  %v2790_v6 = vld [vmem:[#allocation3 + $0x130] sm:$0xff]  ;;  %v2797_v40 = vld [vmem:[#allocation3 + $0x168] sm:$0xff] }
 0x76a   :  { %4096 = vmatpush1.bf16.msra.mxu0 %v3720_v44  ;;  %4440 = vmatpush1.bf16.msra.mxu1 %v3722_v45  ;;  %v2799_v44 = vld [vmem:[#allocation3 + $0x178] sm:$0xff]  ;;  %v2796_v45 = vld [vmem:[#allocation3 + $0x160] sm:$0xff] }
 0x76b   :  { %4097 = vmatprep.subr.bf16.mxu0 %v3729_v20  ;;  %4441 = vmatprep.subr.bf16.mxu1 %v3731_v15  ;;  %v2798_v20 = vld [vmem:[#allocation3 + $0x170] sm:$0xff]  ;;  %v2805_v15 = vld [vmem:[#allocation3 + $0x1a8] sm:$0xff] }
 0x76e   :  { %4098 = vmatpush1.bf16.msra.mxu0 %v3728_v24  ;;  %4442 = vmatpush1.bf16.msra.mxu1 %v3730_v27  ;;  %v2807_v24 = vld [vmem:[#allocation3 + $0x1b8] sm:$0xff]  ;;  %v2804_v27 = vld [vmem:[#allocation3 + $0x1a0] sm:$0xff] }
 0x76f   :  { %4099 = vmatprep.subr.bf16.mxu0 %v3737_v16  ;;  %4443 = vmatprep.subr.bf16.mxu1 %v3739_v12  ;;  %v2806_v16 = vld [vmem:[#allocation3 + $0x1b0] sm:$0xff]  ;;  %v2813_v12 = vld [vmem:[#allocation3 + $0x1e8] sm:$0xff] }
 0x772   :  { %4100 = vmatpush1.bf16.msra.mxu0 %v3736_v23  ;;  %4444 = vmatpush1.bf16.msra.mxu1 %v3738_v51  ;;  %v2815_v23 = vld [vmem:[#allocation3 + $0x1f8] sm:$0xff]  ;;  %v2812_v51 = vld [vmem:[#allocation3 + $0x1e0] sm:$0xff] }
 0x773   :  { %4101 = vmatprep.subr.bf16.mxu0 %v3745_v59  ;;  %4445 = vmatprep.subr.bf16.mxu1 %v3747_v50  ;;  %v2814_v59 = vld [vmem:[#allocation3 + $0x1f0] sm:$0xff]  ;;  %v2821_v50 = vld [vmem:[#allocation3 + $0x228] sm:$0xff] }
 0x776   :  { %4102 = vmatpush1.bf16.msra.mxu0 %v3744_v10  ;;  %4446 = vmatpush1.bf16.msra.mxu1 %v3746_v14  ;;  %v2823_v10 = vld [vmem:[#allocation3 + $0x238] sm:$0xff]  ;;  %v2820_v14 = vld [vmem:[#allocation3 + $0x220] sm:$0xff] }
 0x777   :  { %4103 = vmatprep.subr.bf16.mxu0 %v3753_v35  ;;  %4447 = vmatprep.subr.bf16.mxu1 %v3755_v28  ;;  %v2822_v35 = vld [vmem:[#allocation3 + $0x230] sm:$0xff]  ;;  %v2829_v28 = vld [vmem:[#allocation3 + $0x268] sm:$0xff] }
 0x77a   :  { %4104 = vmatpush1.bf16.msra.mxu0 %v3752_v9  ;;  %4448 = vmatpush1.bf16.msra.mxu1 %v3754_v3  ;;  %v2831_v9 = vld [vmem:[#allocation3 + $0x278] sm:$0xff]  ;;  %v2828_v3 = vld [vmem:[#allocation3 + $0x260] sm:$0xff] }
 0x77b   :  { %4105 = vmatprep.subr.bf16.mxu0 %v3761_v1  ;;  %4449 = vmatprep.subr.bf16.mxu1 %v3763_v29  ;;  %v2830_v1 = vld [vmem:[#allocation3 + $0x270] sm:$0xff]  ;;  %v2837_v29 = vld [vmem:[#allocation3 + $0x2a8] sm:$0xff] }
 0x77e   :  { %4106 = vmatpush1.bf16.msra.mxu0 %v3760_v2  ;;  %4450 = vmatpush1.bf16.msra.mxu1 %v3762_v11  ;;  %v2839_v2 = vld [vmem:[#allocation3 + $0x2b8] sm:$0xff]  ;;  %v2836_v11 = vld [vmem:[#allocation3 + $0x2a0] sm:$0xff] }
 0x77f   :  { %4107 = vmatprep.subr.bf16.mxu0 %v3769_v53  ;;  %4451 = vmatprep.subr.bf16.mxu1 %v3771_v5  ;;  %v2838_v53 = vld [vmem:[#allocation3 + $0x2b0] sm:$0xff]  ;;  %v2845_v5 = vld [vmem:[#allocation3 + $0x2e8] sm:$0xff] }
 0x782   :  { %4108 = vmatpush1.bf16.msra.mxu0 %v3768_v38  ;;  %4452 = vmatpush1.bf16.msra.mxu1 %v3770_v54  ;;  %v2847_v38 = vld [vmem:[#allocation3 + $0x2f8] sm:$0xff]  ;;  %v2844_v54 = vld [vmem:[#allocation3 + $0x2e0] sm:$0xff] }
 0x783   :  { %4464 = vmatprep.subr.bf16.mxu0 %v2757_v25  ;;  %4808 = vmatprep.subr.bf16.mxu1 %v2759_v39  ;;  %v2846_v25 = vld [vmem:[#allocation3 + $0x2f0] sm:$0xff]  ;;  %v2853_v39 = vld [vmem:[#allocation3 + $0x328] sm:$0xff] }
 0x785   :  { %4110 = vmatmul.mubr.bf16.vlgmr.msra.gmra.mrb[16].mxu0 %v8140_v17  ;;  %4454 = vmatmul.mubr.bf16.vlgmr.msra.gmra.mrb[20].mxu1 %v8140_v17 }
 0x786   :  { %4465 = vmatpush1.bf16.msra.mxu0 %v2756_v31  ;;  %4809 = vmatpush1.bf16.msra.mxu1 %v2758_v33  ;;  %v2854_v31 = vld [vmem:[#allocation3 + $0x330] sm:$0xff]  ;;  %v2861_v33 = vld [vmem:[#allocation3 + $0x368] sm:$0xff] }
 0x787   :  { %4466 = vmatprep.subr.bf16.mxu0 %v2765_v46  ;;  %4810 = vmatprep.subr.bf16.mxu1 %v2767_v7  ;;  %v2863_v46 = vld [vmem:[#allocation3 + $0x378] sm:$0xff]  ;;  %v2860_v7 = vld [vmem:[#allocation3 + $0x360] sm:$0xff] }
 0x788   :  { %4496 = vmatprep.mubr.bf16.mxu0 %v8020_v58  ;;  %4840 = vmatprep.mubr.bf16.mxu1 %v8020_v58  ;;  %v2788_v58 = vld [vmem:[#allocation3 + $0x120] sm:$0xff] }
 0x78a   :  { %4467 = vmatpush1.bf16.msra.mxu0 %v2764_v26  ;;  %4811 = vmatpush1.bf16.msra.mxu1 %v2766_v0  ;;  %v2862_v26 = vld [vmem:[#allocation3 + $0x370] sm:$0xff]  ;;  %v2869_v0 = vld [vmem:[#allocation3 + $0x3a8] sm:$0xff] }
 0x78b   :  { %4468 = vmatprep.subr.bf16.mxu0 %v2773_v18  ;;  %4812 = vmatprep.subr.bf16.mxu1 %v2775_v13  ;;  %v2871_v18 = vld [vmem:[#allocation3 + $0x3b8] sm:$0xff]  ;;  %v2868_v13 = vld [vmem:[#allocation3 + $0x3a0] sm:$0xff] }
 0x78e   :  { %4469 = vmatpush1.bf16.msra.mxu0 %v2772_v32  ;;  %4813 = vmatpush1.bf16.msra.mxu1 %v2774_v21  ;;  %v2870_v32 = vld [vmem:[#allocation3 + $0x3b0] sm:$0xff]  ;;  %v2877_v21 = vld [vmem:[#allocation3 + $0x3e8] sm:$0xff] }
 0x78f   :  { %4470 = vmatprep.subr.bf16.mxu0 %v2781_v37  ;;  %4814 = vmatprep.subr.bf16.mxu1 %v2783_v60  ;;  %v2879_v37 = vld [vmem:[#allocation3 + $0x3f8] sm:$0xff]  ;;  %v2876_v60 = vld [vmem:[#allocation3 + $0x3e0] sm:$0xff] }
 0x792   :  { %4471 = vmatpush1.bf16.msra.mxu0 %v2780_v43  ;;  %4815 = vmatpush1.bf16.msra.mxu1 %v2782_v8  ;;  %v2878_v43 = vld [vmem:[#allocation3 + $0x3f0] sm:$0xff]  ;;  %v2885_v8 = vld [vmem:[#allocation3 + $0x428] sm:$0xff] }
 0x793   :  { %4472 = vmatprep.subr.bf16.mxu0 %v2789_v4  ;;  %4816 = vmatprep.subr.bf16.mxu1 %v2791_v19  ;;  %v2887_v4 = vld [vmem:[#allocation3 + $0x438] sm:$0xff]  ;;  %v2884_v19 = vld [vmem:[#allocation3 + $0x420] sm:$0xff] }
 0x796   :  { %4473 = vmatpush1.bf16.msra.mxu0 %v2788_v58  ;;  %4817 = vmatpush1.bf16.msra.mxu1 %v2790_v6  ;;  %v2886_v58 = vld [vmem:[#allocation3 + $0x430] sm:$0xff]  ;;  %v2893_v6 = vld [vmem:[#allocation3 + $0x468] sm:$0xff] }
 0x797   :  { %4474 = vmatprep.subr.bf16.mxu0 %v2797_v40  ;;  %4818 = vmatprep.subr.bf16.mxu1 %v2799_v44  ;;  %v2895_v40 = vld [vmem:[#allocation3 + $0x478] sm:$0xff]  ;;  %v2892_v44 = vld [vmem:[#allocation3 + $0x460] sm:$0xff] }
 0x79a   :  { %4475 = vmatpush1.bf16.msra.mxu0 %v2796_v45  ;;  %4819 = vmatpush1.bf16.msra.mxu1 %v2798_v20  ;;  %v2894_v45 = vld [vmem:[#allocation3 + $0x470] sm:$0xff]  ;;  %v2901_v20 = vld [vmem:[#allocation3 + $0x4a8] sm:$0xff] }
 0x79b   :  { %4476 = vmatprep.subr.bf16.mxu0 %v2805_v15  ;;  %4820 = vmatprep.subr.bf16.mxu1 %v2807_v24  ;;  %v2903_v15 = vld [vmem:[#allocation3 + $0x4b8] sm:$0xff]  ;;  %v2900_v24 = vld [vmem:[#allocation3 + $0x4a0] sm:$0xff] }
 0x79e   :  { %4477 = vmatpush1.bf16.msra.mxu0 %v2804_v27  ;;  %4821 = vmatpush1.bf16.msra.mxu1 %v2806_v16  ;;  %v2902_v27 = vld [vmem:[#allocation3 + $0x4b0] sm:$0xff]  ;;  %v2909_v16 = vld [vmem:[#allocation3 + $0x4e8] sm:$0xff] }
 0x79f   :  { %4478 = vmatprep.subr.bf16.mxu0 %v2813_v12  ;;  %4822 = vmatprep.subr.bf16.mxu1 %v2815_v23  ;;  %v2908_v12 = vld [vmem:[#allocation3 + $0x4e0] sm:$0xff]  ;;  %v2910_v23 = vld [vmem:[#allocation3 + $0x4f0] sm:$0xff] }
 0x7a2   :  { %4479 = vmatpush1.bf16.msra.mxu0 %v2812_v51  ;;  %4823 = vmatpush1.bf16.msra.mxu1 %v2814_v59  ;;  %v2917_v51 = vld [vmem:[#allocation3 + $0x528] sm:$0xff]  ;;  %v2919_v59 = vld [vmem:[#allocation3 + $0x538] sm:$0xff] }
 0x7a3   :  { %4480 = vmatprep.subr.bf16.mxu0 %v2821_v50  ;;  %4824 = vmatprep.subr.bf16.mxu1 %v2823_v10  ;;  %v2918_v50 = vld [vmem:[#allocation3 + $0x530] sm:$0xff]  ;;  %v2925_v10 = vld [vmem:[#allocation3 + $0x568] sm:$0xff] }
 0x7a6   :  { %4481 = vmatpush1.bf16.msra.mxu0 %v2820_v14  ;;  %4825 = vmatpush1.bf16.msra.mxu1 %v2822_v35  ;;  %v2927_v14 = vld [vmem:[#allocation3 + $0x578] sm:$0xff]  ;;  %v2924_v35 = vld [vmem:[#allocation3 + $0x560] sm:$0xff] }
 0x7a7   :  { %4482 = vmatprep.subr.bf16.mxu0 %v2829_v28  ;;  %4826 = vmatprep.subr.bf16.mxu1 %v2831_v9  ;;  %v2926_v28 = vld [vmem:[#allocation3 + $0x570] sm:$0xff]  ;;  %v2933_v9 = vld [vmem:[#allocation3 + $0x5a8] sm:$0xff] }
 0x7aa   :  { %4483 = vmatpush1.bf16.msra.mxu0 %v2828_v3  ;;  %4827 = vmatpush1.bf16.msra.mxu1 %v2830_v1  ;;  %v2935_v3 = vld [vmem:[#allocation3 + $0x5b8] sm:$0xff]  ;;  %v2932_v1 = vld [vmem:[#allocation3 + $0x5a0] sm:$0xff] }
 0x7ab   :  { %4484 = vmatprep.subr.bf16.mxu0 %v2837_v29  ;;  %4828 = vmatprep.subr.bf16.mxu1 %v2839_v2  ;;  %v2934_v29 = vld [vmem:[#allocation3 + $0x5b0] sm:$0xff]  ;;  %v2941_v2 = vld [vmem:[#allocation3 + $0x5e8] sm:$0xff] }
 0x7ae   :  { %4485 = vmatpush1.bf16.msra.mxu0 %v2836_v11  ;;  %4829 = vmatpush1.bf16.msra.mxu1 %v2838_v53  ;;  %v2943_v11 = vld [vmem:[#allocation3 + $0x5f8] sm:$0xff]  ;;  %v2940_v53 = vld [vmem:[#allocation3 + $0x5e0] sm:$0xff] }
 0x7af   :  { %4486 = vmatprep.subr.bf16.mxu0 %v2845_v5  ;;  %4830 = vmatprep.subr.bf16.mxu1 %v2847_v38  ;;  %v2942_v5 = vld [vmem:[#allocation3 + $0x5f0] sm:$0xff]  ;;  %v2949_v38 = vld [vmem:[#allocation3 + $0x628] sm:$0xff] }
 0x7b2   :  { %4487 = vmatpush1.bf16.msra.mxu0 %v2844_v54  ;;  %4831 = vmatpush1.bf16.msra.mxu1 %v2846_v25  ;;  %v2951_v54 = vld [vmem:[#allocation3 + $0x638] sm:$0xff]  ;;  %v2948_v25 = vld [vmem:[#allocation3 + $0x620] sm:$0xff] }
 0x7b3   :  { %4488 = vmatprep.subr.bf16.mxu0 %v2853_v39  ;;  %4832 = vmatprep.subr.bf16.mxu1 %v2855_v48  ;;  %v2950_v39 = vld [vmem:[#allocation3 + $0x630] sm:$0xff]  ;;  %v2957_v48 = vld [vmem:[#allocation3 + $0x668] sm:$0xff] }
 0x7b6   :  { %4489 = vmatpush1.bf16.msra.mxu0 %v2852_v57  ;;  %4833 = vmatpush1.bf16.msra.mxu1 %v2854_v31  ;;  %v2959_v57 = vld [vmem:[#allocation3 + $0x678] sm:$0xff]  ;;  %v2956_v31 = vld [vmem:[#allocation3 + $0x660] sm:$0xff] }
 0x7b7   :  { %4490 = vmatprep.subr.bf16.mxu0 %v2861_v33  ;;  %4834 = vmatprep.subr.bf16.mxu1 %v2863_v46  ;;  %v2958_v33 = vld [vmem:[#allocation3 + $0x670] sm:$0xff]  ;;  %v2965_v46 = vld [vmem:[#allocation3 + $0x6a8] sm:$0xff] }
 0x7ba   :  { %4491 = vmatpush1.bf16.msra.mxu0 %v2860_v7  ;;  %4835 = vmatpush1.bf16.msra.mxu1 %v2862_v26  ;;  %v2967_v7 = vld [vmem:[#allocation3 + $0x6b8] sm:$0xff]  ;;  %v2964_v26 = vld [vmem:[#allocation3 + $0x6a0] sm:$0xff] }
 0x7bb   :  { %4492 = vmatprep.subr.bf16.mxu0 %v2869_v0  ;;  %4836 = vmatprep.subr.bf16.mxu1 %v2871_v18  ;;  %v2966_v0 = vld [vmem:[#allocation3 + $0x6b0] sm:$0xff]  ;;  %v2973_v18 = vld [vmem:[#allocation3 + $0x6e8] sm:$0xff] }
 0x7be   :  { %4493 = vmatpush1.bf16.msra.mxu0 %v2868_v13  ;;  %4837 = vmatpush1.bf16.msra.mxu1 %v2870_v32  ;;  %v2975_v13 = vld [vmem:[#allocation3 + $0x6f8] sm:$0xff]  ;;  %v2972_v32 = vld [vmem:[#allocation3 + $0x6e0] sm:$0xff] }
 0x7bf   :  { %4494 = vmatprep.subr.bf16.mxu0 %v2877_v21  ;;  %4838 = vmatprep.subr.bf16.mxu1 %v2879_v37  ;;  %v2974_v21 = vld [vmem:[#allocation3 + $0x6f0] sm:$0xff]  ;;  %v2981_v37 = vld [vmem:[#allocation3 + $0x728] sm:$0xff] }
 0x7c2   :  { %4495 = vmatpush1.bf16.msra.mxu0 %v2876_v60  ;;  %4839 = vmatpush1.bf16.msra.mxu1 %v2878_v43  ;;  %v2983_v60 = vld [vmem:[#allocation3 + $0x738] sm:$0xff]  ;;  %v2980_v43 = vld [vmem:[#allocation3 + $0x720] sm:$0xff] }
 0x7c3   :  { %4507 = vmatprep.subr.bf16.mxu0 %v2885_v8  ;;  %4851 = vmatprep.subr.bf16.mxu1 %v2887_v4  ;;  %v2982_v8 = vld [vmem:[#allocation3 + $0x730] sm:$0xff]  ;;  %v2989_v4 = vld [vmem:[#allocation3 + $0x768] sm:$0xff] }
 0x7c5   :  { %4497 = vmatmul.mubr.bf16.vlgmr.msra.gmra.mrb[20].mxu0 %v8028_v30  ;;  %4841 = vmatmul.mubr.bf16.vlgmr.msra.gmra.mrb[24].mxu1 %v8028_v30  ;;  %v2911_v30 = vld [vmem:[#allocation3 + $0x4f8] sm:$0xff] }
 0x7c6   :  { %4508 = vmatpush1.bf16.msra.mxu0 %v2884_v19  ;;  %4852 = vmatpush1.bf16.msra.mxu1 %v2886_v58  ;;  %v2991_v19 = vld [vmem:[#allocation3 + $0x778] sm:$0xff]  ;;  %v2988_v58 = vld [vmem:[#allocation3 + $0x760] sm:$0xff] }
 0x7c7   :  { %4509 = vmatprep.subr.bf16.mxu0 %v2893_v6  ;;  %4853 = vmatprep.subr.bf16.mxu1 %v2895_v40  ;;  %v2990_v6 = vld [vmem:[#allocation3 + $0x770] sm:$0xff]  ;;  %v2997_v40 = vld [vmem:[#allocation3 + $0x7a8] sm:$0xff] }
 0x7c8   :  { %4539 = vmatprep.mubr.bf16.mxu0 %v8034_v42  ;;  %4883 = vmatprep.mubr.bf16.mxu1 %v8034_v42  ;;  %v2916_v42 = vld [vmem:[#allocation3 + $0x520] sm:$0xff] }
 0x7ca   :  { %4510 = vmatpush1.bf16.msra.mxu0 %v2892_v44  ;;  %4854 = vmatpush1.bf16.msra.mxu1 %v2894_v45  ;;  %v2999_v44 = vld [vmem:[#allocation3 + $0x7b8] sm:$0xff]  ;;  %v2996_v45 = vld [vmem:[#allocation3 + $0x7a0] sm:$0xff] }
 0x7cb   :  { %4511 = vmatprep.subr.bf16.mxu0 %v2901_v20  ;;  %4855 = vmatprep.subr.bf16.mxu1 %v2903_v15  ;;  %v2998_v20 = vld [vmem:[#allocation3 + $0x7b0] sm:$0xff]  ;;  %v3005_v15 = vld [vmem:[#allocation3 + $0x7e8] sm:$0xff] }
 0x7ce   :  { %4512 = vmatpush1.bf16.msra.mxu0 %v2900_v24  ;;  %4856 = vmatpush1.bf16.msra.mxu1 %v2902_v27  ;;  %v3007_v24 = vld [vmem:[#allocation3 + $0x7f8] sm:$0xff]  ;;  %v3004_v27 = vld [vmem:[#allocation3 + $0x7e0] sm:$0xff] }
 0x7cf   :  { %4513 = vmatprep.subr.bf16.mxu0 %v2909_v16  ;;  %4857 = vmatprep.subr.bf16.mxu1 %v2911_v30  ;;  %v3006_v16 = vld [vmem:[#allocation3 + $0x7f0] sm:$0xff]  ;;  %v3013_v30 = vld [vmem:[#allocation3 + $0x828] sm:$0xff] }
 0x7d2   :  { %4514 = vmatpush1.bf16.msra.mxu0 %v2908_v12  ;;  %4858 = vmatpush1.bf16.msra.mxu1 %v2910_v23  ;;  %v3015_v12 = vld [vmem:[#allocation3 + $0x838] sm:$0xff]  ;;  %v3012_v23 = vld [vmem:[#allocation3 + $0x820] sm:$0xff] }
 0x7d3   :  { %4515 = vmatprep.subr.bf16.mxu0 %v2917_v51  ;;  %4859 = vmatprep.subr.bf16.mxu1 %v2919_v59  ;;  %v3014_v51 = vld [vmem:[#allocation3 + $0x830] sm:$0xff]  ;;  %v3021_v59 = vld [vmem:[#allocation3 + $0x868] sm:$0xff] }
 0x7d6   :  { %4516 = vmatpush1.bf16.msra.mxu0 %v2916_v42  ;;  %4860 = vmatpush1.bf16.msra.mxu1 %v2918_v50  ;;  %v3023_v42 = vld [vmem:[#allocation3 + $0x878] sm:$0xff]  ;;  %v3020_v50 = vld [vmem:[#allocation3 + $0x860] sm:$0xff] }
 0x7d7   :  { %4517 = vmatprep.subr.bf16.mxu0 %v2925_v10  ;;  %4861 = vmatprep.subr.bf16.mxu1 %v2927_v14  ;;  %v3022_v10 = vld [vmem:[#allocation3 + $0x870] sm:$0xff]  ;;  %v3029_v14 = vld [vmem:[#allocation3 + $0x8a8] sm:$0xff] }
 0x7da   :  { %4518 = vmatpush1.bf16.msra.mxu0 %v2924_v35  ;;  %4862 = vmatpush1.bf16.msra.mxu1 %v2926_v28  ;;  %v3031_v35 = vld [vmem:[#allocation3 + $0x8b8] sm:$0xff]  ;;  %v3028_v28 = vld [vmem:[#allocation3 + $0x8a0] sm:$0xff] }
 0x7db   :  { %4519 = vmatprep.subr.bf16.mxu0 %v2933_v9  ;;  %4863 = vmatprep.subr.bf16.mxu1 %v2935_v3  ;;  %v3030_v9 = vld [vmem:[#allocation3 + $0x8b0] sm:$0xff]  ;;  %v3037_v3 = vld [vmem:[#allocation3 + $0x8e8] sm:$0xff] }
 0x7de   :  { %4520 = vmatpush1.bf16.msra.mxu0 %v2932_v1  ;;  %4864 = vmatpush1.bf16.msra.mxu1 %v2934_v29  ;;  %v3036_v1 = vld [vmem:[#allocation3 + $0x8e0] sm:$0xff]  ;;  %v3038_v29 = vld [vmem:[#allocation3 + $0x8f0] sm:$0xff] }
 0x7df   :  { %4521 = vmatprep.subr.bf16.mxu0 %v2941_v2  ;;  %4865 = vmatprep.subr.bf16.mxu1 %v2943_v11  ;;  %v3045_v2 = vld [vmem:[#allocation3 + $0x928] sm:$0xff]  ;;  %v3047_v11 = vld [vmem:[#allocation3 + $0x938] sm:$0xff] }
 0x7e2   :  { %4522 = vmatpush1.bf16.msra.mxu0 %v2940_v53  ;;  %4866 = vmatpush1.bf16.msra.mxu1 %v2942_v5  ;;  %v3046_v53 = vld [vmem:[#allocation3 + $0x930] sm:$0xff]  ;;  %v3053_v5 = vld [vmem:[#allocation3 + $0x968] sm:$0xff] }
 0x7e3   :  { %4523 = vmatprep.subr.bf16.mxu0 %v2949_v38  ;;  %4867 = vmatprep.subr.bf16.mxu1 %v2951_v54  ;;  %v3055_v38 = vld [vmem:[#allocation3 + $0x978] sm:$0xff]  ;;  %v3052_v54 = vld [vmem:[#allocation3 + $0x960] sm:$0xff] }
 0x7e6   :  { %4524 = vmatpush1.bf16.msra.mxu0 %v2948_v25  ;;  %4868 = vmatpush1.bf16.msra.mxu1 %v2950_v39  ;;  %v3054_v25 = vld [vmem:[#allocation3 + $0x970] sm:$0xff]  ;;  %v3061_v39 = vld [vmem:[#allocation3 + $0x9a8] sm:$0xff] }
 0x7e7   :  { %4525 = vmatprep.subr.bf16.mxu0 %v2957_v48  ;;  %4869 = vmatprep.subr.bf16.mxu1 %v2959_v57  ;;  %v3063_v48 = vld [vmem:[#allocation3 + $0x9b8] sm:$0xff]  ;;  %v3060_v57 = vld [vmem:[#allocation3 + $0x9a0] sm:$0xff] }
 0x7ea   :  { %4526 = vmatpush1.bf16.msra.mxu0 %v2956_v31  ;;  %4870 = vmatpush1.bf16.msra.mxu1 %v2958_v33  ;;  %v3062_v31 = vld [vmem:[#allocation3 + $0x9b0] sm:$0xff]  ;;  %v3069_v33 = vld [vmem:[#allocation3 + $0x9e8] sm:$0xff] }
 0x7eb   :  { %4527 = vmatprep.subr.bf16.mxu0 %v2965_v46  ;;  %4871 = vmatprep.subr.bf16.mxu1 %v2967_v7  ;;  %v3071_v46 = vld [vmem:[#allocation3 + $0x9f8] sm:$0xff]  ;;  %v3068_v7 = vld [vmem:[#allocation3 + $0x9e0] sm:$0xff] }
 0x7ee   :  { %4528 = vmatpush1.bf16.msra.mxu0 %v2964_v26  ;;  %4872 = vmatpush1.bf16.msra.mxu1 %v2966_v0  ;;  %v3070_v26 = vld [vmem:[#allocation3 + $0x9f0] sm:$0xff]  ;;  %v3077_v0 = vld [vmem:[#allocation3 + $0xa28] sm:$0xff] }
 0x7ef   :  { %4529 = vmatprep.subr.bf16.mxu0 %v2973_v18  ;;  %4873 = vmatprep.subr.bf16.mxu1 %v2975_v13  ;;  %v3079_v18 = vld [vmem:[#allocation3 + $0xa38] sm:$0xff]  ;;  %v3076_v13 = vld [vmem:[#allocation3 + $0xa20] sm:$0xff] }
 0x7f2   :  { %4530 = vmatpush1.bf16.msra.mxu0 %v2972_v32  ;;  %4874 = vmatpush1.bf16.msra.mxu1 %v2974_v21  ;;  %v3078_v32 = vld [vmem:[#allocation3 + $0xa30] sm:$0xff]  ;;  %v3085_v21 = vld [vmem:[#allocation3 + $0xa68] sm:$0xff] }
 0x7f3   :  { %4531 = vmatprep.subr.bf16.mxu0 %v2981_v37  ;;  %4875 = vmatprep.subr.bf16.mxu1 %v2983_v60  ;;  %v3087_v37 = vld [vmem:[#allocation3 + $0xa78] sm:$0xff]  ;;  %v3084_v60 = vld [vmem:[#allocation3 + $0xa60] sm:$0xff] }
 0x7f6   :  { %4532 = vmatpush1.bf16.msra.mxu0 %v2980_v43  ;;  %4876 = vmatpush1.bf16.msra.mxu1 %v2982_v8  ;;  %v3086_v43 = vld [vmem:[#allocation3 + $0xa70] sm:$0xff]  ;;  %v3093_v8 = vld [vmem:[#allocation3 + $0xaa8] sm:$0xff] }
 0x7f7   :  { %4533 = vmatprep.subr.bf16.mxu0 %v2989_v4  ;;  %4877 = vmatprep.subr.bf16.mxu1 %v2991_v19  ;;  %v3095_v4 = vld [vmem:[#allocation3 + $0xab8] sm:$0xff]  ;;  %v3092_v19 = vld [vmem:[#allocation3 + $0xaa0] sm:$0xff] }
 0x7fa   :  { %4534 = vmatpush1.bf16.msra.mxu0 %v2988_v58  ;;  %4878 = vmatpush1.bf16.msra.mxu1 %v2990_v6  ;;  %v3094_v58 = vld [vmem:[#allocation3 + $0xab0] sm:$0xff]  ;;  %v3101_v6 = vld [vmem:[#allocation3 + $0xae8] sm:$0xff] }
 0x7fb   :  { %4535 = vmatprep.subr.bf16.mxu0 %v2997_v40  ;;  %4879 = vmatprep.subr.bf16.mxu1 %v2999_v44  ;;  %v3103_v40 = vld [vmem:[#allocation3 + $0xaf8] sm:$0xff]  ;;  %v3100_v44 = vld [vmem:[#allocation3 + $0xae0] sm:$0xff] }
 0x7fe   :  { %4536 = vmatpush1.bf16.msra.mxu0 %v2996_v45  ;;  %4880 = vmatpush1.bf16.msra.mxu1 %v2998_v20  ;;  %v3102_v45 = vld [vmem:[#allocation3 + $0xaf0] sm:$0xff]  ;;  %v3109_v20 = vld [vmem:[#allocation3 + $0xb28] sm:$0xff] }
 0x7ff   :  { %4537 = vmatprep.subr.bf16.mxu0 %v3005_v15  ;;  %4881 = vmatprep.subr.bf16.mxu1 %v3007_v24  ;;  %v3111_v15 = vld [vmem:[#allocation3 + $0xb38] sm:$0xff]  ;;  %v3108_v24 = vld [vmem:[#allocation3 + $0xb20] sm:$0xff] }
 0x802   :  { %4538 = vmatpush1.bf16.msra.mxu0 %v3004_v27  ;;  %4882 = vmatpush1.bf16.msra.mxu1 %v3006_v16  ;;  %v3110_v27 = vld [vmem:[#allocation3 + $0xb30] sm:$0xff]  ;;  %v3117_v16 = vld [vmem:[#allocation3 + $0xb68] sm:$0xff] }
 0x803   :  { %4550 = vmatprep.subr.bf16.mxu0 %v3013_v30  ;;  %4894 = vmatprep.subr.bf16.mxu1 %v3015_v12  ;;  %v3119_v30 = vld [vmem:[#allocation3 + $0xb78] sm:$0xff]  ;;  %v3116_v12 = vld [vmem:[#allocation3 + $0xb60] sm:$0xff] }
 0x805   :  { %4540 = vmatmul.mubr.bf16.vlgmr.msra.gmra.mrb[20].mxu0 %v8044_v52  ;;  %4884 = vmatmul.mubr.bf16.vlgmr.msra.gmra.mrb[24].mxu1 %v8044_v52  ;;  %v3039_v52 = vld [vmem:[#allocation3 + $0x8f8] sm:$0xff] }
 0x806   :  { %4551 = vmatpush1.bf16.msra.mxu0 %v3012_v23  ;;  %4895 = vmatpush1.bf16.msra.mxu1 %v3014_v51  ;;  %v3118_v23 = vld [vmem:[#allocation3 + $0xb70] sm:$0xff]  ;;  %v3125_v51 = vld [vmem:[#allocation3 + $0xba8] sm:$0xff] }
 0x807   :  { %4552 = vmatprep.subr.bf16.mxu0 %v3021_v59  ;;  %4896 = vmatprep.subr.bf16.mxu1 %v3023_v42  ;;  %v3127_v59 = vld [vmem:[#allocation3 + $0xbb8] sm:$0xff]  ;;  %v3124_v42 = vld [vmem:[#allocation3 + $0xba0] sm:$0xff] }
 0x808   :  { %4582 = vmatprep.mubr.bf16.mxu0 %v8050_v49  ;;  %4926 = vmatprep.mubr.bf16.mxu1 %v8050_v49  ;;  %v3044_v49 = vld [vmem:[#allocation3 + $0x920] sm:$0xff] }
 0x80a   :  { %4553 = vmatpush1.bf16.msra.mxu0 %v3020_v50  ;;  %4897 = vmatpush1.bf16.msra.mxu1 %v3022_v10  ;;  %v3126_v50 = vld [vmem:[#allocation3 + $0xbb0] sm:$0xff]  ;;  %v3133_v10 = vld [vmem:[#allocation3 + $0xbe8] sm:$0xff] }
 0x80b   :  { %4554 = vmatprep.subr.bf16.mxu0 %v3029_v14  ;;  %4898 = vmatprep.subr.bf16.mxu1 %v3031_v35  ;;  %v3135_v14 = vld [vmem:[#allocation3 + $0xbf8] sm:$0xff]  ;;  %v3132_v35 = vld [vmem:[#allocation3 + $0xbe0] sm:$0xff] }
 0x80e   :  { %4555 = vmatpush1.bf16.msra.mxu0 %v3028_v28  ;;  %4899 = vmatpush1.bf16.msra.mxu1 %v3030_v9  ;;  %v3134_v28 = vld [vmem:[#allocation3 + $0xbf0] sm:$0xff]  ;;  %v3141_v9 = vld [vmem:[#allocation3 + $0xc28] sm:$0xff] }
 0x80f   :  { %4556 = vmatprep.subr.bf16.mxu0 %v3037_v3  ;;  %4900 = vmatprep.subr.bf16.mxu1 %v3039_v52  ;;  %v3143_v3 = vld [vmem:[#allocation3 + $0xc38] sm:$0xff]  ;;  %v3140_v52 = vld [vmem:[#allocation3 + $0xc20] sm:$0xff] }
 0x812   :  { %4557 = vmatpush1.bf16.msra.mxu0 %v3036_v1  ;;  %4901 = vmatpush1.bf16.msra.mxu1 %v3038_v29  ;;  %v3142_v1 = vld [vmem:[#allocation3 + $0xc30] sm:$0xff]  ;;  %v3149_v29 = vld [vmem:[#allocation3 + $0xc68] sm:$0xff] }
 0x813   :  { %4558 = vmatprep.subr.bf16.mxu0 %v3045_v2  ;;  %4902 = vmatprep.subr.bf16.mxu1 %v3047_v11  ;;  %v3151_v2 = vld [vmem:[#allocation3 + $0xc78] sm:$0xff]  ;;  %v3148_v11 = vld [vmem:[#allocation3 + $0xc60] sm:$0xff] }
 0x816   :  { %4559 = vmatpush1.bf16.msra.mxu0 %v3044_v49  ;;  %4903 = vmatpush1.bf16.msra.mxu1 %v3046_v53  ;;  %v3150_v49 = vld [vmem:[#allocation3 + $0xc70] sm:$0xff]  ;;  %v3157_v53 = vld [vmem:[#allocation3 + $0xca8] sm:$0xff] }
 0x817   :  { %4560 = vmatprep.subr.bf16.mxu0 %v3053_v5  ;;  %4904 = vmatprep.subr.bf16.mxu1 %v3055_v38  ;;  %v3159_v5 = vld [vmem:[#allocation3 + $0xcb8] sm:$0xff]  ;;  %v3156_v38 = vld [vmem:[#allocation3 + $0xca0] sm:$0xff] }
 0x81a   :  { %4561 = vmatpush1.bf16.msra.mxu0 %v3052_v54  ;;  %4905 = vmatpush1.bf16.msra.mxu1 %v3054_v25  ;;  %v3158_v54 = vld [vmem:[#allocation3 + $0xcb0] sm:$0xff]  ;;  %v3165_v25 = vld [vmem:[#allocation3 + $0xce8] sm:$0xff] }
 0x81b   :  { %4562 = vmatprep.subr.bf16.mxu0 %v3061_v39  ;;  %4906 = vmatprep.subr.bf16.mxu1 %v3063_v48  ;;  %v3164_v39 = vld [vmem:[#allocation3 + $0xce0] sm:$0xff]  ;;  %v3166_v48 = vld [vmem:[#allocation3 + $0xcf0] sm:$0xff] }
 0x81e   :  { %4563 = vmatpush1.bf16.msra.mxu0 %v3060_v57  ;;  %4907 = vmatpush1.bf16.msra.mxu1 %v3062_v31  ;;  %v3173_v57 = vld [vmem:[#allocation3 + $0xd28] sm:$0xff]  ;;  %v3175_v31 = vld [vmem:[#allocation3 + $0xd38] sm:$0xff] }
 0x81f   :  { %4564 = vmatprep.subr.bf16.mxu0 %v3069_v33  ;;  %4908 = vmatprep.subr.bf16.mxu1 %v3071_v46  ;;  %v3174_v33 = vld [vmem:[#allocation3 + $0xd30] sm:$0xff]  ;;  %v3181_v46 = vld [vmem:[#allocation3 + $0xd68] sm:$0xff] }
 0x822   :  { %4565 = vmatpush1.bf16.msra.mxu0 %v3068_v7  ;;  %4909 = vmatpush1.bf16.msra.mxu1 %v3070_v26  ;;  %v3183_v7 = vld [vmem:[#allocation3 + $0xd78] sm:$0xff]  ;;  %v3180_v26 = vld [vmem:[#allocation3 + $0xd60] sm:$0xff] }
 0x823   :  { %4566 = vmatprep.subr.bf16.mxu0 %v3077_v0  ;;  %4910 = vmatprep.subr.bf16.mxu1 %v3079_v18  ;;  %v3182_v0 = vld [vmem:[#allocation3 + $0xd70] sm:$0xff] }
 0x826   :  { %4567 = vmatpush1.bf16.msra.mxu0 %v3076_v13  ;;  %4911 = vmatpush1.bf16.msra.mxu1 %v3078_v32  ;;  %v3189_v32 = vld [vmem:[#allocation3 + $0xda8] sm:$0xff] }
 0x827   :  { %4568 = vmatprep.subr.bf16.mxu0 %v3085_v21  ;;  %4912 = vmatprep.subr.bf16.mxu1 %v3087_v37 }
 0x82a   :  { %4569 = vmatpush1.bf16.msra.mxu0 %v3084_v60  ;;  %4913 = vmatpush1.bf16.msra.mxu1 %v3086_v43  ;;  %v3191_v43 = vld [vmem:[#allocation3 + $0xdb8] sm:$0xff] }
 0x82b   :  { %4570 = vmatprep.subr.bf16.mxu0 %v3093_v8  ;;  %4914 = vmatprep.subr.bf16.mxu1 %v3095_v4 }
 0x82e   :  { %4571 = vmatpush1.bf16.msra.mxu0 %v3092_v19  ;;  %4915 = vmatpush1.bf16.msra.mxu1 %v3094_v58 }
 0x82f   :  { %4572 = vmatprep.subr.bf16.mxu0 %v3101_v6  ;;  %4916 = vmatprep.subr.bf16.mxu1 %v3103_v40 }
 0x832   :  { %4573 = vmatpush1.bf16.msra.mxu0 %v3100_v44  ;;  %4917 = vmatpush1.bf16.msra.mxu1 %v3102_v45 }
 0x833   :  { %4574 = vmatprep.subr.bf16.mxu0 %v3109_v20  ;;  %4918 = vmatprep.subr.bf16.mxu1 %v3111_v15 }
 0x836   :  { %4575 = vmatpush1.bf16.msra.mxu0 %v3108_v24  ;;  %4919 = vmatpush1.bf16.msra.mxu1 %v3110_v27  ;;  %v3188_v27 = vld [vmem:[#allocation3 + $0xda0] sm:$0xff] }
 0x837   :  { %4576 = vmatprep.subr.bf16.mxu0 %v3117_v16  ;;  %4920 = vmatprep.subr.bf16.mxu1 %v3119_v30  ;;  %v3190_v16 = vld [vmem:[#allocation3 + $0xdb0] sm:$0xff] }
 0x83a   :  { %4577 = vmatpush1.bf16.msra.mxu0 %v3116_v12  ;;  %4921 = vmatpush1.bf16.msra.mxu1 %v3118_v23 }
 0x83b   :  { %4578 = vmatprep.subr.bf16.mxu0 %v3125_v51  ;;  %4922 = vmatprep.subr.bf16.mxu1 %v3127_v59  ;;  %v3197_v59 = vld [vmem:[#allocation3 + $0xde8] sm:$0xff] }
 0x83e   :  { %4579 = vmatpush1.bf16.msra.mxu0 %v3124_v42  ;;  %4923 = vmatpush1.bf16.msra.mxu1 %v3126_v50  ;;  %v3199_v42 = vld [vmem:[#allocation3 + $0xdf8] sm:$0xff] }
 0x83f   :  { %4580 = vmatprep.subr.bf16.mxu0 %v3133_v10  ;;  %4924 = vmatprep.subr.bf16.mxu1 %v3135_v14 }
 0x842   :  { %4581 = vmatpush1.bf16.msra.mxu0 %v3132_v35  ;;  %4925 = vmatpush1.bf16.msra.mxu1 %v3134_v28 }
 0x843   :  { %4593 = vmatprep.subr.bf16.mxu0 %v3141_v9  ;;  %4937 = vmatprep.subr.bf16.mxu1 %v3143_v3 }
 0x845   :  { %4583 = vmatmul.mubr.bf16.vlgmr.msra.gmra.mrb[20].mxu0 %v8060_v63  ;;  %4927 = vmatmul.mubr.bf16.vlgmr.msra.gmra.mrb[24].mxu1 %v8060_v63  ;;  %v3167_v63 = vld [vmem:[#allocation3 + $0xcf8] sm:$0xff] }
 0x846   :  { %4594 = vmatpush1.bf16.msra.mxu0 %v3140_v52  ;;  %4938 = vmatpush1.bf16.msra.mxu1 %v3142_v1 }
 0x847   :  { %4595 = vmatprep.subr.bf16.mxu0 %v3149_v29  ;;  %4939 = vmatprep.subr.bf16.mxu1 %v3151_v2 }
 0x848   :  { %4625 = vmatprep.mubr.bf16.mxu0 %v8066_v41  ;;  %4969 = vmatprep.mubr.bf16.mxu1 %v8066_v41  ;;  %v3172_v41 = vld [vmem:[#allocation3 + $0xd20] sm:$0xff] }
 0x84a   :  { %4596 = vmatpush1.bf16.msra.mxu0 %v3148_v11  ;;  %4940 = vmatpush1.bf16.msra.mxu1 %v3150_v49  ;;  %v3196_v49 = vld [vmem:[#allocation3 + $0xde0] sm:$0xff] }
 0x84b   :  { %4597 = vmatprep.subr.bf16.mxu0 %v3157_v53  ;;  %4941 = vmatprep.subr.bf16.mxu1 %v3159_v5  ;;  %v3198_v53 = vld [vmem:[#allocation3 + $0xdf0] sm:$0xff] }
 0x84e   :  { %4598 = vmatpush1.bf16.msra.mxu0 %v3156_v38  ;;  %4942 = vmatpush1.bf16.msra.mxu1 %v3158_v54 }
 0x84f   :  { %4599 = vmatprep.subr.bf16.mxu0 %v3165_v25  ;;  %4943 = vmatprep.subr.bf16.mxu1 %v3167_v63  ;;  %v3205_v63 = vld [vmem:[#allocation3 + $0xe28] sm:$0xff] }
 0x852   :  { %4600 = vmatpush1.bf16.msra.mxu0 %v3164_v39  ;;  %4944 = vmatpush1.bf16.msra.mxu1 %v3166_v48  ;;  %v3207_v39 = vld [vmem:[#allocation3 + $0xe38] sm:$0xff] }
 0x853   :  { %4601 = vmatprep.subr.bf16.mxu0 %v3173_v57  ;;  %4945 = vmatprep.subr.bf16.mxu1 %v3175_v31 }
 0x856   :  { %4602 = vmatpush1.bf16.msra.mxu0 %v3172_v41  ;;  %4946 = vmatpush1.bf16.msra.mxu1 %v3174_v33 }
 0x857   :  { %4603 = vmatprep.subr.bf16.mxu0 %v3181_v46  ;;  %4947 = vmatprep.subr.bf16.mxu1 %v3183_v7 }
 0x858   :  { %v8158_v18 = vpop.f32.mrb[16].mxu0  ;;  %v8160_v13 = vpop.f32.mrb[20].mxu1 }
 0x859   :  { %v5216_v21 = vmul.f32 %v8158_v18, %v8158_v18  ;;  %v8164_v37 = vpop.f32.mrb[17].mxu0  ;;  %v8166_v60 = vpop.f32.mrb[21].mxu1  ;;  %v5218_v8 = vmul.f32 %v8160_v13, %v8160_v13 }
 0x85a   :  { %v5217_v4 = vmul.f32 %v8164_v37, %v8164_v37  ;;  %v5219_v19 = vmul.f32 %v8166_v60, %v8166_v60  ;;  %v8174_v58 = vpop.f32.mrb[18].mxu0  ;;  %v8176_v6 = vpop.f32.mrb[22].mxu1  ;;  %4604 = vmatpush1.bf16.msra.mxu0 %v3180_v26  ;;  %4948 = vmatpush1.bf16.msra.mxu1 %v3182_v0 }
 0x85b   :  { %v5152_v40 = vadd.f32 %v8174_v58, %v8158_v18  ;;  %v5224_v44 = vmul.f32 %v8174_v58, %v8174_v58  ;;  %v5166_v45 = vadd.f32 %v8176_v6, %v8160_v13  ;;  %v5226_v20 = vmul.f32 %v8176_v6, %v8176_v6  ;;  %v8186_v15 = vpop.f32.mrb[19].mxu0  ;;  %v8188_v24 = vpop.f32.mrb[23].mxu1  ;;  %4605 = vmatprep.subr.bf16.mxu0 %v3189_v32 }
 0x85c   :  { %v5159_v30 = vadd.f32 %v8186_v15, %v8164_v37  ;;  %v5225_v12 = vmul.f32 %v8186_v15, %v8186_v15  ;;  %v5173_v23 = vadd.f32 %v8188_v24, %v8166_v60  ;;  %v5227_v51 = vmul.f32 %v8188_v24, %v8188_v24  ;;  %4949 = vmatprep.subr.bf16.mxu1 %v3191_v43 }
 0x85d   :  { %v5153_v50 = vrot.slane %v5152_v40, 4  ;;  %v5232_v10 = vadd.f32 %v5224_v44, %v5216_v21  ;;  %v5167_v14 = vrot.slane %v5166_v45, 4  ;;  %v5246_v35 = vadd.f32 %v5226_v20, %v5218_v8  ;;  %v3204_v8 = vld [vmem:[#allocation3 + $0xe20] sm:$0xff]  ;;  %v3213_v20 = vld [vmem:[#allocation3 + $0xe68] sm:$0xff] }
 0x85e   :  { %v5160_v28 = vrot.slane %v5159_v30, 4  ;;  %v5239_v9 = vadd.f32 %v5225_v12, %v5217_v4  ;;  %v5174_v3 = vrot.slane %v5173_v23, 4  ;;  %v5253_v52 = vadd.f32 %v5227_v51, %v5219_v19  ;;  %4606 = vmatpush1.bf16.msra.mxu0 %v3188_v27  ;;  %4950 = vmatpush1.bf16.msra.mxu1 %v3190_v16  ;;  %v3206_v4 = vld [vmem:[#allocation3 + $0xe30] sm:$0xff]  ;;  %v3215_v27 = vld [vmem:[#allocation3 + $0xe78] sm:$0xff] }
 0x85f   :  { %v5154_v1 = vadd.f32 %v5153_v50, %v5152_v40  ;;  %v5233_v29 = vrot.slane %v5232_v10, 4  ;;  %v5168_v2 = vadd.f32 %v5167_v14, %v5166_v45  ;;  %v5247_v11 = vrot.slane %v5246_v35, 4  ;;  %4607 = vmatprep.subr.bf16.mxu0 %v3197_v59  ;;  %4951 = vmatprep.subr.bf16.mxu1 %v3199_v42 }
 0x860   :  { %v5161_v5 = vadd.f32 %v5160_v28, %v5159_v30  ;;  %v5240_v38 = vrot.slane %v5239_v9, 4  ;;  %v5175_v54 = vadd.f32 %v5174_v3, %v5173_v23  ;;  %v5254_v25 = vrot.slane %v5253_v52, 4  ;;  %v3214_v3 = vld [vmem:[#allocation3 + $0xe70] sm:$0xff] }
 0x861   :  { %v5155_v48 = vrot.slane %v5154_v1, 2  ;;  %v5234_v57 = vadd.f32 %v5233_v29, %v5232_v10  ;;  %v5169_v31 = vrot.slane %v5168_v2, 2  ;;  %v5248_v41 = vadd.f32 %v5247_v11, %v5246_v35  ;;  %v3221_v11 = vld [vmem:[#allocation3 + $0xea8] sm:$0xff] }
 0x862   :  { %v5162_v33 = vrot.slane %v5161_v5, 2  ;;  %v5241_v46 = vadd.f32 %v5240_v38, %v5239_v9  ;;  %v5176_v7 = vrot.slane %v5175_v54, 2  ;;  %v5255_v26 = vadd.f32 %v5254_v25, %v5253_v52  ;;  %4608 = vmatpush1.bf16.msra.mxu0 %v3196_v49  ;;  %4952 = vmatpush1.bf16.msra.mxu1 %v3198_v53  ;;  %v3212_v9 = vld [vmem:[#allocation3 + $0xe60] sm:$0xff]  ;;  %v3223_v49 = vld [vmem:[#allocation3 + $0xeb8] sm:$0xff] }
 0x863   :  { %v5156_v0 = vadd.f32 %v5155_v48, %v5154_v1  ;;  %v5235_v32 = vrot.slane %v5234_v57, 2  ;;  %v5170_v21 = vadd.f32 %v5169_v31, %v5168_v2  ;;  %v5249_v43 = vrot.slane %v5248_v41, 2  ;;  %4609 = vmatprep.subr.bf16.mxu0 %v3205_v63  ;;  %4953 = vmatprep.subr.bf16.mxu1 %v3207_v39 }
 0x864   :  { %v5163_v19 = vadd.f32 %v5162_v33, %v5161_v5  ;;  %v5242_v40 = vrot.slane %v5241_v46, 2  ;;  %v5177_v44 = vadd.f32 %v5176_v7, %v5175_v54  ;;  %v5256_v45 = vrot.slane %v5255_v26, 2  ;;  %v3222_v7 = vld [vmem:[#allocation3 + $0xeb0] sm:$0xff] }
 0x865   :  { %v5157_v16 = vrot.slane %v5156_v0, 1  ;;  %v5236_v30 = vadd.f32 %v5235_v32, %v5234_v57  ;;  %v5171_v12 = vrot.slane %v5170_v21, 1  ;;  %v5250_v23 = vadd.f32 %v5249_v43, %v5248_v41  ;;  %v3229_v43 = vld [vmem:[#allocation3 + $0xee8] sm:$0xff] }
 0x866   :  { %v5164_v51 = vrot.slane %v5163_v19, 1  ;;  %v5243_v59 = vadd.f32 %v5242_v40, %v5241_v46  ;;  %v5178_v42 = vrot.slane %v5177_v44, 1  ;;  %v5257_v50 = vadd.f32 %v5256_v45, %v5255_v26  ;;  %4610 = vmatpush1.bf16.msra.mxu0 %v3204_v8  ;;  %4954 = vmatpush1.bf16.msra.mxu1 %v3206_v4  ;;  %v3220_v46 = vld [vmem:[#allocation3 + $0xea0] sm:$0xff]  ;;  %v3231_v8 = vld [vmem:[#allocation3 + $0xef8] sm:$0xff] }
 0x867   :  { %v5158_v10 = vadd.f32 %v5157_v16, %v5156_v0  ;;  %v5237_v14 = vrot.slane %v5236_v30, 1  ;;  %v5172_v35 = vadd.f32 %v5171_v12, %v5170_v21  ;;  %v5251_v28 = vrot.slane %v5250_v23, 1  ;;  %4611 = vmatprep.subr.bf16.mxu0 %v3213_v20  ;;  %4955 = vmatprep.subr.bf16.mxu1 %v3215_v27  ;;  %v3228_v27 = vld [vmem:[#allocation3 + $0xee0] sm:$0xff]  ;;  %v3230_v16 = vld [vmem:[#allocation3 + $0xef0] sm:$0xff] }
 0x868   :  { %v5165_v52 = vadd.f32 %v5164_v51, %v5163_v19  ;;  %v5244_v1 = vrot.slane %v5243_v59, 1  ;;  %v5179_v29 = vadd.f32 %v5178_v42, %v5177_v44  ;;  %v5258_v2 = vrot.slane %v5257_v50, 1  ;;  %v3239_v51 = vld [vmem:[#allocation3 + $0xf38] sm:$0xff] }
 0x869   :  { %v8198_v53 = vmul.f32 0.0625, %v5158_v10  ;;  %v5238_v5 = vadd.f32 %v5237_v14, %v5236_v30  ;;  %v8200_v38 = vmul.f32 0.0625, %v5172_v35  ;;  %v5252_v54 = vadd.f32 %v5251_v28, %v5250_v23  ;;  %v3237_v23 = vld [vmem:[#allocation3 + $0xf28] sm:$0xff]  ;;  %v3236_v14 = vld [vmem:[#allocation3 + $0xf20] sm:$0xff]  ;;  %v3238_v35 = vld [vmem:[#allocation3 + $0xf30] sm:$0xff] }
 0x86a   :  { %v8202_v25 = vmul.f32 0.0625, %v5165_v52  ;;  %v5245_v63 = vadd.f32 %v5244_v1, %v5243_v59  ;;  %v8204_v39 = vmul.f32 0.0625, %v5179_v29  ;;  %v5259_v48 = vadd.f32 %v5258_v2, %v5257_v50  ;;  %4612 = vmatpush1.bf16.msra.mxu0 %v3212_v9  ;;  %4956 = vmatpush1.bf16.msra.mxu1 %v3214_v3  ;;  %v3245_v28 = vld [vmem:[#allocation3 + $0xf68] sm:$0xff]  ;;  %v3247_v9 = vld [vmem:[#allocation3 + $0xf78] sm:$0xff]  ;;  %v3244_v29 = vld [vmem:[#allocation3 + $0xf60] sm:$0xff] }
 0x86b   :  { %v5288_v57 = vmul.f32 0.0625, %v5238_v5  ;;  %v5296_v31 = vmul.f32 %v8198_v53, %v8198_v53  ;;  %v5290_v41 = vmul.f32 0.0625, %v5252_v54  ;;  %v5298_v33 = vmul.f32 %v8200_v38, %v8200_v38  ;;  %4613 = vmatprep.subr.bf16.mxu0 %v3221_v11  ;;  %4957 = vmatprep.subr.bf16.mxu1 %v3223_v49  ;;  %v3246_v2 = vld [vmem:[#allocation3 + $0xf70] sm:$0xff]  ;;  %v3253_v11 = vld [vmem:[#allocation3 + $0xfa8] sm:$0xff]  ;;  %v3255_v49 = vld [vmem:[#allocation3 + $0xfb8] sm:$0xff] }
 0x86c   :  { %v5289_v26 = vmul.f32 0.0625, %v5245_v63  ;;  %v5297_v0 = vmul.f32 %v8202_v25, %v8202_v25  ;;  %v5291_v32 = vmul.f32 0.0625, %v5259_v48  ;;  %v5299_v21 = vmul.f32 %v8204_v39, %v8204_v39  ;;  %v3252_v63 = vld [vmem:[#allocation3 + $0xfa0] sm:$0xff]  ;;  %v3254_v48 = vld [vmem:[#allocation3 + $0xfb0] sm:$0xff] }
 0x86d   :  { %v5304_v4 = vsub.f32 %v5288_v57, %v5296_v31  ;;  %v5306_v19 = vsub.f32 %v5290_v41, %v5298_v33  ;;  %v7478_v3 = vmov 1966171168   ;;  %v5352_v1 = vlaneseq  ;;  %v3261_v57 = vld [vmem:[#allocation3 + $0xfe8] sm:$0xff]  ;;  %v3263_v31 = vld [vmem:[#allocation3 + $0xff8] sm:$0xff] }
 0x86e   :  { %v5305_v40 = vsub.f32 %v5289_v26, %v5297_v0  ;;  %v5307_v44 = vsub.f32 %v5291_v32, %v5299_v21  ;;  %4614 = vmatpush1.bf16.msra.mxu0 %v3220_v46  ;;  %4958 = vmatpush1.bf16.msra.mxu1 %v3222_v7  ;;  %v5350_v52 = vunpack.c.l.s4 %v7478_v3  ;;  %v3260_v26 = vld [vmem:[#allocation3 + $0xfe0] sm:$0xff]  ;;  %v3262_v0 = vld [vmem:[#allocation3 + $0xff0] sm:$0xff]  ;;  %v3309_v3 = vld [vmem:[#allocation3 + $0x1168] sm:$0xff] }
 0x86f   :  { %v5312_v45 = vmax.f32 %v5304_v4, 0.0  ;;  %v5314_v20 = vmax.f32 %v5306_v19, 0.0  ;;  %4615 = vmatprep.subr.bf16.mxu0 %v3229_v43  ;;  %4959 = vmatprep.subr.bf16.mxu1 %v3231_v8  ;;  %v8215_v54 = vshrl.u32 %v5352_v1, 7  ;;  %v3269_v43 = vld [vmem:[#allocation3 + $0x1028] sm:$0xff]  ;;  %v3271_v8 = vld [vmem:[#allocation3 + $0x1038] sm:$0xff] }
 0x870   :  { %v5313_v30 = vmax.f32 %v5305_v40, 0.0  ;;  %v5315_v12 = vmax.f32 %v5307_v44, 0.0  ;;  %v5351_v5 = vunpack.c.0.s8 %v5350_v52  ;;  %v3268_v44 = vld [vmem:[#allocation3 + $0x1020] sm:$0xff]  ;;  %v3311_v52 = vld [vmem:[#allocation3 + $0x1178] sm:$0xff] }
 0x871   :  { %v5321_v59 = vadd.f32 1e-05, %v5312_v45  ;;  %v5323_v42 = vadd.f32 1e-05, %v5314_v20  ;;  %v3270_v45 = vld [vmem:[#allocation3 + $0x1030] sm:$0xff]  ;;  %v3277_v20 = vld [vmem:[#allocation3 + $0x1068] sm:$0xff] }
 0x872   :  { %v5322_v50 = vadd.f32 1e-05, %v5313_v30  ;;  %v5324_v10 = vadd.f32 1e-05, %v5315_v12  ;;  %4616 = vmatpush1.bf16.msra.mxu0 %v3228_v27  ;;  %4960 = vmatpush1.bf16.msra.mxu1 %v3230_v16  ;;  %v8218_v46 = vsub.s32 %v5351_v5, %v8215_v54  ;;  %v3279_v27 = vld [vmem:[#allocation3 + $0x1078] sm:$0xff]  ;;  %v3276_v30 = vld [vmem:[#allocation3 + $0x1060] sm:$0xff] }
 0x873   :  { %7191 = vrsqrt.f32 %v5321_v59  ;;  %4617 = vmatprep.subr.bf16.mxu0 %v3237_v23  ;;  %4961 = vmatprep.subr.bf16.mxu1 %v3239_v51  ;;  %v3278_v12 = vld [vmem:[#allocation3 + $0x1070] sm:$0xff]  ;;  %v3285_v23 = vld [vmem:[#allocation3 + $0x10a8] sm:$0xff]  ;;  %v3287_v51 = vld [vmem:[#allocation3 + $0x10b8] sm:$0xff] }
 0x874   :  { %7193 = vrsqrt.f32 %v5323_v42  ;;  %v3284_v59 = vld [vmem:[#allocation3 + $0x10a0] sm:$0xff]  ;;  %v3286_v42 = vld [vmem:[#allocation3 + $0x10b0] sm:$0xff] }
 0x875   :  { %7195 = vrsqrt.f32 %v5322_v50  ;;  %v3293_v50 = vld [vmem:[#allocation3 + $0x10e8] sm:$0xff]  ;;  %v3316_v5 = vld [vmem:[#allocation3 + $0x11a0] sm:$0xff] }
 0x876   :  { %7197 = vrsqrt.f32 %v5324_v10  ;;  %4618 = vmatpush1.bf16.msra.mxu0 %v3236_v14  ;;  %4962 = vmatpush1.bf16.msra.mxu1 %v3238_v35  ;;  %v3292_v10 = vld [vmem:[#allocation3 + $0x10e0] sm:$0xff]  ;;  %v3294_v14 = vld [vmem:[#allocation3 + $0x10f0] sm:$0xff]  ;;  %v3301_v35 = vld [vmem:[#allocation3 + $0x1128] sm:$0xff] }
 0x877   :  { %4619 = vmatprep.subr.bf16.mxu0 %v3245_v28  ;;  %4963 = vmatprep.subr.bf16.mxu1 %v3247_v9  ;;  %v3303_v28 = vld [vmem:[#allocation3 + $0x1138] sm:$0xff]  ;;  %v3302_v9 = vld [vmem:[#allocation3 + $0x1130] sm:$0xff] }
 0x87a   :  { %4620 = vmatpush1.bf16.msra.mxu0 %v3244_v29  ;;  %4964 = vmatpush1.bf16.msra.mxu1 %v3246_v2  ;;  %v3308_v29 = vld [vmem:[#allocation3 + $0x1160] sm:$0xff]  ;;  %v3310_v2 = vld [vmem:[#allocation3 + $0x1170] sm:$0xff] }
 0x87b   :  { %4621 = vmatprep.subr.bf16.mxu0 %v3253_v11  ;;  %4965 = vmatprep.subr.bf16.mxu1 %v3255_v49  ;;  %v3317_v11 = vld [vmem:[#allocation3 + $0x11a8] sm:$0xff]  ;;  %v3319_v49 = vld [vmem:[#allocation3 + $0x11b8] sm:$0xff] }
 0x87d   :  { %v7192_v41 = vpop.eup %7191 }
 0x87e   :  { %v7194_v33 = vpop.eup %7193  ;;  %4622 = vmatpush1.bf16.msra.mxu0 %v3252_v63  ;;  %4966 = vmatpush1.bf16.msra.mxu1 %v3254_v48  ;;  %v3318_v63 = vld [vmem:[#allocation3 + $0x11b0] sm:$0xff]  ;;  %v3325_v48 = vld [vmem:[#allocation3 + $0x11e8] sm:$0xff] }
 0x87f   :  { %v7196_v7 = vpop.eup %7195  ;;  %4623 = vmatprep.subr.bf16.mxu0 %v3261_v57  ;;  %4967 = vmatprep.subr.bf16.mxu1 %v3263_v31  ;;  %v3327_v57 = vld [vmem:[#allocation3 + $0x11f8] sm:$0xff]  ;;  %v3324_v31 = vld [vmem:[#allocation3 + $0x11e0] sm:$0xff] }
 0x880   :  { %v7198_v32 = vpop.eup %7197  ;;  %v5345_v21 = vcombine.low %v7192_v41, %v7196_v7  ;;  %v3326_v41 = vld [vmem:[#allocation3 + $0x11f0] sm:$0xff]  ;;  %v3335_v7 = vld [vmem:[#allocation3 + $0x1238] sm:$0xff] }
 0x881   :  { %v5346_v4 = vcombine.low %v7194_v33, %v7198_v32  ;;  %v3333_v33 = vld [vmem:[#allocation3 + $0x1228] sm:$0xff] }
 0x882   :  { %v8221_v19 = vrot.slane %v5345_v21, %v8218_v46  ;;  %4624 = vmatpush1.bf16.msra.mxu0 %v3260_v26  ;;  %4968 = vmatpush1.bf16.msra.mxu1 %v3262_v0  ;;  %v3332_v26 = vld [vmem:[#allocation3 + $0x1220] sm:$0xff]  ;;  %v3334_v0 = vld [vmem:[#allocation3 + $0x1230] sm:$0xff]  ;;  %v3341_v32 = vld [vmem:[#allocation3 + $0x1268] sm:$0xff] }
 0x883   :  { %v8224_v40 = vrot.slane %v5346_v4, %v8218_v46  ;;  %4636 = vmatprep.subr.bf16.mxu0 %v3269_v43  ;;  %4980 = vmatprep.subr.bf16.mxu1 %v3271_v8  ;;  %v3343_v21 = vld [vmem:[#allocation3 + $0x1278] sm:$0xff]  ;;  %v3340_v43 = vld [vmem:[#allocation3 + $0x1260] sm:$0xff]  ;;  %v3342_v8 = vld [vmem:[#allocation3 + $0x1270] sm:$0xff] }
 0x884   :  { %v3349_v4 = vld [vmem:[#allocation3 + $0x12a8] sm:$0xff] }
 0x885   :  { %v5377_v16 = vcombine.low %v8221_v19, %v8224_v40  ;;  %4626 = vmatmul.mubr.bf16.vlgmr.msra.gmra.mrb[20].mxu0 %v8076_v61  ;;  %4970 = vmatmul.mubr.bf16.vlgmr.msra.gmra.mrb[24].mxu1 %v8076_v61  ;;  %v3295_v61 = vld [vmem:[#allocation3 + $0x10f8] sm:$0xff]  ;;  %v5420_v19 = vsub.s32 5, %v8215_v54  ;;  %v5424_v40 = vsub.s32 6, %v8215_v54 }
 0x886   :  { %4637 = vmatpush1.bf16.msra.mxu0 %v3268_v44  ;;  %4981 = vmatpush1.bf16.msra.mxu1 %v3270_v45  ;;  %v3351_v44 = vld [vmem:[#allocation3 + $0x12b8] sm:$0xff]  ;;  %v3348_v45 = vld [vmem:[#allocation3 + $0x12a0] sm:$0xff] }
 0x887   :  { %4638 = vmatprep.subr.bf16.mxu0 %v3277_v20  ;;  %4982 = vmatprep.subr.bf16.mxu1 %v3279_v27  ;;  %v3350_v20 = vld [vmem:[#allocation3 + $0x12b0] sm:$0xff]  ;;  %v3357_v27 = vld [vmem:[#allocation3 + $0x12e8] sm:$0xff] }
 0x888   :  { %4668 = vmatprep.mubr.bf16.mxu0 %v8082_v55  ;;  %5012 = vmatprep.mubr.bf16.mxu1 %v8082_v55  ;;  %v3300_v55 = vld [vmem:[#allocation3 + $0x1120] sm:$0xff] }
 0x88a   :  { %4639 = vmatpush1.bf16.msra.mxu0 %v3276_v30  ;;  %4983 = vmatpush1.bf16.msra.mxu1 %v3278_v12  ;;  %v3359_v30 = vld [vmem:[#allocation3 + $0x12f8] sm:$0xff]  ;;  %v3356_v12 = vld [vmem:[#allocation3 + $0x12e0] sm:$0xff] }
 0x88b   :  { %4640 = vmatprep.subr.bf16.mxu0 %v3285_v23  ;;  %4984 = vmatprep.subr.bf16.mxu1 %v3287_v51  ;;  %v3358_v23 = vld [vmem:[#allocation3 + $0x12f0] sm:$0xff]  ;;  %v3365_v51 = vld [vmem:[#allocation3 + $0x1328] sm:$0xff] }
 0x88e   :  { %4641 = vmatpush1.bf16.msra.mxu0 %v3284_v59  ;;  %4985 = vmatpush1.bf16.msra.mxu1 %v3286_v42  ;;  %v3367_v59 = vld [vmem:[#allocation3 + $0x1338] sm:$0xff]  ;;  %v3364_v42 = vld [vmem:[#allocation3 + $0x1320] sm:$0xff] }
 0x88f   :  { %4642 = vmatprep.subr.bf16.mxu0 %v3293_v50  ;;  %4986 = vmatprep.subr.bf16.mxu1 %v3295_v61  ;;  %v3366_v50 = vld [vmem:[#allocation3 + $0x1330] sm:$0xff]  ;;  %v3373_v61 = vld [vmem:[#allocation3 + $0x1368] sm:$0xff] }
 0x892   :  { %4643 = vmatpush1.bf16.msra.mxu0 %v3292_v10  ;;  %4987 = vmatpush1.bf16.msra.mxu1 %v3294_v14  ;;  %v3375_v10 = vld [vmem:[#allocation3 + $0x1378] sm:$0xff]  ;;  %v3372_v14 = vld [vmem:[#allocation3 + $0x1360] sm:$0xff] }
 0x893   :  { %4644 = vmatprep.subr.bf16.mxu0 %v3301_v35  ;;  %4988 = vmatprep.subr.bf16.mxu1 %v3303_v28  ;;  %v3374_v35 = vld [vmem:[#allocation3 + $0x1370] sm:$0xff]  ;;  %v3381_v28 = vld [vmem:[#allocation3 + $0x13a8] sm:$0xff] }
 0x896   :  { %4645 = vmatpush1.bf16.msra.mxu0 %v3300_v55  ;;  %4989 = vmatpush1.bf16.msra.mxu1 %v3302_v9  ;;  %v3383_v55 = vld [vmem:[#allocation3 + $0x13b8] sm:$0xff]  ;;  %v3380_v9 = vld [vmem:[#allocation3 + $0x13a0] sm:$0xff] }
 0x897   :  { %4646 = vmatprep.subr.bf16.mxu0 %v3309_v3  ;;  %4990 = vmatprep.subr.bf16.mxu1 %v3311_v52  ;;  %v3382_v3 = vld [vmem:[#allocation3 + $0x13b0] sm:$0xff]  ;;  %v3389_v52 = vld [vmem:[#allocation3 + $0x13e8] sm:$0xff] }
 0x89a   :  { %4647 = vmatpush1.bf16.msra.mxu0 %v3308_v29  ;;  %4991 = vmatpush1.bf16.msra.mxu1 %v3310_v2  ;;  %v3391_v29 = vld [vmem:[#allocation3 + $0x13f8] sm:$0xff]  ;;  %v3388_v2 = vld [vmem:[#allocation3 + $0x13e0] sm:$0xff] }
 0x89b   :  { %4648 = vmatprep.subr.bf16.mxu0 %v3317_v11  ;;  %4992 = vmatprep.subr.bf16.mxu1 %v3319_v49  ;;  %v3390_v11 = vld [vmem:[#allocation3 + $0x13f0] sm:$0xff]  ;;  %v3397_v49 = vld [vmem:[#allocation3 + $0x1428] sm:$0xff] }
 0x89e   :  { %4649 = vmatpush1.bf16.msra.mxu0 %v3316_v5  ;;  %4993 = vmatpush1.bf16.msra.mxu1 %v3318_v63  ;;  %v3399_v5 = vld [vmem:[#allocation3 + $0x1438] sm:$0xff]  ;;  %v3396_v63 = vld [vmem:[#allocation3 + $0x1420] sm:$0xff] }
 0x89f   :  { %4650 = vmatprep.subr.bf16.mxu0 %v3325_v48  ;;  %4994 = vmatprep.subr.bf16.mxu1 %v3327_v57  ;;  %v3398_v48 = vld [vmem:[#allocation3 + $0x1430] sm:$0xff]  ;;  %v3405_v57 = vld [vmem:[#allocation3 + $0x1468] sm:$0xff] }
 0x8a2   :  { %4651 = vmatpush1.bf16.msra.mxu0 %v3324_v31  ;;  %4995 = vmatpush1.bf16.msra.mxu1 %v3326_v41  ;;  %v3407_v31 = vld [vmem:[#allocation3 + $0x1478] sm:$0xff]  ;;  %v3404_v41 = vld [vmem:[#allocation3 + $0x1460] sm:$0xff] }
 0x8a3   :  { %4652 = vmatprep.subr.bf16.mxu0 %v3333_v33  ;;  %4996 = vmatprep.subr.bf16.mxu1 %v3335_v7  ;;  %v3406_v33 = vld [vmem:[#allocation3 + $0x1470] sm:$0xff]  ;;  %v3413_v7 = vld [vmem:[#allocation3 + $0x14a8] sm:$0xff] }
 0x8a6   :  { %4653 = vmatpush1.bf16.msra.mxu0 %v3332_v26  ;;  %4997 = vmatpush1.bf16.msra.mxu1 %v3334_v0  ;;  %v3415_v26 = vld [vmem:[#allocation3 + $0x14b8] sm:$0xff]  ;;  %v3412_v0 = vld [vmem:[#allocation3 + $0x14a0] sm:$0xff] }
 0x8a7   :  { %4654 = vmatprep.subr.bf16.mxu0 %v3341_v32  ;;  %4998 = vmatprep.subr.bf16.mxu1 %v3343_v21  ;;  %v3414_v32 = vld [vmem:[#allocation3 + $0x14b0] sm:$0xff]  ;;  %v3421_v21 = vld [vmem:[#allocation3 + $0x14e8] sm:$0xff] }
 0x8aa   :  { %4655 = vmatpush1.bf16.msra.mxu0 %v3340_v43  ;;  %4999 = vmatpush1.bf16.msra.mxu1 %v3342_v8  ;;  %v3420_v43 = vld [vmem:[#allocation3 + $0x14e0] sm:$0xff]  ;;  %v3422_v8 = vld [vmem:[#allocation3 + $0x14f0] sm:$0xff] }
 0x8ab   :  { %4656 = vmatprep.subr.bf16.mxu0 %v3349_v4  ;;  %5000 = vmatprep.subr.bf16.mxu1 %v3351_v44  ;;  %v3429_v4 = vld [vmem:[#allocation3 + $0x1528] sm:$0xff]  ;;  %v3431_v44 = vld [vmem:[#allocation3 + $0x1538] sm:$0xff] }
 0x8ae   :  { %4657 = vmatpush1.bf16.msra.mxu0 %v3348_v45  ;;  %5001 = vmatpush1.bf16.msra.mxu1 %v3350_v20  ;;  %v3430_v45 = vld [vmem:[#allocation3 + $0x1530] sm:$0xff]  ;;  %v3437_v20 = vld [vmem:[#allocation3 + $0x1568] sm:$0xff] }
 0x8af   :  { %4658 = vmatprep.subr.bf16.mxu0 %v3357_v27  ;;  %5002 = vmatprep.subr.bf16.mxu1 %v3359_v30  ;;  %v3439_v27 = vld [vmem:[#allocation3 + $0x1578] sm:$0xff]  ;;  %v3436_v30 = vld [vmem:[#allocation3 + $0x1560] sm:$0xff] }
 0x8b2   :  { %4659 = vmatpush1.bf16.msra.mxu0 %v3356_v12  ;;  %5003 = vmatpush1.bf16.msra.mxu1 %v3358_v23  ;;  %v3438_v12 = vld [vmem:[#allocation3 + $0x1570] sm:$0xff]  ;;  %v3445_v23 = vld [vmem:[#allocation3 + $0x15a8] sm:$0xff] }
 0x8b3   :  { %4660 = vmatprep.subr.bf16.mxu0 %v3365_v51  ;;  %5004 = vmatprep.subr.bf16.mxu1 %v3367_v59  ;;  %v3447_v51 = vld [vmem:[#allocation3 + $0x15b8] sm:$0xff]  ;;  %v3444_v59 = vld [vmem:[#allocation3 + $0x15a0] sm:$0xff] }
 0x8b6   :  { %4661 = vmatpush1.bf16.msra.mxu0 %v3364_v42  ;;  %5005 = vmatpush1.bf16.msra.mxu1 %v3366_v50  ;;  %v3446_v42 = vld [vmem:[#allocation3 + $0x15b0] sm:$0xff]  ;;  %v3453_v50 = vld [vmem:[#allocation3 + $0x15e8] sm:$0xff] }
 0x8b7   :  { %4662 = vmatprep.subr.bf16.mxu0 %v3373_v61  ;;  %5006 = vmatprep.subr.bf16.mxu1 %v3375_v10  ;;  %v3455_v61 = vld [vmem:[#allocation3 + $0x15f8] sm:$0xff]  ;;  %v3452_v10 = vld [vmem:[#allocation3 + $0x15e0] sm:$0xff] }
 0x8ba   :  { %4663 = vmatpush1.bf16.msra.mxu0 %v3372_v14  ;;  %5007 = vmatpush1.bf16.msra.mxu1 %v3374_v35  ;;  %v3454_v14 = vld [vmem:[#allocation3 + $0x15f0] sm:$0xff]  ;;  %v3461_v35 = vld [vmem:[#allocation3 + $0x1628] sm:$0xff] }
 0x8bb   :  { %4664 = vmatprep.subr.bf16.mxu0 %v3381_v28  ;;  %5008 = vmatprep.subr.bf16.mxu1 %v3383_v55  ;;  %v3463_v28 = vld [vmem:[#allocation3 + $0x1638] sm:$0xff]  ;;  %v3460_v55 = vld [vmem:[#allocation3 + $0x1620] sm:$0xff] }
 0x8be   :  { %4665 = vmatpush1.bf16.msra.mxu0 %v3380_v9  ;;  %5009 = vmatpush1.bf16.msra.mxu1 %v3382_v3  ;;  %v3462_v9 = vld [vmem:[#allocation3 + $0x1630] sm:$0xff]  ;;  %v3469_v3 = vld [vmem:[#allocation3 + $0x1668] sm:$0xff] }
 0x8bf   :  { %4666 = vmatprep.subr.bf16.mxu0 %v3389_v52  ;;  %5010 = vmatprep.subr.bf16.mxu1 %v3391_v29  ;;  %v3471_v52 = vld [vmem:[#allocation3 + $0x1678] sm:$0xff]  ;;  %v3468_v29 = vld [vmem:[#allocation3 + $0x1660] sm:$0xff] }
 0x8c2   :  { %4667 = vmatpush1.bf16.msra.mxu0 %v3388_v2  ;;  %5011 = vmatpush1.bf16.msra.mxu1 %v3390_v11  ;;  %v3470_v2 = vld [vmem:[#allocation3 + $0x1670] sm:$0xff]  ;;  %v3477_v11 = vld [vmem:[#allocation3 + $0x16a8] sm:$0xff] }
 0x8c3   :  { %4679 = vmatprep.subr.bf16.mxu0 %v3397_v49  ;;  %5023 = vmatprep.subr.bf16.mxu1 %v3399_v5  ;;  %v3479_v49 = vld [vmem:[#allocation3 + $0x16b8] sm:$0xff]  ;;  %v3476_v5 = vld [vmem:[#allocation3 + $0x16a0] sm:$0xff] }
 0x8c5   :  { %4669 = vmatmul.mubr.bf16.vlgmr.msra.gmra.mrb[20].mxu0 %v8092_v22  ;;  %5013 = vmatmul.mubr.bf16.vlgmr.msra.gmra.mrb[24].mxu1 %v8092_v22  ;;  %v3423_v22 = vld [vmem:[#allocation3 + $0x14f8] sm:$0xff] }
 0x8c6   :  { %4680 = vmatpush1.bf16.msra.mxu0 %v3396_v63  ;;  %5024 = vmatpush1.bf16.msra.mxu1 %v3398_v48  ;;  %v3478_v63 = vld [vmem:[#allocation3 + $0x16b0] sm:$0xff]  ;;  %v3485_v48 = vld [vmem:[#allocation3 + $0x16e8] sm:$0xff] }
 0x8c7   :  { %4681 = vmatprep.subr.bf16.mxu0 %v3405_v57  ;;  %5025 = vmatprep.subr.bf16.mxu1 %v3407_v31  ;;  %v3487_v57 = vld [vmem:[#allocation3 + $0x16f8] sm:$0xff]  ;;  %v3484_v31 = vld [vmem:[#allocation3 + $0x16e0] sm:$0xff] }
 0x8c8   :  { %4711 = vmatprep.mubr.bf16.mxu0 %v8098_v62  ;;  %5055 = vmatprep.mubr.bf16.mxu1 %v8098_v62  ;;  %v3428_v62 = vld [vmem:[#allocation3 + $0x1520] sm:$0xff] }
 0x8ca   :  { %4682 = vmatpush1.bf16.msra.mxu0 %v3404_v41  ;;  %5026 = vmatpush1.bf16.msra.mxu1 %v3406_v33  ;;  %v3486_v41 = vld [vmem:[#allocation3 + $0x16f0] sm:$0xff]  ;;  %v3493_v33 = vld [vmem:[#allocation3 + $0x1728] sm:$0xff] }
 0x8cb   :  { %4683 = vmatprep.subr.bf16.mxu0 %v3413_v7  ;;  %5027 = vmatprep.subr.bf16.mxu1 %v3415_v26  ;;  %v3495_v7 = vld [vmem:[#allocation3 + $0x1738] sm:$0xff]  ;;  %v3492_v26 = vld [vmem:[#allocation3 + $0x1720] sm:$0xff] }
 0x8ce   :  { %4684 = vmatpush1.bf16.msra.mxu0 %v3412_v0  ;;  %5028 = vmatpush1.bf16.msra.mxu1 %v3414_v32  ;;  %v3494_v0 = vld [vmem:[#allocation3 + $0x1730] sm:$0xff]  ;;  %v3501_v32 = vld [vmem:[#allocation3 + $0x1768] sm:$0xff] }
 0x8cf   :  { %4685 = vmatprep.subr.bf16.mxu0 %v3421_v21  ;;  %5029 = vmatprep.subr.bf16.mxu1 %v3423_v22  ;;  %v3503_v21 = vld [vmem:[#allocation3 + $0x1778] sm:$0xff]  ;;  %v3500_v22 = vld [vmem:[#allocation3 + $0x1760] sm:$0xff] }
 0x8d2   :  { %4686 = vmatpush1.bf16.msra.mxu0 %v3420_v43  ;;  %5030 = vmatpush1.bf16.msra.mxu1 %v3422_v8  ;;  %v3502_v43 = vld [vmem:[#allocation3 + $0x1770] sm:$0xff]  ;;  %v3509_v8 = vld [vmem:[#allocation3 + $0x17a8] sm:$0xff] }
 0x8d3   :  { %4687 = vmatprep.subr.bf16.mxu0 %v3429_v4  ;;  %5031 = vmatprep.subr.bf16.mxu1 %v3431_v44  ;;  %v3511_v4 = vld [vmem:[#allocation3 + $0x17b8] sm:$0xff]  ;;  %v3508_v44 = vld [vmem:[#allocation3 + $0x17a0] sm:$0xff] }
 0x8d6   :  { %4688 = vmatpush1.bf16.msra.mxu0 %v3428_v62  ;;  %5032 = vmatpush1.bf16.msra.mxu1 %v3430_v45  ;;  %v3510_v62 = vld [vmem:[#allocation3 + $0x17b0] sm:$0xff]  ;;  %v3517_v45 = vld [vmem:[#allocation3 + $0x17e8] sm:$0xff] }
 0x8d7   :  { %4689 = vmatprep.subr.bf16.mxu0 %v3437_v20  ;;  %5033 = vmatprep.subr.bf16.mxu1 %v3439_v27  ;;  %v3519_v20 = vld [vmem:[#allocation3 + $0x17f8] sm:$0xff]  ;;  %v3516_v27 = vld [vmem:[#allocation3 + $0x17e0] sm:$0xff] }
 0x8da   :  { %4690 = vmatpush1.bf16.msra.mxu0 %v3436_v30  ;;  %5034 = vmatpush1.bf16.msra.mxu1 %v3438_v12  ;;  %v3518_v30 = vld [vmem:[#allocation3 + $0x17f0] sm:$0xff]  ;;  %v3525_v12 = vld [vmem:[#allocation3 + $0x1828] sm:$0xff] }
 0x8db   :  { %4691 = vmatprep.subr.bf16.mxu0 %v3445_v23  ;;  %5035 = vmatprep.subr.bf16.mxu1 %v3447_v51  ;;  %v3527_v23 = vld [vmem:[#allocation3 + $0x1838] sm:$0xff]  ;;  %v3524_v51 = vld [vmem:[#allocation3 + $0x1820] sm:$0xff] }
 0x8de   :  { %4692 = vmatpush1.bf16.msra.mxu0 %v3444_v59  ;;  %5036 = vmatpush1.bf16.msra.mxu1 %v3446_v42  ;;  %v3526_v59 = vld [vmem:[#allocation3 + $0x1830] sm:$0xff]  ;;  %v3533_v42 = vld [vmem:[#allocation3 + $0x1868] sm:$0xff] }
 0x8df   :  { %4693 = vmatprep.subr.bf16.mxu0 %v3453_v50  ;;  %5037 = vmatprep.subr.bf16.mxu1 %v3455_v61  ;;  %v3535_v50 = vld [vmem:[#allocation3 + $0x1878] sm:$0xff]  ;;  %v3532_v61 = vld [vmem:[#allocation3 + $0x1860] sm:$0xff] }
 0x8e2   :  { %4694 = vmatpush1.bf16.msra.mxu0 %v3452_v10  ;;  %5038 = vmatpush1.bf16.msra.mxu1 %v3454_v14  ;;  %v3534_v10 = vld [vmem:[#allocation3 + $0x1870] sm:$0xff]  ;;  %v3541_v14 = vld [vmem:[#allocation3 + $0x18a8] sm:$0xff] }
 0x8e3   :  { %4695 = vmatprep.subr.bf16.mxu0 %v3461_v35  ;;  %5039 = vmatprep.subr.bf16.mxu1 %v3463_v28  ;;  %v3543_v35 = vld [vmem:[#allocation3 + $0x18b8] sm:$0xff]  ;;  %v3540_v28 = vld [vmem:[#allocation3 + $0x18a0] sm:$0xff] }
 0x8e6   :  { %4696 = vmatpush1.bf16.msra.mxu0 %v3460_v55  ;;  %5040 = vmatpush1.bf16.msra.mxu1 %v3462_v9  ;;  %v3542_v55 = vld [vmem:[#allocation3 + $0x18b0] sm:$0xff]  ;;  %v3549_v9 = vld [vmem:[#allocation3 + $0x18e8] sm:$0xff] }
 0x8e7   :  { %4697 = vmatprep.subr.bf16.mxu0 %v3469_v3  ;;  %5041 = vmatprep.subr.bf16.mxu1 %v3471_v52  ;;  %v3548_v3 = vld [vmem:[#allocation3 + $0x18e0] sm:$0xff]  ;;  %v3550_v52 = vld [vmem:[#allocation3 + $0x18f0] sm:$0xff] }
 0x8ea   :  { %4698 = vmatpush1.bf16.msra.mxu0 %v3468_v29  ;;  %5042 = vmatpush1.bf16.msra.mxu1 %v3470_v2  ;;  %v3557_v29 = vld [vmem:[#allocation3 + $0x1928] sm:$0xff]  ;;  %v3559_v2 = vld [vmem:[#allocation3 + $0x1938] sm:$0xff] }
 0x8eb   :  { %4699 = vmatprep.subr.bf16.mxu0 %v3477_v11  ;;  %5043 = vmatprep.subr.bf16.mxu1 %v3479_v49  ;;  %v3558_v11 = vld [vmem:[#allocation3 + $0x1930] sm:$0xff]  ;;  %v3565_v49 = vld [vmem:[#allocation3 + $0x1968] sm:$0xff] }
 0x8ee   :  { %4700 = vmatpush1.bf16.msra.mxu0 %v3476_v5  ;;  %5044 = vmatpush1.bf16.msra.mxu1 %v3478_v63  ;;  %v3567_v5 = vld [vmem:[#allocation3 + $0x1978] sm:$0xff]  ;;  %v3564_v63 = vld [vmem:[#allocation3 + $0x1960] sm:$0xff] }
 0x8ef   :  { %4701 = vmatprep.subr.bf16.mxu0 %v3485_v48  ;;  %5045 = vmatprep.subr.bf16.mxu1 %v3487_v57  ;;  %v3566_v48 = vld [vmem:[#allocation3 + $0x1970] sm:$0xff]  ;;  %v3573_v57 = vld [vmem:[#allocation3 + $0x19a8] sm:$0xff] }
 0x8f2   :  { %4702 = vmatpush1.bf16.msra.mxu0 %v3484_v31  ;;  %5046 = vmatpush1.bf16.msra.mxu1 %v3486_v41  ;;  %v3575_v31 = vld [vmem:[#allocation3 + $0x19b8] sm:$0xff]  ;;  %v3572_v41 = vld [vmem:[#allocation3 + $0x19a0] sm:$0xff] }
 0x8f3   :  { %4703 = vmatprep.subr.bf16.mxu0 %v3493_v33  ;;  %5047 = vmatprep.subr.bf16.mxu1 %v3495_v7  ;;  %v3574_v33 = vld [vmem:[#allocation3 + $0x19b0] sm:$0xff]  ;;  %v3581_v7 = vld [vmem:[#allocation3 + $0x19e8] sm:$0xff] }
 0x8f6   :  { %4704 = vmatpush1.bf16.msra.mxu0 %v3492_v26  ;;  %5048 = vmatpush1.bf16.msra.mxu1 %v3494_v0  ;;  %v3583_v26 = vld [vmem:[#allocation3 + $0x19f8] sm:$0xff]  ;;  %v3580_v0 = vld [vmem:[#allocation3 + $0x19e0] sm:$0xff] }
 0x8f7   :  { %4705 = vmatprep.subr.bf16.mxu0 %v3501_v32  ;;  %5049 = vmatprep.subr.bf16.mxu1 %v3503_v21  ;;  %v3582_v32 = vld [vmem:[#allocation3 + $0x19f0] sm:$0xff]  ;;  %v3589_v21 = vld [vmem:[#allocation3 + $0x1a28] sm:$0xff] }
 0x8fa   :  { %4706 = vmatpush1.bf16.msra.mxu0 %v3500_v22  ;;  %5050 = vmatpush1.bf16.msra.mxu1 %v3502_v43  ;;  %v3591_v22 = vld [vmem:[#allocation3 + $0x1a38] sm:$0xff]  ;;  %v3588_v43 = vld [vmem:[#allocation3 + $0x1a20] sm:$0xff] }
 0x8fb   :  { %4707 = vmatprep.subr.bf16.mxu0 %v3509_v8  ;;  %5051 = vmatprep.subr.bf16.mxu1 %v3511_v4  ;;  %v3590_v8 = vld [vmem:[#allocation3 + $0x1a30] sm:$0xff]  ;;  %v3597_v4 = vld [vmem:[#allocation3 + $0x1a68] sm:$0xff] }
 0x8fe   :  { %4708 = vmatpush1.bf16.msra.mxu0 %v3508_v44  ;;  %5052 = vmatpush1.bf16.msra.mxu1 %v3510_v62  ;;  %v3599_v44 = vld [vmem:[#allocation3 + $0x1a78] sm:$0xff]  ;;  %v3596_v62 = vld [vmem:[#allocation3 + $0x1a60] sm:$0xff] }
 0x8ff   :  { %4709 = vmatprep.subr.bf16.mxu0 %v3517_v45  ;;  %5053 = vmatprep.subr.bf16.mxu1 %v3519_v20  ;;  %v3598_v45 = vld [vmem:[#allocation3 + $0x1a70] sm:$0xff]  ;;  %v3605_v20 = vld [vmem:[#allocation3 + $0x1aa8] sm:$0xff] }
 0x902   :  { %4710 = vmatpush1.bf16.msra.mxu0 %v3516_v27  ;;  %5054 = vmatpush1.bf16.msra.mxu1 %v3518_v30  ;;  %v3607_v27 = vld [vmem:[#allocation3 + $0x1ab8] sm:$0xff]  ;;  %v3604_v30 = vld [vmem:[#allocation3 + $0x1aa0] sm:$0xff] }
 0x903   :  { %4722 = vmatprep.subr.bf16.mxu0 %v3525_v12  ;;  %5066 = vmatprep.subr.bf16.mxu1 %v3527_v23  ;;  %v3606_v12 = vld [vmem:[#allocation3 + $0x1ab0] sm:$0xff]  ;;  %v3613_v23 = vld [vmem:[#allocation3 + $0x1ae8] sm:$0xff] }
 0x905   :  { %4712 = vmatmul.mubr.bf16.vlgmr.msra.gmra.mrb[20].mxu0 %v8108_v34  ;;  %5056 = vmatmul.mubr.bf16.vlgmr.msra.gmra.mrb[24].mxu1 %v8108_v34  ;;  %v3551_v34 = vld [vmem:[#allocation3 + $0x18f8] sm:$0xff] }
 0x906   :  { %4723 = vmatpush1.bf16.msra.mxu0 %v3524_v51  ;;  %5067 = vmatpush1.bf16.msra.mxu1 %v3526_v59  ;;  %v3615_v51 = vld [vmem:[#allocation3 + $0x1af8] sm:$0xff]  ;;  %v3612_v59 = vld [vmem:[#allocation3 + $0x1ae0] sm:$0xff] }
 0x907   :  { %4724 = vmatprep.subr.bf16.mxu0 %v3533_v42  ;;  %5068 = vmatprep.subr.bf16.mxu1 %v3535_v50  ;;  %v3614_v42 = vld [vmem:[#allocation3 + $0x1af0] sm:$0xff]  ;;  %v3621_v50 = vld [vmem:[#allocation3 + $0x1b28] sm:$0xff] }
 0x908   :  { %4754 = vmatprep.mubr.bf16.mxu0 %v8114_v36  ;;  %5098 = vmatprep.mubr.bf16.mxu1 %v8114_v36  ;;  %v3556_v36 = vld [vmem:[#allocation3 + $0x1920] sm:$0xff] }
 0x90a   :  { %4725 = vmatpush1.bf16.msra.mxu0 %v3532_v61  ;;  %5069 = vmatpush1.bf16.msra.mxu1 %v3534_v10  ;;  %v3623_v61 = vld [vmem:[#allocation3 + $0x1b38] sm:$0xff]  ;;  %v3620_v10 = vld [vmem:[#allocation3 + $0x1b20] sm:$0xff] }
 0x90b   :  { %4726 = vmatprep.subr.bf16.mxu0 %v3541_v14  ;;  %5070 = vmatprep.subr.bf16.mxu1 %v3543_v35  ;;  %v3622_v14 = vld [vmem:[#allocation3 + $0x1b30] sm:$0xff]  ;;  %v3629_v35 = vld [vmem:[#allocation3 + $0x1b68] sm:$0xff] }
 0x90e   :  { %4727 = vmatpush1.bf16.msra.mxu0 %v3540_v28  ;;  %5071 = vmatpush1.bf16.msra.mxu1 %v3542_v55  ;;  %v3631_v28 = vld [vmem:[#allocation3 + $0x1b78] sm:$0xff]  ;;  %v3628_v55 = vld [vmem:[#allocation3 + $0x1b60] sm:$0xff] }
 0x90f   :  { %4728 = vmatprep.subr.bf16.mxu0 %v3549_v9  ;;  %5072 = vmatprep.subr.bf16.mxu1 %v3551_v34  ;;  %v3630_v9 = vld [vmem:[#allocation3 + $0x1b70] sm:$0xff]  ;;  %v3637_v34 = vld [vmem:[#allocation3 + $0x1ba8] sm:$0xff] }
 0x912   :  { %4729 = vmatpush1.bf16.msra.mxu0 %v3548_v3  ;;  %5073 = vmatpush1.bf16.msra.mxu1 %v3550_v52  ;;  %v3639_v3 = vld [vmem:[#allocation3 + $0x1bb8] sm:$0xff]  ;;  %v3636_v52 = vld [vmem:[#allocation3 + $0x1ba0] sm:$0xff] }
 0x913   :  { %4730 = vmatprep.subr.bf16.mxu0 %v3557_v29  ;;  %5074 = vmatprep.subr.bf16.mxu1 %v3559_v2  ;;  %v3638_v29 = vld [vmem:[#allocation3 + $0x1bb0] sm:$0xff]  ;;  %v3645_v2 = vld [vmem:[#allocation3 + $0x1be8] sm:$0xff] }
 0x916   :  { %4731 = vmatpush1.bf16.msra.mxu0 %v3556_v36  ;;  %5075 = vmatpush1.bf16.msra.mxu1 %v3558_v11  ;;  %v3647_v36 = vld [vmem:[#allocation3 + $0x1bf8] sm:$0xff]  ;;  %v3644_v11 = vld [vmem:[#allocation3 + $0x1be0] sm:$0xff] }
 0x917   :  { %4732 = vmatprep.subr.bf16.mxu0 %v3565_v49  ;;  %5076 = vmatprep.subr.bf16.mxu1 %v3567_v5  ;;  %v3646_v49 = vld [vmem:[#allocation3 + $0x1bf0] sm:$0xff]  ;;  %v3653_v5 = vld [vmem:[#allocation3 + $0x1c28] sm:$0xff] }
 0x91a   :  { %4733 = vmatpush1.bf16.msra.mxu0 %v3564_v63  ;;  %5077 = vmatpush1.bf16.msra.mxu1 %v3566_v48  ;;  %v3655_v63 = vld [vmem:[#allocation3 + $0x1c38] sm:$0xff]  ;;  %v3652_v48 = vld [vmem:[#allocation3 + $0x1c20] sm:$0xff] }
 0x91b   :  { %4734 = vmatprep.subr.bf16.mxu0 %v3573_v57  ;;  %5078 = vmatprep.subr.bf16.mxu1 %v3575_v31  ;;  %v3654_v57 = vld [vmem:[#allocation3 + $0x1c30] sm:$0xff]  ;;  %v3661_v31 = vld [vmem:[#allocation3 + $0x1c68] sm:$0xff] }
 0x91e   :  { %4735 = vmatpush1.bf16.msra.mxu0 %v3572_v41  ;;  %5079 = vmatpush1.bf16.msra.mxu1 %v3574_v33  ;;  %v3663_v41 = vld [vmem:[#allocation3 + $0x1c78] sm:$0xff]  ;;  %v3660_v33 = vld [vmem:[#allocation3 + $0x1c60] sm:$0xff] }
 0x91f   :  { %4736 = vmatprep.subr.bf16.mxu0 %v3581_v7  ;;  %5080 = vmatprep.subr.bf16.mxu1 %v3583_v26  ;;  %v3662_v7 = vld [vmem:[#allocation3 + $0x1c70] sm:$0xff]  ;;  %v3669_v26 = vld [vmem:[#allocation3 + $0x1ca8] sm:$0xff] }
 0x922   :  { %4737 = vmatpush1.bf16.msra.mxu0 %v3580_v0  ;;  %5081 = vmatpush1.bf16.msra.mxu1 %v3582_v32  ;;  %v3671_v0 = vld [vmem:[#allocation3 + $0x1cb8] sm:$0xff]  ;;  %v3668_v32 = vld [vmem:[#allocation3 + $0x1ca0] sm:$0xff] }
 0x923   :  { %4738 = vmatprep.subr.bf16.mxu0 %v3589_v21  ;;  %5082 = vmatprep.subr.bf16.mxu1 %v3591_v22  ;;  %v3670_v21 = vld [vmem:[#allocation3 + $0x1cb0] sm:$0xff]  ;;  %v3677_v22 = vld [vmem:[#allocation3 + $0x1ce8] sm:$0xff] }
 0x926   :  { %4739 = vmatpush1.bf16.msra.mxu0 %v3588_v43  ;;  %5083 = vmatpush1.bf16.msra.mxu1 %v3590_v8  ;;  %v3676_v43 = vld [vmem:[#allocation3 + $0x1ce0] sm:$0xff]  ;;  %v3678_v8 = vld [vmem:[#allocation3 + $0x1cf0] sm:$0xff] }
 0x927   :  { %4740 = vmatprep.subr.bf16.mxu0 %v3597_v4  ;;  %5084 = vmatprep.subr.bf16.mxu1 %v3599_v44  ;;  %v3685_v4 = vld [vmem:[#allocation3 + $0x1d28] sm:$0xff]  ;;  %v3687_v44 = vld [vmem:[#allocation3 + $0x1d38] sm:$0xff] }
 0x92a   :  { %4741 = vmatpush1.bf16.msra.mxu0 %v3596_v62  ;;  %5085 = vmatpush1.bf16.msra.mxu1 %v3598_v45  ;;  %v3686_v62 = vld [vmem:[#allocation3 + $0x1d30] sm:$0xff]  ;;  %v3693_v45 = vld [vmem:[#allocation3 + $0x1d68] sm:$0xff] }
 0x92b   :  { %4742 = vmatprep.subr.bf16.mxu0 %v3605_v20  ;;  %5086 = vmatprep.subr.bf16.mxu1 %v3607_v27  ;;  %v3695_v20 = vld [vmem:[#allocation3 + $0x1d78] sm:$0xff]  ;;  %v3692_v27 = vld [vmem:[#allocation3 + $0x1d60] sm:$0xff] }
 0x92e   :  { %4743 = vmatpush1.bf16.msra.mxu0 %v3604_v30  ;;  %5087 = vmatpush1.bf16.msra.mxu1 %v3606_v12  ;;  %v3694_v30 = vld [vmem:[#allocation3 + $0x1d70] sm:$0xff]  ;;  %v3701_v12 = vld [vmem:[#allocation3 + $0x1da8] sm:$0xff] }
 0x92f   :  { %4744 = vmatprep.subr.bf16.mxu0 %v3613_v23  ;;  %5088 = vmatprep.subr.bf16.mxu1 %v3615_v51  ;;  %v3703_v23 = vld [vmem:[#allocation3 + $0x1db8] sm:$0xff]  ;;  %v3700_v51 = vld [vmem:[#allocation3 + $0x1da0] sm:$0xff] }
 0x932   :  { %4745 = vmatpush1.bf16.msra.mxu0 %v3612_v59  ;;  %5089 = vmatpush1.bf16.msra.mxu1 %v3614_v42  ;;  %v3702_v59 = vld [vmem:[#allocation3 + $0x1db0] sm:$0xff]  ;;  %v3709_v42 = vld [vmem:[#allocation3 + $0x1de8] sm:$0xff] }
 0x933   :  { %4746 = vmatprep.subr.bf16.mxu0 %v3621_v50  ;;  %5090 = vmatprep.subr.bf16.mxu1 %v3623_v61  ;;  %v3711_v50 = vld [vmem:[#allocation3 + $0x1df8] sm:$0xff]  ;;  %v3708_v61 = vld [vmem:[#allocation3 + $0x1de0] sm:$0xff] }
 0x936   :  { %4747 = vmatpush1.bf16.msra.mxu0 %v3620_v10  ;;  %5091 = vmatpush1.bf16.msra.mxu1 %v3622_v14  ;;  %v3710_v10 = vld [vmem:[#allocation3 + $0x1df0] sm:$0xff]  ;;  %v3717_v14 = vld [vmem:[#allocation3 + $0x1e28] sm:$0xff] }
 0x937   :  { %4748 = vmatprep.subr.bf16.mxu0 %v3629_v35  ;;  %5092 = vmatprep.subr.bf16.mxu1 %v3631_v28  ;;  %v3719_v35 = vld [vmem:[#allocation3 + $0x1e38] sm:$0xff]  ;;  %v3716_v28 = vld [vmem:[#allocation3 + $0x1e20] sm:$0xff] }
 0x93a   :  { %4749 = vmatpush1.bf16.msra.mxu0 %v3628_v55  ;;  %5093 = vmatpush1.bf16.msra.mxu1 %v3630_v9  ;;  %v3718_v55 = vld [vmem:[#allocation3 + $0x1e30] sm:$0xff]  ;;  %v3725_v9 = vld [vmem:[#allocation3 + $0x1e68] sm:$0xff] }
 0x93b   :  { %4750 = vmatprep.subr.bf16.mxu0 %v3637_v34  ;;  %5094 = vmatprep.subr.bf16.mxu1 %v3639_v3  ;;  %v3727_v34 = vld [vmem:[#allocation3 + $0x1e78] sm:$0xff]  ;;  %v3724_v3 = vld [vmem:[#allocation3 + $0x1e60] sm:$0xff] }
 0x93e   :  { %4751 = vmatpush1.bf16.msra.mxu0 %v3636_v52  ;;  %5095 = vmatpush1.bf16.msra.mxu1 %v3638_v29  ;;  %v3726_v52 = vld [vmem:[#allocation3 + $0x1e70] sm:$0xff]  ;;  %v3733_v29 = vld [vmem:[#allocation3 + $0x1ea8] sm:$0xff] }
 0x93f   :  { %4752 = vmatprep.subr.bf16.mxu0 %v3645_v2  ;;  %5096 = vmatprep.subr.bf16.mxu1 %v3647_v36  ;;  %v3735_v2 = vld [vmem:[#allocation3 + $0x1eb8] sm:$0xff]  ;;  %v3732_v36 = vld [vmem:[#allocation3 + $0x1ea0] sm:$0xff] }
 0x942   :  { %4753 = vmatpush1.bf16.msra.mxu0 %v3644_v11  ;;  %5097 = vmatpush1.bf16.msra.mxu1 %v3646_v49  ;;  %v3734_v11 = vld [vmem:[#allocation3 + $0x1eb0] sm:$0xff]  ;;  %v3741_v49 = vld [vmem:[#allocation3 + $0x1ee8] sm:$0xff] }
 0x943   :  { %4765 = vmatprep.subr.bf16.mxu0 %v3653_v5  ;;  %5109 = vmatprep.subr.bf16.mxu1 %v3655_v63  ;;  %v3743_v5 = vld [vmem:[#allocation3 + $0x1ef8] sm:$0xff]  ;;  %v3740_v63 = vld [vmem:[#allocation3 + $0x1ee0] sm:$0xff] }
 0x945   :  { %4755 = vmatmul.mubr.bf16.vlgmr.msra.gmra.mrb[20].mxu0 %v8124_v56  ;;  %5099 = vmatmul.mubr.bf16.vlgmr.msra.gmra.mrb[24].mxu1 %v8124_v56  ;;  %v3679_v56 = vld [vmem:[#allocation3 + $0x1cf8] sm:$0xff] }
 0x946   :  { %4766 = vmatpush1.bf16.msra.mxu0 %v3652_v48  ;;  %5110 = vmatpush1.bf16.msra.mxu1 %v3654_v57  ;;  %v3742_v48 = vld [vmem:[#allocation3 + $0x1ef0] sm:$0xff]  ;;  %v3749_v57 = vld [vmem:[#allocation3 + $0x1f28] sm:$0xff] }
 0x947   :  { %4767 = vmatprep.subr.bf16.mxu0 %v3661_v31  ;;  %5111 = vmatprep.subr.bf16.mxu1 %v3663_v41  ;;  %v3751_v31 = vld [vmem:[#allocation3 + $0x1f38] sm:$0xff]  ;;  %v3748_v41 = vld [vmem:[#allocation3 + $0x1f20] sm:$0xff] }
 0x948   :  { %4797 = vmatprep.mubr.bf16.mxu0 %v8130_v47  ;;  %5141 = vmatprep.mubr.bf16.mxu1 %v8130_v47  ;;  %v3684_v47 = vld [vmem:[#allocation3 + $0x1d20] sm:$0xff] }
 0x94a   :  { %4768 = vmatpush1.bf16.msra.mxu0 %v3660_v33  ;;  %5112 = vmatpush1.bf16.msra.mxu1 %v3662_v7  ;;  %v3750_v33 = vld [vmem:[#allocation3 + $0x1f30] sm:$0xff]  ;;  %v3757_v7 = vld [vmem:[#allocation3 + $0x1f68] sm:$0xff] }
 0x94b   :  { %4769 = vmatprep.subr.bf16.mxu0 %v3669_v26  ;;  %5113 = vmatprep.subr.bf16.mxu1 %v3671_v0  ;;  %v3759_v26 = vld [vmem:[#allocation3 + $0x1f78] sm:$0xff]  ;;  %v3756_v0 = vld [vmem:[#allocation3 + $0x1f60] sm:$0xff] }
 0x94e   :  { %4770 = vmatpush1.bf16.msra.mxu0 %v3668_v32  ;;  %5114 = vmatpush1.bf16.msra.mxu1 %v3670_v21  ;;  %v3758_v32 = vld [vmem:[#allocation3 + $0x1f70] sm:$0xff]  ;;  %v3765_v21 = vld [vmem:[#allocation3 + $0x1fa8] sm:$0xff] }
 0x94f   :  { %4771 = vmatprep.subr.bf16.mxu0 %v3677_v22  ;;  %5115 = vmatprep.subr.bf16.mxu1 %v3679_v56  ;;  %v3767_v22 = vld [vmem:[#allocation3 + $0x1fb8] sm:$0xff]  ;;  %v3764_v56 = vld [vmem:[#allocation3 + $0x1fa0] sm:$0xff] }
 0x952   :  { %4772 = vmatpush1.bf16.msra.mxu0 %v3676_v43  ;;  %5116 = vmatpush1.bf16.msra.mxu1 %v3678_v8  ;;  %v3766_v43 = vld [vmem:[#allocation3 + $0x1fb0] sm:$0xff]  ;;  %v3773_v8 = vld [vmem:[#allocation3 + $0x1fe8] sm:$0xff] }
 0x953   :  { %4773 = vmatprep.subr.bf16.mxu0 %v3685_v4  ;;  %5117 = vmatprep.subr.bf16.mxu1 %v3687_v44  ;;  %v3775_v4 = vld [vmem:[#allocation3 + $0x1ff8] sm:$0xff]  ;;  %v3772_v44 = vld [vmem:[#allocation3 + $0x1fe0] sm:$0xff] }
 0x956   :  { %4774 = vmatpush1.bf16.msra.mxu0 %v3684_v47  ;;  %5118 = vmatpush1.bf16.msra.mxu1 %v3686_v62  ;;  %v3774_v47 = vld [vmem:[#allocation3 + $0x1ff0] sm:$0xff] }
 0x957   :  { %4775 = vmatprep.subr.bf16.mxu0 %v3693_v45  ;;  %5119 = vmatprep.subr.bf16.mxu1 %v3695_v20 }
 0x95a   :  { %4776 = vmatpush1.bf16.msra.mxu0 %v3692_v27  ;;  %5120 = vmatpush1.bf16.msra.mxu1 %v3694_v30 }
 0x95b   :  { %4777 = vmatprep.subr.bf16.mxu0 %v3701_v12  ;;  %5121 = vmatprep.subr.bf16.mxu1 %v3703_v23 }
 0x95e   :  { %4778 = vmatpush1.bf16.msra.mxu0 %v3700_v51  ;;  %5122 = vmatpush1.bf16.msra.mxu1 %v3702_v59 }
 0x95f   :  { %4779 = vmatprep.subr.bf16.mxu0 %v3709_v42  ;;  %5123 = vmatprep.subr.bf16.mxu1 %v3711_v50 }
 0x962   :  { %4780 = vmatpush1.bf16.msra.mxu0 %v3708_v61  ;;  %5124 = vmatpush1.bf16.msra.mxu1 %v3710_v10 }
 0x963   :  { %4781 = vmatprep.subr.bf16.mxu0 %v3717_v14  ;;  %5125 = vmatprep.subr.bf16.mxu1 %v3719_v35 }
 0x966   :  { %4782 = vmatpush1.bf16.msra.mxu0 %v3716_v28  ;;  %5126 = vmatpush1.bf16.msra.mxu1 %v3718_v55 }
 0x967   :  { %4783 = vmatprep.subr.bf16.mxu0 %v3725_v9  ;;  %5127 = vmatprep.subr.bf16.mxu1 %v3727_v34 }
 0x96a   :  { %4784 = vmatpush1.bf16.msra.mxu0 %v3724_v3  ;;  %5128 = vmatpush1.bf16.msra.mxu1 %v3726_v52 }
 0x96b   :  { %4785 = vmatprep.subr.bf16.mxu0 %v3733_v29  ;;  %5129 = vmatprep.subr.bf16.mxu1 %v3735_v2 }
 0x96e   :  { %4786 = vmatpush1.bf16.msra.mxu0 %v3732_v36  ;;  %5130 = vmatpush1.bf16.msra.mxu1 %v3734_v11 }
 0x96f   :  { %4787 = vmatprep.subr.bf16.mxu0 %v3741_v49  ;;  %5131 = vmatprep.subr.bf16.mxu1 %v3743_v5 }
 0x972   :  { %4788 = vmatpush1.bf16.msra.mxu0 %v3740_v63  ;;  %5132 = vmatpush1.bf16.msra.mxu1 %v3742_v48 }
 0x973   :  { %4789 = vmatprep.subr.bf16.mxu0 %v3749_v57  ;;  %5133 = vmatprep.subr.bf16.mxu1 %v3751_v31 }
 0x976   :  { %4790 = vmatpush1.bf16.msra.mxu0 %v3748_v41  ;;  %5134 = vmatpush1.bf16.msra.mxu1 %v3750_v33 }
 0x977   :  { %4791 = vmatprep.subr.bf16.mxu0 %v3757_v7  ;;  %5135 = vmatprep.subr.bf16.mxu1 %v3759_v26 }
 0x97a   :  { %4792 = vmatpush1.bf16.msra.mxu0 %v3756_v0  ;;  %5136 = vmatpush1.bf16.msra.mxu1 %v3758_v32 }
 0x97b   :  { %4793 = vmatprep.subr.bf16.mxu0 %v3765_v21  ;;  %5137 = vmatprep.subr.bf16.mxu1 %v3767_v22 }
 0x97e   :  { %4794 = vmatpush1.bf16.msra.mxu0 %v3764_v56  ;;  %5138 = vmatpush1.bf16.msra.mxu1 %v3766_v43 }
 0x97f   :  { %4795 = vmatprep.subr.bf16.mxu0 %v3773_v8  ;;  %5139 = vmatprep.subr.bf16.mxu1 %v3775_v4 }
 0x982   :  { %4796 = vmatpush1.bf16.msra.mxu0 %v3772_v44  ;;  %5140 = vmatpush1.bf16.msra.mxu1 %v3774_v47 }
 0x985   :  { %4798 = vmatmul.mubr.bf16.vlgmr.msra.gmra.mrb[20].mxu0 %v8140_v17  ;;  %5142 = vmatmul.mubr.bf16.vlgmr.msra.gmra.mrb[24].mxu1 %v8140_v17 }
 0xa58   :  { %v8246_v62 = vpop.f32.mrb[20].mxu0  ;;  %v8248_v45 = vpop.f32.mrb[24].mxu1 }
 0xa59   :  { %v8250_v20 = vpop.f32.mrb[21].mxu0  ;;  %v8252_v27 = vpop.f32.mrb[25].mxu1  ;;  %v5220_v30 = vmul.f32 %v8246_v62, %v8246_v62  ;;  %v5222_v12 = vmul.f32 %v8248_v45, %v8248_v45 }
 0xa5a   :  { %v5221_v23 = vmul.f32 %v8250_v20, %v8250_v20  ;;  %v5223_v17 = vmul.f32 %v8252_v27, %v8252_v27  ;;  %v8262_v51 = vpop.f32.mrb[22].mxu0  ;;  %v8264_v59 = vpop.f32.mrb[26].mxu1 }
 0xa5b   :  { %v5180_v42 = vadd.f32 %v8262_v51, %v8246_v62  ;;  %v5228_v50 = vmul.f32 %v8262_v51, %v8262_v51  ;;  %v5194_v61 = vadd.f32 %v8264_v59, %v8248_v45  ;;  %v5230_v10 = vmul.f32 %v8264_v59, %v8264_v59  ;;  %v8274_v14 = vpop.f32.mrb[23].mxu0  ;;  %v8276_v35 = vpop.f32.mrb[27].mxu1 }
 0xa5c   :  { %v5187_v28 = vadd.f32 %v8274_v14, %v8250_v20  ;;  %v5229_v55 = vmul.f32 %v8274_v14, %v8274_v14  ;;  %v5201_v9 = vadd.f32 %v8276_v35, %v8252_v27  ;;  %v5231_v34 = vmul.f32 %v8276_v35, %v8276_v35 }
 0xa5d   :  { %v5181_v3 = vrot.slane %v5180_v42, 4  ;;  %v5260_v52 = vadd.f32 %v5228_v50, %v5220_v30  ;;  %v5195_v29 = vrot.slane %v5194_v61, 4  ;;  %v5274_v2 = vadd.f32 %v5230_v10, %v5222_v12 }
 0xa5e   :  { %v5188_v36 = vrot.slane %v5187_v28, 4  ;;  %v5267_v11 = vadd.f32 %v5229_v55, %v5221_v23  ;;  %v5202_v49 = vrot.slane %v5201_v9, 4  ;;  %v5281_v5 = vadd.f32 %v5231_v34, %v5223_v17 }
 0xa5f   :  { %v5182_v63 = vadd.f32 %v5181_v3, %v5180_v42  ;;  %v5261_v48 = vrot.slane %v5260_v52, 4  ;;  %v5196_v57 = vadd.f32 %v5195_v29, %v5194_v61  ;;  %v5275_v31 = vrot.slane %v5274_v2, 4 }
 0xa60   :  { %v5189_v41 = vadd.f32 %v5188_v36, %v5187_v28  ;;  %v5268_v33 = vrot.slane %v5267_v11, 4  ;;  %v5203_v7 = vadd.f32 %v5202_v49, %v5201_v9  ;;  %v5282_v26 = vrot.slane %v5281_v5, 4 }
 0xa61   :  { %v5183_v0 = vrot.slane %v5182_v63, 2  ;;  %v5262_v32 = vadd.f32 %v5261_v48, %v5260_v52  ;;  %v5197_v21 = vrot.slane %v5196_v57, 2  ;;  %v5276_v22 = vadd.f32 %v5275_v31, %v5274_v2 }
 0xa62   :  { %v5190_v56 = vrot.slane %v5189_v41, 2  ;;  %v5269_v43 = vadd.f32 %v5268_v33, %v5267_v11  ;;  %v5204_v8 = vrot.slane %v5203_v7, 2  ;;  %v5283_v4 = vadd.f32 %v5282_v26, %v5281_v5 }
 0xa63   :  { %v5184_v44 = vadd.f32 %v5183_v0, %v5182_v63  ;;  %v5263_v47 = vrot.slane %v5262_v32, 2  ;;  %v5198_v30 = vadd.f32 %v5197_v21, %v5196_v57  ;;  %v5277_v12 = vrot.slane %v5276_v22, 2 }
 0xa64   :  { %v5191_v23 = vadd.f32 %v5190_v56, %v5189_v41  ;;  %v5270_v17 = vrot.slane %v5269_v43, 2  ;;  %v5205_v42 = vadd.f32 %v5204_v8, %v5203_v7  ;;  %v5284_v50 = vrot.slane %v5283_v4, 2 }
 0xa65   :  { %v5185_v61 = vrot.slane %v5184_v44, 1  ;;  %v5264_v10 = vadd.f32 %v5263_v47, %v5262_v32  ;;  %v5199_v28 = vrot.slane %v5198_v30, 1  ;;  %v5278_v55 = vadd.f32 %v5277_v12, %v5276_v22 }
 0xa66   :  { %v5192_v9 = vrot.slane %v5191_v23, 1  ;;  %v5271_v34 = vadd.f32 %v5270_v17, %v5269_v43  ;;  %v5206_v3 = vrot.slane %v5205_v42, 1  ;;  %v5285_v52 = vadd.f32 %v5284_v50, %v5283_v4 }
 0xa67   :  { %v5186_v29 = vadd.f32 %v5185_v61, %v5184_v44  ;;  %v5265_v2 = vrot.slane %v5264_v10, 1  ;;  %v5200_v36 = vadd.f32 %v5199_v28, %v5198_v30  ;;  %v5279_v11 = vrot.slane %v5278_v55, 1 }
 0xa68   :  { %v5193_v49 = vadd.f32 %v5192_v9, %v5191_v23  ;;  %v5272_v5 = vrot.slane %v5271_v34, 1  ;;  %v5207_v63 = vadd.f32 %v5206_v3, %v5205_v42  ;;  %v5286_v48 = vrot.slane %v5285_v52, 1 }
 0xa69   :  { %v8286_v57 = vmul.f32 0.0625, %v5186_v29  ;;  %v5266_v31 = vadd.f32 %v5265_v2, %v5264_v10  ;;  %v8288_v41 = vmul.f32 0.0625, %v5200_v36  ;;  %v5280_v33 = vadd.f32 %v5279_v11, %v5278_v55 }
 0xa6a   :  { %v8290_v7 = vmul.f32 0.0625, %v5193_v49  ;;  %v5273_v26 = vadd.f32 %v5272_v5, %v5271_v34  ;;  %v8292_v0 = vmul.f32 0.0625, %v5207_v63  ;;  %v5287_v32 = vadd.f32 %v5286_v48, %v5285_v52 }
 0xa6b   :  { %v5292_v21 = vmul.f32 0.0625, %v5266_v31  ;;  %v5300_v22 = vmul.f32 %v8286_v57, %v8286_v57  ;;  %v5294_v56 = vmul.f32 0.0625, %v5280_v33  ;;  %v5302_v43 = vmul.f32 %v8288_v41, %v8288_v41  ;;  %v5320_v33 = vld [vmem:[#allocation11] sm:$0xff] }
 0xa6c   :  { %v5293_v8 = vmul.f32 0.0625, %v5273_v26  ;;  %v5301_v4 = vmul.f32 %v8290_v7, %v8290_v7  ;;  %v5295_v44 = vmul.f32 0.0625, %v5287_v32  ;;  %v5303_v47 = vmul.f32 %v8292_v0, %v8292_v0 }
 0xa6d   :  { %v5308_v30 = vsub.f32 %v5292_v21, %v5300_v22  ;;  %v5310_v12 = vsub.f32 %v5294_v56, %v5302_v43  ;;  %v5385_v48 = vrot.slane %v5377_v16, %v8218_v46  ;;  %v8310_v26 = vsub.s32 0, %v8215_v54 }
 0xa6e   :  { %v5309_v23 = vsub.f32 %v5293_v8, %v5301_v4  ;;  %v5311_v17 = vsub.f32 %v5295_v44, %v5303_v47  ;;  %v8313_v21 = vsub.s32 1, %v8215_v54  ;;  %v8316_v22 = vsub.s32 2, %v8215_v54 }
 0xa6f   :  { %v5316_v42 = vmax.f32 %v5308_v30, 0.0  ;;  %v5318_v50 = vmax.f32 %v5310_v12, 0.0  ;;  %v8319_v56 = vsub.s32 3, %v8215_v54  ;;  %v5416_v43 = vsub.s32 4, %v8215_v54 }
 0xa70   :  { %v5317_v61 = vmax.f32 %v5309_v23, 0.0  ;;  %v5319_v10 = vmax.f32 %v5311_v17, 0.0  ;;  %v5428_v16 = vsub.s32 7, %v8215_v54 }
 0xa71   :  { %v5325_v28 = vadd.f32 1e-05, %v5316_v42  ;;  %v5327_v55 = vadd.f32 1e-05, %v5318_v50 }
 0xa72   :  { %v5326_v9 = vadd.f32 1e-05, %v5317_v61  ;;  %v5328_v34 = vadd.f32 1e-05, %v5319_v10 }
 0xa73   :  { %7199 = vrsqrt.f32 %v5325_v28 }
 0xa74   :  { %7201 = vrsqrt.f32 %v5327_v55 }
 0xa75   :  { %7203 = vrsqrt.f32 %v5326_v9 }
 0xa76   :  { %7205 = vrsqrt.f32 %v5328_v34 }
 0xa7d   :  { %v7200_v3 = vpop.eup %7199 }
 0xa7e   :  { %v7202_v52 = vpop.eup %7201 }
 0xa7f   :  { %v7204_v29 = vpop.eup %7203 }
 0xa80   :  { %v7206_v2 = vpop.eup %7205  ;;  %v5347_v36 = vcombine.low %v7200_v3, %v7204_v29 }
 0xa81   :  { %v5348_v11 = vcombine.low %v7202_v52, %v7206_v2 }
 0xa82   :  { %v5369_v49 = vrot.slane %v5347_v36, %v8218_v46 }
 0xa83   :  { %v5376_v5 = vrot.slane %v5348_v11, %v8218_v46 }
 0xa85   :  { %v5378_v63 = vcombine.low %v5369_v49, %v5376_v5 }
 0xa87   :  { %v5392_v31 = vrot.slane %v5378_v63, %v8218_v46 }
 0xa89   :  { %v5393_v32 = vcombine.low %v5385_v48, %v5392_v31 }
 0xa8b   :  { %v5395_v8 = vmul.f32 %v5393_v32, %v5320_v33 }
 0xa8d   :  { %v5401_v4 = vrot.slane %v5395_v8, %v8310_v26  ;;  %v5405_v44 = vrot.slane %v5395_v8, %v8313_v21  ;;  %v5409_v47 = vrot.slane %v5395_v8, %v8316_v22  ;;  %v5413_v30 = vrot.slane %v5395_v8, %v8319_v56 }
 0xa8e   :  { %v5417_v12 = vrot.slane %v5395_v8, %v5416_v43  ;;  %v5421_v23 = vrot.slane %v5395_v8, %v5420_v19  ;;  %v5425_v17 = vrot.slane %v5395_v8, %v5424_v40  ;;  %v5429_v42 = vrot.slane %v5395_v8, %v5428_v16 }
 0xa8f   :  { %v5438_v50 = vmul.f32 %v5401_v4, %v8198_v53  ;;  %v5439_v61 = vmul.f32 %v5405_v44, %v8202_v25  ;;  %v5440_v10 = vmul.f32 %v5409_v47, %v8200_v38  ;;  %v5441_v54 = vmul.f32 %v5413_v30, %v8204_v39 }
 0xa90   :  { %v5442_v28 = vmul.f32 %v5417_v12, %v8286_v57  ;;  %v5443_v55 = vmul.f32 %v5421_v23, %v8290_v7  ;;  %v5444_v9 = vmul.f32 %v5425_v17, %v8288_v41  ;;  %v5445_v34 = vmul.f32 %v5429_v42, %v8292_v0 }
 0xa91   :  { %v5454_v3 = vcombine.low %v5438_v50, %v5439_v61  ;;  %v5455_v52 = vcombine.low %v5440_v10, %v5441_v54  ;;  %v5505_v29 = vmul.f32 %v5401_v4, %v8158_v18  ;;  %v5506_v53 = vmul.f32 %v5405_v44, %v8164_v37 }
 0xa92   :  { %v5456_v2 = vcombine.low %v5442_v28, %v5443_v55  ;;  %v5457_v25 = vcombine.low %v5444_v9, %v5445_v34  ;;  %v5507_v38 = vmul.f32 %v5409_v47, %v8160_v13  ;;  %v5508_v39 = vmul.f32 %v5413_v30, %v8166_v60 }
 0xa93   :  { %v5464_v57 = vrot.slane %v5454_v3, %v8218_v46  ;;  %v5471_v7 = vrot.slane %v5455_v52, %v8218_v46  ;;  %v5509_v41 = vmul.f32 %v5417_v12, %v8246_v62  ;;  %v5510_v0 = vmul.f32 %v5421_v23, %v8250_v20 }
 0xa94   :  { %v5478_v36 = vrot.slane %v5456_v2, %v8218_v46  ;;  %v5485_v18 = vrot.slane %v5457_v25, %v8218_v46  ;;  %v5511_v37 = vmul.f32 %v5425_v17, %v8248_v45  ;;  %v5512_v11 = vmul.f32 %v5429_v42, %v8252_v27 }
 0xa95   :  { %v5486_v49 = vcombine.low %v5464_v57, %v5471_v7  ;;  %v5513_v13 = vmul.f32 %v5401_v4, %v8174_v58  ;;  %v5514_v60 = vmul.f32 %v5405_v44, %v8186_v15  ;;  %v5515_v5 = vmul.f32 %v5409_v47, %v8176_v6  ;;  %v5396_v58 = vld [vmem:[#allocation13] sm:$0xff] }
 0xa96   :  { %v5487_v63 = vcombine.low %v5478_v36, %v5485_v18  ;;  %v5516_v62 = vmul.f32 %v5413_v30, %v8188_v24  ;;  %v5517_v20 = vmul.f32 %v5417_v12, %v8262_v51  ;;  %v5518_v48 = vmul.f32 %v5421_v23, %v8274_v14 }
 0xa97   :  { %v5494_v31 = vrot.slane %v5486_v49, %v8218_v46  ;;  %v5519_v45 = vmul.f32 %v5425_v17, %v8264_v59  ;;  %v5520_v27 = vmul.f32 %v5429_v42, %v8276_v35 }
 0xa98   :  { %v5501_v33 = vrot.slane %v5487_v63, %v8218_v46 }
 0xa9a   :  { %v5502_v32 = vcombine.low %v5494_v31, %v5501_v33 }
 0xa9c   :  { %v5504_v15 = vsub.f32 %v5396_v58, %v5502_v32 }
 0xa9e   :  { %v5525_v6 = vrot.slane %v5504_v15, %v8310_v26  ;;  %v5529_v8 = vrot.slane %v5504_v15, %v8313_v21  ;;  %v5533_v24 = vrot.slane %v5504_v15, %v8316_v22  ;;  %v5537_v51 = vrot.slane %v5504_v15, %v8319_v56 }
 0xa9f   :  { %v5541_v14 = vrot.slane %v5504_v15, %v5416_v43  ;;  %v5545_v4 = vrot.slane %v5504_v15, %v5420_v19  ;;  %v5549_v44 = vrot.slane %v5504_v15, %v5424_v40  ;;  %v5553_v47 = vrot.slane %v5504_v15, %v5428_v16 }
 0xaa0   :  { %v8363_v59 = vadd.f32 %v5525_v6, %v5505_v29  ;;  %v5563_v35 = vadd.f32 %v5529_v8, %v5506_v53  ;;  %v8365_v30 = vadd.f32 %v5533_v24, %v5507_v38  ;;  %v8367_v12 = vadd.f32 %v5537_v51, %v5508_v39 }
 0xaa1   :  { %v8369_v23 = vadd.f32 %v5541_v14, %v5509_v41  ;;  %v8371_v17 = vadd.f32 %v5545_v4, %v5510_v0  ;;  %v8373_v42 = vadd.f32 %v5549_v44, %v5511_v37  ;;  %v8375_v50 = vadd.f32 %v5553_v47, %v5512_v11 }
 0xaa2   :  { %v8377_v61 = vadd.f32 %v5525_v6, %v5513_v13  ;;  %v5571_v43 = vadd.f32 %v5529_v8, %v5514_v60  ;;  %v8379_v19 = vadd.f32 %v5533_v24, %v5515_v5  ;;  %v8381_v40 = vadd.f32 %v5537_v51, %v5516_v62 }
 0xaa3   :  { %v8383_v16 = vadd.f32 %v5541_v14, %v5517_v20  ;;  %v8385_v10 = vadd.f32 %v5545_v4, %v5518_v48  ;;  %v8387_v54 = vadd.f32 %v5549_v44, %v5519_v45  ;;  %v8389_v28 = vadd.f32 %v5553_v47, %v5520_v27 }
 0xaa4   :  { %v5578_v55 = vmax.f32 %v8363_v59, 0.0  ;;  %v5579_v9 = vmax.f32 %v5563_v35, 0.0  ;;  %v5580_v34 = vmax.f32 %v8365_v30, 0.0  ;;  %v5581_v3 = vmax.f32 %v8367_v12, 0.0 }
 0xaa5   :  { %v5582_v52 = vmax.f32 %v8369_v23, 0.0  ;;  %v5583_v29 = vmax.f32 %v8371_v17, 0.0  ;;  %v5584_v53 = vmax.f32 %v8373_v42, 0.0  ;;  %v5585_v2 = vmax.f32 %v8375_v50, 0.0 }
 0xaa6   :  { %v5586_v25 = vmax.f32 %v8377_v61, 0.0  ;;  %v5587_v38 = vmax.f32 %v5571_v43, 0.0  ;;  %v5588_v39 = vmax.f32 %v8379_v19, 0.0  ;;  %v5589_v57 = vmax.f32 %v8381_v40, 0.0 }
 0xaa7   :  { %v5590_v7 = vmax.f32 %v8383_v16, 0.0  ;;  %v5591_v41 = vmax.f32 %v8385_v10, 0.0  ;;  %v5592_v0 = vmax.f32 %v8387_v54, 0.0  ;;  %v5593_v36 = vmax.f32 %v8389_v28, 0.0 }
 0xaa8   :  { %7437 = dma.done.wait [#allocation7 + $0x2], 32768 }
 0xaa9   :  { %7438 = vsyncadd [#allocation7 + $0x2], 4294934528  ;;  %v5599_v18 = vpack.c.bf16 %v5587_v38, %v5579_v9  ;;  %v5607_v37 = vld [vmem:[#allocation4 + $0x8] sm:$0xff]  ;;  %v5609_v11 = vld [vmem:[#allocation4 + $0x18] sm:$0xff] }
 0xaaa   :  { %v5606_v49 = vld [vmem:[#allocation4] sm:$0xff]  ;;  %5862 = vmatprep.subr.bf16.mxu0 %v5607_v37  ;;  %6034 = vmatprep.subr.bf16.mxu1 %v5609_v11  ;;  %v5608_v13 = vld [vmem:[#allocation4 + $0x10] sm:$0xff]  ;;  %v5611_v60 = vld [vmem:[#allocation4 + $0x28] sm:$0xff] }
 0xaab   :  { %5894 = vmatprep.mubr.bf16.mxu0 %v5599_v18  ;;  %6066 = vmatprep.mubr.bf16.mxu1 %v5599_v18  ;;  %v5613_v5 = vld [vmem:[#allocation4 + $0x38] sm:$0xff]  ;;  %v5610_v63 = vld [vmem:[#allocation4 + $0x20] sm:$0xff]  ;;  %v5612_v62 = vld [vmem:[#allocation4 + $0x30] sm:$0xff] }
 0xaac   :  { %5863 = vmatpush1.bf16.msra.mxu0 %v5606_v49  ;;  %6035 = vmatpush1.bf16.msra.mxu1 %v5608_v13  ;;  %v5615_v20 = vld [vmem:[#allocation4 + $0x48] sm:$0xff]  ;;  %v5617_v48 = vld [vmem:[#allocation4 + $0x58] sm:$0xff]  ;;  %v5614_v31 = vld [vmem:[#allocation4 + $0x40] sm:$0xff] }
 0xaad   :  { %5864 = vmatprep.subr.bf16.mxu0 %v5611_v60  ;;  %6036 = vmatprep.subr.bf16.mxu1 %v5613_v5  ;;  %v5616_v45 = vld [vmem:[#allocation4 + $0x50] sm:$0xff]  ;;  %v5619_v27 = vld [vmem:[#allocation4 + $0x68] sm:$0xff]  ;;  %v5621_v33 = vld [vmem:[#allocation4 + $0x78] sm:$0xff] }
 0xaae   :  { %v5618_v58 = vld [vmem:[#allocation4 + $0x60] sm:$0xff]  ;;  %v5620_v32 = vld [vmem:[#allocation4 + $0x70] sm:$0xff]  ;;  %v5623_v15 = vld [vmem:[#allocation4 + $0x88] sm:$0xff] }
 0xaaf   :  { %v5625_v6 = vld [vmem:[#allocation4 + $0x98] sm:$0xff]  ;;  %v5622_v8 = vld [vmem:[#allocation4 + $0x80] sm:$0xff]  ;;  %v5624_v24 = vld [vmem:[#allocation4 + $0x90] sm:$0xff] }
 0xab0   :  { %5865 = vmatpush1.bf16.msra.mxu0 %v5610_v63  ;;  %6037 = vmatpush1.bf16.msra.mxu1 %v5612_v62  ;;  %v5627_v51 = vld [vmem:[#allocation4 + $0xa8] sm:$0xff]  ;;  %v5629_v14 = vld [vmem:[#allocation4 + $0xb8] sm:$0xff]  ;;  %v5626_v4 = vld [vmem:[#allocation4 + $0xa0] sm:$0xff] }
 0xab1   :  { %5866 = vmatprep.subr.bf16.mxu0 %v5615_v20  ;;  %6038 = vmatprep.subr.bf16.mxu1 %v5617_v48  ;;  %v5628_v44 = vld [vmem:[#allocation4 + $0xb0] sm:$0xff]  ;;  %v5631_v47 = vld [vmem:[#allocation4 + $0xc8] sm:$0xff]  ;;  %v5633_v35 = vld [vmem:[#allocation4 + $0xd8] sm:$0xff] }
 0xab2   :  { %v5630_v43 = vld [vmem:[#allocation4 + $0xc0] sm:$0xff]  ;;  %v5632_v9 = vld [vmem:[#allocation4 + $0xd0] sm:$0xff]  ;;  %v5635_v38 = vld [vmem:[#allocation4 + $0xe8] sm:$0xff] }
 0xab3   :  { %v5637_v18 = vld [vmem:[#allocation4 + $0xf8] sm:$0xff]  ;;  %v5634_v37 = vld [vmem:[#allocation4 + $0xe0] sm:$0xff]  ;;  %v5636_v11 = vld [vmem:[#allocation4 + $0xf0] sm:$0xff] }
 0xab4   :  { %5867 = vmatpush1.bf16.msra.mxu0 %v5614_v31  ;;  %6039 = vmatpush1.bf16.msra.mxu1 %v5616_v45  ;;  %v5639_v49 = vld [vmem:[#allocation4 + $0x108] sm:$0xff]  ;;  %v5641_v13 = vld [vmem:[#allocation4 + $0x118] sm:$0xff]  ;;  %v5638_v60 = vld [vmem:[#allocation4 + $0x100] sm:$0xff] }
 0xab5   :  { %5868 = vmatprep.subr.bf16.mxu0 %v5619_v27  ;;  %6040 = vmatprep.subr.bf16.mxu1 %v5621_v33  ;;  %v5640_v5 = vld [vmem:[#allocation4 + $0x110] sm:$0xff]  ;;  %v5643_v63 = vld [vmem:[#allocation4 + $0x128] sm:$0xff]  ;;  %v5645_v62 = vld [vmem:[#allocation4 + $0x138] sm:$0xff] }
 0xab6   :  { %v5642_v20 = vld [vmem:[#allocation4 + $0x120] sm:$0xff]  ;;  %v5644_v48 = vld [vmem:[#allocation4 + $0x130] sm:$0xff]  ;;  %v5647_v31 = vld [vmem:[#allocation4 + $0x148] sm:$0xff] }
 0xab7   :  { %v5649_v45 = vld [vmem:[#allocation4 + $0x158] sm:$0xff]  ;;  %v5646_v27 = vld [vmem:[#allocation4 + $0x140] sm:$0xff]  ;;  %v5648_v33 = vld [vmem:[#allocation4 + $0x150] sm:$0xff] }
 0xab8   :  { %5869 = vmatpush1.bf16.msra.mxu0 %v5618_v58  ;;  %6041 = vmatpush1.bf16.msra.mxu1 %v5620_v32  ;;  %v5651_v58 = vld [vmem:[#allocation4 + $0x168] sm:$0xff]  ;;  %v5653_v32 = vld [vmem:[#allocation4 + $0x178] sm:$0xff]  ;;  %v5674_v59 = vld [vmem:[#allocation4 + $0x220] sm:$0xff] }
 0xab9   :  { %5870 = vmatprep.subr.bf16.mxu0 %v5623_v15  ;;  %6042 = vmatprep.subr.bf16.mxu1 %v5625_v6  ;;  %v5650_v15 = vld [vmem:[#allocation4 + $0x160] sm:$0xff]  ;;  %v5652_v6 = vld [vmem:[#allocation4 + $0x170] sm:$0xff]  ;;  %v5683_v40 = vld [vmem:[#allocation4 + $0x268] sm:$0xff] }
 0xaba   :  { %v5676_v61 = vld [vmem:[#allocation4 + $0x230] sm:$0xff]  ;;  %v5678_v12 = vld [vmem:[#allocation4 + $0x240] sm:$0xff]  ;;  %v5747_v10 = vld [vmem:[#allocation4 + $0x468] sm:$0xff] }
 0xabb   :  { %v5738_v30 = vld [vmem:[#allocation4 + $0x420] sm:$0xff]  ;;  %v5740_v19 = vld [vmem:[#allocation4 + $0x430] sm:$0xff]  ;;  %v5811_v28 = vld [vmem:[#allocation4 + $0x668] sm:$0xff] }
 0xabc   :  { %5871 = vmatpush1.bf16.msra.mxu0 %v5622_v8  ;;  %6043 = vmatpush1.bf16.msra.mxu1 %v5624_v24  ;;  %v5655_v8 = vld [vmem:[#allocation4 + $0x188] sm:$0xff]  ;;  %v5657_v24 = vld [vmem:[#allocation4 + $0x198] sm:$0xff]  ;;  %v5742_v17 = vld [vmem:[#allocation4 + $0x440] sm:$0xff] }
 0xabd   :  { %5872 = vmatprep.subr.bf16.mxu0 %v5627_v51  ;;  %6044 = vmatprep.subr.bf16.mxu1 %v5629_v14  ;;  %v5654_v51 = vld [vmem:[#allocation4 + $0x180] sm:$0xff]  ;;  %v5656_v14 = vld [vmem:[#allocation4 + $0x190] sm:$0xff] }
 0xabe   :  { %v5802_v23 = vld [vmem:[#allocation4 + $0x620] sm:$0xff]  ;;  %v5804_v16 = vld [vmem:[#allocation4 + $0x630] sm:$0xff] }
 0xabf   :  { %v5806_v50 = vld [vmem:[#allocation4 + $0x640] sm:$0xff] }
 0xac0   :  { %5873 = vmatpush1.bf16.msra.mxu0 %v5626_v4  ;;  %6045 = vmatpush1.bf16.msra.mxu1 %v5628_v44  ;;  %v5659_v4 = vld [vmem:[#allocation4 + $0x1a8] sm:$0xff]  ;;  %v5661_v44 = vld [vmem:[#allocation4 + $0x1b8] sm:$0xff] }
 0xac1   :  { %5874 = vmatprep.subr.bf16.mxu0 %v5631_v47  ;;  %6046 = vmatprep.subr.bf16.mxu1 %v5633_v35  ;;  %v5658_v47 = vld [vmem:[#allocation4 + $0x1a0] sm:$0xff]  ;;  %v5660_v35 = vld [vmem:[#allocation4 + $0x1b0] sm:$0xff] }
 0xac4   :  { %5875 = vmatpush1.bf16.msra.mxu0 %v5630_v43  ;;  %6047 = vmatpush1.bf16.msra.mxu1 %v5632_v9  ;;  %v5663_v43 = vld [vmem:[#allocation4 + $0x1c8] sm:$0xff]  ;;  %v5665_v9 = vld [vmem:[#allocation4 + $0x1d8] sm:$0xff] }
 0xac5   :  { %5876 = vmatprep.subr.bf16.mxu0 %v5635_v38  ;;  %6048 = vmatprep.subr.bf16.mxu1 %v5637_v18  ;;  %v5662_v38 = vld [vmem:[#allocation4 + $0x1c0] sm:$0xff]  ;;  %v5664_v18 = vld [vmem:[#allocation4 + $0x1d0] sm:$0xff] }
 0xac8   :  { %5877 = vmatpush1.bf16.msra.mxu0 %v5634_v37  ;;  %6049 = vmatpush1.bf16.msra.mxu1 %v5636_v11  ;;  %v5667_v37 = vld [vmem:[#allocation4 + $0x1e8] sm:$0xff]  ;;  %v5669_v11 = vld [vmem:[#allocation4 + $0x1f8] sm:$0xff] }
 0xac9   :  { %5878 = vmatprep.subr.bf16.mxu0 %v5639_v49  ;;  %6050 = vmatprep.subr.bf16.mxu1 %v5641_v13  ;;  %v5666_v49 = vld [vmem:[#allocation4 + $0x1e0] sm:$0xff]  ;;  %v5668_v13 = vld [vmem:[#allocation4 + $0x1f0] sm:$0xff] }
 0xacc   :  { %5879 = vmatpush1.bf16.msra.mxu0 %v5638_v60  ;;  %6051 = vmatpush1.bf16.msra.mxu1 %v5640_v5  ;;  %v5671_v60 = vld [vmem:[#allocation4 + $0x208] sm:$0xff]  ;;  %v5673_v5 = vld [vmem:[#allocation4 + $0x218] sm:$0xff] }
 0xacd   :  { %5880 = vmatprep.subr.bf16.mxu0 %v5643_v63  ;;  %6052 = vmatprep.subr.bf16.mxu1 %v5645_v62  ;;  %v5598_v63 = vpack.c.bf16 %v5586_v25, %v5578_v55  ;;  %v5670_v62 = vld [vmem:[#allocation4 + $0x200] sm:$0xff]  ;;  %v5679_v55 = vld [vmem:[#allocation4 + $0x248] sm:$0xff]  ;;  %v5681_v25 = vld [vmem:[#allocation4 + $0x258] sm:$0xff] }
 0xad0   :  { %5881 = vmatpush1.bf16.msra.mxu0 %v5642_v20  ;;  %6053 = vmatpush1.bf16.msra.mxu1 %v5644_v48  ;;  %v5672_v20 = vld [vmem:[#allocation4 + $0x210] sm:$0xff]  ;;  %v5675_v48 = vld [vmem:[#allocation4 + $0x228] sm:$0xff] }
 0xad1   :  { %5882 = vmatprep.subr.bf16.mxu0 %v5647_v31  ;;  %6054 = vmatprep.subr.bf16.mxu1 %v5649_v45  ;;  %v5677_v31 = vld [vmem:[#allocation4 + $0x238] sm:$0xff]  ;;  %v5601_v45 = vpack.c.bf16 %v5589_v57, %v5581_v3  ;;  %v5682_v57 = vld [vmem:[#allocation4 + $0x260] sm:$0xff] }
 0xad2   :  { %v5685_v3 = vld [vmem:[#allocation4 + $0x278] sm:$0xff] }
 0xad4   :  { %5883 = vmatpush1.bf16.msra.mxu0 %v5646_v27  ;;  %6055 = vmatpush1.bf16.msra.mxu1 %v5648_v33  ;;  %v5680_v27 = vld [vmem:[#allocation4 + $0x250] sm:$0xff] }
 0xad5   :  { %5884 = vmatprep.subr.bf16.mxu0 %v5651_v58  ;;  %6056 = vmatprep.subr.bf16.mxu1 %v5653_v32  ;;  %v5684_v33 = vld [vmem:[#allocation4 + $0x270] sm:$0xff]  ;;  %v5687_v58 = vld [vmem:[#allocation4 + $0x288] sm:$0xff]  ;;  %v5689_v32 = vld [vmem:[#allocation4 + $0x298] sm:$0xff] }
 0xad8   :  { %5885 = vmatpush1.bf16.msra.mxu0 %v5650_v15  ;;  %6057 = vmatpush1.bf16.msra.mxu1 %v5652_v6  ;;  %v5686_v15 = vld [vmem:[#allocation4 + $0x280] sm:$0xff]  ;;  %v5688_v6 = vld [vmem:[#allocation4 + $0x290] sm:$0xff] }
 0xad9   :  { %5886 = vmatprep.subr.bf16.mxu0 %v5655_v8  ;;  %6058 = vmatprep.subr.bf16.mxu1 %v5657_v24  ;;  %v5691_v8 = vld [vmem:[#allocation4 + $0x2a8] sm:$0xff]  ;;  %v5693_v24 = vld [vmem:[#allocation4 + $0x2b8] sm:$0xff] }
 0xadc   :  { %5887 = vmatpush1.bf16.msra.mxu0 %v5654_v51  ;;  %6059 = vmatpush1.bf16.msra.mxu1 %v5656_v14  ;;  %v5690_v51 = vld [vmem:[#allocation4 + $0x2a0] sm:$0xff]  ;;  %v5692_v14 = vld [vmem:[#allocation4 + $0x2b0] sm:$0xff] }
 0xadd   :  { %5888 = vmatprep.subr.bf16.mxu0 %v5659_v4  ;;  %6060 = vmatprep.subr.bf16.mxu1 %v5661_v44  ;;  %v5695_v4 = vld [vmem:[#allocation4 + $0x2c8] sm:$0xff]  ;;  %v5697_v44 = vld [vmem:[#allocation4 + $0x2d8] sm:$0xff] }
 0xae0   :  { %5889 = vmatpush1.bf16.msra.mxu0 %v5658_v47  ;;  %6061 = vmatpush1.bf16.msra.mxu1 %v5660_v35  ;;  %v5694_v47 = vld [vmem:[#allocation4 + $0x2c0] sm:$0xff]  ;;  %v5696_v35 = vld [vmem:[#allocation4 + $0x2d0] sm:$0xff] }
 0xae1   :  { %5890 = vmatprep.subr.bf16.mxu0 %v5663_v43  ;;  %6062 = vmatprep.subr.bf16.mxu1 %v5665_v9  ;;  %v5699_v43 = vld [vmem:[#allocation4 + $0x2e8] sm:$0xff]  ;;  %v5701_v9 = vld [vmem:[#allocation4 + $0x2f8] sm:$0xff] }
 0xae4   :  { %5891 = vmatpush1.bf16.msra.mxu0 %v5662_v38  ;;  %6063 = vmatpush1.bf16.msra.mxu1 %v5664_v18  ;;  %v5698_v38 = vld [vmem:[#allocation4 + $0x2e0] sm:$0xff]  ;;  %v5700_v18 = vld [vmem:[#allocation4 + $0x2f0] sm:$0xff] }
 0xae5   :  { %5892 = vmatprep.subr.bf16.mxu0 %v5667_v37  ;;  %6064 = vmatprep.subr.bf16.mxu1 %v5669_v11  ;;  %v5703_v37 = vld [vmem:[#allocation4 + $0x308] sm:$0xff]  ;;  %v5705_v11 = vld [vmem:[#allocation4 + $0x318] sm:$0xff] }
 0xae8   :  { %5893 = vmatpush1.bf16.msra.mxu0 %v5666_v49  ;;  %6065 = vmatpush1.bf16.msra.mxu1 %v5668_v13  ;;  %v5702_v49 = vld [vmem:[#allocation4 + $0x300] sm:$0xff]  ;;  %v5704_v13 = vld [vmem:[#allocation4 + $0x310] sm:$0xff] }
 0xae9   :  { %5905 = vmatprep.subr.bf16.mxu0 %v5671_v60  ;;  %6077 = vmatprep.subr.bf16.mxu1 %v5673_v5  ;;  %v5707_v60 = vld [vmem:[#allocation4 + $0x328] sm:$0xff]  ;;  %v5709_v5 = vld [vmem:[#allocation4 + $0x338] sm:$0xff] }
 0xaeb   :  { %5895 = vmatmul.mubr.bf16.vlgmr.msra.gmra.mrb[24].mxu0 %v5598_v63  ;;  %6067 = vmatmul.mubr.bf16.vlgmr.msra.gmra.mrb[28].mxu1 %v5598_v63  ;;  %v5706_v63 = vld [vmem:[#allocation4 + $0x320] sm:$0xff] }
 0xaec   :  { %5906 = vmatpush1.bf16.msra.mxu0 %v5670_v62  ;;  %6078 = vmatpush1.bf16.msra.mxu1 %v5672_v20  ;;  %v5708_v62 = vld [vmem:[#allocation4 + $0x330] sm:$0xff]  ;;  %v5711_v20 = vld [vmem:[#allocation4 + $0x348] sm:$0xff] }
 0xaed   :  { %5907 = vmatprep.subr.bf16.mxu0 %v5675_v48  ;;  %6079 = vmatprep.subr.bf16.mxu1 %v5677_v31  ;;  %v5713_v48 = vld [vmem:[#allocation4 + $0x358] sm:$0xff]  ;;  %v5710_v31 = vld [vmem:[#allocation4 + $0x340] sm:$0xff] }
 0xaee   :  { %5937 = vmatprep.mubr.bf16.mxu0 %v5601_v45  ;;  %6109 = vmatprep.mubr.bf16.mxu1 %v5601_v45  ;;  %v5712_v45 = vld [vmem:[#allocation4 + $0x350] sm:$0xff] }
 0xaf0   :  { %5908 = vmatpush1.bf16.msra.mxu0 %v5674_v59  ;;  %6080 = vmatpush1.bf16.msra.mxu1 %v5676_v61  ;;  %v5715_v59 = vld [vmem:[#allocation4 + $0x368] sm:$0xff]  ;;  %v5717_v61 = vld [vmem:[#allocation4 + $0x378] sm:$0xff] }
 0xaf1   :  { %5909 = vmatprep.subr.bf16.mxu0 %v5679_v55  ;;  %6081 = vmatprep.subr.bf16.mxu1 %v5681_v25  ;;  %v5714_v55 = vld [vmem:[#allocation4 + $0x360] sm:$0xff]  ;;  %v5716_v25 = vld [vmem:[#allocation4 + $0x370] sm:$0xff] }
 0xaf4   :  { %5910 = vmatpush1.bf16.msra.mxu0 %v5678_v12  ;;  %6082 = vmatpush1.bf16.msra.mxu1 %v5680_v27  ;;  %v5719_v12 = vld [vmem:[#allocation4 + $0x388] sm:$0xff]  ;;  %v5721_v27 = vld [vmem:[#allocation4 + $0x398] sm:$0xff] }
 0xaf5   :  { %5911 = vmatprep.subr.bf16.mxu0 %v5683_v40  ;;  %6083 = vmatprep.subr.bf16.mxu1 %v5685_v3  ;;  %v5718_v40 = vld [vmem:[#allocation4 + $0x380] sm:$0xff]  ;;  %v5720_v3 = vld [vmem:[#allocation4 + $0x390] sm:$0xff] }
 0xaf8   :  { %5912 = vmatpush1.bf16.msra.mxu0 %v5682_v57  ;;  %6084 = vmatpush1.bf16.msra.mxu1 %v5684_v33  ;;  %v5723_v57 = vld [vmem:[#allocation4 + $0x3a8] sm:$0xff]  ;;  %v5725_v33 = vld [vmem:[#allocation4 + $0x3b8] sm:$0xff] }
 0xaf9   :  { %5913 = vmatprep.subr.bf16.mxu0 %v5687_v58  ;;  %6085 = vmatprep.subr.bf16.mxu1 %v5689_v32  ;;  %v5722_v58 = vld [vmem:[#allocation4 + $0x3a0] sm:$0xff]  ;;  %v5724_v32 = vld [vmem:[#allocation4 + $0x3b0] sm:$0xff] }
 0xafc   :  { %5914 = vmatpush1.bf16.msra.mxu0 %v5686_v15  ;;  %6086 = vmatpush1.bf16.msra.mxu1 %v5688_v6  ;;  %v5727_v15 = vld [vmem:[#allocation4 + $0x3c8] sm:$0xff]  ;;  %v5729_v6 = vld [vmem:[#allocation4 + $0x3d8] sm:$0xff] }
 0xafd   :  { %5915 = vmatprep.subr.bf16.mxu0 %v5691_v8  ;;  %6087 = vmatprep.subr.bf16.mxu1 %v5693_v24  ;;  %v5726_v8 = vld [vmem:[#allocation4 + $0x3c0] sm:$0xff]  ;;  %v5728_v24 = vld [vmem:[#allocation4 + $0x3d0] sm:$0xff] }
 0xb00   :  { %5916 = vmatpush1.bf16.msra.mxu0 %v5690_v51  ;;  %6088 = vmatpush1.bf16.msra.mxu1 %v5692_v14  ;;  %v5731_v51 = vld [vmem:[#allocation4 + $0x3e8] sm:$0xff]  ;;  %v5733_v14 = vld [vmem:[#allocation4 + $0x3f8] sm:$0xff] }
 0xb01   :  { %5917 = vmatprep.subr.bf16.mxu0 %v5695_v4  ;;  %6089 = vmatprep.subr.bf16.mxu1 %v5697_v44  ;;  %v5730_v4 = vld [vmem:[#allocation4 + $0x3e0] sm:$0xff]  ;;  %v5732_v44 = vld [vmem:[#allocation4 + $0x3f0] sm:$0xff] }
 0xb04   :  { %5918 = vmatpush1.bf16.msra.mxu0 %v5694_v47  ;;  %6090 = vmatpush1.bf16.msra.mxu1 %v5696_v35  ;;  %v5735_v47 = vld [vmem:[#allocation4 + $0x408] sm:$0xff]  ;;  %v5737_v35 = vld [vmem:[#allocation4 + $0x418] sm:$0xff] }
 0xb05   :  { %5919 = vmatprep.subr.bf16.mxu0 %v5699_v43  ;;  %6091 = vmatprep.subr.bf16.mxu1 %v5701_v9  ;;  %v5600_v43 = vpack.c.bf16 %v5588_v39, %v5580_v34  ;;  %v5734_v9 = vld [vmem:[#allocation4 + $0x400] sm:$0xff]  ;;  %v5743_v34 = vld [vmem:[#allocation4 + $0x448] sm:$0xff]  ;;  %v5745_v39 = vld [vmem:[#allocation4 + $0x458] sm:$0xff] }
 0xb08   :  { %5920 = vmatpush1.bf16.msra.mxu0 %v5698_v38  ;;  %6092 = vmatpush1.bf16.msra.mxu1 %v5700_v18  ;;  %v5736_v38 = vld [vmem:[#allocation4 + $0x410] sm:$0xff]  ;;  %v5739_v18 = vld [vmem:[#allocation4 + $0x428] sm:$0xff] }
 0xb09   :  { %5921 = vmatprep.subr.bf16.mxu0 %v5703_v37  ;;  %6093 = vmatprep.subr.bf16.mxu1 %v5705_v11  ;;  %v5741_v37 = vld [vmem:[#allocation4 + $0x438] sm:$0xff]  ;;  %v5603_v11 = vpack.c.bf16 %v5591_v41, %v5583_v29  ;;  %v5746_v41 = vld [vmem:[#allocation4 + $0x460] sm:$0xff] }
 0xb0a   :  { %v5749_v29 = vld [vmem:[#allocation4 + $0x478] sm:$0xff] }
 0xb0c   :  { %5922 = vmatpush1.bf16.msra.mxu0 %v5702_v49  ;;  %6094 = vmatpush1.bf16.msra.mxu1 %v5704_v13  ;;  %v5744_v49 = vld [vmem:[#allocation4 + $0x450] sm:$0xff] }
 0xb0d   :  { %5923 = vmatprep.subr.bf16.mxu0 %v5707_v60  ;;  %6095 = vmatprep.subr.bf16.mxu1 %v5709_v5  ;;  %v5748_v13 = vld [vmem:[#allocation4 + $0x470] sm:$0xff]  ;;  %v5751_v60 = vld [vmem:[#allocation4 + $0x488] sm:$0xff]  ;;  %v5753_v5 = vld [vmem:[#allocation4 + $0x498] sm:$0xff] }
 0xb10   :  { %5924 = vmatpush1.bf16.msra.mxu0 %v5706_v63  ;;  %6096 = vmatpush1.bf16.msra.mxu1 %v5708_v62  ;;  %v5750_v63 = vld [vmem:[#allocation4 + $0x480] sm:$0xff]  ;;  %v5752_v62 = vld [vmem:[#allocation4 + $0x490] sm:$0xff] }
 0xb11   :  { %5925 = vmatprep.subr.bf16.mxu0 %v5711_v20  ;;  %6097 = vmatprep.subr.bf16.mxu1 %v5713_v48  ;;  %v5755_v20 = vld [vmem:[#allocation4 + $0x4a8] sm:$0xff]  ;;  %v5757_v48 = vld [vmem:[#allocation4 + $0x4b8] sm:$0xff] }
 0xb14   :  { %5926 = vmatpush1.bf16.msra.mxu0 %v5710_v31  ;;  %6098 = vmatpush1.bf16.msra.mxu1 %v5712_v45  ;;  %v5754_v31 = vld [vmem:[#allocation4 + $0x4a0] sm:$0xff]  ;;  %v5756_v45 = vld [vmem:[#allocation4 + $0x4b0] sm:$0xff] }
 0xb15   :  { %5927 = vmatprep.subr.bf16.mxu0 %v5715_v59  ;;  %6099 = vmatprep.subr.bf16.mxu1 %v5717_v61  ;;  %v5759_v59 = vld [vmem:[#allocation4 + $0x4c8] sm:$0xff]  ;;  %v5761_v61 = vld [vmem:[#allocation4 + $0x4d8] sm:$0xff] }
 0xb18   :  { %5928 = vmatpush1.bf16.msra.mxu0 %v5714_v55  ;;  %6100 = vmatpush1.bf16.msra.mxu1 %v5716_v25  ;;  %v5758_v55 = vld [vmem:[#allocation4 + $0x4c0] sm:$0xff]  ;;  %v5760_v25 = vld [vmem:[#allocation4 + $0x4d0] sm:$0xff] }
 0xb19   :  { %5929 = vmatprep.subr.bf16.mxu0 %v5719_v12  ;;  %6101 = vmatprep.subr.bf16.mxu1 %v5721_v27  ;;  %v5763_v12 = vld [vmem:[#allocation4 + $0x4e8] sm:$0xff]  ;;  %v5765_v27 = vld [vmem:[#allocation4 + $0x4f8] sm:$0xff] }
 0xb1c   :  { %5930 = vmatpush1.bf16.msra.mxu0 %v5718_v40  ;;  %6102 = vmatpush1.bf16.msra.mxu1 %v5720_v3  ;;  %v5762_v40 = vld [vmem:[#allocation4 + $0x4e0] sm:$0xff]  ;;  %v5764_v3 = vld [vmem:[#allocation4 + $0x4f0] sm:$0xff] }
 0xb1d   :  { %5931 = vmatprep.subr.bf16.mxu0 %v5723_v57  ;;  %6103 = vmatprep.subr.bf16.mxu1 %v5725_v33  ;;  %v5767_v57 = vld [vmem:[#allocation4 + $0x508] sm:$0xff]  ;;  %v5769_v33 = vld [vmem:[#allocation4 + $0x518] sm:$0xff] }
 0xb20   :  { %5932 = vmatpush1.bf16.msra.mxu0 %v5722_v58  ;;  %6104 = vmatpush1.bf16.msra.mxu1 %v5724_v32  ;;  %v5766_v58 = vld [vmem:[#allocation4 + $0x500] sm:$0xff]  ;;  %v5768_v32 = vld [vmem:[#allocation4 + $0x510] sm:$0xff] }
 0xb21   :  { %5933 = vmatprep.subr.bf16.mxu0 %v5727_v15  ;;  %6105 = vmatprep.subr.bf16.mxu1 %v5729_v6  ;;  %v5771_v15 = vld [vmem:[#allocation4 + $0x528] sm:$0xff]  ;;  %v5773_v6 = vld [vmem:[#allocation4 + $0x538] sm:$0xff] }
 0xb24   :  { %5934 = vmatpush1.bf16.msra.mxu0 %v5726_v8  ;;  %6106 = vmatpush1.bf16.msra.mxu1 %v5728_v24  ;;  %v5770_v8 = vld [vmem:[#allocation4 + $0x520] sm:$0xff]  ;;  %v5772_v24 = vld [vmem:[#allocation4 + $0x530] sm:$0xff] }
 0xb25   :  { %5935 = vmatprep.subr.bf16.mxu0 %v5731_v51  ;;  %6107 = vmatprep.subr.bf16.mxu1 %v5733_v14  ;;  %v5775_v51 = vld [vmem:[#allocation4 + $0x548] sm:$0xff]  ;;  %v5777_v14 = vld [vmem:[#allocation4 + $0x558] sm:$0xff] }
 0xb28   :  { %5936 = vmatpush1.bf16.msra.mxu0 %v5730_v4  ;;  %6108 = vmatpush1.bf16.msra.mxu1 %v5732_v44  ;;  %v5774_v4 = vld [vmem:[#allocation4 + $0x540] sm:$0xff]  ;;  %v5776_v44 = vld [vmem:[#allocation4 + $0x550] sm:$0xff] }
 0xb29   :  { %5948 = vmatprep.subr.bf16.mxu0 %v5735_v47  ;;  %6120 = vmatprep.subr.bf16.mxu1 %v5737_v35  ;;  %v5779_v47 = vld [vmem:[#allocation4 + $0x568] sm:$0xff]  ;;  %v5781_v35 = vld [vmem:[#allocation4 + $0x578] sm:$0xff] }
 0xb2b   :  { %5938 = vmatmul.mubr.bf16.vlgmr.msra.gmra.mrb[24].mxu0 %v5600_v43  ;;  %6110 = vmatmul.mubr.bf16.vlgmr.msra.gmra.mrb[28].mxu1 %v5600_v43  ;;  %v5778_v43 = vld [vmem:[#allocation4 + $0x560] sm:$0xff] }
 0xb2c   :  { %5949 = vmatpush1.bf16.msra.mxu0 %v5734_v9  ;;  %6121 = vmatpush1.bf16.msra.mxu1 %v5736_v38  ;;  %v5780_v9 = vld [vmem:[#allocation4 + $0x570] sm:$0xff]  ;;  %v5783_v38 = vld [vmem:[#allocation4 + $0x588] sm:$0xff] }
 0xb2d   :  { %5950 = vmatprep.subr.bf16.mxu0 %v5739_v18  ;;  %6122 = vmatprep.subr.bf16.mxu1 %v5741_v37  ;;  %v5785_v18 = vld [vmem:[#allocation4 + $0x598] sm:$0xff]  ;;  %v5782_v37 = vld [vmem:[#allocation4 + $0x580] sm:$0xff] }
 0xb2e   :  { %5980 = vmatprep.mubr.bf16.mxu0 %v5603_v11  ;;  %6152 = vmatprep.mubr.bf16.mxu1 %v5603_v11  ;;  %v5784_v11 = vld [vmem:[#allocation4 + $0x590] sm:$0xff] }
 0xb30   :  { %5951 = vmatpush1.bf16.msra.mxu0 %v5738_v30  ;;  %6123 = vmatpush1.bf16.msra.mxu1 %v5740_v19  ;;  %v5787_v30 = vld [vmem:[#allocation4 + $0x5a8] sm:$0xff]  ;;  %v5789_v19 = vld [vmem:[#allocation4 + $0x5b8] sm:$0xff] }
 0xb31   :  { %5952 = vmatprep.subr.bf16.mxu0 %v5743_v34  ;;  %6124 = vmatprep.subr.bf16.mxu1 %v5745_v39  ;;  %v5786_v34 = vld [vmem:[#allocation4 + $0x5a0] sm:$0xff]  ;;  %v5788_v39 = vld [vmem:[#allocation4 + $0x5b0] sm:$0xff] }
 0xb34   :  { %5953 = vmatpush1.bf16.msra.mxu0 %v5742_v17  ;;  %6125 = vmatpush1.bf16.msra.mxu1 %v5744_v49  ;;  %v5791_v17 = vld [vmem:[#allocation4 + $0x5c8] sm:$0xff]  ;;  %v5793_v49 = vld [vmem:[#allocation4 + $0x5d8] sm:$0xff] }
 0xb35   :  { %5954 = vmatprep.subr.bf16.mxu0 %v5747_v10  ;;  %6126 = vmatprep.subr.bf16.mxu1 %v5749_v29  ;;  %v5790_v10 = vld [vmem:[#allocation4 + $0x5c0] sm:$0xff]  ;;  %v5792_v29 = vld [vmem:[#allocation4 + $0x5d0] sm:$0xff] }
 0xb38   :  { %5955 = vmatpush1.bf16.msra.mxu0 %v5746_v41  ;;  %6127 = vmatpush1.bf16.msra.mxu1 %v5748_v13  ;;  %v5795_v41 = vld [vmem:[#allocation4 + $0x5e8] sm:$0xff]  ;;  %v5797_v13 = vld [vmem:[#allocation4 + $0x5f8] sm:$0xff] }
 0xb39   :  { %5956 = vmatprep.subr.bf16.mxu0 %v5751_v60  ;;  %6128 = vmatprep.subr.bf16.mxu1 %v5753_v5  ;;  %v5794_v60 = vld [vmem:[#allocation4 + $0x5e0] sm:$0xff]  ;;  %v5796_v5 = vld [vmem:[#allocation4 + $0x5f0] sm:$0xff] }
 0xb3c   :  { %5957 = vmatpush1.bf16.msra.mxu0 %v5750_v63  ;;  %6129 = vmatpush1.bf16.msra.mxu1 %v5752_v62  ;;  %v5799_v63 = vld [vmem:[#allocation4 + $0x608] sm:$0xff]  ;;  %v5801_v62 = vld [vmem:[#allocation4 + $0x618] sm:$0xff] }
 0xb3d   :  { %5958 = vmatprep.subr.bf16.mxu0 %v5755_v20  ;;  %6130 = vmatprep.subr.bf16.mxu1 %v5757_v48  ;;  %v5602_v20 = vpack.c.bf16 %v5590_v7, %v5582_v52  ;;  %v5798_v48 = vld [vmem:[#allocation4 + $0x600] sm:$0xff]  ;;  %v5807_v52 = vld [vmem:[#allocation4 + $0x648] sm:$0xff]  ;;  %v5809_v7 = vld [vmem:[#allocation4 + $0x658] sm:$0xff] }
 0xb40   :  { %5959 = vmatpush1.bf16.msra.mxu0 %v5754_v31  ;;  %6131 = vmatpush1.bf16.msra.mxu1 %v5756_v45  ;;  %v5800_v31 = vld [vmem:[#allocation4 + $0x610] sm:$0xff]  ;;  %v5803_v45 = vld [vmem:[#allocation4 + $0x628] sm:$0xff] }
 0xb41   :  { %5960 = vmatprep.subr.bf16.mxu0 %v5759_v59  ;;  %6132 = vmatprep.subr.bf16.mxu1 %v5761_v61  ;;  %v5805_v59 = vld [vmem:[#allocation4 + $0x638] sm:$0xff]  ;;  %v5605_v61 = vpack.c.bf16 %v5593_v36, %v5585_v2  ;;  %v5810_v36 = vld [vmem:[#allocation4 + $0x660] sm:$0xff] }
 0xb42   :  { %v5813_v2 = vld [vmem:[#allocation4 + $0x678] sm:$0xff] }
 0xb44   :  { %5961 = vmatpush1.bf16.msra.mxu0 %v5758_v55  ;;  %6133 = vmatpush1.bf16.msra.mxu1 %v5760_v25  ;;  %v5808_v55 = vld [vmem:[#allocation4 + $0x650] sm:$0xff] }
 0xb45   :  { %5962 = vmatprep.subr.bf16.mxu0 %v5763_v12  ;;  %6134 = vmatprep.subr.bf16.mxu1 %v5765_v27  ;;  %v5812_v25 = vld [vmem:[#allocation4 + $0x670] sm:$0xff]  ;;  %v5815_v12 = vld [vmem:[#allocation4 + $0x688] sm:$0xff]  ;;  %v5817_v27 = vld [vmem:[#allocation4 + $0x698] sm:$0xff] }
 0xb48   :  { %5963 = vmatpush1.bf16.msra.mxu0 %v5762_v40  ;;  %6135 = vmatpush1.bf16.msra.mxu1 %v5764_v3  ;;  %v5814_v40 = vld [vmem:[#allocation4 + $0x680] sm:$0xff]  ;;  %v5816_v3 = vld [vmem:[#allocation4 + $0x690] sm:$0xff] }
 0xb49   :  { %5964 = vmatprep.subr.bf16.mxu0 %v5767_v57  ;;  %6136 = vmatprep.subr.bf16.mxu1 %v5769_v33  ;;  %v5819_v57 = vld [vmem:[#allocation4 + $0x6a8] sm:$0xff]  ;;  %v5821_v33 = vld [vmem:[#allocation4 + $0x6b8] sm:$0xff] }
 0xb4c   :  { %5965 = vmatpush1.bf16.msra.mxu0 %v5766_v58  ;;  %6137 = vmatpush1.bf16.msra.mxu1 %v5768_v32  ;;  %v5818_v58 = vld [vmem:[#allocation4 + $0x6a0] sm:$0xff]  ;;  %v5820_v32 = vld [vmem:[#allocation4 + $0x6b0] sm:$0xff] }
 0xb4d   :  { %5966 = vmatprep.subr.bf16.mxu0 %v5771_v15  ;;  %6138 = vmatprep.subr.bf16.mxu1 %v5773_v6  ;;  %v5823_v15 = vld [vmem:[#allocation4 + $0x6c8] sm:$0xff]  ;;  %v5825_v6 = vld [vmem:[#allocation4 + $0x6d8] sm:$0xff] }
 0xb50   :  { %5967 = vmatpush1.bf16.msra.mxu0 %v5770_v8  ;;  %6139 = vmatpush1.bf16.msra.mxu1 %v5772_v24  ;;  %v5822_v8 = vld [vmem:[#allocation4 + $0x6c0] sm:$0xff]  ;;  %v5824_v24 = vld [vmem:[#allocation4 + $0x6d0] sm:$0xff] }
 0xb51   :  { %5968 = vmatprep.subr.bf16.mxu0 %v5775_v51  ;;  %6140 = vmatprep.subr.bf16.mxu1 %v5777_v14  ;;  %v5827_v51 = vld [vmem:[#allocation4 + $0x6e8] sm:$0xff]  ;;  %v5829_v14 = vld [vmem:[#allocation4 + $0x6f8] sm:$0xff] }
 0xb54   :  { %5969 = vmatpush1.bf16.msra.mxu0 %v5774_v4  ;;  %6141 = vmatpush1.bf16.msra.mxu1 %v5776_v44  ;;  %v5826_v4 = vld [vmem:[#allocation4 + $0x6e0] sm:$0xff]  ;;  %v5828_v44 = vld [vmem:[#allocation4 + $0x6f0] sm:$0xff] }
 0xb55   :  { %5970 = vmatprep.subr.bf16.mxu0 %v5779_v47  ;;  %6142 = vmatprep.subr.bf16.mxu1 %v5781_v35  ;;  %v5831_v47 = vld [vmem:[#allocation4 + $0x708] sm:$0xff]  ;;  %v5833_v35 = vld [vmem:[#allocation4 + $0x718] sm:$0xff] }
 0xb58   :  { %5971 = vmatpush1.bf16.msra.mxu0 %v5778_v43  ;;  %6143 = vmatpush1.bf16.msra.mxu1 %v5780_v9  ;;  %v5830_v43 = vld [vmem:[#allocation4 + $0x700] sm:$0xff]  ;;  %v5832_v9 = vld [vmem:[#allocation4 + $0x710] sm:$0xff] }
 0xb59   :  { %5972 = vmatprep.subr.bf16.mxu0 %v5783_v38  ;;  %6144 = vmatprep.subr.bf16.mxu1 %v5785_v18  ;;  %v5835_v38 = vld [vmem:[#allocation4 + $0x728] sm:$0xff]  ;;  %v5837_v18 = vld [vmem:[#allocation4 + $0x738] sm:$0xff] }
 0xb5c   :  { %5973 = vmatpush1.bf16.msra.mxu0 %v5782_v37  ;;  %6145 = vmatpush1.bf16.msra.mxu1 %v5784_v11  ;;  %v5834_v37 = vld [vmem:[#allocation4 + $0x720] sm:$0xff]  ;;  %v5836_v11 = vld [vmem:[#allocation4 + $0x730] sm:$0xff] }
 0xb5d   :  { %5974 = vmatprep.subr.bf16.mxu0 %v5787_v30  ;;  %6146 = vmatprep.subr.bf16.mxu1 %v5789_v19  ;;  %v5839_v30 = vld [vmem:[#allocation4 + $0x748] sm:$0xff]  ;;  %v5841_v19 = vld [vmem:[#allocation4 + $0x758] sm:$0xff] }
 0xb60   :  { %5975 = vmatpush1.bf16.msra.mxu0 %v5786_v34  ;;  %6147 = vmatpush1.bf16.msra.mxu1 %v5788_v39  ;;  %v5838_v34 = vld [vmem:[#allocation4 + $0x740] sm:$0xff]  ;;  %v5840_v39 = vld [vmem:[#allocation4 + $0x750] sm:$0xff] }
 0xb61   :  { %5976 = vmatprep.subr.bf16.mxu0 %v5791_v17  ;;  %6148 = vmatprep.subr.bf16.mxu1 %v5793_v49  ;;  %v5843_v17 = vld [vmem:[#allocation4 + $0x768] sm:$0xff]  ;;  %v5845_v49 = vld [vmem:[#allocation4 + $0x778] sm:$0xff] }
 0xb64   :  { %5977 = vmatpush1.bf16.msra.mxu0 %v5790_v10  ;;  %6149 = vmatpush1.bf16.msra.mxu1 %v5792_v29  ;;  %v5842_v10 = vld [vmem:[#allocation4 + $0x760] sm:$0xff]  ;;  %v5844_v29 = vld [vmem:[#allocation4 + $0x770] sm:$0xff] }
 0xb65   :  { %5978 = vmatprep.subr.bf16.mxu0 %v5795_v41  ;;  %6150 = vmatprep.subr.bf16.mxu1 %v5797_v13  ;;  %v5847_v41 = vld [vmem:[#allocation4 + $0x788] sm:$0xff]  ;;  %v5849_v13 = vld [vmem:[#allocation4 + $0x798] sm:$0xff] }
 0xb68   :  { %5979 = vmatpush1.bf16.msra.mxu0 %v5794_v60  ;;  %6151 = vmatpush1.bf16.msra.mxu1 %v5796_v5  ;;  %v5846_v60 = vld [vmem:[#allocation4 + $0x780] sm:$0xff]  ;;  %v5848_v5 = vld [vmem:[#allocation4 + $0x790] sm:$0xff] }
 0xb69   :  { %5991 = vmatprep.subr.bf16.mxu0 %v5799_v63  ;;  %6163 = vmatprep.subr.bf16.mxu1 %v5801_v62  ;;  %v5851_v63 = vld [vmem:[#allocation4 + $0x7a8] sm:$0xff]  ;;  %v5853_v62 = vld [vmem:[#allocation4 + $0x7b8] sm:$0xff] }
 0xb6b   :  { %5981 = vmatmul.mubr.bf16.vlgmr.msra.gmra.mrb[24].mxu0 %v5602_v20  ;;  %6153 = vmatmul.mubr.bf16.vlgmr.msra.gmra.mrb[28].mxu1 %v5602_v20  ;;  %v5850_v20 = vld [vmem:[#allocation4 + $0x7a0] sm:$0xff] }
 0xb6c   :  { %5992 = vmatpush1.bf16.msra.mxu0 %v5798_v48  ;;  %6164 = vmatpush1.bf16.msra.mxu1 %v5800_v31  ;;  %v5852_v48 = vld [vmem:[#allocation4 + $0x7b0] sm:$0xff]  ;;  %v5855_v31 = vld [vmem:[#allocation4 + $0x7c8] sm:$0xff] }
 0xb6d   :  { %5993 = vmatprep.subr.bf16.mxu0 %v5803_v45  ;;  %6165 = vmatprep.subr.bf16.mxu1 %v5805_v59  ;;  %v5857_v45 = vld [vmem:[#allocation4 + $0x7d8] sm:$0xff]  ;;  %v5854_v59 = vld [vmem:[#allocation4 + $0x7c0] sm:$0xff] }
 0xb6e   :  { %6023 = vmatprep.mubr.bf16.mxu0 %v5605_v61  ;;  %6195 = vmatprep.mubr.bf16.mxu1 %v5605_v61  ;;  %v5856_v61 = vld [vmem:[#allocation4 + $0x7d0] sm:$0xff] }
 0xb70   :  { %5994 = vmatpush1.bf16.msra.mxu0 %v5802_v23  ;;  %6166 = vmatpush1.bf16.msra.mxu1 %v5804_v16  ;;  %v5859_v23 = vld [vmem:[#allocation4 + $0x7e8] sm:$0xff]  ;;  %v5861_v16 = vld [vmem:[#allocation4 + $0x7f8] sm:$0xff] }
 0xb71   :  { %5995 = vmatprep.subr.bf16.mxu0 %v5807_v52  ;;  %6167 = vmatprep.subr.bf16.mxu1 %v5809_v7  ;;  %v5858_v52 = vld [vmem:[#allocation4 + $0x7e0] sm:$0xff]  ;;  %v5860_v7 = vld [vmem:[#allocation4 + $0x7f0] sm:$0xff] }
 0xb74   :  { %5996 = vmatpush1.bf16.msra.mxu0 %v5806_v50  ;;  %6168 = vmatpush1.bf16.msra.mxu1 %v5808_v55  ;;  %v5604_v50 = vpack.c.bf16 %v5592_v0, %v5584_v53 }
 0xb75   :  { %5997 = vmatprep.subr.bf16.mxu0 %v5811_v28  ;;  %6169 = vmatprep.subr.bf16.mxu1 %v5813_v2 }
 0xb78   :  { %5998 = vmatpush1.bf16.msra.mxu0 %v5810_v36  ;;  %6170 = vmatpush1.bf16.msra.mxu1 %v5812_v25 }
 0xb79   :  { %5999 = vmatprep.subr.bf16.mxu0 %v5815_v12  ;;  %6171 = vmatprep.subr.bf16.mxu1 %v5817_v27 }
 0xb7c   :  { %6000 = vmatpush1.bf16.msra.mxu0 %v5814_v40  ;;  %6172 = vmatpush1.bf16.msra.mxu1 %v5816_v3 }
 0xb7d   :  { %6001 = vmatprep.subr.bf16.mxu0 %v5819_v57  ;;  %6173 = vmatprep.subr.bf16.mxu1 %v5821_v33 }
 0xb80   :  { %6002 = vmatpush1.bf16.msra.mxu0 %v5818_v58  ;;  %6174 = vmatpush1.bf16.msra.mxu1 %v5820_v32 }
 0xb81   :  { %6003 = vmatprep.subr.bf16.mxu0 %v5823_v15  ;;  %6175 = vmatprep.subr.bf16.mxu1 %v5825_v6 }
 0xb84   :  { %6004 = vmatpush1.bf16.msra.mxu0 %v5822_v8  ;;  %6176 = vmatpush1.bf16.msra.mxu1 %v5824_v24 }
 0xb85   :  { %6005 = vmatprep.subr.bf16.mxu0 %v5827_v51  ;;  %6177 = vmatprep.subr.bf16.mxu1 %v5829_v14 }
 0xb88   :  { %6006 = vmatpush1.bf16.msra.mxu0 %v5826_v4  ;;  %6178 = vmatpush1.bf16.msra.mxu1 %v5828_v44 }
 0xb89   :  { %6007 = vmatprep.subr.bf16.mxu0 %v5831_v47  ;;  %6179 = vmatprep.subr.bf16.mxu1 %v5833_v35 }
 0xb8c   :  { %6008 = vmatpush1.bf16.msra.mxu0 %v5830_v43  ;;  %6180 = vmatpush1.bf16.msra.mxu1 %v5832_v9 }
 0xb8d   :  { %6009 = vmatprep.subr.bf16.mxu0 %v5835_v38  ;;  %6181 = vmatprep.subr.bf16.mxu1 %v5837_v18 }
 0xb90   :  { %6010 = vmatpush1.bf16.msra.mxu0 %v5834_v37  ;;  %6182 = vmatpush1.bf16.msra.mxu1 %v5836_v11 }
 0xb91   :  { %6011 = vmatprep.subr.bf16.mxu0 %v5839_v30  ;;  %6183 = vmatprep.subr.bf16.mxu1 %v5841_v19 }
 0xb94   :  { %6012 = vmatpush1.bf16.msra.mxu0 %v5838_v34  ;;  %6184 = vmatpush1.bf16.msra.mxu1 %v5840_v39 }
 0xb95   :  { %6013 = vmatprep.subr.bf16.mxu0 %v5843_v17  ;;  %6185 = vmatprep.subr.bf16.mxu1 %v5845_v49 }
 0xb98   :  { %6014 = vmatpush1.bf16.msra.mxu0 %v5842_v10  ;;  %6186 = vmatpush1.bf16.msra.mxu1 %v5844_v29 }
 0xb99   :  { %6015 = vmatprep.subr.bf16.mxu0 %v5847_v41  ;;  %6187 = vmatprep.subr.bf16.mxu1 %v5849_v13 }
 0xb9c   :  { %6016 = vmatpush1.bf16.msra.mxu0 %v5846_v60  ;;  %6188 = vmatpush1.bf16.msra.mxu1 %v5848_v5 }
 0xb9d   :  { %6017 = vmatprep.subr.bf16.mxu0 %v5851_v63  ;;  %6189 = vmatprep.subr.bf16.mxu1 %v5853_v62 }
 0xba0   :  { %6018 = vmatpush1.bf16.msra.mxu0 %v5850_v20  ;;  %6190 = vmatpush1.bf16.msra.mxu1 %v5852_v48 }
 0xba1   :  { %6019 = vmatprep.subr.bf16.mxu0 %v5855_v31  ;;  %6191 = vmatprep.subr.bf16.mxu1 %v5857_v45 }
 0xba4   :  { %6020 = vmatpush1.bf16.msra.mxu0 %v5854_v59  ;;  %6192 = vmatpush1.bf16.msra.mxu1 %v5856_v61 }
 0xba5   :  { %6021 = vmatprep.subr.bf16.mxu0 %v5859_v23  ;;  %6193 = vmatprep.subr.bf16.mxu1 %v5861_v16 }
 0xba8   :  { %6022 = vmatpush1.bf16.msra.mxu0 %v5858_v52  ;;  %6194 = vmatpush1.bf16.msra.mxu1 %v5860_v7 }
 0xbab   :  { %6024 = vmatmul.mubr.bf16.vlgmr.msra.gmra.mrb[24].mxu0 %v5604_v50  ;;  %6196 = vmatmul.mubr.bf16.vlgmr.msra.gmra.mrb[28].mxu1 %v5604_v50 }
 0xc7e   :  { %v8433_v55 = vpop.f32.mrb[24].mxu0  ;;  %v8435_v28 = vpop.f32.mrb[28].mxu1 }
 0xc7f   :  { %v8437_v2 = vpop.f32.mrb[25].mxu0  ;;  %v8439_v36 = vpop.f32.mrb[29].mxu1  ;;  %v6238_v25 = vmul.f32 %v8433_v55, %v8433_v55  ;;  %v6240_v42 = vmul.f32 %v8435_v28, %v8435_v28 }
 0xc80   :  { %v6239_v54 = vmul.f32 %v8437_v2, %v8437_v2  ;;  %v6241_v53 = vmul.f32 %v8439_v36, %v8439_v36  ;;  %v8449_v0 = vpop.f32.mrb[26].mxu0  ;;  %v8451_v12 = vpop.f32.mrb[30].mxu1 }
 0xc81   :  { %v6206_v27 = vadd.f32 %v8449_v0, %v8433_v55  ;;  %v6242_v40 = vmul.f32 %v8449_v0, %v8449_v0  ;;  %v6220_v3 = vadd.f32 %v8451_v12, %v8435_v28  ;;  %v6244_v57 = vmul.f32 %v8451_v12, %v8451_v12  ;;  %v8461_v33 = vpop.f32.mrb[27].mxu0  ;;  %v8463_v58 = vpop.f32.mrb[31].mxu1 }
 0xc82   :  { %v6213_v32 = vadd.f32 %v8461_v33, %v8437_v2  ;;  %v6243_v15 = vmul.f32 %v8461_v33, %v8461_v33  ;;  %v6227_v6 = vadd.f32 %v8463_v58, %v8439_v36  ;;  %v6245_v8 = vmul.f32 %v8463_v58, %v8463_v58 }
 0xc83   :  { %v6207_v24 = vrot.slane %v6206_v27, 4  ;;  %v6246_v51 = vadd.f32 %v6242_v40, %v6238_v25  ;;  %v6221_v14 = vrot.slane %v6220_v3, 4  ;;  %v6260_v4 = vadd.f32 %v6244_v57, %v6240_v42 }
 0xc84   :  { %v6214_v44 = vrot.slane %v6213_v32, 4  ;;  %v6253_v47 = vadd.f32 %v6243_v15, %v6239_v54  ;;  %v6228_v35 = vrot.slane %v6227_v6, 4  ;;  %v6267_v43 = vadd.f32 %v6245_v8, %v6241_v53 }
 0xc85   :  { %v6208_v9 = vadd.f32 %v6207_v24, %v6206_v27  ;;  %v6247_v38 = vrot.slane %v6246_v51, 4  ;;  %v6222_v18 = vadd.f32 %v6221_v14, %v6220_v3  ;;  %v6261_v37 = vrot.slane %v6260_v4, 4 }
 0xc86   :  { %v6215_v11 = vadd.f32 %v6214_v44, %v6213_v32  ;;  %v6254_v30 = vrot.slane %v6253_v47, 4  ;;  %v6229_v19 = vadd.f32 %v6228_v35, %v6227_v6  ;;  %v6268_v34 = vrot.slane %v6267_v43, 4 }
 0xc87   :  { %v6209_v39 = vrot.slane %v6208_v9, 2  ;;  %v6248_v17 = vadd.f32 %v6247_v38, %v6246_v51  ;;  %v6223_v49 = vrot.slane %v6222_v18, 2  ;;  %v6262_v10 = vadd.f32 %v6261_v37, %v6260_v4 }
 0xc88   :  { %v6216_v29 = vrot.slane %v6215_v11, 2  ;;  %v6255_v41 = vadd.f32 %v6254_v30, %v6253_v47  ;;  %v6230_v13 = vrot.slane %v6229_v19, 2  ;;  %v6269_v60 = vadd.f32 %v6268_v34, %v6267_v43 }
 0xc89   :  { %v6210_v5 = vadd.f32 %v6209_v39, %v6208_v9  ;;  %v6249_v63 = vrot.slane %v6248_v17, 2  ;;  %v6224_v62 = vadd.f32 %v6223_v49, %v6222_v18  ;;  %v6263_v20 = vrot.slane %v6262_v10, 2 }
 0xc8a   :  { %v6217_v48 = vadd.f32 %v6216_v29, %v6215_v11  ;;  %v6256_v31 = vrot.slane %v6255_v41, 2  ;;  %v6231_v45 = vadd.f32 %v6230_v13, %v6229_v19  ;;  %v6270_v59 = vrot.slane %v6269_v60, 2 }
 0xc8b   :  { %v6211_v61 = vrot.slane %v6210_v5, 1  ;;  %v6250_v23 = vadd.f32 %v6249_v63, %v6248_v17  ;;  %v6225_v16 = vrot.slane %v6224_v62, 1  ;;  %v6264_v52 = vadd.f32 %v6263_v20, %v6262_v10 }
 0xc8c   :  { %v6218_v7 = vrot.slane %v6217_v48, 1  ;;  %v6257_v50 = vadd.f32 %v6256_v31, %v6255_v41  ;;  %v6232_v25 = vrot.slane %v6231_v45, 1  ;;  %v6271_v42 = vadd.f32 %v6270_v59, %v6269_v60 }
 0xc8d   :  { %v6212_v54 = vadd.f32 %v6211_v61, %v6210_v5  ;;  %v6251_v53 = vrot.slane %v6250_v23, 1  ;;  %v6226_v27 = vadd.f32 %v6225_v16, %v6224_v62  ;;  %v6265_v40 = vrot.slane %v6264_v52, 1 }
 0xc8e   :  { %v6219_v3 = vadd.f32 %v6218_v7, %v6217_v48  ;;  %v6258_v57 = vrot.slane %v6257_v50, 1  ;;  %v6233_v32 = vadd.f32 %v6232_v25, %v6231_v45  ;;  %v6272_v15 = vrot.slane %v6271_v42, 1 }
 0xc8f   :  { %v6234_v6 = vmul.f32 0.0625, %v6212_v54  ;;  %v6252_v8 = vadd.f32 %v6251_v53, %v6250_v23  ;;  %v6236_v24 = vmul.f32 0.0625, %v6226_v27  ;;  %v6266_v51 = vadd.f32 %v6265_v40, %v6264_v52  ;;  %v6290_v52 = vld [vmem:[#allocation14] sm:$0xf] }
 0xc90   :  { %v6235_v14 = vmul.f32 0.0625, %v6219_v3  ;;  %v6259_v4 = vadd.f32 %v6258_v57, %v6257_v50  ;;  %v6237_v44 = vmul.f32 0.0625, %v6233_v32  ;;  %v6273_v47 = vadd.f32 %v6272_v15, %v6271_v42 }
 0xc91   :  { %v6274_v35 = vmul.f32 0.0625, %v6252_v8  ;;  %v6278_v43 = vmul.f32 %v6234_v6, %v6234_v6  ;;  %v6276_v9 = vmul.f32 0.0625, %v6266_v51  ;;  %v6280_v38 = vmul.f32 %v6236_v24, %v6236_v24 }
 0xc92   :  { %v6275_v18 = vmul.f32 0.0625, %v6259_v4  ;;  %v6279_v37 = vmul.f32 %v6235_v14, %v6235_v14  ;;  %v6277_v11 = vmul.f32 0.0625, %v6273_v47  ;;  %v6281_v30 = vmul.f32 %v6237_v44, %v6237_v44 }
 0xc93   :  { %v6282_v19 = vsub.f32 %v6274_v35, %v6278_v43  ;;  %v6284_v34 = vsub.f32 %v6276_v9, %v6280_v38 }
 0xc94   :  { %v6283_v39 = vsub.f32 %v6275_v18, %v6279_v37  ;;  %v6285_v17 = vsub.f32 %v6277_v11, %v6281_v30 }
 0xc95   :  { %v6286_v49 = vmax.f32 %v6282_v19, 0.0  ;;  %v6288_v10 = vmax.f32 %v6284_v34, 0.0 }
 0xc96   :  { %v6287_v29 = vmax.f32 %v6283_v39, 0.0  ;;  %v6289_v41 = vmax.f32 %v6285_v17, 0.0 }
 0xc97   :  { %v6291_v13 = vadd.f32 1e-05, %v6286_v49  ;;  %v6293_v60 = vadd.f32 1e-05, %v6288_v10 }
 0xc98   :  { %v6292_v5 = vadd.f32 1e-05, %v6287_v29  ;;  %v6294_v63 = vadd.f32 1e-05, %v6289_v41 }
 0xc99   :  { %7207 = vrsqrt.f32 %v6291_v13 }
 0xc9a   :  { %7209 = vrsqrt.f32 %v6293_v60 }
 0xc9b   :  { %7211 = vrsqrt.f32 %v6292_v5 }
 0xc9c   :  { %7213 = vrsqrt.f32 %v6294_v63 }
 0xca3   :  { %v7208_v62 = vpop.eup %7207 }
 0xca4   :  { %v7210_v20 = vpop.eup %7209 }
 0xca5   :  { %v7212_v48 = vpop.eup %7211 }
 0xca6   :  { %v7214_v31 = vpop.eup %7213  ;;  %v6303_v45 = vcombine.low %v7208_v62, %v7212_v48 }
 0xca7   :  { %v6304_v59 = vcombine.low %v7210_v20, %v7214_v31 }
 0xca8   :  { %v6311_v61 = vrot.slane %v6303_v45, %v8218_v46 }
 0xca9   :  { %v6318_v23 = vrot.slane %v6304_v59, %v8218_v46 }
 0xcab   :  { %v6319_v16 = vcombine.low %v6311_v61, %v6318_v23 }
 0xcad   :  { %v6326_v7 = vrot.slane %v6319_v16, %v8218_v46 }
 0xcaf   :  { %v6328_v50 = vmul.f32 %v6326_v7, %v6290_v52 }
 0xcb1   :  { %v6334_v25 = vrot.slane %v6328_v50, %v8310_v26  ;;  %v6338_v42 = vrot.slane %v6328_v50, %v8313_v21  ;;  %v6342_v54 = vrot.slane %v6328_v50, %v8316_v22  ;;  %v6346_v53 = vrot.slane %v6328_v50, %v8319_v56 }
 0xcb3   :  { %v6351_v27 = vmul.f32 %v6334_v25, %v6234_v6  ;;  %v6352_v40 = vmul.f32 %v6338_v42, %v6235_v14  ;;  %v6353_v3 = vmul.f32 %v6342_v54, %v6236_v24  ;;  %v6354_v57 = vmul.f32 %v6346_v53, %v6237_v44 }
 0xcb4   :  { %v6385_v32 = vmul.f32 %v6334_v25, %v8433_v55  ;;  %v6386_v15 = vmul.f32 %v6338_v42, %v8437_v2  ;;  %v6387_v8 = vmul.f32 %v6342_v54, %v8435_v28  ;;  %v6388_v51 = vmul.f32 %v6346_v53, %v8439_v36  ;;  %v6329_v2 = vld [vmem:[#allocation16] sm:$0xf] }
 0xcb5   :  { %v6359_v4 = vcombine.low %v6351_v27, %v6352_v40  ;;  %v6360_v47 = vcombine.low %v6353_v3, %v6354_v57  ;;  %v6389_v35 = vmul.f32 %v6334_v25, %v8449_v0  ;;  %v6390_v43 = vmul.f32 %v6338_v42, %v8461_v33 }
 0xcb6   :  { %v6391_v9 = vmul.f32 %v6342_v54, %v8451_v12  ;;  %v6392_v6 = vmul.f32 %v6346_v53, %v8463_v58 }
 0xcb7   :  { %v6367_v24 = vrot.slane %v6359_v4, %v8218_v46  ;;  %v6374_v55 = vrot.slane %v6360_v47, %v8218_v46 }
 0xcb9   :  { %v6375_v14 = vcombine.low %v6367_v24, %v6374_v55 }
 0xcbb   :  { %v6382_v28 = vrot.slane %v6375_v14, %v8218_v46 }
 0xcbd   :  { %v6384_v44 = vsub.f32 %v6329_v2, %v6382_v28 }
 0xcbf   :  { %v6397_v36 = vrot.slane %v6384_v44, %v8310_v26  ;;  %v6401_v38 = vrot.slane %v6384_v44, %v8313_v21  ;;  %v6405_v0 = vrot.slane %v6384_v44, %v8316_v22  ;;  %v6409_v33 = vrot.slane %v6384_v44, %v8319_v56 }
 0xcc1   :  { %v8495_v12 = vadd.f32 %v6397_v36, %v6385_v32  ;;  %v6415_v58 = vadd.f32 %v6401_v38, %v6386_v15  ;;  %v8497_v18 = vadd.f32 %v6405_v0, %v6387_v8  ;;  %v8499_v37 = vadd.f32 %v6409_v33, %v6388_v51 }
 0xcc2   :  { %v8501_v11 = vadd.f32 %v6397_v36, %v6389_v35  ;;  %v6419_v30 = vadd.f32 %v6401_v38, %v6390_v43  ;;  %v8503_v19 = vadd.f32 %v6405_v0, %v6391_v9  ;;  %v8505_v34 = vadd.f32 %v6409_v33, %v6392_v6 }
 0xcc3   :  { %v6422_v39 = vmax.f32 %v8495_v12, 0.0  ;;  %v6423_v17 = vmax.f32 %v6415_v58, 0.0  ;;  %v6424_v22 = vmax.f32 %v8497_v18, 0.0  ;;  %v6425_v56 = vmax.f32 %v8499_v37, 0.0 }
 0xcc4   :  { %v6426_v49 = vmax.f32 %v8501_v11, 0.0  ;;  %v6427_v10 = vmax.f32 %v6419_v30, 0.0  ;;  %v6428_v29 = vmax.f32 %v8503_v19, 0.0  ;;  %v6429_v41 = vmax.f32 %v8505_v34, 0.0 }
 0xcc5   :  { %7439 = dma.done.wait [#allocation7 + $0x3], 8192 }
 0xcc6   :  { %7440 = vsyncadd [#allocation7 + $0x3], 4294959104  ;;  %v6435_v13 = vpack.c.bf16 %v6427_v10, %v6423_v17  ;;  %v6439_v60 = vld [vmem:[#allocation5 + $0x8] sm:$0xff]  ;;  %v6438_v5 = vld [vmem:[#allocation5] sm:$0xff]  ;;  %v6434_v24 = vpack.c.bf16 %v6426_v49, %v6422_v39  ;;  %v6437_v55 = vpack.c.bf16 %v6429_v41, %v6425_v56 }
 0xcc7   :  { %v6441_v63 = vld [vmem:[#allocation5 + $0x18] sm:$0xff]  ;;  %6502 = vmatprep.subr.bf16.mxu0 %v6439_v60  ;;  %v6440_v62 = vld [vmem:[#allocation5 + $0x10] sm:$0xff]  ;;  %v6443_v20 = vld [vmem:[#allocation5 + $0x28] sm:$0xff] }
 0xcc8   :  { %6534 = vmatprep.mubr.bf16.mxu0 %v6435_v13  ;;  %6503 = vmatpush1.bf16.msra.mxu0 %v6438_v5  ;;  %v6442_v48 = vld [vmem:[#allocation5 + $0x20] sm:$0xff]  ;;  %v6445_v31 = vld [vmem:[#allocation5 + $0x38] sm:$0xff]  ;;  %v6444_v45 = vld [vmem:[#allocation5 + $0x30] sm:$0xff] }
 0xcc9   :  { %6504 = vmatprep.subr.bf16.mxu0 %v6441_v63  ;;  %v6447_v59 = vld [vmem:[#allocation5 + $0x48] sm:$0xff]  ;;  %v6446_v61 = vld [vmem:[#allocation5 + $0x40] sm:$0xff]  ;;  %v6449_v23 = vld [vmem:[#allocation5 + $0x58] sm:$0xff] }
 0xcca   :  { %v6448_v16 = vld [vmem:[#allocation5 + $0x50] sm:$0xff]  ;;  %v6451_v52 = vld [vmem:[#allocation5 + $0x68] sm:$0xff]  ;;  %v6450_v7 = vld [vmem:[#allocation5 + $0x60] sm:$0xff] }
 0xccb   :  { %v6453_v50 = vld [vmem:[#allocation5 + $0x78] sm:$0xff]  ;;  %v6452_v25 = vld [vmem:[#allocation5 + $0x70] sm:$0xff]  ;;  %v6455_v42 = vld [vmem:[#allocation5 + $0x88] sm:$0xff] }
 0xccc   :  { %6505 = vmatpush1.bf16.msra.mxu0 %v6440_v62  ;;  %v6454_v54 = vld [vmem:[#allocation5 + $0x80] sm:$0xff]  ;;  %v6457_v53 = vld [vmem:[#allocation5 + $0x98] sm:$0xff]  ;;  %v6456_v27 = vld [vmem:[#allocation5 + $0x90] sm:$0xff] }
 0xccd   :  { %6506 = vmatprep.subr.bf16.mxu0 %v6443_v20  ;;  %v6459_v40 = vld [vmem:[#allocation5 + $0xa8] sm:$0xff]  ;;  %v6458_v3 = vld [vmem:[#allocation5 + $0xa0] sm:$0xff]  ;;  %v6461_v57 = vld [vmem:[#allocation5 + $0xb8] sm:$0xff] }
 0xcce   :  { %v6460_v32 = vld [vmem:[#allocation5 + $0xb0] sm:$0xff]  ;;  %v6463_v15 = vld [vmem:[#allocation5 + $0xc8] sm:$0xff]  ;;  %v6462_v8 = vld [vmem:[#allocation5 + $0xc0] sm:$0xff] }
 0xccf   :  { %v6465_v51 = vld [vmem:[#allocation5 + $0xd8] sm:$0xff]  ;;  %v6464_v4 = vld [vmem:[#allocation5 + $0xd0] sm:$0xff]  ;;  %v6467_v47 = vld [vmem:[#allocation5 + $0xe8] sm:$0xff] }
 0xcd0   :  { %6507 = vmatpush1.bf16.msra.mxu0 %v6442_v48  ;;  %v6466_v35 = vld [vmem:[#allocation5 + $0xe0] sm:$0xff]  ;;  %v6469_v43 = vld [vmem:[#allocation5 + $0xf8] sm:$0xff]  ;;  %v6468_v9 = vld [vmem:[#allocation5 + $0xf0] sm:$0xff] }
 0xcd1   :  { %6508 = vmatprep.subr.bf16.mxu0 %v6445_v31  ;;  %v6471_v6 = vld [vmem:[#allocation5 + $0x108] sm:$0xff]  ;;  %v6470_v14 = vld [vmem:[#allocation5 + $0x100] sm:$0xff]  ;;  %v6473_v2 = vld [vmem:[#allocation5 + $0x118] sm:$0xff] }
 0xcd2   :  { %v6472_v28 = vld [vmem:[#allocation5 + $0x110] sm:$0xff]  ;;  %v6475_v44 = vld [vmem:[#allocation5 + $0x128] sm:$0xff]  ;;  %v6474_v36 = vld [vmem:[#allocation5 + $0x120] sm:$0xff] }
 0xcd3   :  { %v6477_v38 = vld [vmem:[#allocation5 + $0x138] sm:$0xff]  ;;  %v6476_v0 = vld [vmem:[#allocation5 + $0x130] sm:$0xff]  ;;  %v6479_v33 = vld [vmem:[#allocation5 + $0x148] sm:$0xff] }
 0xcd4   :  { %6509 = vmatpush1.bf16.msra.mxu0 %v6444_v45  ;;  %v6478_v12 = vld [vmem:[#allocation5 + $0x140] sm:$0xff]  ;;  %v6481_v58 = vld [vmem:[#allocation5 + $0x158] sm:$0xff]  ;;  %v6480_v37 = vld [vmem:[#allocation5 + $0x150] sm:$0xff] }
 0xcd5   :  { %6510 = vmatprep.subr.bf16.mxu0 %v6447_v59  ;;  %v6483_v11 = vld [vmem:[#allocation5 + $0x168] sm:$0xff]  ;;  %v6482_v30 = vld [vmem:[#allocation5 + $0x160] sm:$0xff]  ;;  %v6485_v34 = vld [vmem:[#allocation5 + $0x178] sm:$0xff] }
 0xcd6   :  { %v6484_v39 = vld [vmem:[#allocation5 + $0x170] sm:$0xff]  ;;  %v6487_v17 = vld [vmem:[#allocation5 + $0x188] sm:$0xff]  ;;  %v6486_v56 = vld [vmem:[#allocation5 + $0x180] sm:$0xff] }
 0xcd7   :  { %v6489_v49 = vld [vmem:[#allocation5 + $0x198] sm:$0xff]  ;;  %v6488_v10 = vld [vmem:[#allocation5 + $0x190] sm:$0xff]  ;;  %v6491_v41 = vld [vmem:[#allocation5 + $0x1a8] sm:$0xff] }
 0xcd8   :  { %6511 = vmatpush1.bf16.msra.mxu0 %v6446_v61  ;;  %v6490_v13 = vld [vmem:[#allocation5 + $0x1a0] sm:$0xff]  ;;  %v6493_v60 = vld [vmem:[#allocation5 + $0x1b8] sm:$0xff]  ;;  %v6492_v5 = vld [vmem:[#allocation5 + $0x1b0] sm:$0xff] }
 0xcd9   :  { %6512 = vmatprep.subr.bf16.mxu0 %v6449_v23  ;;  %v6495_v63 = vld [vmem:[#allocation5 + $0x1c8] sm:$0xff]  ;;  %v6494_v62 = vld [vmem:[#allocation5 + $0x1c0] sm:$0xff]  ;;  %v6497_v20 = vld [vmem:[#allocation5 + $0x1d8] sm:$0xff]  ;;  %v6436_v23 = vpack.c.bf16 %v6428_v29, %v6424_v22 }
 0xcda   :  { %v6496_v48 = vld [vmem:[#allocation5 + $0x1d0] sm:$0xff]  ;;  %v6499_v31 = vld [vmem:[#allocation5 + $0x1e8] sm:$0xff]  ;;  %v6498_v45 = vld [vmem:[#allocation5 + $0x1e0] sm:$0xff] }
 0xcdb   :  { %v6501_v59 = vld [vmem:[#allocation5 + $0x1f8] sm:$0xff]  ;;  %v6500_v61 = vld [vmem:[#allocation5 + $0x1f0] sm:$0xff] }
 0xcdc   :  { %6513 = vmatpush1.bf16.msra.mxu0 %v6448_v16 }
 0xcdd   :  { %6514 = vmatprep.subr.bf16.mxu0 %v6451_v52 }
 0xce0   :  { %6515 = vmatpush1.bf16.msra.mxu0 %v6450_v7 }
 0xce1   :  { %6516 = vmatprep.subr.bf16.mxu0 %v6453_v50 }
 0xce4   :  { %6517 = vmatpush1.bf16.msra.mxu0 %v6452_v25 }
 0xce5   :  { %6518 = vmatprep.subr.bf16.mxu0 %v6455_v42 }
 0xce8   :  { %6519 = vmatpush1.bf16.msra.mxu0 %v6454_v54 }
 0xce9   :  { %6520 = vmatprep.subr.bf16.mxu0 %v6457_v53 }
 0xcec   :  { %6521 = vmatpush1.bf16.msra.mxu0 %v6456_v27 }
 0xced   :  { %6522 = vmatprep.subr.bf16.mxu0 %v6459_v40 }
 0xcf0   :  { %6523 = vmatpush1.bf16.msra.mxu0 %v6458_v3 }
 0xcf1   :  { %6524 = vmatprep.subr.bf16.mxu0 %v6461_v57 }
 0xcf4   :  { %6525 = vmatpush1.bf16.msra.mxu0 %v6460_v32 }
 0xcf5   :  { %6526 = vmatprep.subr.bf16.mxu0 %v6463_v15 }
 0xcf8   :  { %6527 = vmatpush1.bf16.msra.mxu0 %v6462_v8 }
 0xcf9   :  { %6528 = vmatprep.subr.bf16.mxu0 %v6465_v51 }
 0xcfc   :  { %6529 = vmatpush1.bf16.msra.mxu0 %v6464_v4 }
 0xcfd   :  { %6530 = vmatprep.subr.bf16.mxu0 %v6467_v47 }
 0xd00   :  { %6531 = vmatpush1.bf16.msra.mxu0 %v6466_v35 }
 0xd01   :  { %6532 = vmatprep.subr.bf16.mxu0 %v6469_v43 }
 0xd04   :  { %6533 = vmatpush1.bf16.msra.mxu0 %v6468_v9 }
 0xd05   :  { %6545 = vmatprep.subr.bf16.mxu0 %v6471_v6 }
 0xd07   :  { %6535 = vmatmul.mubr.bf16.vlgmr.msra.gmra.mrb[28].mxu0 %v6434_v24 }
 0xd08   :  { %6546 = vmatpush1.bf16.msra.mxu0 %v6470_v14  ;;  %6577 = vmatprep.mubr.bf16.mxu0 %v6437_v55 }
 0xd09   :  { %6547 = vmatprep.subr.bf16.mxu0 %v6473_v2 }
 0xd0c   :  { %6548 = vmatpush1.bf16.msra.mxu0 %v6472_v28 }
 0xd0d   :  { %6549 = vmatprep.subr.bf16.mxu0 %v6475_v44 }
 0xd10   :  { %6550 = vmatpush1.bf16.msra.mxu0 %v6474_v36 }
 0xd11   :  { %6551 = vmatprep.subr.bf16.mxu0 %v6477_v38 }
 0xd14   :  { %6552 = vmatpush1.bf16.msra.mxu0 %v6476_v0 }
 0xd15   :  { %6553 = vmatprep.subr.bf16.mxu0 %v6479_v33 }
 0xd18   :  { %6554 = vmatpush1.bf16.msra.mxu0 %v6478_v12 }
 0xd19   :  { %6555 = vmatprep.subr.bf16.mxu0 %v6481_v58 }
 0xd1c   :  { %6556 = vmatpush1.bf16.msra.mxu0 %v6480_v37 }
 0xd1d   :  { %6557 = vmatprep.subr.bf16.mxu0 %v6483_v11 }
 0xd20   :  { %6558 = vmatpush1.bf16.msra.mxu0 %v6482_v30 }
 0xd21   :  { %6559 = vmatprep.subr.bf16.mxu0 %v6485_v34 }
 0xd24   :  { %6560 = vmatpush1.bf16.msra.mxu0 %v6484_v39 }
 0xd25   :  { %6561 = vmatprep.subr.bf16.mxu0 %v6487_v17 }
 0xd28   :  { %6562 = vmatpush1.bf16.msra.mxu0 %v6486_v56 }
 0xd29   :  { %6563 = vmatprep.subr.bf16.mxu0 %v6489_v49 }
 0xd2c   :  { %6564 = vmatpush1.bf16.msra.mxu0 %v6488_v10 }
 0xd2d   :  { %6565 = vmatprep.subr.bf16.mxu0 %v6491_v41 }
 0xd30   :  { %6566 = vmatpush1.bf16.msra.mxu0 %v6490_v13 }
 0xd31   :  { %6567 = vmatprep.subr.bf16.mxu0 %v6493_v60 }
 0xd34   :  { %6568 = vmatpush1.bf16.msra.mxu0 %v6492_v5 }
 0xd35   :  { %6569 = vmatprep.subr.bf16.mxu0 %v6495_v63 }
 0xd38   :  { %6570 = vmatpush1.bf16.msra.mxu0 %v6494_v62  ;;  %v6630_v62 = vld [vmem:[#allocation17] sm:$0x3] }
 0xd39   :  { %6571 = vmatprep.subr.bf16.mxu0 %v6497_v20 }
 0xd3c   :  { %6572 = vmatpush1.bf16.msra.mxu0 %v6496_v48 }
 0xd3d   :  { %6573 = vmatprep.subr.bf16.mxu0 %v6499_v31 }
 0xd40   :  { %6574 = vmatpush1.bf16.msra.mxu0 %v6498_v45 }
 0xd41   :  { %6575 = vmatprep.subr.bf16.mxu0 %v6501_v59 }
 0xd44   :  { %6576 = vmatpush1.bf16.msra.mxu0 %v6500_v61 }
 0xd47   :  { %6578 = vmatmul.mubr.bf16.vlgmr.msra.gmra.mrb[28].mxu0 %v6436_v23 }
 0xe1a   :  { %v6579_v16 = vpop.f32.mrb[28].mxu0 }
 0xe1b   :  { %v6581_v52 = vpop.f32.mrb[29].mxu0  ;;  %v6604_v50 = vmul.f32 %v6579_v16, %v6579_v16 }
 0xe1c   :  { %v6583_v7 = vpop.f32.mrb[30].mxu0  ;;  %v6605_v53 = vmul.f32 %v6581_v52, %v6581_v52 }
 0xe1d   :  { %v6588_v25 = vadd.f32 %v6583_v7, %v6579_v16  ;;  %v6606_v42 = vmul.f32 %v6583_v7, %v6583_v7  ;;  %v6585_v54 = vpop.f32.mrb[31].mxu0 }
 0xe1e   :  { %v6595_v27 = vadd.f32 %v6585_v54, %v6581_v52  ;;  %v6607_v40 = vmul.f32 %v6585_v54, %v6585_v54 }
 0xe1f   :  { %v6589_v3 = vrot.slane %v6588_v25, 4  ;;  %v6608_v57 = vadd.f32 %v6606_v42, %v6604_v50 }
 0xe20   :  { %v6596_v32 = vrot.slane %v6595_v27, 4  ;;  %v6615_v15 = vadd.f32 %v6607_v40, %v6605_v53  ;;  %v6654_v40 = vld [vmem:[#allocation19] sm:$0x3] }
 0xe21   :  { %v6590_v18 = vadd.f32 %v6589_v3, %v6588_v25  ;;  %v6609_v8 = vrot.slane %v6608_v57, 4 }
 0xe22   :  { %v6597_v19 = vadd.f32 %v6596_v32, %v6595_v27  ;;  %v6616_v22 = vrot.slane %v6615_v15, 4 }
 0xe23   :  { %v6591_v29 = vrot.slane %v6590_v18, 2  ;;  %v6610_v51 = vadd.f32 %v6609_v8, %v6608_v57 }
 0xe24   :  { %v6598_v4 = vrot.slane %v6597_v19, 2  ;;  %v6617_v47 = vadd.f32 %v6616_v22, %v6615_v15 }
 0xe25   :  { %v6592_v35 = vadd.f32 %v6591_v29, %v6590_v18  ;;  %v6611_v43 = vrot.slane %v6610_v51, 2 }
 0xe26   :  { %v6599_v9 = vadd.f32 %v6598_v4, %v6597_v19  ;;  %v6618_v6 = vrot.slane %v6617_v47, 2 }
 0xe27   :  { %v6593_v24 = vrot.slane %v6592_v35, 1  ;;  %v6612_v55 = vadd.f32 %v6611_v43, %v6610_v51 }
 0xe28   :  { %v6600_v14 = vrot.slane %v6599_v9, 1  ;;  %v6619_v2 = vadd.f32 %v6618_v6, %v6617_v47 }
 0xe29   :  { %v6594_v28 = vadd.f32 %v6593_v24, %v6592_v35  ;;  %v6613_v44 = vrot.slane %v6612_v55, 1 }
 0xe2a   :  { %v6601_v36 = vadd.f32 %v6600_v14, %v6599_v9  ;;  %v6620_v38 = vrot.slane %v6619_v2, 1 }
 0xe2b   :  { %v6602_v0 = vmul.f32 0.0625, %v6594_v28  ;;  %v6614_v33 = vadd.f32 %v6613_v44, %v6612_v55 }
 0xe2c   :  { %v6603_v12 = vmul.f32 0.0625, %v6601_v36  ;;  %v6621_v58 = vadd.f32 %v6620_v38, %v6619_v2 }
 0xe2d   :  { %v6622_v37 = vmul.f32 0.0625, %v6614_v33  ;;  %v6624_v11 = vmul.f32 %v6602_v0, %v6602_v0 }
 0xe2e   :  { %v6623_v30 = vmul.f32 0.0625, %v6621_v58  ;;  %v6625_v34 = vmul.f32 %v6603_v12, %v6603_v12 }
 0xe2f   :  { %v6626_v39 = vsub.f32 %v6622_v37, %v6624_v11 }
 0xe30   :  { %v6627_v17 = vsub.f32 %v6623_v30, %v6625_v34 }
 0xe31   :  { %v6628_v56 = vmax.f32 %v6626_v39, 0.0 }
 0xe32   :  { %v6629_v49 = vmax.f32 %v6627_v17, 0.0 }
 0xe33   :  { %v6631_v10 = vadd.f32 1e-05, %v6628_v56 }
 0xe34   :  { %v6632_v41 = vadd.f32 1e-05, %v6629_v49 }
 0xe35   :  { %7215 = vrsqrt.f32 %v6631_v10 }
 0xe36   :  { %7217 = vrsqrt.f32 %v6632_v41 }
 0xe3f   :  { %v7216_v13 = vpop.eup %7215 }
 0xe40   :  { %v7218_v60 = vpop.eup %7217 }
 0xe41   :  { %v6637_v5 = vcombine.low %v7216_v13, %v7218_v60 }
 0xe43   :  { %v6644_v63 = vrot.slane %v6637_v5, %v8218_v46 }
 0xe45   :  { %v6651_v20 = vrot.slane %v6644_v63, %v8218_v46 }
 0xe47   :  { %v6653_v48 = vmul.f32 %v6651_v20, %v6630_v62 }
 0xe49   :  { %v6659_v31 = vrot.slane %v6653_v48, %v8310_v26  ;;  %v6663_v45 = vrot.slane %v6653_v48, %v8313_v21 }
 0xe4b   :  { %v6666_v59 = vmul.f32 %v6659_v31, %v6602_v0  ;;  %v6667_v61 = vmul.f32 %v6663_v45, %v6603_v12  ;;  %v6687_v23 = vmul.f32 %v6659_v31, %v6579_v16  ;;  %v6688_v50 = vmul.f32 %v6663_v45, %v6581_v52 }
 0xe4c   :  { %v6689_v25 = vmul.f32 %v6659_v31, %v6583_v7  ;;  %v6690_v42 = vmul.f32 %v6663_v45, %v6585_v54 }
 0xe4d   :  { %v6670_v53 = vcombine.low %v6666_v59, %v6667_v61 }
 0xe4f   :  { %v6677_v27 = vrot.slane %v6670_v53, %v8218_v46 }
 0xe51   :  { %v6684_v3 = vrot.slane %v6677_v27, %v8218_v46 }
 0xe53   :  { %v6686_v57 = vsub.f32 %v6654_v40, %v6684_v3 }
 0xe55   :  { %v6695_v32 = vrot.slane %v6686_v57, %v8310_v26  ;;  %v6699_v15 = vrot.slane %v6686_v57, %v8313_v21 }
 0xe57   :  { %v6702_v18 = vadd.f32 %v6695_v32, %v6687_v23  ;;  %v6703_v8 = vadd.f32 %v6699_v15, %v6688_v50  ;;  %v6704_v19 = vadd.f32 %v6695_v32, %v6689_v25  ;;  %v6705_v22 = vadd.f32 %v6699_v15, %v6690_v42 }
 0xe59   :  { %v6706_v29 = vmax.f32 %v6702_v18, 0.0  ;;  %v6707_v16 = vmax.f32 %v6703_v8, 0.0  ;;  %v6708_v52 = vmax.f32 %v6704_v19, 0.0  ;;  %v6709_v7 = vmax.f32 %v6705_v22, 0.0 }
 0xe5a   :  { %7441 = dma.done.wait [#allocation7 + $0x4], 2048 }
 0xe5b   :  { %7442 = vsyncadd [#allocation7 + $0x4], 4294965248  ;;  %v6715_v54 = vpack.c.bf16 %v6709_v7, %v6707_v16  ;;  %v6724_v51 = vld [vmem:[#allocation6 + $0x40] sm:$0xff]  ;;  %v6725_v46 = vld [vmem:[#allocation6 + $0x48] sm:$0xff]  ;;  %v6714_v36 = vpack.c.bf16 %v6708_v52, %v6706_v29  ;;  %v6774_v38 = vand.u32 127, %v5352_v1  ;;  %s7479_s11 = smov [#allocation20]  }
 0xe5c   :  { %v6716_v4 = vld [vmem:[#allocation6] sm:$0xff]  ;;  %6874 = vmatprep.subr.bf16.mxu1 %v6724_v51  ;;  %v6717_v26 = vld [vmem:[#allocation6 + $0x8] sm:$0xff]  ;;  %v6726_v21 = vld [vmem:[#allocation6 + $0x50] sm:$0xff]  ;;  %s6805_s28 = sshll.u32 %s7479_s11, 4  ;;  %s6806_s28 = int_to_ptr.vmem [resolvable:$true] %s6805_s28 }
 0xe5d   :  { %6764 = vmatprep.mubr.bf16.mxu1 %v6715_v54  ;;  %6875 = vmatpush3.bf16.msra.mxu1 %v6716_v4  ;;  %v6718_v47 = vld [vmem:[#allocation6 + $0x10] sm:$0xff]  ;;  %v6727_v35 = vld [vmem:[#allocation6 + $0x58] sm:$0xff]  ;;  %v6728_v9 = vld [vmem:[#allocation6 + $0x60] sm:$0xff]  ;;  %vm6775_vm0 = vcmp.lt.s32.totalorder %v6774_v38, 10  ;;  %s7403_s0 = scalar_lea.vmem %s6806_s28, 256  ;;  %p7408_p9 = scmp.lt.s32.totalorder %s6806_s28, %s6806_s28 }
 0xe5e   :  { %6876 = vmatprep.subr.bf16.mxu1 %v6725_v46  ;;  %v6719_v43 = vld [vmem:[#allocation6 + $0x18] sm:$0xff]  ;;  %v6720_v6 = vld [vmem:[#allocation6 + $0x20] sm:$0xff]  ;;  %v6729_v24 = vld [vmem:[#allocation6 + $0x68] sm:$0xff]  ;;  %p7404_p8 = scmp.ne.s32.totalorder %s6806_s28, %s7403_s0  ;;  %p7409_p10 = scmp.lt.s32.totalorder %s7403_s0, %s7403_s0 }
 0xe5f   :  { %v6721_v55 = vld [vmem:[#allocation6 + $0x28] sm:$0xff]  ;;  %v6730_v14 = vld [vmem:[#allocation6 + $0x70] sm:$0xff]  ;;  %v6731_v28 = vld [vmem:[#allocation6 + $0x78] sm:$0xff] }
 0xe60   :  { %v6722_v2 = vld [vmem:[#allocation6 + $0x30] sm:$0xff]  ;;  %v6723_v44 = vld [vmem:[#allocation6 + $0x38] sm:$0xff]  ;;  %p7410_p11 = por %p7409_p10, %p7408_p9 }
 0xe61   :  { %6877 = vmatpush3.bf16.msra.mxu1 %v6717_v26 }
 0xe62   :  { %6878 = vmatprep.subr.bf16.mxu1 %v6726_v21  ;;  %p7411_p12 = pnand %p7410_p11, %p7404_p8 }
 0xe65   :  { %6879 = vmatpush3.bf16.msra.mxu1 %v6718_v47 }
 0xe66   :  { %6880 = vmatprep.subr.bf16.mxu1 %v6727_v35 }
 0xe69   :  { %6881 = vmatpush3.bf16.msra.mxu1 %v6719_v43 }
 0xe6a   :  { %6882 = vmatprep.subr.bf16.mxu1 %v6728_v9 }
 0xe6d   :  { %6883 = vmatpush3.bf16.msra.mxu1 %v6720_v6 }
 0xe6e   :  { %6884 = vmatprep.subr.bf16.mxu1 %v6729_v24 }
 0xe71   :  { %6885 = vmatpush3.bf16.msra.mxu1 %v6721_v55 }
 0xe72   :  { %6886 = vmatprep.subr.bf16.mxu1 %v6730_v14 }
 0xe75   :  { %6887 = vmatpush3.bf16.msra.mxu1 %v6722_v2 }
 0xe76   :  { %6888 = vmatprep.subr.bf16.mxu1 %v6731_v28 }
 0xe79   :  { %6889 = vmatpush3.bf16.msra.mxu1 %v6723_v44 }
 0xe7c   :  { %6765 = vmatmul.mubr.bf16.vlgmr.msra.gmra.mrb[32].mxu1 %v6714_v36 }
 0xf4f   :  { %v6890_v0 = vpop.f32.mrb[32].mxu1 }
 0xf50   :  { %v6891_v33 = vpop.f32.mrb[33].mxu1 }
 0xf51   :  { %v6892_v12 = vadd.f32 %v6891_v33, %v6890_v0  ;;  %v6893_v58 = vpop.f32.mrb[34].mxu1 }
 0xf52   :  { %v6894_v37 = vpop.f32.mrb[35].mxu1 }
 0xf53   :  { %v6895_v11 = vadd.f32 %v6894_v37, %v6893_v58  ;;  %v6776_v30 = vsel %vm6775_vm0, %v6892_v12, -inf }
 0xf54   :  { %6778 = vmax.xlane.f32.xlu0 %v6776_v30 }
 0xf55   :  { %v6777_v34 = vsel %vm6775_vm0, %v6895_v11, -inf }
 0xf58   :  { %6780 = vmax.xlane.f32.xlu0 %v6777_v34 }
 0xfe1   :  { %v6779_v39 = vpop.xlane.xlu0 %6778 }
 0xfe2   :  { %v6782_v17 = vsub.f32 %v6776_v30, %v6779_v39 }
 0xfe4   :  { %v6784_v56 = vmul.f32 1.442695, %v6782_v17 }
 0xfe5   :  { %v6781_v49 = vpop.xlane.xlu0 %6780 }
 0xfe6   :  { %v6783_v10 = vsub.f32 %v6777_v34, %v6781_v49  ;;  %7219 = vpow2.f32 %v6784_v56 }
 0xfe8   :  { %v6786_v41 = vmul.f32 1.442695, %v6783_v10 }
 0xfea   :  { %7221 = vpow2.f32 %v6786_v41 }
 0xff0   :  { %v7220_v1 = vpop.eup %7219 }
 0xff1   :  { %6788 = vadd.xlane.f32.xlu1 %v7220_v1 }
 0xff4   :  { %v7222_v13 = vpop.eup %7221 }
 0xff5   :  { %6790 = vadd.xlane.f32.xlu1 %v7222_v13 }
0x107e   :  { %v6789_v60 = vpop.xlane.xlu1 %6788 }
0x107f   :  { %7223 = vlog2.f32 %v6789_v60 }
0x1082   :  { %v6791_v5 = vpop.xlane.xlu1 %6790 }
0x1083   :  { %7225 = vlog2.f32 %v6791_v5 }
0x1089   :  { %v7224_v63 = vpop.eup %7223 }
0x108a   :  { %v6793_v62 = vmul.f32 0.6931472, %v7224_v63 }
0x108c   :  { %v6796_v20 = vsub.f32 %v6782_v17, %v6793_v62 }
0x108d   :  { %v7226_v48 = vpop.eup %7225 }
0x108e   :  { %6798 = vst [vmem:[#allocation20] sm:$0xff] %v6796_v20  ;;  %v6795_v31 = vmul.f32 0.6931472, %v7226_v48 }
0x1090   :  { %v6797_v45 = vsub.f32 %v6783_v10, %v6795_v31 }
0x1092   :  { %6799 = vst [vmem:[#allocation20 + $0x8] sm:$0xff] %v6797_v45 }
0x1093   :  { %7414 = shalt.err (!%p7411_p12)
}
0x1094   :  { %s7415_s30 = scalar_lea.hbm %s8561_s12, 256 }
0x1095   :  { %p7416_p13 = scmp.ne.s32.totalorder %s8561_s12, %s7415_s30  ;;  %p7419_p0 = scmp.lt.u32.totalorder %s7415_s30, %s8561_s12 }
0x1097   :  { %p7421_p1 = pnand %p7419_p0, %p7416_p13 }
0x1099   :  { %7424 = shalt.err (!%p7421_p1)
}
0x109a   :  { %6811 = dma.vmem_to_hbm [thread:$0]  %s6806_s28, 256, %s8561_s12, [#allocation10], %s7457_s27, %s7457_s27, %s7464_s6  }
0x109b   :  { %7443 = dma.done.wait [#allocation10], 256  }
0x109c   :  { %7444 = vsyncadd [#allocation10], 4294967040 }
0x109d   :  { %6815 = vsyncpa [#allocation9], 1 }
0x109e   :  { %6816 = vsyncpa [#allocation12], 1 }
0x109f   :  { %6817 = vsyncpa [#allocation15], 1 }
0x10a0   :  { %6818 = vsyncpa [#allocation18], 1 }
0x10a1   :  { %6819 = vsyncpa [#allocation10], 1 }
0x10a2   :  { %6820 = vsyncmov [#allocation7] }
0x10a5   :  { %s6821_s4 = vpop.sfrf %6820 }
0x10a6   :  { %p6869_p2 = scmp.ne.s32.totalorder %s6821_s4, 0 }
0x10a8   :  { %6825 = shalt.err (%p6869_p2)  }
0x10a9   :  { %6827 = vsyncmov [#allocation7 + $0x1] }
0x10ac   :  { %s6828_s15 = vpop.sfrf %6827 }
0x10ad   :  { %p6870_p3 = scmp.ne.s32.totalorder %s6828_s15, 0 }
0x10af   :  { %6832 = shalt.err (%p6870_p3)  }
0x10b0   :  { %6834 = vsyncmov [#allocation7 + $0x2] }
0x10b3   :  { %s6835_s5 = vpop.sfrf %6834 }
0x10b4   :  { %p6871_p4 = scmp.ne.s32.totalorder %s6835_s5, 0 }
0x10b6   :  { %6839 = shalt.err (%p6871_p4)  }
0x10b7   :  { %6841 = vsyncmov [#allocation7 + $0x3] }
0x10ba   :  { %s6842_s12 = vpop.sfrf %6841 }
0x10bb   :  { %p6872_p5 = scmp.ne.s32.totalorder %s6842_s12, 0 }
0x10bd   :  { %6846 = shalt.err (%p6872_p5)  }
0x10be   :  { %6848 = vsyncmov [#allocation7 + $0x4] }
0x10c1   :  { %s6849_s27 = vpop.sfrf %6848 }
0x10c2   :  { %p6873_p6 = scmp.ne.s32.totalorder %s6849_s27, 0 }
0x10c4   :  { %6853 = shalt.err (%p6873_p6)  }

</bundles_post_ra>
